<compile_context>
chip_gen: v5e
topology: v5e:2x2
jax: 0.10.0
libtpu: 0.0.40
codegen_flags: <defaults>
</compile_context>

<pallas_src>
import numpy as np

import jax
import jax.numpy as jnp
from jax.experimental import pallas as pl
from jax.experimental.pallas import tpu as pltpu


# ----------------------------- configuration -----------------------------
class Opt:
    latent_dim = 8
    n_classes = 4
    code_dim = 2
    img_size = 16
    channels = 1


opt = Opt()
INPUT_DIM = opt.latent_dim + opt.n_classes + opt.code_dim          # 14
INIT_SIZE = opt.img_size // 4                                       # 4
L1_OUT = 128 * INIT_SIZE * INIT_SIZE                                # 2048

C = 128                          # working channel width (all convs lane-padded)
H1 = W1 = 2 * INIT_SIZE          # 8   (after first upsample)
HP1 = H1 + 2                     # 10  (zero-padded rows for conv1)
WP1 = 16                         # padded width 10 -> 16 (sublane aligned)
H2 = W2 = opt.img_size           # 16  (after second upsample)
HP2 = H2 + 2                     # 18
WP2 = 24                         # padded width 18 -> 24 (sublane aligned)
N1 = H1 * WP1                    # 128 conv1 "wide" rows
N2 = H2 * WP2                    # 384 conv2/conv3 "wide" rows


# ----------------------------- fused Pallas kernel -----------------------------
def _generator_kernel(gin_ref, w1_ref, b1_ref, wc1_ref, bc1_ref,
                      wc2_ref, bc2_ref, wc3_ref, bc3_ref, p2_ref,
                      out_ref, x1_pad, x2_pad):
    f32 = jnp.float32

    def conv3x3_wide(src_ref, h, wp, w_ref, b_ref, act):
        # src_ref: (h+2, wp, C) zero-padded input; computes all h*wp "wide"
        # output rows (valid columns are 1..w); 9 accumulating MXU matmuls,
        # dx shifts done with pltpu.roll on the flattened (h*wp, C) tile.
        n = h * wp
        acc = jnp.zeros((n, C), f32)
        for dy in range(3):
            xs = src_ref[dy:dy + h, :, :].reshape(n, C)
            for dx in range(3):
                xr = xs if dx == 1 else pltpu.roll(xs, (1 - dx) % n, axis=0)
                acc = acc + jnp.dot(xr, w_ref[3 * dy + dx],
                                    preferred_element_type=f32)
        acc = acc + b_ref[...]
        if act == "leaky":
            return jnp.where(acc >= 0.0, acc, 0.2 * acc)     # LeakyReLU(0.2)
        return jnp.tanh(acc)

    # ---- l1: Linear(14 -> 2048) with BatchNorm2d(128) folded (HWC col order) --
    lin = jnp.dot(gin_ref[0], w1_ref[...],
                  preferred_element_type=f32) + b1_ref[...]          # (1, 2048)

    # ---- Upsample 4x4 -> 8x8 and zero-pad into conv1 input scratch ----
    x1_pad[...] = jnp.zeros(x1_pad.shape, f32)
    for h in range(INIT_SIZE):
        for w in range(INIT_SIZE):
            s = h * INIT_SIZE + w
            v = lin[:, s * C:(s + 1) * C].reshape(1, 1, C)           # lane-aligned
            x1_pad[1 + 2 * h:3 + 2 * h, 1 + 2 * w:3 + 2 * w, :] = (
                jnp.broadcast_to(v, (2, 2, C)))

    # ---- Conv(128->128) + BN + LeakyReLU on 8x8 ----
    a1 = conv3x3_wide(x1_pad, H1, WP1, wc1_ref, bc1_ref, "leaky")    # (128, 128)

    # ---- Upsample 8x8 -> 16x16 + zero-pad, as one 0/1 gather-matmul (MXU) ----
    x2_pad[...] = jnp.dot(p2_ref[...], a1,
                          preferred_element_type=f32).reshape(HP2, WP2, C)

    # ---- Conv(128->64, lane-padded) + BN + LeakyReLU on 16x16 ----
    a2 = conv3x3_wide(x2_pad, H2, WP2, wc2_ref, bc2_ref, "leaky")    # (384, 128)

    # ---- Re-pad valid region as conv3 input (reuse x2_pad; borders stay 0) ----
    a2r = a2.reshape(H2, WP2, C)
    cols = jax.lax.broadcasted_iota(jnp.int32, (H2, WP2, C), 1)
    x2_pad[1:H2 + 1, :, :] = jnp.where((cols >= 1) & (cols <= W2), a2r, 0.0)

    # ---- Conv(64->1, lane-padded to 128) + Tanh ----
    a3 = conv3x3_wide(x2_pad, H2, WP2, wc3_ref, bc3_ref, "tanh")     # (384, 128)
    out_ref[0] = a3.reshape(H2, WP2, C)   # lane-dense store; wrapper slices ch 0


# ----------------------------- parameter setup -----------------------------
def _bn_affine(key, c, eps):
    kg, kb, km, kv = jax.random.split(key, 4)
    gamma = 1.0 + 0.1 * jax.random.normal(kg, (c,), jnp.float32)
    beta = 0.1 * jax.random.normal(kb, (c,), jnp.float32)
    mean = 0.1 * jax.random.normal(km, (c,), jnp.float32)
    var = 1.0 + 0.1 * jax.random.uniform(kv, (c,), jnp.float32)
    scale = gamma / jnp.sqrt(var + eps)
    shift = beta - mean * scale
    return scale, shift


def init_params(key):
    """Logical (PyTorch-shaped) params with eval-mode BN folded in."""
    ks = jax.random.split(key, 10)
    p = {}

    # l1: Linear(INPUT_DIM, 128 * init_size^2), columns channel-major (c, y, x)
    w1 = 0.1 * jax.random.normal(ks[0], (INPUT_DIM, L1_OUT), jnp.float32)
    b1 = 0.1 * jax.random.normal(ks[1], (L1_OUT,), jnp.float32)
    s1, t1 = _bn_affine(ks[2], 128, 1e-5)                # BatchNorm2d(128)
    s1f = jnp.repeat(s1, INIT_SIZE * INIT_SIZE)
    t1f = jnp.repeat(t1, INIT_SIZE * INIT_SIZE)
    p["w1"] = w1 * s1f[None, :]
    p["b1"] = b1 * s1f + t1f

    # Conv2d(128,128,3,p=1) + BatchNorm2d(128, eps=0.8)
    wc1 = 0.05 * jax.random.normal(ks[3], (3, 3, 128, 128), jnp.float32)
    bc1 = 0.05 * jax.random.normal(ks[4], (128,), jnp.float32)
    s2, t2 = _bn_affine(ks[5], 128, 0.8)
    p["wc1"] = wc1 * s2[None, None, None, :]
    p["bc1"] = bc1 * s2 + t2

    # Conv2d(128,64,3,p=1) + BatchNorm2d(64, eps=0.8)
    wc2 = 0.05 * jax.random.normal(ks[6], (3, 3, 128, 64), jnp.float32)
    bc2 = 0.05 * jax.random.normal(ks[7], (64,), jnp.float32)
    s3, t3 = _bn_affine(ks[8], 64, 0.8)
    p["wc2"] = wc2 * s3[None, None, None, :]
    p["bc2"] = bc2 * s3 + t3

    # Conv2d(64, channels, 3, p=1)
    p["wc3"] = 0.05 * jax.random.normal(ks[9], (3, 3, 64, opt.channels), jnp.float32)
    p["bc3"] = jnp.zeros((opt.channels,), jnp.float32)
    return p


def _upsample_pad_matrix():
    """0/1 matrix mapping conv1 wide rows (H1*WP1, valid cols 1..W1) to the
    fully zero-padded conv2 input rows (HP2*WP2): 2x nearest upsample + pad."""
    m = np.zeros((HP2 * WP2, N1), np.float32)
    for u in range(H2):
        for v in range(W2):
            r = (1 + u) * WP2 + (1 + v)
            s = (u // 2) * WP1 + (v // 2 + 1)
            m[r, s] = 1.0
    return jnp.asarray(m)


def pack_params(p):
    """Repack logical params into the kernel layout (HWC cols, lane-padded)."""
    kp = {}
    kp["w1"] = (p["w1"].reshape(INPUT_DIM, 128, INIT_SIZE * INIT_SIZE)
                .transpose(0, 2, 1).reshape(INPUT_DIM, L1_OUT))
    kp["b1"] = (p["b1"].reshape(128, INIT_SIZE * INIT_SIZE)
                .transpose(1, 0).reshape(1, L1_OUT))
    kp["wc1"] = p["wc1"].reshape(9, C, C)
    kp["bc1"] = p["bc1"].reshape(1, C)
    kp["wc2"] = jnp.pad(p["wc2"], ((0, 0), (0, 0), (0, 0), (0, C - 64))).reshape(9, C, C)
    kp["bc2"] = jnp.pad(p["bc2"], (0, C - 64)).reshape(1, C)
    kp["wc3"] = jnp.pad(p["wc3"],
                        ((0, 0), (0, 0), (0, C - 64), (0, C - opt.channels))
                        ).reshape(9, C, C)
    kp["bc3"] = jnp.pad(p["bc3"], (0, C - opt.channels)).reshape(1, C)
    kp["p2"] = _upsample_pad_matrix()
    return kp


# ----------------------------- forward pass -----------------------------
@jax.jit
def generator_forward(kp, noise, labels, code):
    gen_input = jnp.concatenate([noise, labels, code], axis=-1)      # (B, 14)
    B = gen_input.shape[0]
    out_wide = pl.pallas_call(
        _generator_kernel,
        out_shape=jax.ShapeDtypeStruct((B, H2, WP2, C), jnp.float32),
        grid=(B,),
        in_specs=[
            pl.BlockSpec((1, 1, INPUT_DIM), lambda i: (i, 0, 0)),
            pl.BlockSpec((INPUT_DIM, L1_OUT), lambda i: (0, 0)),
            pl.BlockSpec((1, L1_OUT), lambda i: (0, 0)),
            pl.BlockSpec((9, C, C), lambda i: (0, 0, 0)),
            pl.BlockSpec((1, C), lambda i: (0, 0)),
            pl.BlockSpec((9, C, C), lambda i: (0, 0, 0)),
            pl.BlockSpec((1, C), lambda i: (0, 0)),
            pl.BlockSpec((9, C, C), lambda i: (0, 0, 0)),
            pl.BlockSpec((1, C), lambda i: (0, 0)),
            pl.BlockSpec((HP2 * WP2, N1), lambda i: (0, 0)),
        ],
        out_specs=pl.BlockSpec((1, H2, WP2, C), lambda i: (i, 0, 0, 0)),
        scratch_shapes=[pltpu.VMEM((HP1, WP1, C), jnp.float32),
                        pltpu.VMEM((HP2, WP2, C), jnp.float32)],
        compiler_params=pltpu.CompilerParams(
            dimension_semantics=("parallel",)),
    )(gen_input.reshape(B, 1, INPUT_DIM),
      kp["w1"], kp["b1"], kp["wc1"], kp["bc1"],
      kp["wc2"], kp["bc2"], kp["wc3"], kp["bc3"], kp["p2"])
    # valid spatial columns are 1..16; channel 0 is the real (single) channel.
    img = out_wide[:, :, 1:1 + opt.img_size, 0]                      # (B, 16, 16)
    return img[:, None, :, :]                                        # NCHW (B,1,16,16)


# ----------------------------- pure-JAX reference -----------------------------
def _upsample2x_nhwc(x):
    return jnp.repeat(jnp.repeat(x, 2, axis=1), 2, axis=2)


def _conv_ref(x, w, b, act):
    y = jax.lax.conv_general_dilated(
        x, w, window_strides=(1, 1), padding="SAME",
        dimension_numbers=("NHWC", "HWIO", "NHWC"))
    y = y + b.reshape(1, 1, 1, -1)
    if act == "leaky":
        return jnp.where(y >= 0, y, 0.2 * y)
    return jnp.tanh(y)


def reference_forward(p, noise, labels, code):
    gen_input = jnp.concatenate([noise, labels, code], axis=-1)
    out = gen_input @ p["w1"] + p["b1"]
    B = out.shape[0]
    x = out.reshape(B, 128, INIT_SIZE, INIT_SIZE).transpose(0, 2, 3, 1)
    x = _upsample2x_nhwc(x)
    x = _conv_ref(x, p["wc1"], p["bc1"], "leaky")
    x = _upsample2x_nhwc(x)
    x = _conv_ref(x, p["wc2"], p["bc2"], "leaky")
    x = _conv_ref(x, p["wc3"], p["bc3"], "tanh")
    return x.transpose(0, 3, 1, 2)


# ----------------------------- main -----------------------------
if __name__ == "__main__":
    key = jax.random.PRNGKey(0)
    kp_key, kn, kl, kc = jax.random.split(key, 4)

    batch = 2
    params = init_params(kp_key)
    kparams = pack_params(params)

    noise = jax.random.normal(kn, (batch, opt.latent_dim), jnp.float32)
    labels = jax.nn.one_hot(
        jax.random.randint(kl, (batch,), 0, opt.n_classes), opt.n_classes
    ).astype(jnp.float32)
    code = jax.random.uniform(kc, (batch, opt.code_dim), jnp.float32, -1.0, 1.0)

    img = generator_forward(kparams, noise, labels, code)
    img = jax.block_until_ready(img)
    assert img.shape == (batch, opt.channels, opt.img_size, opt.img_size), img.shape

    ref = reference_forward(params, noise, labels, code)
    max_err = float(jnp.max(jnp.abs(img - ref)))
    assert jnp.allclose(img, ref, atol=1e-3, rtol=1e-3), max_err

    print("KERNEL_OK")
</pallas_src>

<mosaic_0001>
module attributes {stable_mosaic.version = 11 : i64} {
  func.func @_generator_kernel(%arg0: i32, %arg1: memref<1x1x14xf32, #tpu.memory_space<vmem>>, %arg2: memref<14x2048xf32, #tpu.memory_space<vmem>>, %arg3: memref<1x2048xf32, #tpu.memory_space<vmem>>, %arg4: memref<9x128x128xf32, #tpu.memory_space<vmem>>, %arg5: memref<1x128xf32, #tpu.memory_space<vmem>>, %arg6: memref<9x128x128xf32, #tpu.memory_space<vmem>>, %arg7: memref<1x128xf32, #tpu.memory_space<vmem>>, %arg8: memref<9x128x128xf32, #tpu.memory_space<vmem>>, %arg9: memref<1x128xf32, #tpu.memory_space<vmem>>, %arg10: memref<432x128xf32, #tpu.memory_space<vmem>>, %arg11: memref<1x16x24x128xf32, #tpu.memory_space<vmem>>, %arg12: memref<10x16x128xf32, #tpu.memory_space<vmem>>, %arg13: memref<18x24x128xf32, #tpu.memory_space<vmem>>) attributes {dimension_semantics = [#tpu.dimension_semantics<parallel>], iteration_bounds = array<i64: 2>, scalar_prefetch = 0 : i64, scratch_operands = 2 : i64, tpu.core_type = #tpu.core_type<tc>, window_params = [{transform_indices = @transform_0, window_bounds = array<i64: 1, 1, 14>}, {pipeline_mode = #tpu.pipeline_mode<synchronous>, transform_indices = @transform_1, window_bounds = array<i64: 14, 2048>}, {pipeline_mode = #tpu.pipeline_mode<synchronous>, transform_indices = @transform_2, window_bounds = array<i64: 1, 2048>}, {pipeline_mode = #tpu.pipeline_mode<synchronous>, transform_indices = @transform_3, window_bounds = array<i64: 9, 128, 128>}, {pipeline_mode = #tpu.pipeline_mode<synchronous>, transform_indices = @transform_4, window_bounds = array<i64: 1, 128>}, {pipeline_mode = #tpu.pipeline_mode<synchronous>, transform_indices = @transform_5, window_bounds = array<i64: 9, 128, 128>}, {pipeline_mode = #tpu.pipeline_mode<synchronous>, transform_indices = @transform_6, window_bounds = array<i64: 1, 128>}, {pipeline_mode = #tpu.pipeline_mode<synchronous>, transform_indices = @transform_7, window_bounds = array<i64: 9, 128, 128>}, {pipeline_mode = #tpu.pipeline_mode<synchronous>, transform_indices = @transform_8, window_bounds = array<i64: 1, 128>}, {pipeline_mode = #tpu.pipeline_mode<synchronous>, transform_indices = @transform_9, window_bounds = array<i64: 432, 128>}, {transform_indices = @transform_10, window_bounds = array<i64: 1, 16, 24, 128>}]} {
    %c0 = arith.constant 0 : index
    %c0_0 = arith.constant 0 : index
    %c0_1 = arith.constant 0 : index
    %0 = vector.load %arg1[%c0, %c0_0, %c0_1] : memref<1x1x14xf32, #tpu.memory_space<vmem>>, vector<1x1x14xf32>
    %1 = vector.shape_cast %0 : vector<1x1x14xf32> to vector<1x14xf32>
    %c0_2 = arith.constant 0 : index
    %c0_3 = arith.constant 0 : index
    %2 = vector.load %arg2[%c0_2, %c0_3] : memref<14x2048xf32, #tpu.memory_space<vmem>>, vector<14x2048xf32>
    %cst = arith.constant dense<0.000000e+00> : vector<1x2048xf32>
    %3 = tpu.matmul %1, %2, %cst {dimension_numbers = #tpu.dot_dimension_numbers<[1], [0], [0], [1], [0, 0, 1, 1], [], []>} : vector<1x14xf32>, vector<14x2048xf32>, vector<1x2048xf32> -> vector<1x2048xf32>
    %c0_4 = arith.constant 0 : index
    %c0_5 = arith.constant 0 : index
    %4 = vector.load %arg3[%c0_4, %c0_5] : memref<1x2048xf32, #tpu.memory_space<vmem>>, vector<1x2048xf32>
    %5 = arith.addf %3, %4 : vector<1x2048xf32>
    %cst_6 = arith.constant 0.000000e+00 : f32
    %6 = vector.broadcast %cst_6 : f32 to vector<10x16x128xf32>
    %c0_7 = arith.constant 0 : index
    %c0_8 = arith.constant 0 : index
    %c0_9 = arith.constant 0 : index
    %7 = vector.load %arg12[%c0_7, %c0_8, %c0_9] : memref<10x16x128xf32, #tpu.memory_space<vmem>>, vector<10x16x128xf32>
    tpu.vector_store %arg12[%c0_7, %c0_8, %c0_9], %6 {strides = array<i32>} : memref<10x16x128xf32, #tpu.memory_space<vmem>>, vector<10x16x128xf32>,
    %8 = vector.extract_strided_slice %5 {offsets = [0, 0], sizes = [1, 128], strides = [1, 1]} : vector<1x2048xf32> to vector<1x128xf32>
    %9 = vector.shape_cast %8 : vector<1x128xf32> to vector<1x1x128xf32>
    %10 = vector.shape_cast %9 : vector<1x1x128xf32> to vector<1x1x128xf32>
    %11 = vector.broadcast %10 : vector<1x1x128xf32> to vector<2x2x128xf32>
    %c1 = arith.constant 1 : index
    %c1_10 = arith.constant 1 : index
    %c0_11 = arith.constant 0 : index
    %12 = vector.load %arg12[%c1, %c1_10, %c0_11] : memref<10x16x128xf32, #tpu.memory_space<vmem>>, vector<2x2x128xf32>
    tpu.vector_store %arg12[%c1, %c1_10, %c0_11], %11 {strides = array<i32>} : memref<10x16x128xf32, #tpu.memory_space<vmem>>, vector<2x2x128xf32>,
    %13 = vector.extract_strided_slice %5 {offsets = [0, 128], sizes = [1, 128], strides = [1, 1]} : vector<1x2048xf32> to vector<1x128xf32>
    %14 = vector.shape_cast %13 : vector<1x128xf32> to vector<1x1x128xf32>
    %15 = vector.shape_cast %14 : vector<1x1x128xf32> to vector<1x1x128xf32>
    %16 = vector.broadcast %15 : vector<1x1x128xf32> to vector<2x2x128xf32>
    %c1_12 = arith.constant 1 : index
    %c3 = arith.constant 3 : index
    %c0_13 = arith.constant 0 : index
    %17 = vector.load %arg12[%c1_12, %c3, %c0_13] : memref<10x16x128xf32, #tpu.memory_space<vmem>>, vector<2x2x128xf32>
    tpu.vector_store %arg12[%c1_12, %c3, %c0_13], %16 {strides = array<i32>} : memref<10x16x128xf32, #tpu.memory_space<vmem>>, vector<2x2x128xf32>,
    %18 = vector.extract_strided_slice %5 {offsets = [0, 256], sizes = [1, 128], strides = [1, 1]} : vector<1x2048xf32> to vector<1x128xf32>
    %19 = vector.shape_cast %18 : vector<1x128xf32> to vector<1x1x128xf32>
    %20 = vector.shape_cast %19 : vector<1x1x128xf32> to vector<1x1x128xf32>
    %21 = vector.broadcast %20 : vector<1x1x128xf32> to vector<2x2x128xf32>
    %c1_14 = arith.constant 1 : index
    %c5 = arith.constant 5 : index
    %c0_15 = arith.constant 0 : index
    %22 = vector.load %arg12[%c1_14, %c5, %c0_15] : memref<10x16x128xf32, #tpu.memory_space<vmem>>, vector<2x2x128xf32>
    tpu.vector_store %arg12[%c1_14, %c5, %c0_15], %21 {strides = array<i32>} : memref<10x16x128xf32, #tpu.memory_space<vmem>>, vector<2x2x128xf32>,
    %23 = vector.extract_strided_slice %5 {offsets = [0, 384], sizes = [1, 128], strides = [1, 1]} : vector<1x2048xf32> to vector<1x128xf32>
    %24 = vector.shape_cast %23 : vector<1x128xf32> to vector<1x1x128xf32>
    %25 = vector.shape_cast %24 : vector<1x1x128xf32> to vector<1x1x128xf32>
    %26 = vector.broadcast %25 : vector<1x1x128xf32> to vector<2x2x128xf32>
    %c1_16 = arith.constant 1 : index
    %c7 = arith.constant 7 : index
    %c0_17 = arith.constant 0 : index
    %27 = vector.load %arg12[%c1_16, %c7, %c0_17] : memref<10x16x128xf32, #tpu.memory_space<vmem>>, vector<2x2x128xf32>
    tpu.vector_store %arg12[%c1_16, %c7, %c0_17], %26 {strides = array<i32>} : memref<10x16x128xf32, #tpu.memory_space<vmem>>, vector<2x2x128xf32>,
    %28 = vector.extract_strided_slice %5 {offsets = [0, 512], sizes = [1, 128], strides = [1, 1]} : vector<1x2048xf32> to vector<1x128xf32>
    %29 = vector.shape_cast %28 : vector<1x128xf32> to vector<1x1x128xf32>
    %30 = vector.shape_cast %29 : vector<1x1x128xf32> to vector<1x1x128xf32>
    %31 = vector.broadcast %30 : vector<1x1x128xf32> to vector<2x2x128xf32>
    %c3_18 = arith.constant 3 : index
    %c1_19 = arith.constant 1 : index
    %c0_20 = arith.constant 0 : index
    %32 = vector.load %arg12[%c3_18, %c1_19, %c0_20] : memref<10x16x128xf32, #tpu.memory_space<vmem>>, vector<2x2x128xf32>
    tpu.vector_store %arg12[%c3_18, %c1_19, %c0_20], %31 {strides = array<i32>} : memref<10x16x128xf32, #tpu.memory_space<vmem>>, vector<2x2x128xf32>,
    %33 = vector.extract_strided_slice %5 {offsets = [0, 640], sizes = [1, 128], strides = [1, 1]} : vector<1x2048xf32> to vector<1x128xf32>
    %34 = vector.shape_cast %33 : vector<1x128xf32> to vector<1x1x128xf32>
    %35 = vector.shape_cast %34 : vector<1x1x128xf32> to vector<1x1x128xf32>
    %36 = vector.broadcast %35 : vector<1x1x128xf32> to vector<2x2x128xf32>
    %c3_21 = arith.constant 3 : index
    %c3_22 = arith.constant 3 : index
    %c0_23 = arith.constant 0 : index
    %37 = vector.load %arg12[%c3_21, %c3_22, %c0_23] : memref<10x16x128xf32, #tpu.memory_space<vmem>>, vector<2x2x128xf32>
    tpu.vector_store %arg12[%c3_21, %c3_22, %c0_23], %36 {strides = array<i32>} : memref<10x16x128xf32, #tpu.memory_space<vmem>>, vector<2x2x128xf32>,
    %38 = vector.extract_strided_slice %5 {offsets = [0, 768], sizes = [1, 128], strides = [1, 1]} : vector<1x2048xf32> to vector<1x128xf32>
    %39 = vector.shape_cast %38 : vector<1x128xf32> to vector<1x1x128xf32>
    %40 = vector.shape_cast %39 : vector<1x1x128xf32> to vector<1x1x128xf32>
    %41 = vector.broadcast %40 : vector<1x1x128xf32> to vector<2x2x128xf32>
    %c3_24 = arith.constant 3 : index
    %c5_25 = arith.constant 5 : index
    %c0_26 = arith.constant 0 : index
    %42 = vector.load %arg12[%c3_24, %c5_25, %c0_26] : memref<10x16x128xf32, #tpu.memory_space<vmem>>, vector<2x2x128xf32>
    tpu.vector_store %arg12[%c3_24, %c5_25, %c0_26], %41 {strides = array<i32>} : memref<10x16x128xf32, #tpu.memory_space<vmem>>, vector<2x2x128xf32>,
    %43 = vector.extract_strided_slice %5 {offsets = [0, 896], sizes = [1, 128], strides = [1, 1]} : vector<1x2048xf32> to vector<1x128xf32>
    %44 = vector.shape_cast %43 : vector<1x128xf32> to vector<1x1x128xf32>
    %45 = vector.shape_cast %44 : vector<1x1x128xf32> to vector<1x1x128xf32>
    %46 = vector.broadcast %45 : vector<1x1x128xf32> to vector<2x2x128xf32>
    %c3_27 = arith.constant 3 : index
    %c7_28 = arith.constant 7 : index
    %c0_29 = arith.constant 0 : index
    %47 = vector.load %arg12[%c3_27, %c7_28, %c0_29] : memref<10x16x128xf32, #tpu.memory_space<vmem>>, vector<2x2x128xf32>
    tpu.vector_store %arg12[%c3_27, %c7_28, %c0_29], %46 {strides = array<i32>} : memref<10x16x128xf32, #tpu.memory_space<vmem>>, vector<2x2x128xf32>,
    %48 = vector.extract_strided_slice %5 {offsets = [0, 1024], sizes = [1, 128], strides = [1, 1]} : vector<1x2048xf32> to vector<1x128xf32>
    %49 = vector.shape_cast %48 : vector<1x128xf32> to vector<1x1x128xf32>
    %50 = vector.shape_cast %49 : vector<1x1x128xf32> to vector<1x1x128xf32>
    %51 = vector.broadcast %50 : vector<1x1x128xf32> to vector<2x2x128xf32>
    %c5_30 = arith.constant 5 : index
    %c1_31 = arith.constant 1 : index
    %c0_32 = arith.constant 0 : index
    %52 = vector.load %arg12[%c5_30, %c1_31, %c0_32] : memref<10x16x128xf32, #tpu.memory_space<vmem>>, vector<2x2x128xf32>
    tpu.vector_store %arg12[%c5_30, %c1_31, %c0_32], %51 {strides = array<i32>} : memref<10x16x128xf32, #tpu.memory_space<vmem>>, vector<2x2x128xf32>,
    %53 = vector.extract_strided_slice %5 {offsets = [0, 1152], sizes = [1, 128], strides = [1, 1]} : vector<1x2048xf32> to vector<1x128xf32>
    %54 = vector.shape_cast %53 : vector<1x128xf32> to vector<1x1x128xf32>
    %55 = vector.shape_cast %54 : vector<1x1x128xf32> to vector<1x1x128xf32>
    %56 = vector.broadcast %55 : vector<1x1x128xf32> to vector<2x2x128xf32>
    %c5_33 = arith.constant 5 : index
    %c3_34 = arith.constant 3 : index
    %c0_35 = arith.constant 0 : index
    %57 = vector.load %arg12[%c5_33, %c3_34, %c0_35] : memref<10x16x128xf32, #tpu.memory_space<vmem>>, vector<2x2x128xf32>
    tpu.vector_store %arg12[%c5_33, %c3_34, %c0_35], %56 {strides = array<i32>} : memref<10x16x128xf32, #tpu.memory_space<vmem>>, vector<2x2x128xf32>,
    %58 = vector.extract_strided_slice %5 {offsets = [0, 1280], sizes = [1, 128], strides = [1, 1]} : vector<1x2048xf32> to vector<1x128xf32>
    %59 = vector.shape_cast %58 : vector<1x128xf32> to vector<1x1x128xf32>
    %60 = vector.shape_cast %59 : vector<1x1x128xf32> to vector<1x1x128xf32>
    %61 = vector.broadcast %60 : vector<1x1x128xf32> to vector<2x2x128xf32>
    %c5_36 = arith.constant 5 : index
    %c5_37 = arith.constant 5 : index
    %c0_38 = arith.constant 0 : index
    %62 = vector.load %arg12[%c5_36, %c5_37, %c0_38] : memref<10x16x128xf32, #tpu.memory_space<vmem>>, vector<2x2x128xf32>
    tpu.vector_store %arg12[%c5_36, %c5_37, %c0_38], %61 {strides = array<i32>} : memref<10x16x128xf32, #tpu.memory_space<vmem>>, vector<2x2x128xf32>,
    %63 = vector.extract_strided_slice %5 {offsets = [0, 1408], sizes = [1, 128], strides = [1, 1]} : vector<1x2048xf32> to vector<1x128xf32>
    %64 = vector.shape_cast %63 : vector<1x128xf32> to vector<1x1x128xf32>
    %65 = vector.shape_cast %64 : vector<1x1x128xf32> to vector<1x1x128xf32>
    %66 = vector.broadcast %65 : vector<1x1x128xf32> to vector<2x2x128xf32>
    %c5_39 = arith.constant 5 : index
    %c7_40 = arith.constant 7 : index
    %c0_41 = arith.constant 0 : index
    %67 = vector.load %arg12[%c5_39, %c7_40, %c0_41] : memref<10x16x128xf32, #tpu.memory_space<vmem>>, vector<2x2x128xf32>
    tpu.vector_store %arg12[%c5_39, %c7_40, %c0_41], %66 {strides = array<i32>} : memref<10x16x128xf32, #tpu.memory_space<vmem>>, vector<2x2x128xf32>,
    %68 = vector.extract_strided_slice %5 {offsets = [0, 1536], sizes = [1, 128], strides = [1, 1]} : vector<1x2048xf32> to vector<1x128xf32>
    %69 = vector.shape_cast %68 : vector<1x128xf32> to vector<1x1x128xf32>
    %70 = vector.shape_cast %69 : vector<1x1x128xf32> to vector<1x1x128xf32>
    %71 = vector.broadcast %70 : vector<1x1x128xf32> to vector<2x2x128xf32>
    %c7_42 = arith.constant 7 : index
    %c1_43 = arith.constant 1 : index
    %c0_44 = arith.constant 0 : index
    %72 = vector.load %arg12[%c7_42, %c1_43, %c0_44] : memref<10x16x128xf32, #tpu.memory_space<vmem>>, vector<2x2x128xf32>
    tpu.vector_store %arg12[%c7_42, %c1_43, %c0_44], %71 {strides = array<i32>} : memref<10x16x128xf32, #tpu.memory_space<vmem>>, vector<2x2x128xf32>,
    %73 = vector.extract_strided_slice %5 {offsets = [0, 1664], sizes = [1, 128], strides = [1, 1]} : vector<1x2048xf32> to vector<1x128xf32>
    %74 = vector.shape_cast %73 : vector<1x128xf32> to vector<1x1x128xf32>
    %75 = vector.shape_cast %74 : vector<1x1x128xf32> to vector<1x1x128xf32>
    %76 = vector.broadcast %75 : vector<1x1x128xf32> to vector<2x2x128xf32>
    %c7_45 = arith.constant 7 : index
    %c3_46 = arith.constant 3 : index
    %c0_47 = arith.constant 0 : index
    %77 = vector.load %arg12[%c7_45, %c3_46, %c0_47] : memref<10x16x128xf32, #tpu.memory_space<vmem>>, vector<2x2x128xf32>
    tpu.vector_store %arg12[%c7_45, %c3_46, %c0_47], %76 {strides = array<i32>} : memref<10x16x128xf32, #tpu.memory_space<vmem>>, vector<2x2x128xf32>,
    %78 = vector.extract_strided_slice %5 {offsets = [0, 1792], sizes = [1, 128], strides = [1, 1]} : vector<1x2048xf32> to vector<1x128xf32>
    %79 = vector.shape_cast %78 : vector<1x128xf32> to vector<1x1x128xf32>
    %80 = vector.shape_cast %79 : vector<1x1x128xf32> to vector<1x1x128xf32>
    %81 = vector.broadcast %80 : vector<1x1x128xf32> to vector<2x2x128xf32>
    %c7_48 = arith.constant 7 : index
    %c5_49 = arith.constant 5 : index
    %c0_50 = arith.constant 0 : index
    %82 = vector.load %arg12[%c7_48, %c5_49, %c0_50] : memref<10x16x128xf32, #tpu.memory_space<vmem>>, vector<2x2x128xf32>
    tpu.vector_store %arg12[%c7_48, %c5_49, %c0_50], %81 {strides = array<i32>} : memref<10x16x128xf32, #tpu.memory_space<vmem>>, vector<2x2x128xf32>,
    %83 = vector.extract_strided_slice %5 {offsets = [0, 1920], sizes = [1, 128], strides = [1, 1]} : vector<1x2048xf32> to vector<1x128xf32>
    %84 = vector.shape_cast %83 : vector<1x128xf32> to vector<1x1x128xf32>
    %85 = vector.shape_cast %84 : vector<1x1x128xf32> to vector<1x1x128xf32>
    %86 = vector.broadcast %85 : vector<1x1x128xf32> to vector<2x2x128xf32>
    %c7_51 = arith.constant 7 : index
    %c7_52 = arith.constant 7 : index
    %c0_53 = arith.constant 0 : index
    %87 = vector.load %arg12[%c7_51, %c7_52, %c0_53] : memref<10x16x128xf32, #tpu.memory_space<vmem>>, vector<2x2x128xf32>
    tpu.vector_store %arg12[%c7_51, %c7_52, %c0_53], %86 {strides = array<i32>} : memref<10x16x128xf32, #tpu.memory_space<vmem>>, vector<2x2x128xf32>,
    %cst_54 = arith.constant 0.000000e+00 : f32
    %88 = vector.broadcast %cst_54 : f32 to vector<128x128xf32>
    %c0_55 = arith.constant 0 : index
    %c0_56 = arith.constant 0 : index
    %c0_57 = arith.constant 0 : index
    %89 = vector.load %arg12[%c0_55, %c0_56, %c0_57] : memref<10x16x128xf32, #tpu.memory_space<vmem>>, vector<8x16x128xf32>
    %90 = vector.shape_cast %89 : vector<8x16x128xf32> to vector<128x128xf32>
    %c1_i32 = arith.constant 1 : i32
    %91 = tpu.dynamic_rotate %90 by %c1_i32 dim 0 : vector<128x128xf32>, i32 -> vector<128x128xf32>
    %c0_58 = arith.constant 0 : index
    %c0_59 = arith.constant 0 : index
    %c0_60 = arith.constant 0 : index
    %92 = vector.load %arg4[%c0_58, %c0_59, %c0_60] : memref<9x128x128xf32, #tpu.memory_space<vmem>>, vector<1x128x128xf32>
    %93 = vector.shape_cast %92 : vector<1x128x128xf32> to vector<128x128xf32>
    %cst_61 = arith.constant dense<0.000000e+00> : vector<128x128xf32>
    %94 = tpu.matmul %91, %93, %cst_61 {dimension_numbers = #tpu.dot_dimension_numbers<[1], [0], [0], [1], [0, 0, 1, 1], [], []>} : vector<128x128xf32>, vector<128x128xf32>, vector<128x128xf32> -> vector<128x128xf32>
    %95 = arith.addf %88, %94 : vector<128x128xf32>
    %c1_62 = arith.constant 1 : index
    %c0_63 = arith.constant 0 : index
    %c0_64 = arith.constant 0 : index
    %96 = vector.load %arg4[%c1_62, %c0_63, %c0_64] : memref<9x128x128xf32, #tpu.memory_space<vmem>>, vector<1x128x128xf32>
    %97 = vector.shape_cast %96 : vector<1x128x128xf32> to vector<128x128xf32>
    %cst_65 = arith.constant dense<0.000000e+00> : vector<128x128xf32>
    %98 = tpu.matmul %90, %97, %cst_65 {dimension_numbers = #tpu.dot_dimension_numbers<[1], [0], [0], [1], [0, 0, 1, 1], [], []>} : vector<128x128xf32>, vector<128x128xf32>, vector<128x128xf32> -> vector<128x128xf32>
    %99 = arith.addf %95, %98 : vector<128x128xf32>
    %c127_i32 = arith.constant 127 : i32
    %100 = tpu.dynamic_rotate %90 by %c127_i32 dim 0 : vector<128x128xf32>, i32 -> vector<128x128xf32>
    %c2 = arith.constant 2 : index
    %c0_66 = arith.constant 0 : index
    %c0_67 = arith.constant 0 : index
    %101 = vector.load %arg4[%c2, %c0_66, %c0_67] : memref<9x128x128xf32, #tpu.memory_space<vmem>>, vector<1x128x128xf32>
    %102 = vector.shape_cast %101 : vector<1x128x128xf32> to vector<128x128xf32>
    %cst_68 = arith.constant dense<0.000000e+00> : vector<128x128xf32>
    %103 = tpu.matmul %100, %102, %cst_68 {dimension_numbers = #tpu.dot_dimension_numbers<[1], [0], [0], [1], [0, 0, 1, 1], [], []>} : vector<128x128xf32>, vector<128x128xf32>, vector<128x128xf32> -> vector<128x128xf32>
    %104 = arith.addf %99, %103 : vector<128x128xf32>
    %c1_69 = arith.constant 1 : index
    %c0_70 = arith.constant 0 : index
    %c0_71 = arith.constant 0 : index
    %105 = vector.load %arg12[%c1_69, %c0_70, %c0_71] : memref<10x16x128xf32, #tpu.memory_space<vmem>>, vector<8x16x128xf32>
    %106 = vector.shape_cast %105 : vector<8x16x128xf32> to vector<128x128xf32>
    %c1_i32_72 = arith.constant 1 : i32
    %107 = tpu.dynamic_rotate %106 by %c1_i32_72 dim 0 : vector<128x128xf32>, i32 -> vector<128x128xf32>
    %c3_73 = arith.constant 3 : index
    %c0_74 = arith.constant 0 : index
    %c0_75 = arith.constant 0 : index
    %108 = vector.load %arg4[%c3_73, %c0_74, %c0_75] : memref<9x128x128xf32, #tpu.memory_space<vmem>>, vector<1x128x128xf32>
    %109 = vector.shape_cast %108 : vector<1x128x128xf32> to vector<128x128xf32>
    %cst_76 = arith.constant dense<0.000000e+00> : vector<128x128xf32>
    %110 = tpu.matmul %107, %109, %cst_76 {dimension_numbers = #tpu.dot_dimension_numbers<[1], [0], [0], [1], [0, 0, 1, 1], [], []>} : vector<128x128xf32>, vector<128x128xf32>, vector<128x128xf32> -> vector<128x128xf32>
    %111 = arith.addf %104, %110 : vector<128x128xf32>
    %c4 = arith.constant 4 : index
    %c0_77 = arith.constant 0 : index
    %c0_78 = arith.constant 0 : index
    %112 = vector.load %arg4[%c4, %c0_77, %c0_78] : memref<9x128x128xf32, #tpu.memory_space<vmem>>, vector<1x128x128xf32>
    %113 = vector.shape_cast %112 : vector<1x128x128xf32> to vector<128x128xf32>
    %cst_79 = arith.constant dense<0.000000e+00> : vector<128x128xf32>
    %114 = tpu.matmul %106, %113, %cst_79 {dimension_numbers = #tpu.dot_dimension_numbers<[1], [0], [0], [1], [0, 0, 1, 1], [], []>} : vector<128x128xf32>, vector<128x128xf32>, vector<128x128xf32> -> vector<128x128xf32>
    %115 = arith.addf %111, %114 : vector<128x128xf32>
    %c127_i32_80 = arith.constant 127 : i32
    %116 = tpu.dynamic_rotate %106 by %c127_i32_80 dim 0 : vector<128x128xf32>, i32 -> vector<128x128xf32>
    %c5_81 = arith.constant 5 : index
    %c0_82 = arith.constant 0 : index
    %c0_83 = arith.constant 0 : index
    %117 = vector.load %arg4[%c5_81, %c0_82, %c0_83] : memref<9x128x128xf32, #tpu.memory_space<vmem>>, vector<1x128x128xf32>
    %118 = vector.shape_cast %117 : vector<1x128x128xf32> to vector<128x128xf32>
    %cst_84 = arith.constant dense<0.000000e+00> : vector<128x128xf32>
    %119 = tpu.matmul %116, %118, %cst_84 {dimension_numbers = #tpu.dot_dimension_numbers<[1], [0], [0], [1], [0, 0, 1, 1], [], []>} : vector<128x128xf32>, vector<128x128xf32>, vector<128x128xf32> -> vector<128x128xf32>
    %120 = arith.addf %115, %119 : vector<128x128xf32>
    %c2_85 = arith.constant 2 : index
    %c0_86 = arith.constant 0 : index
    %c0_87 = arith.constant 0 : index
    %121 = vector.load %arg12[%c2_85, %c0_86, %c0_87] : memref<10x16x128xf32, #tpu.memory_space<vmem>>, vector<8x16x128xf32>
    %122 = vector.shape_cast %121 : vector<8x16x128xf32> to vector<128x128xf32>
    %c1_i32_88 = arith.constant 1 : i32
    %123 = tpu.dynamic_rotate %122 by %c1_i32_88 dim 0 : vector<128x128xf32>, i32 -> vector<128x128xf32>
    %c6 = arith.constant 6 : index
    %c0_89 = arith.constant 0 : index
    %c0_90 = arith.constant 0 : index
    %124 = vector.load %arg4[%c6, %c0_89, %c0_90] : memref<9x128x128xf32, #tpu.memory_space<vmem>>, vector<1x128x128xf32>
    %125 = vector.shape_cast %124 : vector<1x128x128xf32> to vector<128x128xf32>
    %cst_91 = arith.constant dense<0.000000e+00> : vector<128x128xf32>
    %126 = tpu.matmul %123, %125, %cst_91 {dimension_numbers = #tpu.dot_dimension_numbers<[1], [0], [0], [1], [0, 0, 1, 1], [], []>} : vector<128x128xf32>, vector<128x128xf32>, vector<128x128xf32> -> vector<128x128xf32>
    %127 = arith.addf %120, %126 : vector<128x128xf32>
    %c7_92 = arith.constant 7 : index
    %c0_93 = arith.constant 0 : index
    %c0_94 = arith.constant 0 : index
    %128 = vector.load %arg4[%c7_92, %c0_93, %c0_94] : memref<9x128x128xf32, #tpu.memory_space<vmem>>, vector<1x128x128xf32>
    %129 = vector.shape_cast %128 : vector<1x128x128xf32> to vector<128x128xf32>
    %cst_95 = arith.constant dense<0.000000e+00> : vector<128x128xf32>
    %130 = tpu.matmul %122, %129, %cst_95 {dimension_numbers = #tpu.dot_dimension_numbers<[1], [0], [0], [1], [0, 0, 1, 1], [], []>} : vector<128x128xf32>, vector<128x128xf32>, vector<128x128xf32> -> vector<128x128xf32>
    %131 = arith.addf %127, %130 : vector<128x128xf32>
    %c127_i32_96 = arith.constant 127 : i32
    %132 = tpu.dynamic_rotate %122 by %c127_i32_96 dim 0 : vector<128x128xf32>, i32 -> vector<128x128xf32>
    %c8 = arith.constant 8 : index
    %c0_97 = arith.constant 0 : index
    %c0_98 = arith.constant 0 : index
    %133 = vector.load %arg4[%c8, %c0_97, %c0_98] : memref<9x128x128xf32, #tpu.memory_space<vmem>>, vector<1x128x128xf32>
    %134 = vector.shape_cast %133 : vector<1x128x128xf32> to vector<128x128xf32>
    %cst_99 = arith.constant dense<0.000000e+00> : vector<128x128xf32>
    %135 = tpu.matmul %132, %134, %cst_99 {dimension_numbers = #tpu.dot_dimension_numbers<[1], [0], [0], [1], [0, 0, 1, 1], [], []>} : vector<128x128xf32>, vector<128x128xf32>, vector<128x128xf32> -> vector<128x128xf32>
    %136 = arith.addf %131, %135 : vector<128x128xf32>
    %c0_100 = arith.constant 0 : index
    %c0_101 = arith.constant 0 : index
    %137 = vector.load %arg5[%c0_100, %c0_101] : memref<1x128xf32, #tpu.memory_space<vmem>>, vector<1x128xf32>
    %138 = vector.broadcast %137 : vector<1x128xf32> to vector<128x128xf32>
    %139 = arith.addf %136, %138 : vector<128x128xf32>
    %cst_102 = arith.constant 0.000000e+00 : f32
    %140 = vector.broadcast %cst_102 : f32 to vector<128x128xf32>
    %141 = arith.cmpf oge, %139, %140 : vector<128x128xf32>
    %cst_103 = arith.constant 2.000000e-01 : f32
    %142 = vector.broadcast %cst_103 : f32 to vector<128x128xf32>
    %143 = arith.mulf %142, %139 : vector<128x128xf32>
    %144 = arith.select %141, %139, %143 : vector<128x128xi1>, vector<128x128xf32>
    %c0_104 = arith.constant 0 : index
    %c0_105 = arith.constant 0 : index
    %145 = vector.load %arg10[%c0_104, %c0_105] : memref<432x128xf32, #tpu.memory_space<vmem>>, vector<432x128xf32>
    %cst_106 = arith.constant dense<0.000000e+00> : vector<432x128xf32>
    %146 = tpu.matmul %145, %144, %cst_106 {dimension_numbers = #tpu.dot_dimension_numbers<[1], [0], [0], [1], [0, 0, 1, 1], [], []>} : vector<432x128xf32>, vector<128x128xf32>, vector<432x128xf32> -> vector<432x128xf32>
    %147 = vector.shape_cast %146 : vector<432x128xf32> to vector<18x24x128xf32>
    %c0_107 = arith.constant 0 : index
    %c0_108 = arith.constant 0 : index
    %c0_109 = arith.constant 0 : index
    %148 = vector.load %arg13[%c0_107, %c0_108, %c0_109] : memref<18x24x128xf32, #tpu.memory_space<vmem>>, vector<18x24x128xf32>
    tpu.vector_store %arg13[%c0_107, %c0_108, %c0_109], %147 {strides = array<i32>} : memref<18x24x128xf32, #tpu.memory_space<vmem>>, vector<18x24x128xf32>,
    %cst_110 = arith.constant 0.000000e+00 : f32
    %149 = vector.broadcast %cst_110 : f32 to vector<384x128xf32>
    %c0_111 = arith.constant 0 : index
    %c0_112 = arith.constant 0 : index
    %c0_113 = arith.constant 0 : index
    %150 = vector.load %arg13[%c0_111, %c0_112, %c0_113] : memref<18x24x128xf32, #tpu.memory_space<vmem>>, vector<16x24x128xf32>
    %151 = vector.shape_cast %150 : vector<16x24x128xf32> to vector<384x128xf32>
    %c1_i32_114 = arith.constant 1 : i32
    %152 = tpu.dynamic_rotate %151 by %c1_i32_114 dim 0 : vector<384x128xf32>, i32 -> vector<384x128xf32>
    %c0_115 = arith.constant 0 : index
    %c0_116 = arith.constant 0 : index
    %c0_117 = arith.constant 0 : index
    %153 = vector.load %arg6[%c0_115, %c0_116, %c0_117] : memref<9x128x128xf32, #tpu.memory_space<vmem>>, vector<1x128x128xf32>
    %154 = vector.shape_cast %153 : vector<1x128x128xf32> to vector<128x128xf32>
    %cst_118 = arith.constant dense<0.000000e+00> : vector<384x128xf32>
    %155 = tpu.matmul %152, %154, %cst_118 {dimension_numbers = #tpu.dot_dimension_numbers<[1], [0], [0], [1], [0, 0, 1, 1], [], []>} : vector<384x128xf32>, vector<128x128xf32>, vector<384x128xf32> -> vector<384x128xf32>
    %156 = arith.addf %149, %155 : vector<384x128xf32>
    %c1_119 = arith.constant 1 : index
    %c0_120 = arith.constant 0 : index
    %c0_121 = arith.constant 0 : index
    %157 = vector.load %arg6[%c1_119, %c0_120, %c0_121] : memref<9x128x128xf32, #tpu.memory_space<vmem>>, vector<1x128x128xf32>
    %158 = vector.shape_cast %157 : vector<1x128x128xf32> to vector<128x128xf32>
    %cst_122 = arith.constant dense<0.000000e+00> : vector<384x128xf32>
    %159 = tpu.matmul %151, %158, %cst_122 {dimension_numbers = #tpu.dot_dimension_numbers<[1], [0], [0], [1], [0, 0, 1, 1], [], []>} : vector<384x128xf32>, vector<128x128xf32>, vector<384x128xf32> -> vector<384x128xf32>
    %160 = arith.addf %156, %159 : vector<384x128xf32>
    %c383_i32 = arith.constant 383 : i32
    %161 = tpu.dynamic_rotate %151 by %c383_i32 dim 0 : vector<384x128xf32>, i32 -> vector<384x128xf32>
    %c2_123 = arith.constant 2 : index
    %c0_124 = arith.constant 0 : index
    %c0_125 = arith.constant 0 : index
    %162 = vector.load %arg6[%c2_123, %c0_124, %c0_125] : memref<9x128x128xf32, #tpu.memory_space<vmem>>, vector<1x128x128xf32>
    %163 = vector.shape_cast %162 : vector<1x128x128xf32> to vector<128x128xf32>
    %cst_126 = arith.constant dense<0.000000e+00> : vector<384x128xf32>
    %164 = tpu.matmul %161, %163, %cst_126 {dimension_numbers = #tpu.dot_dimension_numbers<[1], [0], [0], [1], [0, 0, 1, 1], [], []>} : vector<384x128xf32>, vector<128x128xf32>, vector<384x128xf32> -> vector<384x128xf32>
    %165 = arith.addf %160, %164 : vector<384x128xf32>
    %c1_127 = arith.constant 1 : index
    %c0_128 = arith.constant 0 : index
    %c0_129 = arith.constant 0 : index
    %166 = vector.load %arg13[%c1_127, %c0_128, %c0_129] : memref<18x24x128xf32, #tpu.memory_space<vmem>>, vector<16x24x128xf32>
    %167 = vector.shape_cast %166 : vector<16x24x128xf32> to vector<384x128xf32>
    %c1_i32_130 = arith.constant 1 : i32
    %168 = tpu.dynamic_rotate %167 by %c1_i32_130 dim 0 : vector<384x128xf32>, i32 -> vector<384x128xf32>
    %c3_131 = arith.constant 3 : index
    %c0_132 = arith.constant 0 : index
    %c0_133 = arith.constant 0 : index
    %169 = vector.load %arg6[%c3_131, %c0_132, %c0_133] : memref<9x128x128xf32, #tpu.memory_space<vmem>>, vector<1x128x128xf32>
    %170 = vector.shape_cast %169 : vector<1x128x128xf32> to vector<128x128xf32>
    %cst_134 = arith.constant dense<0.000000e+00> : vector<384x128xf32>
    %171 = tpu.matmul %168, %170, %cst_134 {dimension_numbers = #tpu.dot_dimension_numbers<[1], [0], [0], [1], [0, 0, 1, 1], [], []>} : vector<384x128xf32>, vector<128x128xf32>, vector<384x128xf32> -> vector<384x128xf32>
    %172 = arith.addf %165, %171 : vector<384x128xf32>
    %c4_135 = arith.constant 4 : index
    %c0_136 = arith.constant 0 : index
    %c0_137 = arith.constant 0 : index
    %173 = vector.load %arg6[%c4_135, %c0_136, %c0_137] : memref<9x128x128xf32, #tpu.memory_space<vmem>>, vector<1x128x128xf32>
    %174 = vector.shape_cast %173 : vector<1x128x128xf32> to vector<128x128xf32>
    %cst_138 = arith.constant dense<0.000000e+00> : vector<384x128xf32>
    %175 = tpu.matmul %167, %174, %cst_138 {dimension_numbers = #tpu.dot_dimension_numbers<[1], [0], [0], [1], [0, 0, 1, 1], [], []>} : vector<384x128xf32>, vector<128x128xf32>, vector<384x128xf32> -> vector<384x128xf32>
    %176 = arith.addf %172, %175 : vector<384x128xf32>
    %c383_i32_139 = arith.constant 383 : i32
    %177 = tpu.dynamic_rotate %167 by %c383_i32_139 dim 0 : vector<384x128xf32>, i32 -> vector<384x128xf32>
    %c5_140 = arith.constant 5 : index
    %c0_141 = arith.constant 0 : index
    %c0_142 = arith.constant 0 : index
    %178 = vector.load %arg6[%c5_140, %c0_141, %c0_142] : memref<9x128x128xf32, #tpu.memory_space<vmem>>, vector<1x128x128xf32>
    %179 = vector.shape_cast %178 : vector<1x128x128xf32> to vector<128x128xf32>
    %cst_143 = arith.constant dense<0.000000e+00> : vector<384x128xf32>
    %180 = tpu.matmul %177, %179, %cst_143 {dimension_numbers = #tpu.dot_dimension_numbers<[1], [0], [0], [1], [0, 0, 1, 1], [], []>} : vector<384x128xf32>, vector<128x128xf32>, vector<384x128xf32> -> vector<384x128xf32>
    %181 = arith.addf %176, %180 : vector<384x128xf32>
    %c2_144 = arith.constant 2 : index
    %c0_145 = arith.constant 0 : index
    %c0_146 = arith.constant 0 : index
    %182 = vector.load %arg13[%c2_144, %c0_145, %c0_146] : memref<18x24x128xf32, #tpu.memory_space<vmem>>, vector<16x24x128xf32>
    %183 = vector.shape_cast %182 : vector<16x24x128xf32> to vector<384x128xf32>
    %c1_i32_147 = arith.constant 1 : i32
    %184 = tpu.dynamic_rotate %183 by %c1_i32_147 dim 0 : vector<384x128xf32>, i32 -> vector<384x128xf32>
    %c6_148 = arith.constant 6 : index
    %c0_149 = arith.constant 0 : index
    %c0_150 = arith.constant 0 : index
    %185 = vector.load %arg6[%c6_148, %c0_149, %c0_150] : memref<9x128x128xf32, #tpu.memory_space<vmem>>, vector<1x128x128xf32>
    %186 = vector.shape_cast %185 : vector<1x128x128xf32> to vector<128x128xf32>
    %cst_151 = arith.constant dense<0.000000e+00> : vector<384x128xf32>
    %187 = tpu.matmul %184, %186, %cst_151 {dimension_numbers = #tpu.dot_dimension_numbers<[1], [0], [0], [1], [0, 0, 1, 1], [], []>} : vector<384x128xf32>, vector<128x128xf32>, vector<384x128xf32> -> vector<384x128xf32>
    %188 = arith.addf %181, %187 : vector<384x128xf32>
    %c7_152 = arith.constant 7 : index
    %c0_153 = arith.constant 0 : index
    %c0_154 = arith.constant 0 : index
    %189 = vector.load %arg6[%c7_152, %c0_153, %c0_154] : memref<9x128x128xf32, #tpu.memory_space<vmem>>, vector<1x128x128xf32>
    %190 = vector.shape_cast %189 : vector<1x128x128xf32> to vector<128x128xf32>
    %cst_155 = arith.constant dense<0.000000e+00> : vector<384x128xf32>
    %191 = tpu.matmul %183, %190, %cst_155 {dimension_numbers = #tpu.dot_dimension_numbers<[1], [0], [0], [1], [0, 0, 1, 1], [], []>} : vector<384x128xf32>, vector<128x128xf32>, vector<384x128xf32> -> vector<384x128xf32>
    %192 = arith.addf %188, %191 : vector<384x128xf32>
    %c383_i32_156 = arith.constant 383 : i32
    %193 = tpu.dynamic_rotate %183 by %c383_i32_156 dim 0 : vector<384x128xf32>, i32 -> vector<384x128xf32>
    %c8_157 = arith.constant 8 : index
    %c0_158 = arith.constant 0 : index
    %c0_159 = arith.constant 0 : index
    %194 = vector.load %arg6[%c8_157, %c0_158, %c0_159] : memref<9x128x128xf32, #tpu.memory_space<vmem>>, vector<1x128x128xf32>
    %195 = vector.shape_cast %194 : vector<1x128x128xf32> to vector<128x128xf32>
    %cst_160 = arith.constant dense<0.000000e+00> : vector<384x128xf32>
    %196 = tpu.matmul %193, %195, %cst_160 {dimension_numbers = #tpu.dot_dimension_numbers<[1], [0], [0], [1], [0, 0, 1, 1], [], []>} : vector<384x128xf32>, vector<128x128xf32>, vector<384x128xf32> -> vector<384x128xf32>
    %197 = arith.addf %192, %196 : vector<384x128xf32>
    %c0_161 = arith.constant 0 : index
    %c0_162 = arith.constant 0 : index
    %198 = vector.load %arg7[%c0_161, %c0_162] : memref<1x128xf32, #tpu.memory_space<vmem>>, vector<1x128xf32>
    %199 = vector.broadcast %198 : vector<1x128xf32> to vector<384x128xf32>
    %200 = arith.addf %197, %199 : vector<384x128xf32>
    %cst_163 = arith.constant 0.000000e+00 : f32
    %201 = vector.broadcast %cst_163 : f32 to vector<384x128xf32>
    %202 = arith.cmpf oge, %200, %201 : vector<384x128xf32>
    %cst_164 = arith.constant 2.000000e-01 : f32
    %203 = vector.broadcast %cst_164 : f32 to vector<384x128xf32>
    %204 = arith.mulf %203, %200 : vector<384x128xf32>
    %205 = arith.select %202, %200, %204 : vector<384x128xi1>, vector<384x128xf32>
    %206 = vector.shape_cast %205 : vector<384x128xf32> to vector<16x24x128xf32>
    %207 = tpu.iota {dimensions = array<i32: 1>} : vector<16x24x128xi32>
    %c1_i32_165 = arith.constant 1 : i32
    %208 = vector.broadcast %c1_i32_165 : i32 to vector<16x24x128xi32>
    %209 = arith.cmpi sge, %207, %208 : vector<16x24x128xi32>
    %c16_i32 = arith.constant 16 : i32
    %210 = vector.broadcast %c16_i32 : i32 to vector<16x24x128xi32>
    %211 = arith.cmpi sle, %207, %210 : vector<16x24x128xi32>
    %212 = arith.andi %209, %211 : vector<16x24x128xi1>
    %cst_166 = arith.constant 0.000000e+00 : f32
    %213 = vector.broadcast %cst_166 : f32 to vector<16x24x128xf32>
    %214 = arith.select %212, %206, %213 : vector<16x24x128xi1>, vector<16x24x128xf32>
    %c1_167 = arith.constant 1 : index
    %c0_168 = arith.constant 0 : index
    %c0_169 = arith.constant 0 : index
    %215 = vector.load %arg13[%c1_167, %c0_168, %c0_169] : memref<18x24x128xf32, #tpu.memory_space<vmem>>, vector<16x24x128xf32>
    tpu.vector_store %arg13[%c1_167, %c0_168, %c0_169], %214 {strides = array<i32>} : memref<18x24x128xf32, #tpu.memory_space<vmem>>, vector<16x24x128xf32>,
    %cst_170 = arith.constant 0.000000e+00 : f32
    %216 = vector.broadcast %cst_170 : f32 to vector<384x128xf32>
    %c0_171 = arith.constant 0 : index
    %c0_172 = arith.constant 0 : index
    %c0_173 = arith.constant 0 : index
    %217 = vector.load %arg13[%c0_171, %c0_172, %c0_173] : memref<18x24x128xf32, #tpu.memory_space<vmem>>, vector<16x24x128xf32>
    %218 = vector.shape_cast %217 : vector<16x24x128xf32> to vector<384x128xf32>
    %c1_i32_174 = arith.constant 1 : i32
    %219 = tpu.dynamic_rotate %218 by %c1_i32_174 dim 0 : vector<384x128xf32>, i32 -> vector<384x128xf32>
    %c0_175 = arith.constant 0 : index
    %c0_176 = arith.constant 0 : index
    %c0_177 = arith.constant 0 : index
    %220 = vector.load %arg8[%c0_175, %c0_176, %c0_177] : memref<9x128x128xf32, #tpu.memory_space<vmem>>, vector<1x128x128xf32>
    %221 = vector.shape_cast %220 : vector<1x128x128xf32> to vector<128x128xf32>
    %cst_178 = arith.constant dense<0.000000e+00> : vector<384x128xf32>
    %222 = tpu.matmul %219, %221, %cst_178 {dimension_numbers = #tpu.dot_dimension_numbers<[1], [0], [0], [1], [0, 0, 1, 1], [], []>} : vector<384x128xf32>, vector<128x128xf32>, vector<384x128xf32> -> vector<384x128xf32>
    %223 = arith.addf %216, %222 : vector<384x128xf32>
    %c1_179 = arith.constant 1 : index
    %c0_180 = arith.constant 0 : index
    %c0_181 = arith.constant 0 : index
    %224 = vector.load %arg8[%c1_179, %c0_180, %c0_181] : memref<9x128x128xf32, #tpu.memory_space<vmem>>, vector<1x128x128xf32>
    %225 = vector.shape_cast %224 : vector<1x128x128xf32> to vector<128x128xf32>
    %cst_182 = arith.constant dense<0.000000e+00> : vector<384x128xf32>
    %226 = tpu.matmul %218, %225, %cst_182 {dimension_numbers = #tpu.dot_dimension_numbers<[1], [0], [0], [1], [0, 0, 1, 1], [], []>} : vector<384x128xf32>, vector<128x128xf32>, vector<384x128xf32> -> vector<384x128xf32>
    %227 = arith.addf %223, %226 : vector<384x128xf32>
    %c383_i32_183 = arith.constant 383 : i32
    %228 = tpu.dynamic_rotate %218 by %c383_i32_183 dim 0 : vector<384x128xf32>, i32 -> vector<384x128xf32>
    %c2_184 = arith.constant 2 : index
    %c0_185 = arith.constant 0 : index
    %c0_186 = arith.constant 0 : index
    %229 = vector.load %arg8[%c2_184, %c0_185, %c0_186] : memref<9x128x128xf32, #tpu.memory_space<vmem>>, vector<1x128x128xf32>
    %230 = vector.shape_cast %229 : vector<1x128x128xf32> to vector<128x128xf32>
    %cst_187 = arith.constant dense<0.000000e+00> : vector<384x128xf32>
    %231 = tpu.matmul %228, %230, %cst_187 {dimension_numbers = #tpu.dot_dimension_numbers<[1], [0], [0], [1], [0, 0, 1, 1], [], []>} : vector<384x128xf32>, vector<128x128xf32>, vector<384x128xf32> -> vector<384x128xf32>
    %232 = arith.addf %227, %231 : vector<384x128xf32>
    %c1_188 = arith.constant 1 : index
    %c0_189 = arith.constant 0 : index
    %c0_190 = arith.constant 0 : index
    %233 = vector.load %arg13[%c1_188, %c0_189, %c0_190] : memref<18x24x128xf32, #tpu.memory_space<vmem>>, vector<16x24x128xf32>
    %234 = vector.shape_cast %233 : vector<16x24x128xf32> to vector<384x128xf32>
    %c1_i32_191 = arith.constant 1 : i32
    %235 = tpu.dynamic_rotate %234 by %c1_i32_191 dim 0 : vector<384x128xf32>, i32 -> vector<384x128xf32>
    %c3_192 = arith.constant 3 : index
    %c0_193 = arith.constant 0 : index
    %c0_194 = arith.constant 0 : index
    %236 = vector.load %arg8[%c3_192, %c0_193, %c0_194] : memref<9x128x128xf32, #tpu.memory_space<vmem>>, vector<1x128x128xf32>
    %237 = vector.shape_cast %236 : vector<1x128x128xf32> to vector<128x128xf32>
    %cst_195 = arith.constant dense<0.000000e+00> : vector<384x128xf32>
    %238 = tpu.matmul %235, %237, %cst_195 {dimension_numbers = #tpu.dot_dimension_numbers<[1], [0], [0], [1], [0, 0, 1, 1], [], []>} : vector<384x128xf32>, vector<128x128xf32>, vector<384x128xf32> -> vector<384x128xf32>
    %239 = arith.addf %232, %238 : vector<384x128xf32>
    %c4_196 = arith.constant 4 : index
    %c0_197 = arith.constant 0 : index
    %c0_198 = arith.constant 0 : index
    %240 = vector.load %arg8[%c4_196, %c0_197, %c0_198] : memref<9x128x128xf32, #tpu.memory_space<vmem>>, vector<1x128x128xf32>
    %241 = vector.shape_cast %240 : vector<1x128x128xf32> to vector<128x128xf32>
    %cst_199 = arith.constant dense<0.000000e+00> : vector<384x128xf32>
    %242 = tpu.matmul %234, %241, %cst_199 {dimension_numbers = #tpu.dot_dimension_numbers<[1], [0], [0], [1], [0, 0, 1, 1], [], []>} : vector<384x128xf32>, vector<128x128xf32>, vector<384x128xf32> -> vector<384x128xf32>
    %243 = arith.addf %239, %242 : vector<384x128xf32>
    %c383_i32_200 = arith.constant 383 : i32
    %244 = tpu.dynamic_rotate %234 by %c383_i32_200 dim 0 : vector<384x128xf32>, i32 -> vector<384x128xf32>
    %c5_201 = arith.constant 5 : index
    %c0_202 = arith.constant 0 : index
    %c0_203 = arith.constant 0 : index
    %245 = vector.load %arg8[%c5_201, %c0_202, %c0_203] : memref<9x128x128xf32, #tpu.memory_space<vmem>>, vector<1x128x128xf32>
    %246 = vector.shape_cast %245 : vector<1x128x128xf32> to vector<128x128xf32>
    %cst_204 = arith.constant dense<0.000000e+00> : vector<384x128xf32>
    %247 = tpu.matmul %244, %246, %cst_204 {dimension_numbers = #tpu.dot_dimension_numbers<[1], [0], [0], [1], [0, 0, 1, 1], [], []>} : vector<384x128xf32>, vector<128x128xf32>, vector<384x128xf32> -> vector<384x128xf32>
    %248 = arith.addf %243, %247 : vector<384x128xf32>
    %c2_205 = arith.constant 2 : index
    %c0_206 = arith.constant 0 : index
    %c0_207 = arith.constant 0 : index
    %249 = vector.load %arg13[%c2_205, %c0_206, %c0_207] : memref<18x24x128xf32, #tpu.memory_space<vmem>>, vector<16x24x128xf32>
    %250 = vector.shape_cast %249 : vector<16x24x128xf32> to vector<384x128xf32>
    %c1_i32_208 = arith.constant 1 : i32
    %251 = tpu.dynamic_rotate %250 by %c1_i32_208 dim 0 : vector<384x128xf32>, i32 -> vector<384x128xf32>
    %c6_209 = arith.constant 6 : index
    %c0_210 = arith.constant 0 : index
    %c0_211 = arith.constant 0 : index
    %252 = vector.load %arg8[%c6_209, %c0_210, %c0_211] : memref<9x128x128xf32, #tpu.memory_space<vmem>>, vector<1x128x128xf32>
    %253 = vector.shape_cast %252 : vector<1x128x128xf32> to vector<128x128xf32>
    %cst_212 = arith.constant dense<0.000000e+00> : vector<384x128xf32>
    %254 = tpu.matmul %251, %253, %cst_212 {dimension_numbers = #tpu.dot_dimension_numbers<[1], [0], [0], [1], [0, 0, 1, 1], [], []>} : vector<384x128xf32>, vector<128x128xf32>, vector<384x128xf32> -> vector<384x128xf32>
    %255 = arith.addf %248, %254 : vector<384x128xf32>
    %c7_213 = arith.constant 7 : index
    %c0_214 = arith.constant 0 : index
    %c0_215 = arith.constant 0 : index
    %256 = vector.load %arg8[%c7_213, %c0_214, %c0_215] : memref<9x128x128xf32, #tpu.memory_space<vmem>>, vector<1x128x128xf32>
    %257 = vector.shape_cast %256 : vector<1x128x128xf32> to vector<128x128xf32>
    %cst_216 = arith.constant dense<0.000000e+00> : vector<384x128xf32>
    %258 = tpu.matmul %250, %257, %cst_216 {dimension_numbers = #tpu.dot_dimension_numbers<[1], [0], [0], [1], [0, 0, 1, 1], [], []>} : vector<384x128xf32>, vector<128x128xf32>, vector<384x128xf32> -> vector<384x128xf32>
    %259 = arith.addf %255, %258 : vector<384x128xf32>
    %c383_i32_217 = arith.constant 383 : i32
    %260 = tpu.dynamic_rotate %250 by %c383_i32_217 dim 0 : vector<384x128xf32>, i32 -> vector<384x128xf32>
    %c8_218 = arith.constant 8 : index
    %c0_219 = arith.constant 0 : index
    %c0_220 = arith.constant 0 : index
    %261 = vector.load %arg8[%c8_218, %c0_219, %c0_220] : memref<9x128x128xf32, #tpu.memory_space<vmem>>, vector<1x128x128xf32>
    %262 = vector.shape_cast %261 : vector<1x128x128xf32> to vector<128x128xf32>
    %cst_221 = arith.constant dense<0.000000e+00> : vector<384x128xf32>
    %263 = tpu.matmul %260, %262, %cst_221 {dimension_numbers = #tpu.dot_dimension_numbers<[1], [0], [0], [1], [0, 0, 1, 1], [], []>} : vector<384x128xf32>, vector<128x128xf32>, vector<384x128xf32> -> vector<384x128xf32>
    %264 = arith.addf %259, %263 : vector<384x128xf32>
    %c0_222 = arith.constant 0 : index
    %c0_223 = arith.constant 0 : index
    %265 = vector.load %arg9[%c0_222, %c0_223] : memref<1x128xf32, #tpu.memory_space<vmem>>, vector<1x128xf32>
    %266 = vector.broadcast %265 : vector<1x128xf32> to vector<384x128xf32>
    %267 = arith.addf %264, %266 : vector<384x128xf32>
    %268 = math.tanh %267 : vector<384x128xf32>
    %269 = vector.shape_cast %268 : vector<384x128xf32> to vector<16x24x128xf32>
    %c0_224 = arith.constant 0 : index
    %c0_225 = arith.constant 0 : index
    %c0_226 = arith.constant 0 : index
    %c0_227 = arith.constant 0 : index
    %270 = vector.load %arg11[%c0_224, %c0_225, %c0_226, %c0_227] : memref<1x16x24x128xf32, #tpu.memory_space<vmem>>, vector<1x16x24x128xf32>
    %271 = vector.shape_cast %270 : vector<1x16x24x128xf32> to vector<16x24x128xf32>
    %272 = vector.shape_cast %269 : vector<16x24x128xf32> to vector<1x16x24x128xf32>
    tpu.vector_store %arg11[%c0_224, %c0_225, %c0_226, %c0_227], %272 {strides = array<i32>} : memref<1x16x24x128xf32, #tpu.memory_space<vmem>>, vector<1x16x24x128xf32>,
    return
  }
  func.func @transform_0(%arg0: i32) -> (i32, i32, i32) {
    %c0_i32 = arith.constant 0 : i32
    %c0_i32_0 = arith.constant 0 : i32
    %c0_i32_1 = arith.constant 0 : i32
    return %arg0, %c0_i32, %c0_i32_0 : i32, i32, i32
  }
  func.func @transform_1(%arg0: i32) -> (i32, i32) {
    %c0_i32 = arith.constant 0 : i32
    %c0_i32_0 = arith.constant 0 : i32
    %c0_i32_1 = arith.constant 0 : i32
    return %c0_i32, %c0_i32_0 : i32, i32
  }
  func.func @transform_2(%arg0: i32) -> (i32, i32) {
    %c0_i32 = arith.constant 0 : i32
    %c0_i32_0 = arith.constant 0 : i32
    %c0_i32_1 = arith.constant 0 : i32
    return %c0_i32, %c0_i32_0 : i32, i32
  }
  func.func @transform_3(%arg0: i32) -> (i32, i32, i32) {
    %c0_i32 = arith.constant 0 : i32
    %c0_i32_0 = arith.constant 0 : i32
    %c0_i32_1 = arith.constant 0 : i32
    %c0_i32_2 = arith.constant 0 : i32
    return %c0_i32, %c0_i32_0, %c0_i32_1 : i32, i32, i32
  }
  func.func @transform_4(%arg0: i32) -> (i32, i32) {
    %c0_i32 = arith.constant 0 : i32
    %c0_i32_0 = arith.constant 0 : i32
    %c0_i32_1 = arith.constant 0 : i32
    return %c0_i32, %c0_i32_0 : i32, i32
  }
  func.func @transform_5(%arg0: i32) -> (i32, i32, i32) {
    %c0_i32 = arith.constant 0 : i32
    %c0_i32_0 = arith.constant 0 : i32
    %c0_i32_1 = arith.constant 0 : i32
    %c0_i32_2 = arith.constant 0 : i32
    return %c0_i32, %c0_i32_0, %c0_i32_1 : i32, i32, i32
  }
  func.func @transform_6(%arg0: i32) -> (i32, i32) {
    %c0_i32 = arith.constant 0 : i32
    %c0_i32_0 = arith.constant 0 : i32
    %c0_i32_1 = arith.constant 0 : i32
    return %c0_i32, %c0_i32_0 : i32, i32
  }
  func.func @transform_7(%arg0: i32) -> (i32, i32, i32) {
    %c0_i32 = arith.constant 0 : i32
    %c0_i32_0 = arith.constant 0 : i32
    %c0_i32_1 = arith.constant 0 : i32
    %c0_i32_2 = arith.constant 0 : i32
    return %c0_i32, %c0_i32_0, %c0_i32_1 : i32, i32, i32
  }
  func.func @transform_8(%arg0: i32) -> (i32, i32) {
    %c0_i32 = arith.constant 0 : i32
    %c0_i32_0 = arith.constant 0 : i32
    %c0_i32_1 = arith.constant 0 : i32
    return %c0_i32, %c0_i32_0 : i32, i32
  }
  func.func @transform_9(%arg0: i32) -> (i32, i32) {
    %c0_i32 = arith.constant 0 : i32
    %c0_i32_0 = arith.constant 0 : i32
    %c0_i32_1 = arith.constant 0 : i32
    return %c0_i32, %c0_i32_0 : i32, i32
  }
  func.func @transform_10(%arg0: i32) -> (i32, i32, i32, i32) {
    %c0_i32 = arith.constant 0 : i32
    %c0_i32_0 = arith.constant 0 : i32
    %c0_i32_1 = arith.constant 0 : i32
    %c0_i32_2 = arith.constant 0 : i32
    return %arg0, %c0_i32, %c0_i32_0, %c0_i32_1 : i32, i32, i32, i32
  }
}

</mosaic_0001>

<bundles_post_ra>
// kernel: generator_forward.1
= control target key start
LH: loop header
LB: loop body
LE: loop exit
PB: predicated region body
PF: predicated region fallthrough
CT: control target
= control target key end

     0   :  { %15 = vsyncpa [#allocation5], 0  ;;  %s13926_s0 = inlined_call_operand.vmem [shape: f32[2,1,14], index: 0, kind: input, shape index: {}]   ;;  %s13927_s1 = inlined_call_operand.hbm [shape: f32[14,2048], index: 1, kind: input, shape index: {}]   ;;  %s13928_s2 = inlined_call_operand.hbm [shape: f32[1,2048], index: 2, kind: input, shape index: {}]   ;;  %s13929_s3 = inlined_call_operand.hbm [shape: f32[9,128,128], index: 3, kind: input, shape index: {}]   ;;  %s13930_s4 = inlined_call_operand.vmem [shape: f32[1,128], index: 4, kind: input, shape index: {}]   ;;  %s13931_s5 = inlined_call_operand.hbm [shape: f32[9,128,128], index: 5, kind: input, shape index: {}]   ;;  %s13932_s6 = inlined_call_operand.vmem [shape: f32[1,128], index: 6, kind: input, shape index: {}]   ;;  %s13933_s7 = inlined_call_operand.hbm [shape: f32[9,128,128], index: 7, kind: input, shape index: {}]   ;;  %s13934_s8 = inlined_call_operand.vmem [shape: f32[1,128], index: 8, kind: input, shape index: {}]   ;;  %s13935_s9 = inlined_call_operand.hbm [shape: f32[432,128], index: 9, kind: input, shape index: {}]   ;;  %s13936_s10 = inlined_call_operand.vmem [shape: f32[2,16,24,128], index: 10, kind: output, shape index: {}]  }
   0x1   :  { %16 = vsyncpa [#allocation7], 0 }
   0x2   :  { %17 = vsyncpa [#allocation10], 0 }
   0x3   :  { %18 = vsyncpa [#allocation13], 0  ;;  %s8934_s13 = smov 0  }
   0x4 LB: > { %s296_s16 = sshll.u32 %s13928_s2, 4  ;;  %s8943_s17 = sadd.s32 4294967295, %s8867_s13   ;;  %s8867_s13 = sphi %s8934_s13, %s24_s13   ;;  %s297_s16 = int_to_ptr.hbm [resolvable:$true] %s296_s16 }
   0x5   : > { %p8296_p0 = scmp.ge.s32.totalorder %s8867_s13, 1  ;;  %p270_p1 = scmp.lt.s32.totalorder %s8867_s13, 3 }
   0x6   : > { %p8530_p2 = scmp.eq.s32.totalorder %s8943_s17, 0  ;;  %s8869_s19 = smov [#allocation6]  }
   0x7   : > { %p8948_p3 = pnand %p8296_p0, %p270_p1  ;;  %s298_s20 = sshll.u32 %s8869_s19, 4  ;;  %s299_s20 = int_to_ptr.vmem [resolvable:$true] %s298_s20 }
   0x8   : > { %s324_s23 = sshll.u32 %s13931_s5, 4  ;;  %s8870_s25 = smov [#allocation9]   ;;  %s325_s23 = int_to_ptr.hbm [resolvable:$true] %s324_s23 }
   0x9   : > { %p8511_p4 = pneg %p8948_p3  ;;  %s326_s26 = sshll.u32 %s8870_s25, 4  ;;  %s327_s26 = int_to_ptr.vmem [resolvable:$true] %s326_s26 }
   0xa   : > { %s281_s29 = sshll.u32 %s13927_s1, 4  ;;  %s8871_s30 = smov 128   ;;  %s282_s29 = int_to_ptr.hbm [resolvable:$true] %s281_s29 }
   0xb   : > { %p8959_p5 = pnand %p8530_p2, %p8511_p4  ;;  %s8872_s11 = smov 8  }
   0xc   : > { %s8873_s12 = smov [#allocation4]   ;;  %s307_s21 = sshll.u32 %s13929_s3, 4  ;;  %s308_s21 = int_to_ptr.hbm [resolvable:$true] %s307_s21 }
   0xd   : > { %8517 = dma.hbm_to_vmem [thread:$0]  (!%p8959_p5), %s297_s16, 256, %s299_s20, [#allocation7]  }
   0xe   : > { %8523 = dma.hbm_to_vmem [thread:$0]  (!%p8959_p5), %s325_s23, 18432, %s327_s26, [#allocation10], %s8871_s30, %s8871_s30, %s8872_s11  }
   0xf   : > { %s283_s14 = sshll.u32 %s8873_s12, 4  ;;  %s8874_s22 = smov 2048   ;;  %s284_s14 = int_to_ptr.vmem [resolvable:$true] %s283_s14 }
  0x10   : > { %8514 = dma.hbm_to_vmem [thread:$0]  (!%p8959_p5), %s282_s29, 4096, %s284_s14, [#allocation5], %s8874_s22, %s8874_s22, %s8871_s30  }
  0x11   : > { %s8875_s16 = smov [#allocation8]   ;;  %s341_s23 = sshll.u32 %s13933_s7, 4  ;;  %s342_s23 = int_to_ptr.hbm [resolvable:$true] %s341_s23 }
  0x12   : > { %s309_s20 = sshll.u32 %s8875_s16, 4  ;;  %s358_s12 = sshll.u32 %s13935_s9, 4  ;;  %s310_s20 = int_to_ptr.vmem [resolvable:$true] %s309_s20  ;;  %s359_s12 = int_to_ptr.hbm [resolvable:$true] %s358_s12 }
  0x13   : > { %8520 = dma.hbm_to_vmem [thread:$0]  (!%p8959_p5), %s308_s21, 18432, %s310_s20, [#allocation7], %s8871_s30, %s8871_s30, %s8872_s11  }
  0x14   : > { %s8876_s15 = smov [#allocation11]   ;;  %s8877_s29 = smov [#allocation12]  }
  0x15   : > { %s343_s19 = sshll.u32 %s8876_s15, 4  ;;  %s360_s14 = sshll.u32 %s8877_s29, 4  ;;  %s344_s19 = int_to_ptr.vmem [resolvable:$true] %s343_s19  ;;  %s361_s14 = int_to_ptr.vmem [resolvable:$true] %s360_s14 }
  0x16   : > { %8526 = dma.hbm_to_vmem [thread:$0]  (!%p8959_p5), %s342_s23, 18432, %s344_s19, [#allocation10], %s8871_s30, %s8871_s30, %s8872_s11  }
  0x17   : > { %8529 = dma.hbm_to_vmem [thread:$0]  (!%p8959_p5), %s359_s12, 6912, %s361_s14, [#allocation13], %s8871_s30, %s8871_s30, %s8872_s11  }
  0x18   : > { %382 = sbr.rel (%p8948_p3) target bundleno = 3617 (0xe21), region = 60 }
  0x1d   : > { %8850 = dma.done.wait (%p8530_p2), [#allocation5], 4096  }
  0x1e   : > { %8852 = vsyncadd (%p8530_p2), [#allocation5], 4294963200 }
  0x1f   : > { %8854 = dma.done.wait (%p8530_p2), [#allocation7], 18688  }
  0x20   : > { %8856 = vsyncadd (%p8530_p2), [#allocation7], 4294948608 }
  0x21   : > { %8858 = dma.done.wait (%p8530_p2), [#allocation10], 36864  }
  0x22   : > { %8860 = vsyncadd (%p8530_p2), [#allocation10], 4294930432 }
  0x23   : > { %8862 = dma.done.wait (%p8530_p2), [#allocation13], 6912  }
  0x24   : > { %8864 = vsyncadd (%p8530_p2), [#allocation13], 4294960384  ;;  %p444_p6 = scmp.lt.s32.totalorder %s8943_s17, 1  ;;  %vm525_vm0 = vcmask 1045504   ;;  %v471_v0 = vld [vmem:[#allocation4 + $0x90] sm:$0x3f] }
  0x25   : > { %v472_v1 = vld [vmem:[#allocation4 + $0x98] sm:$0x3f]  ;;  %v455_v2 = vld [vmem:[#allocation4 + $0x10] sm:$0xff]  ;;  %8316 = vmatpush.msk.msra.mxu2 %vm525_vm0, %v471_v0  ;;  %vm521_vm1 = vcmask 113664   ;;  %v469_v5 = vld [vmem:[#allocation4 + $0x80] sm:$0x3f] }
  0x26   : > { %s15686_s17 = smov (!%p444_p6, %s8943_s17), 1  ;;  %8318 = vmatpush.msk.msra.mxu3 %vm525_vm0, %v472_v1  ;;  %v456_v3 = vld [vmem:[#allocation4 + $0x18] sm:$0xff]  ;;  %8312 = vmatpush.msk.msra.mxu0 %vm525_vm0, %v469_v5  ;;  %v470_v6 = vld [vmem:[#allocation4 + $0x88] sm:$0x3f]  ;;  %v453_v7 = vld [vmem:[#allocation4] sm:$0xff]  ;;  %v13938_v39 = vmov 0.0  }
  0x27   : > { %s446_s30 = scalar_lea.vmem %s13926_s0, %s15686_s17  ;;  %629 = vmatpush.msra.mxu2 %v455_v2  ;;  %v475_v8 = vld [vmem:[#allocation4 + $0xb0] sm:$0x3f]  ;;  %v476_v9 = vld [vmem:[#allocation4 + $0xb8] sm:$0x3f]  ;;  %v454_v10 = vld [vmem:[#allocation4 + $0x8] sm:$0xff]  ;;  %8314 = vmatpush.msk.msra.mxu1 %vm525_vm0, %v470_v6  ;;  %894 = vst [vmem:[#allocation2] sm:$0xff] %v13938_v39 }
  0x28   : > { %v9015_v4 = vld [vmem:[%s446_s30] sm:$0x1]  ;;  %649 = vmatpush.msra.mxu3 %v456_v3  ;;  %589 = vmatpush.msra.mxu0 %v453_v7  ;;  %v459_v11 = vld [vmem:[#allocation4 + $0x30] sm:$0xff]  ;;  %v460_v12 = vld [vmem:[#allocation4 + $0x38] sm:$0xff]  ;;  %896 = vst [vmem:[#allocation2 + $0x10] sm:$0xff] %v13938_v39  ;;  %s8486_s12 = smul.u32 384, %s15686_s17 }
  0x29   : > { %8317 = vmatmul.msk.f32.vlgmr.msra.gmra.mxu2 %vm521_vm1, %v9015_v4  ;;  %8319 = vmatmul.msk.f32.vlgmr.msra.gmra.mxu3 %vm521_vm1, %v9015_v4  ;;  %v473_v13 = vld [vmem:[#allocation4 + $0xa0] sm:$0x3f]  ;;  %v474_v14 = vld [vmem:[#allocation4 + $0xa8] sm:$0x3f]  ;;  %v480_v15 = vld [vmem:[#allocation4 + $0xd8] sm:$0x3f] }
  0x2a   : > { %8324 = vmatpush.msk.msrb.mxu2 %vm525_vm0, %v475_v8  ;;  %8326 = vmatpush.msk.msrb.mxu3 %vm525_vm0, %v476_v9  ;;  %v457_v16 = vld [vmem:[#allocation4 + $0x20] sm:$0xff]  ;;  %v479_v17 = vld [vmem:[#allocation4 + $0xd0] sm:$0x3f]  ;;  %v458_v18 = vld [vmem:[#allocation4 + $0x28] sm:$0xff]  ;;  %897 = vst [vmem:[#allocation2 + $0x18] sm:$0xff] %v13938_v39  ;;  %s13597_s29 = scalar_lea.vmem %s13936_s10, %s8486_s12 }
  0x2b   : > { %609 = vmatpush.msra.mxu1 %v454_v10  ;;  %8313 = vmatmul.msk.f32.vlgmr.msra.gmra.mxu0 %vm521_vm1, %v9015_v4  ;;  %v464_v19 = vld [vmem:[#allocation4 + $0x58] sm:$0xff]  ;;  %v463_v21 = vld [vmem:[#allocation4 + $0x50] sm:$0xff]  ;;  %v478_v22 = vld [vmem:[#allocation4 + $0xc8] sm:$0x3f]  ;;  %898 = vst [vmem:[#allocation2 + $0x20] sm:$0xff] %v13938_v39 }
  0x2c   : > { %8315 = vmatmul.msk.f32.vlgmr.msra.gmra.mxu1 %vm521_vm1, %v9015_v4  ;;  %709 = vmatpush.msrb.mxu2 %v459_v11  ;;  %v484_v20 = vld [vmem:[#allocation4 + $0xf8] sm:$0x3f]  ;;  %v477_v24 = vld [vmem:[#allocation4 + $0xc0] sm:$0x3f]  ;;  %v462_v25 = vld [vmem:[#allocation4 + $0x48] sm:$0xff]  ;;  %899 = vst [vmem:[#allocation2 + $0x28] sm:$0xff] %v13938_v39 }
  0x2d   : > { %729 = vmatpush.msrb.mxu3 %v460_v12  ;;  %8320 = vmatpush.msk.msrb.mxu0 %vm525_vm0, %v473_v13  ;;  %v468_v23 = vld [vmem:[#allocation4 + $0x78] sm:$0xff]  ;;  %v483_v26 = vld [vmem:[#allocation4 + $0xf0] sm:$0x3f]  ;;  %v482_v27 = vld [vmem:[#allocation4 + $0xe8] sm:$0x3f]  ;;  %900 = vst [vmem:[#allocation2 + $0x30] sm:$0xff] %v13938_v39 }
  0x2e   : > { %8322 = vmatpush.msk.msrb.mxu1 %vm525_vm0, %v474_v14  ;;  %8332 = vmatpush.msk.msra.mxu2 %vm525_vm0, %v479_v17  ;;  %v461_v28 = vld [vmem:[#allocation4 + $0x40] sm:$0xff]  ;;  %v467_v29 = vld [vmem:[#allocation4 + $0x70] sm:$0xff]  ;;  %v466_v31 = vld [vmem:[#allocation4 + $0x68] sm:$0xff]  ;;  %901 = vst [vmem:[#allocation2 + $0x38] sm:$0xff] %v13938_v39 }
  0x2f   : > { %8334 = vmatpush.msk.msra.mxu3 %vm525_vm0, %v480_v15  ;;  %669 = vmatpush.msrb.mxu0 %v457_v16  ;;  %v481_v30 = vld [vmem:[#allocation4 + $0xe0] sm:$0x3f]  ;;  %v1375_v32 = vld [vmem:[#allocation8 + $0x1f8] sm:$0xff]  ;;  %v1047_v40 = vld [vmem:[#allocation8 + $0xe8] sm:$0xff]  ;;  %902 = vst [vmem:[#allocation2 + $0x40] sm:$0xff] %v13938_v39 }
  0x30   : > { %689 = vmatpush.msrb.mxu1 %v458_v18  ;;  %789 = vmatpush.msra.mxu2 %v463_v21  ;;  %v465_v33 = vld [vmem:[#allocation4 + $0x60] sm:$0xff]  ;;  %v9051_v34 = vld [vmem:[#allocation8 + $0x178] sm:$0xff]  ;;  %v9062_v41 = vld [vmem:[#allocation8 + $0x168] sm:$0xff]  ;;  %903 = vst [vmem:[#allocation2 + $0x48] sm:$0xff] %v13938_v39 }
  0x31   : > { %8325 = vmatmul.msk.f32.vlgmr.msrb.gmra.mxu2 %vm521_vm1, %v9015_v4  ;;  %8327 = vmatmul.msk.f32.vlgmr.msrb.gmra.mxu3 %vm521_vm1, %v9015_v4  ;;  %v1049_v35 = vld [vmem:[#allocation8 + $0xf8] sm:$0xff]  ;;  %v1374_v36 = vld [vmem:[#allocation8 + $0x1f0] sm:$0xff]  ;;  %v9067_v42 = vld [vmem:[#allocation8 + $0x1e8] sm:$0xff]  ;;  %904 = vst [vmem:[#allocation2 + $0x50] sm:$0xff] %v13938_v39 }
  0x32   : > { %809 = vmatpush.msra.mxu3 %v464_v19  ;;  %8330 = vmatpush.msk.msra.mxu1 %vm525_vm0, %v478_v22  ;;  %v1048_v37 = vld [vmem:[#allocation8 + $0xf0] sm:$0xff]  ;;  %v9073_v43 = vld [vmem:[#allocation8 + $0x160] sm:$0xff]  ;;  %v9078_v45 = vld [vmem:[#allocation8 + $0x158] sm:$0xff]  ;;  %905 = vst [vmem:[#allocation2 + $0x58] sm:$0xff] %v13938_v39 }
  0x33   : > { %8321 = vmatmul.msk.f32.vlgmr.msrb.gmra.mxu0 %vm521_vm1, %v9015_v4  ;;  %8340 = vmatpush.msk.msrb.mxu2 %vm525_vm0, %v483_v26  ;;  %v9058_v38 = vld [vmem:[#allocation8 + $0x170] sm:$0xff]  ;;  %v1046_v44 = vld [vmem:[#allocation8 + $0xe0] sm:$0xff]  ;;  %v1045_v46 = vld [vmem:[#allocation8 + $0xd8] sm:$0xff]  ;;  %906 = vst [vmem:[#allocation2 + $0x60] sm:$0xff] %v13938_v39 }
  0x34   : > { %8342 = vmatpush.msk.msrb.mxu3 %vm525_vm0, %v484_v20  ;;  %8323 = vmatmul.msk.f32.vlgmr.msrb.gmra.mxu1 %vm521_vm1, %v9015_v4  ;;  %v9087_v47 = vld [vmem:[#allocation8 + $0x1e0] sm:$0xff]  ;;  %v9091_v48 = vld [vmem:[#allocation8 + $0x150] sm:$0xff]  ;;  %v9097_v50 = vld [vmem:[#allocation8 + $0x148] sm:$0xff]  ;;  %907 = vst [vmem:[#allocation2 + $0x68] sm:$0xff] %v13938_v39 }
  0x35   : > { %8328 = vmatpush.msk.msra.mxu0 %vm525_vm0, %v477_v24  ;;  %769 = vmatpush.msra.mxu1 %v462_v25  ;;  %v1044_v49 = vld [vmem:[#allocation8 + $0xd0] sm:$0xff]  ;;  %v1043_v51 = vld [vmem:[#allocation8 + $0xc8] sm:$0xff]  ;;  %v9104_v52 = vld [vmem:[#allocation8 + $0x140] sm:$0xff]  ;;  %908 = vst [vmem:[#allocation2 + $0x70] sm:$0xff] %v13938_v39 }
  0x36   : > { %889 = vmatpush.msrb.mxu3 %v468_v23  ;;  %869 = vmatpush.msrb.mxu2 %v467_v29  ;;  %v1042_v53 = vld [vmem:[#allocation8 + $0xc0] sm:$0xff]  ;;  %v9110_v54 = vld [vmem:[#allocation8 + $0x138] sm:$0xff]  ;;  %v9116_v56 = vld [vmem:[#allocation8 + $0x130] sm:$0xff]  ;;  %909 = vst [vmem:[#allocation2 + $0x78] sm:$0xff] %v13938_v39 }
  0x37   : > { %8338 = vmatpush.msk.msrb.mxu1 %vm525_vm0, %v482_v27  ;;  %749 = vmatpush.msra.mxu0 %v461_v28  ;;  %v1041_v55 = vld [vmem:[#allocation8 + $0xb8] sm:$0xff]  ;;  %v1040_v57 = vld [vmem:[#allocation8 + $0xb0] sm:$0xff]  ;;  %910 = vst [vmem:[#allocation2 + $0x80] sm:$0xff] %v13938_v39  ;;  %v9122_v58 = vld [vmem:[#allocation8 + $0x128] sm:$0xff] }
  0x38   : > { %911 = vst [vmem:[#allocation2 + $0x88] sm:$0xff] %v13938_v39  ;;  %v1039_v59 = vld [vmem:[#allocation8 + $0xa8] sm:$0xff]  ;;  %v9127_v60 = vld [vmem:[#allocation8 + $0x120] sm:$0xff]  ;;  %v9131_v62 = vld [vmem:[#allocation8 + $0x118] sm:$0xff] }
  0x39   : > { %8335 = vmatmul.msk.f32.vlgmr.msra.gmra.mxu3 %vm521_vm1, %v9015_v4  ;;  %8333 = vmatmul.msk.f32.vlgmr.msra.gmra.mxu2 %vm521_vm1, %v9015_v4  ;;  %v1038_v61 = vld [vmem:[#allocation8 + $0xa0] sm:$0xff]  ;;  %v1037_v63 = vld [vmem:[#allocation8 + $0x98] sm:$0xff]  ;;  %v9135_v0 = vld [vmem:[#allocation8 + $0x110] sm:$0xff] }
  0x3a   : > { %8336 = vmatpush.msk.msrb.mxu0 %vm525_vm0, %v481_v30  ;;  %849 = vmatpush.msrb.mxu1 %v466_v31  ;;  %v1036_v1 = vld [vmem:[#allocation8 + $0x90] sm:$0xff]  ;;  %v9139_v2 = vld [vmem:[#allocation8 + $0x108] sm:$0xff]  ;;  %v9148_v5 = vld [vmem:[#allocation8 + $0x100] sm:$0xff] }
  0x3b   : > { %8439 = vmatpush.msra.mxu2 %v9051_v34  ;;  %8329 = vmatmul.msk.f32.vlgmr.msra.gmra.mxu0 %vm521_vm1, %v9015_v4  ;;  %v1035_v3 = vld [vmem:[#allocation8 + $0x88] sm:$0xff]  ;;  %v9151_v6 = vld [vmem:[#allocation8 + $0x1d8] sm:$0xff]  ;;  %v9155_v8 = vld [vmem:[#allocation8 + $0x1d0] sm:$0xff] }
  0x3c   : > { %8470 = vmatpush.msra.mxu3 %v1375_v32  ;;  %8331 = vmatmul.msk.f32.vlgmr.msra.gmra.mxu1 %vm521_vm1, %v9015_v4  ;;  %v1603_v7 = vld [vmem:[#allocation8 + $0x2f8] sm:$0xff]  ;;  %v1602_v9 = vld [vmem:[#allocation8 + $0x2f0] sm:$0xff]  ;;  %v9158_v10 = vld [vmem:[#allocation8 + $0x1c8] sm:$0xff] }
  0x3d   : > { %829 = vmatpush.msrb.mxu0 %v465_v33  ;;  %8438 = vmatpush.msra.mxu1 %v9051_v34  ;;  %v1601_v11 = vld [vmem:[#allocation8 + $0x2e8] sm:$0xff]  ;;  %v9161_v12 = vld [vmem:[#allocation8 + $0x1c0] sm:$0xff]  ;;  %v9164_v14 = vld [vmem:[#allocation8 + $0x1b8] sm:$0xff] }
  0x3e   : > { %8441 = vmatpush.msra.mxu2 %v9058_v38  ;;  %8471 = vmatpush.msra.mxu3 %v1374_v36  ;;  %v1600_v13 = vld [vmem:[#allocation8 + $0x2e0] sm:$0xff]  ;;  %v1599_v15 = vld [vmem:[#allocation8 + $0x2d8] sm:$0xff]  ;;  %v9167_v16 = vld [vmem:[#allocation8 + $0x1b0] sm:$0xff] }
  0x3f   : > { %1050 = vmatpush.msra.mxu0 %v1049_v35  ;;  %8440 = vmatpush.msra.mxu1 %v9058_v38  ;;  %v1598_v17 = vld [vmem:[#allocation8 + $0x2d0] sm:$0xff]  ;;  %v9170_v18 = vld [vmem:[#allocation8 + $0x1a8] sm:$0xff]  ;;  %v9173_v20 = vld [vmem:[#allocation8 + $0x1a0] sm:$0xff] }
  0x40   : > { %8443 = vmatpush.msra.mxu2 %v9062_v41  ;;  %8472 = vmatpush.msra.mxu3 %v9067_v42  ;;  %v1597_v19 = vld [vmem:[#allocation8 + $0x2c8] sm:$0xff]  ;;  %14347 = vst [vmem:[#allocation18_spill] sm:$0xff] %v9173_v20  ;;  %v1596_v21 = vld [vmem:[#allocation8 + $0x2c0] sm:$0xff]  ;;  %v9176_v22 = vld [vmem:[#allocation8 + $0x198] sm:$0xff] }
  0x41   : > { %1051 = vmatpush.msra.mxu0 %v1048_v37  ;;  %8343 = vmatmul.msk.f32.vlgmr.msrb.gmra.mxu3 %vm521_vm1, %v9015_v4  ;;  %14348 = vst [vmem:[#allocation19_spill] sm:$0xff] %v9176_v22  ;;  %v1595_v23 = vld [vmem:[#allocation8 + $0x2b8] sm:$0xff]  ;;  %v9179_v24 = vld [vmem:[#allocation8 + $0x190] sm:$0xff]  ;;  %v9182_v27 = vld [vmem:[#allocation8 + $0x188] sm:$0xff] }
  0x42   : > { %8341 = vmatmul.msk.f32.vlgmr.msrb.gmra.mxu2 %vm521_vm1, %v9015_v4  ;;  %8442 = vmatpush.msra.mxu1 %v9062_v41  ;;  %14349 = vst [vmem:[#allocation20_spill] sm:$0xff] %v9179_v24  ;;  %v1594_v25 = vld [vmem:[#allocation8 + $0x2b0] sm:$0xff]  ;;  %v1593_v28 = vld [vmem:[#allocation8 + $0x2a8] sm:$0xff]  ;;  %v9184_v29 = vld [vmem:[#allocation8 + $0x180] sm:$0xff] }
  0x43   : > { %1052 = vmatpush.msra.mxu0 %v1047_v40  ;;  %8445 = vmatpush.msra.mxu2 %v9073_v43  ;;  %v485_v26 = vld [vmem:[#allocation6] sm:$0xff]  ;;  %14350 = vst [vmem:[#allocation21_spill] sm:$0xff] %v9182_v27  ;;  %v1592_v30 = vld [vmem:[#allocation8 + $0x2a0] sm:$0xff]  ;;  %v1591_v37 = vld [vmem:[#allocation8 + $0x298] sm:$0xff] }
  0x44   : > { %8337 = vmatmul.msk.f32.vlgmr.msrb.gmra.mxu0 %vm521_vm1, %v9015_v4  ;;  %8444 = vmatpush.msra.mxu1 %v9073_v43  ;;  %14351 = vst [vmem:[#allocation22_spill] sm:$0xff] %v9184_v29  ;;  %v489_v31 = vperm.slane %v485_v26, 0  ;;  %v490_v32 = vperm.slane %v485_v26, 1  ;;  %v491_v35 = vperm.slane %v485_v26, 2  ;;  %v492_v36 = vperm.slane %v485_v26, 3 }
  0x45   : > { %8339 = vmatmul.msk.f32.vlgmr.msrb.gmra.mxu1 %vm521_vm1, %v9015_v4  ;;  %1053 = vmatpush.msra.mxu0 %v1046_v44  ;;  %v1034_v4 = vld [vmem:[#allocation8 + $0x80] sm:$0xff] }
  0x46   : > { %8446 = vmatpush.msra.mxu1 %v9078_v45  ;;  %8473 = vmatpush.msra.mxu3 %v9087_v47 }
  0x47   : > { %1054 = vmatpush.msra.mxu0 %v1045_v46  ;;  %8447 = vmatpush.msra.mxu2 %v9078_v45  ;;  %v1590_v46 = vld [vmem:[#allocation8 + $0x290] sm:$0xff] }
  0x48   : > { %8448 = vmatpush.msra.mxu1 %v9091_v48  ;;  %8474 = vmatpush.msra.mxu3 %v9151_v6 }
  0x49   : > { %1055 = vmatpush.msra.mxu0 %v1044_v49  ;;  %8449 = vmatpush.msra.mxu2 %v9091_v48 }
  0x4a   : > { %8450 = vmatpush.msra.mxu1 %v9097_v50  ;;  %8475 = vmatpush.msra.mxu3 %v9155_v8 }
  0x4b   : > { %1056 = vmatpush.msra.mxu0 %v1043_v51  ;;  %8451 = vmatpush.msra.mxu2 %v9097_v50 }
  0x4c   : > { %8452 = vmatpush.msra.mxu1 %v9104_v52  ;;  %8476 = vmatpush.msra.mxu3 %v9158_v10 }
  0x4d   : > { %1057 = vmatpush.msra.mxu0 %v1042_v53  ;;  %8453 = vmatpush.msra.mxu2 %v9104_v52 }
  0x4e   : > { %8454 = vmatpush.msra.mxu1 %v9110_v54  ;;  %8477 = vmatpush.msra.mxu3 %v9161_v12 }
  0x4f   : > { %1058 = vmatpush.msra.mxu0 %v1041_v55  ;;  %8455 = vmatpush.msra.mxu2 %v9110_v54 }
  0x50   : > { %8456 = vmatpush.msra.mxu1 %v9116_v56  ;;  %8478 = vmatpush.msra.mxu3 %v9164_v14 }
  0x51   : > { %1059 = vmatpush.msra.mxu0 %v1040_v57  ;;  %8457 = vmatpush.msra.mxu2 %v9116_v56  ;;  %v1589_v57 = vld [vmem:[#allocation8 + $0x288] sm:$0xff] }
  0x52   : > { %8458 = vmatpush.msra.mxu1 %v9122_v58  ;;  %8479 = vmatpush.msra.mxu3 %v9167_v16 }
  0x53   : > { %1060 = vmatpush.msra.mxu0 %v1039_v59  ;;  %8459 = vmatpush.msra.mxu2 %v9122_v58 }
  0x54   : > { %8460 = vmatpush.msra.mxu1 %v9127_v60  ;;  %8480 = vmatpush.msra.mxu3 %v9170_v18 }
  0x55   : > { %1061 = vmatpush.msra.mxu0 %v1038_v61  ;;  %8461 = vmatpush.msra.mxu2 %v9127_v60 }
  0x56   : > { %8462 = vmatpush.msra.mxu1 %v9131_v62  ;;  %8481 = vmatpush.msra.mxu3 %v9173_v20 }
  0x57   : > { %1062 = vmatpush.msra.mxu0 %v1037_v63  ;;  %8463 = vmatpush.msra.mxu2 %v9131_v62 }
  0x58   : > { %8464 = vmatpush.msra.mxu1 %v9135_v0  ;;  %8482 = vmatpush.msra.mxu3 %v9176_v22  ;;  %v1739_v22 = vld [vmem:[#allocation8 + $0x320] sm:$0xff] }
  0x59   : > { %1063 = vmatpush.msra.mxu0 %v1036_v1  ;;  %8465 = vmatpush.msra.mxu2 %v9135_v0  ;;  %v1588_v1 = vld [vmem:[#allocation8 + $0x280] sm:$0xff] }
  0x5a   : > { %8466 = vmatpush.msra.mxu1 %v9139_v2  ;;  %8483 = vmatpush.msra.mxu3 %v9179_v24  ;;  %v1030_v24 = vld [vmem:[#allocation8 + $0x68] sm:$0xff] }
  0x5b   : > { %1064 = vmatpush.msra.mxu0 %v1035_v3  ;;  %8467 = vmatpush.msra.mxu2 %v9139_v2  ;;  %v493_v3 = vperm.slane %v485_v26, 4 }
  0x5c   : > { %8468 = vmatpush.msra.mxu1 %v9148_v5  ;;  %8484 = vmatpush.msra.mxu3 %v9182_v27  ;;  %v1741_v27 = vld [vmem:[#allocation8 + $0x330] sm:$0xff] }
  0x5d   : > { %1065 = vmatpush.msra.mxu0 %v1034_v4  ;;  %8469 = vmatpush.msra.mxu2 %v9148_v5 }
  0x5e   : > { %1066 = vmatmul.f32.vlgmr.msra.gmra.mxu0 %v13938_v39  ;;  %1604 = vmatpush.msrb.mxu1 %v1603_v7  ;;  %v494_v7 = vperm.slane %v485_v26, 5 }
  0x5f   : > { %8485 = vmatpush.msra.mxu3 %v9184_v29  ;;  %v1841_v29 = vld [vmem:[#allocation8 + $0x3c0] sm:$0xff] }
  0x60   : > { %1605 = vmatpush.msrb.mxu1 %v1602_v9 }
  0x62   : > { %1606 = vmatpush.msrb.mxu1 %v1601_v11 }
  0x64   : > { %1607 = vmatpush.msrb.mxu1 %v1600_v13  ;;  %v495_v13 = vperm.slane %v485_v26, 6 }
  0x66   : > { %1069 = vmatmul.f32.gmra.mxu0 %v13938_v39  ;;  %1608 = vmatpush.msrb.mxu1 %v1599_v15  ;;  %v496_v15 = vperm.slane %v485_v26, 7 }
  0x68   : > { %1609 = vmatpush.msrb.mxu1 %v1598_v17 }
  0x6a   : > { %1610 = vmatpush.msrb.mxu1 %v1597_v19 }
  0x6c   : > { %1611 = vmatpush.msrb.mxu1 %v1596_v21 }
  0x6e   : > { %1612 = vmatpush.msrb.mxu1 %v1595_v23  ;;  %v9188_v23 = vld [vmem:[#allocation6 + $0x8] sm:$0xff] }
  0x70   : > { %1613 = vmatpush.msrb.mxu1 %v1594_v25 }
  0x72   : > { %1614 = vmatpush.msrb.mxu1 %v1593_v28 }
  0x74   : > { %1615 = vmatpush.msrb.mxu1 %v1592_v30 }
  0x76   : > { %1616 = vmatpush.msrb.mxu1 %v1591_v37 }
  0x78   : > { %1617 = vmatpush.msrb.mxu1 %v1590_v46  ;;  %v500_v46 = vperm.slane %v9188_v23, 3 }
  0x7a   : > { %1618 = vmatpush.msrb.mxu1 %v1589_v57 }
  0x7c   : > { %1619 = vmatpush.msrb.mxu1 %v1588_v1 }
  0xa8   : > { %v591_v33 = vpop.f32.mrf.mxu0 }
  0xa9   : > { %v592_v40 = vadd.f32 %v591_v33, %v489_v31  ;;  %v611_v44 = vpop.f32.mrf.mxu1  ;;  %v998_v31 = vlaneseq }
  0xaa   : > { %v612_v49 = vadd.f32 %v611_v44, %v490_v32  ;;  %v498_v44 = vperm.slane %v9188_v23, 1 }
  0xab   : > { %v914_v51 = vperm.slane %v592_v40, 0  ;;  %v9191_v40 = vshrl.u32 %v998_v31, 7 }
  0xac   : > { %v631_v53 = vpop.f32.mrf.mxu2  ;;  %v651_v55 = vpop.f32.mrf.mxu3  ;;  %v918_v59 = vperm.slane %v612_v49, 0 }
  0xad   : > { %v632_v61 = vadd.f32 %v631_v53, %v491_v35  ;;  %v652_v63 = vadd.f32 %v651_v55, %v492_v36  ;;  %916 = vst [vmem:[#allocation2 + $0x11] sm:$0x3] %v914_v51  ;;  %v497_v36 = vperm.slane %v9188_v23, 0  ;;  %v499_v55 = vperm.slane %v9188_v23, 2 }
  0xae   : > { %917 = vst [vmem:[#allocation2 + $0x21] sm:$0x3] %v914_v51  ;;  %vm1196_vm2 = vcmp.lt.s32.totalorder %v9191_v40, 7  ;;  %vm1000_vm3 = vcmp.lt.s32.totalorder %v9191_v40, 1 }
  0xaf   : > { %v921_v4 = vperm.slane %v632_v61, 0  ;;  %919 = vst [vmem:[#allocation2 + $0x13] sm:$0x3] %v918_v59  ;;  %v924_v9 = vperm.slane %v652_v63, 0 }
  0xb0   : > { %920 = vst [vmem:[#allocation2 + $0x23] sm:$0x3] %v918_v59  ;;  %v671_v11 = vpop.f32.mrf.mxu0 }
  0xb1   : > { %922 = vst [vmem:[#allocation2 + $0x15] sm:$0x3] %v921_v4  ;;  %v672_v17 = vadd.f32 %v671_v11, %v493_v3  ;;  %v691_v19 = vpop.f32.mrf.mxu1 }
  0xb2   : > { %923 = vst [vmem:[#allocation2 + $0x25] sm:$0x3] %v921_v4  ;;  %v692_v21 = vadd.f32 %v691_v19, %v494_v7 }
  0xb3   : > { %925 = vst [vmem:[#allocation2 + $0x17] sm:$0x3] %v924_v9  ;;  %v927_v25 = vperm.slane %v672_v17, 0 }
  0xb4   : > { %v711_v28 = vpop.f32.mrf.mxu2  ;;  %v731_v30 = vpop.f32.mrf.mxu3  ;;  %926 = vst [vmem:[#allocation2 + $0x27] sm:$0x3] %v924_v9  ;;  %v931_v32 = vperm.slane %v692_v21, 0 }
  0xb5   : > { %v712_v33 = vadd.f32 %v711_v28, %v495_v13  ;;  %v732_v35 = vadd.f32 %v731_v30, %v496_v15  ;;  %929 = vst [vmem:[#allocation2 + $0x31] sm:$0x3] %v927_v25  ;;  %v504_v30 = vperm.slane %v9188_v23, 7 }
  0xb6   : > { %930 = vst [vmem:[#allocation2 + $0x41] sm:$0x3] %v927_v25 }
  0xb7   : > { %v934_v26 = vperm.slane %v712_v33, 0  ;;  %932 = vst [vmem:[#allocation2 + $0x33] sm:$0x3] %v931_v32  ;;  %v937_v37 = vperm.slane %v732_v35, 0 }
  0xb8   : > { %14352 = vst [vmem:[#allocation23_spill] sm:$0xff] %v9191_v40  ;;  %v751_v49 = vpop.f32.mrf.mxu0 }
  0xb9   : > { %933 = vst [vmem:[#allocation2 + $0x43] sm:$0x3] %v931_v32  ;;  %v752_v51 = vadd.f32 %v751_v49, %v497_v36  ;;  %v771_v53 = vpop.f32.mrf.mxu1 }
  0xba   : > { %935 = vst [vmem:[#allocation2 + $0x35] sm:$0x3] %v934_v26  ;;  %v9196_v57 = vld [vmem:[#allocation2 + $0x10] sm:$0xff]  ;;  %v9198_v59 = vld [vmem:[#allocation2 + $0x18] sm:$0xff]  ;;  %v772_v3 = vadd.f32 %v771_v53, %v498_v44 }
  0xbb   : > { %936 = vst [vmem:[#allocation2 + $0x45] sm:$0x3] %v934_v26  ;;  %1072 = vmatmul.f32.gmra.mxu0 %v9196_v57  ;;  %v9201_v63 = vld [vmem:[#allocation2 + $0x20] sm:$0xff]  ;;  %v9203_v1 = vld [vmem:[#allocation2 + $0x28] sm:$0xff]  ;;  %v9211_v13 = vrot.slane %v9196_v57, 1  ;;  %v1183_v15 = vrot.slane %v9198_v59, 1 }
  0xbc   : > { %938 = vst [vmem:[#allocation2 + $0x37] sm:$0x3] %v937_v37  ;;  %v811_v61 = vpop.f32.mrf.mxu3  ;;  %v791_v4 = vpop.f32.mrf.mxu2  ;;  %v9207_v9 = vrot.slane %v9201_v63, 1  ;;  %v1185_v11 = vrot.slane %v9203_v1, 1  ;;  %v940_v17 = vperm.slane %v752_v51, 0  ;;  %v944_v28 = vperm.slane %v772_v3, 0 }
  0xbd   : > { %939 = vst [vmem:[#allocation2 + $0x47] sm:$0x3] %v937_v37  ;;  %v812_v7 = vadd.f32 %v811_v61, %v500_v46  ;;  %v792_v19 = vadd.f32 %v791_v4, %v499_v55  ;;  %v9224_v32 = vsel %vm1196_vm2, %v9211_v13, %v1183_v15  ;;  %v501_v61 = vperm.slane %v9188_v23, 4 }
  0xbe   : > { %14353 = vst [vmem:[#allocation24_spill] sm:$0xff] %v9207_v9  ;;  %v9217_v25 = vsel %vm1196_vm2, %v9207_v9, %v1185_v11  ;;  %v9229_v33 = vsel %vm1196_vm2, %v1183_v15, %v9207_v9 }
  0xbf   : > { %v950_v21 = vperm.slane %v812_v7, 0  ;;  %14354 = vst [vmem:[#allocation25_spill] sm:$0xff] %v9217_v25  ;;  %1258 = vmatmul.f32.vlgmr.msra.gmra.mxu1 %v9217_v25  ;;  %v947_v31 = vperm.slane %v792_v19, 0 }
  0xc0   : > { %942 = vst [vmem:[#allocation2 + $0x51] sm:$0x3] %v940_v17 }
  0xc1   : > { %951 = vst [vmem:[#allocation2 + $0x57] sm:$0x3] %v950_v21  ;;  %v831_v51 = vpop.f32.mrf.mxu0 }
  0xc2   : > { %952 = vst [vmem:[#allocation2 + $0x67] sm:$0x3] %v950_v21  ;;  %v851_v19 = vpop.f32.mrf.mxu1 }
  0xc3   : > { %14355 = vst [vmem:[#allocation26_spill] sm:$0xff] %v9224_v32  ;;  %v9231_v35 = vld [vmem:[#allocation2 + $0x30] sm:$0xff]  ;;  %v9233_v36 = vld [vmem:[#allocation2 + $0x38] sm:$0xff]  ;;  %1075 = vmatmul.f32.gmra.mxu0 %v9198_v59 }
  0xc4   : > { %14356 = vst [vmem:[#allocation27_spill] sm:$0xff] %v9229_v33  ;;  %v891_v26 = vpop.f32.mrf.mxu3  ;;  %v1186_v37 = vrot.slane %v9231_v35, 1  ;;  %v1187_v44 = vrot.slane %v9233_v36, 1  ;;  %v9238_v46 = vld [vmem:[#allocation2 + $0x40] sm:$0xff]  ;;  %v13937_v49 = vrot.slane %v9233_v36, 7  ;;  %v9252_v7 = vld [vmem:[#allocation2 + $0x48] sm:$0xff] }
  0xc5   : > { %943 = vst [vmem:[#allocation2 + $0x61] sm:$0x3] %v940_v17  ;;  %v892_v53 = vadd.f32 %v891_v26, %v504_v30  ;;  %v1333_v55 = vrot.slane %v9238_v46, 7  ;;  %v871_v21 = vpop.f32.mrf.mxu2  ;;  %v502_v30 = vperm.slane %v9188_v23, 5  ;;  %v1334_v26 = vrot.slane %v9252_v7, 7 }
  0xc6   : > { %945 = vst [vmem:[#allocation2 + $0x53] sm:$0x3] %v944_v28  ;;  %v9245_v3 = vsel %vm1196_vm2, %v1185_v11, %v1186_v37  ;;  %v9249_v4 = vsel %vm1196_vm2, %v1186_v37, %v1187_v44  ;;  %v832_v11 = vadd.f32 %v831_v51, %v501_v61 }
  0xc7   : > { %946 = vst [vmem:[#allocation2 + $0x63] sm:$0x3] %v944_v28  ;;  %v963_v15 = vperm.slane %v892_v53, 0  ;;  %1264 = vmatmul.f32.vlgmr.msra.gmra.mxu2 %v9249_v4  ;;  %v9259_v17 = vsel %vm1000_vm3, %v13937_v49, %v1333_v55  ;;  %1261 = vmatmul.f32.gmra.mxu1 %v9245_v3  ;;  %v1188_v28 = vrot.slane %v9238_v46, 1  ;;  %v852_v53 = vadd.f32 %v851_v19, %v502_v30  ;;  %v1750_v19 = vld [vmem:[#allocation8 + $0x378] sm:$0xff]  ;;  %v1749_v30 = vld [vmem:[#allocation8 + $0x370] sm:$0xff] }
  0xc8   : > { %948 = vst [vmem:[#allocation2 + $0x55] sm:$0x3] %v947_v31  ;;  %1410 = vmatmul.f32.vlgmr.msra.gmra.mxu3 %v9259_v17  ;;  %v953_v37 = vperm.slane %v832_v11, 0  ;;  %v9292_v11 = vld [vmem:[#allocation2 + $0x58] sm:$0xff]  ;;  %1751 = vmatpush.msrb.mxu2 %v1750_v19 }
  0xc9   : > { %14357 = vst [vmem:[#allocation28_spill] sm:$0xff] %v9245_v3  ;;  %v9270_v51 = vsel %vm1196_vm2, %v1187_v44, %v1188_v28  ;;  %v957_v61 = vperm.slane %v852_v53, 0  ;;  %v1189_v44 = vrot.slane %v9252_v7, 1  ;;  %v1846_v53 = vld [vmem:[#allocation8 + $0x3e8] sm:$0xff] }
  0xca   : > { %14358 = vst [vmem:[#allocation29_spill] sm:$0xff] %v9249_v4  ;;  %1752 = vmatpush.msrb.mxu2 %v1749_v30  ;;  %v1746_v30 = vld [vmem:[#allocation8 + $0x358] sm:$0xff] }
  0xcb   : > { %949 = vst [vmem:[#allocation2 + $0x65] sm:$0x3] %v947_v31  ;;  %v503_v31 = vperm.slane %v9188_v23, 6  ;;  %1078 = vmatmul.f32.gmra.mxu0 %v9201_v63  ;;  %v9274_v23 = vsel %vm1000_vm3, %v1333_v55, %v1334_v26 }
  0xcc   : > { %964 = vst [vmem:[#allocation2 + $0x77] sm:$0x3] %v963_v15 }
  0xcd   : > { %965 = vst [vmem:[#allocation2 + $0x87] sm:$0x3] %v963_v15  ;;  %v872_v49 = vadd.f32 %v871_v21, %v503_v31  ;;  %v1848_v21 = vld [vmem:[#allocation8 + $0x3f8] sm:$0xff]  ;;  %v1847_v31 = vld [vmem:[#allocation8 + $0x3f0] sm:$0xff] }
  0xce   : > { %955 = vst [vmem:[#allocation2 + $0x71] sm:$0x3] %v953_v37  ;;  %1849 = vmatpush.msrb.mxu3 %v1848_v21  ;;  %v1747_v21 = vld [vmem:[#allocation8 + $0x360] sm:$0xff] }
  0xcf   : > { %14359 = vst [vmem:[#allocation30_spill] sm:$0xff] %v9270_v51  ;;  %v960_v39 = vperm.slane %v872_v49, 0  ;;  %v9276_v9 = vld [vmem:[#allocation2 + $0x50] sm:$0xff]  ;;  %1267 = vmatmul.f32.gmra.mxu2 %v9270_v51  ;;  %1620 = vmatmul.f32.vlgmr.msrb.gmra.mxu1 %v9224_v32  ;;  %v9286_v49 = vsel %vm1196_vm2, %v1188_v28, %v1189_v44  ;;  %v1336_v28 = vrot.slane %v9292_v11, 7  ;;  %v1842_v32 = vld [vmem:[#allocation8 + $0x3c8] sm:$0xff] }
  0xd0   : > { %956 = vst [vmem:[#allocation2 + $0x81] sm:$0x3] %v953_v37  ;;  %1413 = vmatmul.f32.gmra.mxu3 %v9274_v23  ;;  %v1335_v15 = vrot.slane %v9276_v9, 7  ;;  %v1748_v37 = vld [vmem:[#allocation8 + $0x368] sm:$0xff] }
  0xd1   : > { %958 = vst [vmem:[#allocation2 + $0x73] sm:$0x3] %v957_v61  ;;  %1850 = vmatpush.msrb.mxu3 %v1847_v31  ;;  %1753 = vmatpush.msrb.mxu2 %v1748_v37  ;;  %v1844_v31 = vld [vmem:[#allocation8 + $0x3d8] sm:$0xff]  ;;  %v1843_v37 = vld [vmem:[#allocation8 + $0x3d0] sm:$0xff] }
  0xd2   : > { %959 = vst [vmem:[#allocation2 + $0x83] sm:$0x3] %v957_v61  ;;  %v9290_v55 = vsel %vm1000_vm3, %v1334_v26, %v1335_v15  ;;  %v9306_v61 = vsel %vm1000_vm3, %v1335_v15, %v1336_v28  ;;  %v9308_v19 = vld [vmem:[#allocation2 + $0x60] sm:$0xff] }
  0xd3   : > { %961 = vst [vmem:[#allocation2 + $0x75] sm:$0x3] %v960_v39  ;;  %1081 = vmatmul.f32.gmra.mxu0 %v9203_v1  ;;  %1851 = vmatpush.msrb.mxu3 %v1846_v53  ;;  %v1337_v15 = vrot.slane %v9308_v19, 7  ;;  %v1745_v53 = vld [vmem:[#allocation8 + $0x350] sm:$0xff] }
  0xd4   : > { %962 = vst [vmem:[#allocation2 + $0x85] sm:$0x3] %v960_v39  ;;  %v1190_v39 = vrot.slane %v9276_v9, 1  ;;  %1754 = vmatpush.msrb.mxu2 %v1747_v21  ;;  %v9324_v21 = vld [vmem:[#allocation2 + $0x68] sm:$0xff] }
  0xd5   : > { %14360 = vst [vmem:[#allocation31_spill] sm:$0xff] %v9286_v49 }
  0xd6   : > { %v9302_v26 = vsel %vm1196_vm2, %v1189_v44, %v1190_v39  ;;  %14362 = vst [vmem:[#allocation33_spill] sm:$0xff] %v9306_v61  ;;  %v1191_v44 = vrot.slane %v9292_v11, 1  ;;  %1755 = vmatpush.msrb.mxu2 %v1746_v30  ;;  %v1743_v30 = vld [vmem:[#allocation8 + $0x340] sm:$0xff] }
  0xd7   : > { %1270 = vmatmul.f32.gmra.mxu2 %v9286_v49  ;;  %1623 = vmatmul.f32.gmra.mxu1 %v9229_v33  ;;  %14361 = vst [vmem:[#allocation32_spill] sm:$0xff] %v9302_v26  ;;  %v1845_v33 = vld [vmem:[#allocation8 + $0x3e0] sm:$0xff] }
  0xd8   : > { %1416 = vmatmul.f32.gmra.mxu3 %v9290_v55  ;;  %1756 = vmatpush.msrb.mxu2 %v1745_v53  ;;  %v1742_v53 = vld [vmem:[#allocation8 + $0x338] sm:$0xff] }
  0xd9   : > { %1852 = vmatpush.msrb.mxu3 %v1845_v33  ;;  %v9318_v33 = vsel %vm1196_vm2, %v1190_v39, %v1191_v44  ;;  %v1192_v39 = vrot.slane %v9308_v19, 1 }
  0xdb   : > { %1084 = vmatmul.f32.gmra.mxu0 %v9231_v35  ;;  %1853 = vmatpush.msrb.mxu3 %v1844_v31  ;;  %v1744_v31 = vld [vmem:[#allocation8 + $0x348] sm:$0xff] }
  0xdc   : > { %1757 = vmatpush.msrb.mxu2 %v1744_v31  ;;  %v1837_v31 = vld [vmem:[#allocation8 + $0x3a0] sm:$0xff] }
  0xdd   : > { %1854 = vmatpush.msrb.mxu3 %v1843_v37  ;;  %v1840_v37 = vld [vmem:[#allocation8 + $0x3b8] sm:$0xff] }
  0xde   : > { %1758 = vmatpush.msrb.mxu2 %v1743_v30  ;;  %v1031_v30 = vld [vmem:[#allocation8 + $0x70] sm:$0xff] }
  0xdf   : > { %1273 = vmatmul.f32.gmra.mxu2 %v9302_v26  ;;  %1626 = vmatmul.f32.gmra.mxu1 %v9217_v25  ;;  %v9322_v25 = vsel %vm1000_vm3, %v1336_v28, %v1337_v15  ;;  %v1338_v28 = vrot.slane %v9324_v21, 7 }
  0xe0   : > { %1419 = vmatmul.f32.gmra.mxu3 %v9306_v61  ;;  %14363 = vst [vmem:[#allocation34_spill] sm:$0xff] %v9322_v25  ;;  %1759 = vmatpush.msrb.mxu2 %v1742_v53  ;;  %v1835_v53 = vld [vmem:[#allocation8 + $0x390] sm:$0xff] }
  0xe1   : > { %1855 = vmatpush.msrb.mxu3 %v1842_v32  ;;  %v1839_v32 = vld [vmem:[#allocation8 + $0x3b0] sm:$0xff]  ;;  %v9338_v61 = vsel %vm1000_vm3, %v1337_v15, %v1338_v28  ;;  %v1836_v15 = vld [vmem:[#allocation8 + $0x398] sm:$0xff] }
  0xe2   : > { %14364 = vst [vmem:[#allocation35_spill] sm:$0xff] %v9338_v61  ;;  %1760 = vmatpush.msrb.mxu2 %v1741_v27  ;;  %v9356_v27 = vld [vmem:[#allocation2 + $0x78] sm:$0xff] }
  0xe3   : > { %1087 = vmatmul.f32.gmra.mxu0 %v9233_v36  ;;  %1856 = vmatpush.msrb.mxu3 %v1841_v29  ;;  %v9334_v29 = vsel %vm1196_vm2, %v1191_v44, %v1192_v39  ;;  %v1193_v44 = vrot.slane %v9324_v21, 1 }
  0xe5   : > { %1857 = vmatpush.msrb.mxu3 %v1840_v37  ;;  %v9340_v37 = vld [vmem:[#allocation2 + $0x70] sm:$0xff] }
  0xe7   : > { %1276 = vmatmul.f32.gmra.mxu2 %v9318_v33  ;;  %1629 = vmatmul.f32.gmra.mxu1 %v9245_v3  ;;  %v1032_v3 = vld [vmem:[#allocation8 + $0x78] sm:$0xff] }
  0xe8   : > { %1422 = vmatmul.f32.gmra.mxu3 %v9322_v25  ;;  %v1838_v25 = vld [vmem:[#allocation8 + $0x3a8] sm:$0xff]  ;;  %1115 = vmatpush.msrb.mxu0 %v1032_v3  ;;  %v1029_v3 = vld [vmem:[#allocation8 + $0x60] sm:$0xff] }
  0xe9   : > { %1858 = vmatpush.msrb.mxu3 %v1839_v32  ;;  %v1740_v32 = vld [vmem:[#allocation8 + $0x328] sm:$0xff] }
  0xea   : > { %1116 = vmatpush.msrb.mxu0 %v1031_v30  ;;  %1761 = vmatpush.msrb.mxu2 %v1740_v32  ;;  %v1738_v30 = vld [vmem:[#allocation8 + $0x318] sm:$0xff]  ;;  %v1027_v32 = vld [vmem:[#allocation8 + $0x50] sm:$0xff] }
  0xeb   : > { %1090 = vmatmul.f32.gmra.mxu0 %v9238_v46  ;;  %1859 = vmatpush.msrb.mxu3 %v1838_v25  ;;  %v1339_v25 = vrot.slane %v9340_v37, 7 }
  0xec   : > { %1117 = vmatpush.msrb.mxu0 %v1030_v24  ;;  %1762 = vmatpush.msrb.mxu2 %v1739_v22  ;;  %v1833_v24 = vld [vmem:[#allocation8 + $0x380] sm:$0xff]  ;;  %v1736_v22 = vld [vmem:[#allocation8 + $0x308] sm:$0xff] }
  0xed   : > { %1860 = vmatpush.msrb.mxu3 %v1837_v31  ;;  %v9350_v31 = vsel %vm1196_vm2, %v1192_v39, %v1193_v44  ;;  %v9354_v20 = vsel %vm1000_vm3, %v1338_v28, %v1339_v25  ;;  %v1194_v39 = vrot.slane %v9340_v37, 1  ;;  %v9363_v28 = vrot.slane %v9356_v27, 7 }
  0xee   : > { %14365 = vst [vmem:[#allocation36_spill] sm:$0xff] %v9354_v20  ;;  %1118 = vmatpush.msrb.mxu0 %v1029_v3  ;;  %1763 = vmatpush.msrb.mxu2 %v1738_v30  ;;  %v9375_v30 = vld [vmem:[#allocation2 + $0x80] sm:$0xff] }
  0xef   : > { %1279 = vmatmul.f32.gmra.mxu2 %v9334_v29  ;;  %1632 = vmatmul.f32.gmra.mxu1 %v9249_v4  ;;  %v1834_v4 = vld [vmem:[#allocation8 + $0x388] sm:$0xff]  ;;  %v9373_v3 = vsel %vm1000_vm3, %v1339_v25, %v9363_v28  ;;  %v1341_v25 = vrot.slane %v9375_v30, 7 }
  0xf0   : > { %1425 = vmatmul.f32.gmra.mxu3 %v9338_v61  ;;  %v1028_v61 = vld [vmem:[#allocation8 + $0x58] sm:$0xff]  ;;  %14366 = vst [vmem:[#allocation37_spill] sm:$0xff] %v9373_v3 }
  0xf1   : > { %1861 = vmatpush.msrb.mxu3 %v1836_v15  ;;  %1119 = vmatpush.msrb.mxu0 %v1028_v61  ;;  %v1737_v15 = vld [vmem:[#allocation8 + $0x310] sm:$0xff]  ;;  %v9368_v61 = vsel %vm1196_vm2, %v1193_v44, %v1194_v39  ;;  %v9381_v44 = vrot.slane %v9356_v27, 1 }
  0xf2   : > { %1764 = vmatpush.msrb.mxu2 %v1737_v15  ;;  %v1023_v15 = vld [vmem:[#allocation8 + $0x30] sm:$0xff] }
  0xf3   : > { %1093 = vmatmul.f32.gmra.mxu0 %v9252_v7  ;;  %1862 = vmatpush.msrb.mxu3 %v1835_v53  ;;  %v1025_v53 = vld [vmem:[#allocation8 + $0x40] sm:$0xff] }
  0xf4   : > { %1120 = vmatpush.msrb.mxu0 %v1027_v32  ;;  %1765 = vmatpush.msrb.mxu2 %v1736_v22  ;;  %v1024_v32 = vld [vmem:[#allocation8 + $0x38] sm:$0xff]  ;;  %v1022_v22 = vld [vmem:[#allocation8 + $0x28] sm:$0xff] }
  0xf5   : > { %1863 = vmatpush.msrb.mxu3 %v1834_v4  ;;  %v1026_v4 = vld [vmem:[#allocation8 + $0x48] sm:$0xff] }
  0xf6   : > { %1121 = vmatpush.msrb.mxu0 %v1026_v4  ;;  %v9388_v4 = vsel %vm1196_vm2, %v1194_v39, %v9381_v44  ;;  %v14367_v39 = vmov 0.0  }
  0xf7   : > { %1282 = vmatmul.f32.gmra.mxu2 %v9350_v31  ;;  %1635 = vmatmul.f32.gmra.mxu1 %v9270_v51  ;;  %v1020_v51 = vld [vmem:[#allocation8 + $0x18] sm:$0xff] }
  0xf8   : > { %1428 = vmatmul.f32.gmra.mxu3 %v9354_v20  ;;  %1122 = vmatpush.msrb.mxu0 %v1025_v53  ;;  %v1021_v53 = vld [vmem:[#allocation8 + $0x20] sm:$0xff] }
  0xf9   : > { %1864 = vmatpush.msrb.mxu3 %v1833_v24  ;;  %v1735_v24 = vld [vmem:[#allocation8 + $0x300] sm:$0xff] }
  0xfa   : > { %1766 = vmatpush.msrb.mxu2 %v1735_v24  ;;  %1123 = vmatpush.msrb.mxu0 %v1024_v32  ;;  %v9398_v24 = vld [vmem:[#allocation2 + $0x88] sm:$0xff]  ;;  %v1019_v32 = vld [vmem:[#allocation8 + $0x10] sm:$0xff] }
  0xfb   : > { %1096 = vmatmul.f32.gmra.mxu0 %v9276_v9  ;;  %v9404_v20 = vrot.slane %v9398_v24, 7 }
  0xfc   : > { %1124 = vmatpush.msrb.mxu0 %v1023_v15  ;;  %v9401_v15 = vrot.slane %v14367_v39, 1 }
  0xfe   : > { %1125 = vmatpush.msrb.mxu0 %v1022_v22  ;;  %v1212_v22 = vsel %vm1196_vm2, %v9381_v44, %v9401_v15 }
  0xff   : > { %1285 = vmatmul.f32.gmra.mxu2 %v9368_v61  ;;  %1638 = vmatmul.f32.gmra.mxu1 %v9286_v49  ;;  %v9393_v49 = vsel %vm1000_vm3, %v9363_v28, %v1341_v25 }
 0x100   : > { %1431 = vmatmul.f32.gmra.mxu3 %v9373_v3  ;;  %1126 = vmatpush.msrb.mxu0 %v1021_v53  ;;  %v1018_v3 = vld [vmem:[#allocation8 + $0x8] sm:$0xff]  ;;  %v1017_v53 = vld [vmem:[#allocation8] sm:$0xff] }
 0x102   : > { %1127 = vmatpush.msrb.mxu0 %v1020_v51  ;;  %v9414_v51 = vsel %vm1000_vm3, %v1341_v25, %v9404_v20  ;;  %v14374_v25 = vld [vmem:[#allocation21_spill] sm:$0xff] }
 0x103   : > { %1099 = vmatmul.f32.gmra.mxu0 %v9292_v11 }
 0x104   : > { %1128 = vmatpush.msrb.mxu0 %v1019_v32  ;;  %v9420_v32 = vrot.slane %v14367_v39, 7  ;;  %v14375_v39 = vld [vmem:[#allocation33_spill] sm:$0xff] }
 0x106   : > { %1129 = vmatpush.msrb.mxu0 %v1018_v3 }
 0x107   : > { %1288 = vmatmul.f32.gmra.mxu2 %v9388_v4  ;;  %1641 = vmatmul.f32.gmra.mxu1 %v9302_v26  ;;  %v9423_v26 = vrot.slane %v9201_v63, 7 }
 0x108   : > { %1434 = vmatmul.f32.gmra.mxu3 %v9393_v49  ;;  %1130 = vmatpush.msrb.mxu0 %v1017_v53 }
 0x109   : > { %v1733_v3 = vsel %vm1000_vm3, %v9420_v32, %v9423_v26 }
 0x10a   : > { %1230 = vmatpush.msra.mxu0 %v9051_v34  ;;  %v1703_v34 = vrot.slane %v9203_v1, 7 }
 0x10b   : > { %1102 = vmatmul.f32.gmra.mxu0 %v9308_v19 }
 0x10c   : > { %1231 = vmatpush.msra.mxu0 %v9058_v38  ;;  %v9443_v38 = vsel %vm1000_vm3, %v9423_v26, %v1703_v34 }
 0x10e   : > { %1232 = vmatpush.msra.mxu0 %v9062_v41  ;;  %v1704_v41 = vrot.slane %v9231_v35, 7 }
 0x10f   : > { %1291 = vmatmul.f32.gmra.mxu2 %v1212_v22  ;;  %1644 = vmatmul.f32.gmra.mxu1 %v9318_v33  ;;  %v14376_v22 = vld [vmem:[#allocation22_spill] sm:$0xff] }
 0x110   : > { %1437 = vmatmul.f32.gmra.mxu3 %v9414_v51  ;;  %1233 = vmatpush.msra.mxu0 %v9073_v43  ;;  %v9453_v43 = vpop.f32.mrf.mxu0 }
 0x112   : > { %1234 = vmatpush.msra.mxu0 %v9078_v45  ;;  %v9458_v45 = vsel %vm1000_vm3, %v1703_v34, %v1704_v41  ;;  %v14378_v34 = vld [vmem:[#allocation35_spill] sm:$0xff] }
 0x113   : > { %1105 = vmatmul.f32.gmra.mxu0 %v9324_v21 }
 0x114   : > { %1235 = vmatpush.msra.mxu0 %v9091_v48  ;;  %v1016_v48 = vsel %vm1000_vm3, %v9363_v28, %v9420_v32 }
 0x116   : > { %1236 = vmatpush.msra.mxu0 %v9097_v50  ;;  %v14368_v50 = vrot.slane %v9233_v36, 7 }
 0x117   : > { %1767 = vmatmul.f32.vlgmr.msrb.gmra.mxu2 %v1733_v3  ;;  %1647 = vmatmul.f32.gmra.mxu1 %v9334_v29  ;;  %v14377_v3 = vld [vmem:[#allocation34_spill] sm:$0xff] }
 0x118   : > { %1865 = vmatmul.f32.vlgmr.msrb.gmra.mxu3 %v9201_v63  ;;  %1237 = vmatpush.msra.mxu0 %v9104_v52  ;;  %v9475_v52 = vsel %vm1000_vm3, %v1704_v41, %v14368_v50 }
 0x11a   : > { %1238 = vmatpush.msra.mxu0 %v9110_v54  ;;  %v9478_v54 = vpop.f32.mrf.mxu0 }
 0x11b   : > { %1108 = vmatmul.f32.gmra.mxu0 %v9340_v37 }
 0x11c   : > { %1239 = vmatpush.msra.mxu0 %v9116_v56  ;;  %v8659_v56 = vld [vmem:[#allocation8 + $0x1f8] sm:$0xff] }
 0x11e   : > { %1240 = vmatpush.msra.mxu0 %v9122_v58  ;;  %v1569_v58 = vrot.slane %v9375_v30, 1 }
 0x11f   : > { %1770 = vmatmul.f32.gmra.mxu2 %v9443_v38  ;;  %1650 = vmatmul.f32.gmra.mxu1 %v9350_v31 }
 0x120   : > { %1868 = vmatmul.f32.gmra.mxu3 %v9203_v1  ;;  %1241 = vmatpush.msra.mxu0 %v9127_v60  ;;  %v8660_v60 = vld [vmem:[#allocation8 + $0x1f0] sm:$0xff] }
 0x122   : > { %1242 = vmatpush.msra.mxu0 %v9131_v62  ;;  %v9487_v62 = vrot.slane %v9196_v57, 7 }
 0x123   : > { %1111 = vmatmul.f32.gmra.mxu0 %v9356_v27 }
 0x124   : > { %1243 = vmatpush.msra.mxu0 %v9135_v0  ;;  %v9492_v0 = vsel %vm1196_vm2, %v9381_v44, %v1569_v58  ;;  %v14372_v44 = vld [vmem:[#allocation19_spill] sm:$0xff] }
 0x126   : > { %1244 = vmatpush.msra.mxu0 %v9139_v2 }
 0x127   : > { %1773 = vmatmul.f32.gmra.mxu2 %v9458_v45  ;;  %1653 = vmatmul.f32.gmra.mxu1 %v9368_v61 }
 0x128   : > { %1871 = vmatmul.f32.gmra.mxu3 %v9231_v35  ;;  %1245 = vmatpush.msra.mxu0 %v9148_v5  ;;  %v9507_v5 = vrot.slane %v9398_v24, 1 }
 0x12a   : > { %v9514_v28 = vsel %vm1196_vm2, %v1569_v58, %v9507_v5 }
 0x12b   : > { %1131 = vmatmul.f32.vlgmr.msrb.gmra.mxu0 %v1016_v48  ;;  %v14379_v48 = vld [vmem:[#allocation36_spill] sm:$0xff] }
 0x12c   : > { %1376 = vmatpush.msrb.mxu0 %v8659_v56  ;;  %v14380_v56 = vld [vmem:[#allocation37_spill] sm:$0xff] }
 0x12e   : > { %1377 = vmatpush.msrb.mxu0 %v8660_v60 }
 0x12f   : > { %1776 = vmatmul.f32.gmra.mxu2 %v9475_v52  ;;  %1656 = vmatmul.f32.gmra.mxu1 %v9388_v4 }
 0x130   : > { %1874 = vmatmul.f32.gmra.mxu3 %v9233_v36  ;;  %1378 = vmatpush.msrb.mxu0 %v9067_v42  ;;  %v1014_v42 = vsel %vm1000_vm3, %v9420_v32, %v9487_v62 }
 0x132   : > { %1379 = vmatpush.msrb.mxu0 %v9087_v47  ;;  %v985_v47 = vrot.slane %v9198_v59, 7 }
 0x133   : > { %1134 = vmatmul.f32.gmra.mxu0 %v9420_v32 }
 0x134   : > { %1380 = vmatpush.msrb.mxu0 %v9151_v6 }
 0x136   : > { %1381 = vmatpush.msrb.mxu0 %v9155_v8  ;;  %v9526_v8 = vsel %vm1000_vm3, %v9487_v62, %v985_v47 }
 0x137   : > { %1779 = vmatmul.f32.gmra.mxu2 %v9259_v17  ;;  %1659 = vmatmul.f32.gmra.mxu1 %v9492_v0 }
 0x138   : > { %1877 = vmatmul.f32.gmra.mxu3 %v9238_v46  ;;  %v9498_v2 = vpop.f32.mrf.mxu0  ;;  %1382 = vmatpush.msrb.mxu0 %v9158_v10  ;;  %v1586_v10 = vsel %vm1196_vm2, %v9507_v5, %v9211_v13 }
 0x139   : > { %14369 = vst [vmem:[#allocation38_spill] sm:$0xff] %v9498_v2  ;;  %v1468_v2 = vld [vmem:[#allocation8 + $0x250] sm:$0xff] }
 0x13a   : > { %1383 = vmatpush.msrb.mxu0 %v9161_v12  ;;  %v14371_v12 = vld [vmem:[#allocation18_spill] sm:$0xff] }
 0x13b   : > { %1137 = vmatmul.f32.gmra.mxu0 %v1014_v42  ;;  %v9584_v42 = vld [vmem:[#allocation2] sm:$0xff] }
 0x13c   : > { %1384 = vmatpush.msrb.mxu0 %v9164_v14 }
 0x13e   : > { %1385 = vmatpush.msrb.mxu0 %v9167_v16  ;;  %v9544_v16 = vsel %vm1000_vm3, %v985_v47, %v9423_v26  ;;  %v13964_v47 = vrot.slane %v9584_v42, 7 }
 0x13f   : > { %1782 = vmatmul.f32.gmra.mxu2 %v9274_v23  ;;  %1662 = vmatmul.f32.gmra.mxu1 %v9514_v28 }
 0x140   : > { %1880 = vmatmul.f32.gmra.mxu3 %v9252_v7  ;;  %v9520_v6 = vpop.f32.mrf.mxu0  ;;  %1386 = vmatpush.msrb.mxu0 %v9170_v18  ;;  %v14373_v18 = vld [vmem:[#allocation20_spill] sm:$0xff] }
 0x141   : > { %14370 = vst [vmem:[#allocation39_spill] sm:$0xff] %v9520_v6  ;;  %v1469_v6 = vld [vmem:[#allocation8 + $0x258] sm:$0xff] }
 0x142   : > { %1387 = vmatpush.msrb.mxu0 %v14371_v12 }
 0x143   : > { %1140 = vmatmul.f32.gmra.mxu0 %v9526_v8 }
 0x144   : > { %1388 = vmatpush.msrb.mxu0 %v14372_v44 }
 0x146   : > { %1389 = vmatpush.msrb.mxu0 %v14373_v18 }
 0x147   : > { %1785 = vmatmul.f32.gmra.mxu2 %v9290_v55  ;;  %1665 = vmatmul.f32.gmra.mxu1 %v1586_v10 }
 0x148   : > { %1883 = vmatmul.f32.gmra.mxu3 %v9276_v9  ;;  %v9538_v14 = vpop.f32.mrf.mxu0  ;;  %1390 = vmatpush.msrb.mxu0 %v14374_v25 }
 0x14a   : > { %1391 = vmatpush.msrb.mxu0 %v14376_v22  ;;  %v1210_v22 = vsel %vm1196_vm2, %v9401_v15, %v9211_v13 }
 0x14b   : > { %1143 = vmatmul.f32.gmra.mxu0 %v9544_v16 }
 0x14f   : > { %1788 = vmatmul.f32.gmra.mxu2 %v14375_v39 }
 0x150   : > { %1886 = vmatmul.f32.gmra.mxu3 %v9292_v11  ;;  %v9552_v53 = vpop.f32.mrf.mxu0 }
 0x153   : > { %1146 = vmatmul.f32.gmra.mxu0 %v9443_v38 }
 0x157   : > { %1791 = vmatmul.f32.gmra.mxu2 %v14377_v3 }
 0x158   : > { %1889 = vmatmul.f32.gmra.mxu3 %v9308_v19  ;;  %v9557_v26 = vpop.f32.mrf.mxu0 }
 0x15b   : > { %1149 = vmatmul.f32.gmra.mxu0 %v9458_v45 }
 0x15f   : > { %1794 = vmatmul.f32.gmra.mxu2 %v14378_v34 }
 0x160   : > { %1892 = vmatmul.f32.gmra.mxu3 %v9324_v21  ;;  %v9562_v41 = vpop.f32.mrf.mxu0 }
 0x163   : > { %1152 = vmatmul.f32.gmra.mxu0 %v9475_v52 }
 0x167   : > { %1797 = vmatmul.f32.gmra.mxu2 %v14379_v48 }
 0x168   : > { %1895 = vmatmul.f32.gmra.mxu3 %v9340_v37  ;;  %v9567_v50 = vpop.f32.mrf.mxu0 }
 0x16b   : > { %1155 = vmatmul.f32.gmra.mxu0 %v9259_v17 }
 0x16f   : > { %1800 = vmatmul.f32.gmra.mxu2 %v14380_v56 }
 0x170   : > { %1898 = vmatmul.f32.gmra.mxu3 %v9356_v27  ;;  %v9572_v58 = vpop.f32.mrf.mxu0 }
 0x173   : > { %1158 = vmatmul.f32.gmra.mxu0 %v9274_v23  ;;  %v9588_v23 = vpop.f32.mrf.mxu3 }
 0x174   : > { %14381 = vst [vmem:[#allocation18_spill] sm:$0xff] %v9588_v23  ;;  %v1470_v23 = vld [vmem:[#allocation8 + $0x260] sm:$0xff] }
 0x177   : > { %1803 = vmatmul.f32.gmra.mxu2 %v9393_v49  ;;  %v1719_v49 = vsel %vm1000_vm3, %v9404_v20, %v13964_v47  ;;  %v14384_v47 = vld [vmem:[#allocation27_spill] sm:$0xff] }
 0x178   : > { %1901 = vmatmul.f32.gmra.mxu3 %v9375_v30  ;;  %v9577_v60 = vpop.f32.mrf.mxu0 }
 0x17b   : > { %1161 = vmatmul.f32.gmra.mxu0 %v9290_v55  ;;  %v9595_v55 = vpop.f32.mrf.mxu2  ;;  %v9601_v10 = vpop.f32.mrf.mxu3 }
 0x17c   : > { %14382 = vst [vmem:[#allocation19_spill] sm:$0xff] %v9601_v10  ;;  %v1471_v10 = vld [vmem:[#allocation8 + $0x268] sm:$0xff] }
 0x17f   : > { %1806 = vmatmul.f32.gmra.mxu2 %v9414_v51 }
 0x180   : > { %1904 = vmatmul.f32.gmra.mxu3 %v9398_v24  ;;  %v9582_v17 = vpop.f32.mrf.mxu0 }
 0x183   : > { %1164 = vmatmul.f32.gmra.mxu0 %v14375_v39 }
 0x187   : > { %1809 = vmatmul.f32.gmra.mxu2 %v1719_v49  ;;  %v1472_v49 = vld [vmem:[#allocation8 + $0x270] sm:$0xff] }
 0x188   : > { %1907 = vmatmul.f32.gmra.mxu3 %v9584_v42  ;;  %v9598_v51 = vpop.f32.mrf.mxu0 }
 0x18b   : > { %1167 = vmatmul.f32.gmra.mxu0 %v14377_v3 }
 0x190   : > { %1910 = vmatmul.f32.gmra.mxu3 %v9584_v42  ;;  %v9604_v12 = vpop.f32.mrf.mxu0 }
 0x193   : > { %1170 = vmatmul.f32.gmra.mxu0 %v14378_v34  ;;  %v14383_v34 = vld [vmem:[#allocation26_spill] sm:$0xff] }
 0x198   : > { %v9607_v44 = vpop.f32.mrf.mxu0 }
 0x19b   : > { %1173 = vmatmul.f32.gmra.mxu0 %v14379_v48  ;;  %v1473_v48 = vld [vmem:[#allocation8 + $0x278] sm:$0xff] }
 0x1a0   : > { %v9610_v18 = vpop.f32.mrf.mxu0 }
 0x1a3   : > { %1176 = vmatmul.f32.gmra.mxu0 %v14380_v56 }
 0x1a8   : > { %v9613_v25 = vpop.f32.mrf.mxu0 }
 0x1ab   : > { %1246 = vmatmul.f32.vlgmr.msra.gmra.mxu0 %v9401_v15  ;;  %v1358_v15 = vsel %vm1000_vm3, %v9404_v20, %v9487_v62  ;;  %v1460_v20 = vld [vmem:[#allocation8 + $0x210] sm:$0xff] }
 0x1ac   : > { %1474 = vmatpush.msra.mxu0 %v1473_v48  ;;  %v1464_v48 = vld [vmem:[#allocation8 + $0x230] sm:$0xff] }
 0x1ae   : > { %1475 = vmatpush.msra.mxu0 %v1472_v49  ;;  %v1461_v49 = vld [vmem:[#allocation8 + $0x218] sm:$0xff] }
 0x1b0   : > { %v9616_v39 = vpop.f32.mrf.mxu0  ;;  %1476 = vmatpush.msra.mxu0 %v1471_v10 }
 0x1b2   : > { %1477 = vmatpush.msra.mxu0 %v1470_v23  ;;  %v1462_v23 = vld [vmem:[#allocation8 + $0x220] sm:$0xff] }
 0x1b3   : > { %1249 = vmatmul.f32.gmra.mxu0 %v1210_v22  ;;  %v1467_v22 = vld [vmem:[#allocation8 + $0x248] sm:$0xff] }
 0x1b4   : > { %1478 = vmatpush.msra.mxu0 %v1469_v6  ;;  %v1463_v6 = vld [vmem:[#allocation8 + $0x228] sm:$0xff] }
 0x1b6   : > { %1479 = vmatpush.msra.mxu0 %v1468_v2  ;;  %v1459_v2 = vld [vmem:[#allocation8 + $0x208] sm:$0xff] }
 0x1b8   : > { %v9622_v3 = vpop.f32.mrf.mxu0  ;;  %1480 = vmatpush.msra.mxu0 %v1467_v22 }
 0x1bb   : > { %1252 = vmatmul.f32.gmra.mxu0 %v14383_v34  ;;  %v1466_v34 = vld [vmem:[#allocation8 + $0x240] sm:$0xff] }
 0x1bc   : > { %1481 = vmatpush.msra.mxu0 %v1466_v34 }
 0x1c0   : > { %v9625_v56 = vpop.f32.mrf.mxu0 }
 0x1c3   : > { %1255 = vmatmul.f32.gmra.mxu0 %v14384_v47  ;;  %v1465_v47 = vld [vmem:[#allocation8 + $0x238] sm:$0xff] }
 0x1c4   : > { %1482 = vmatpush.msra.mxu0 %v1465_v47 }
 0x1c6   : > { %1483 = vmatpush.msra.mxu0 %v1464_v48 }
 0x1c8   : > { %v9628_v13 = vpop.f32.mrf.mxu0  ;;  %1484 = vmatpush.msra.mxu0 %v1463_v6  ;;  %v1977_v6 = vld [vmem:[#allocation8 + $0x470] sm:$0xff] }
 0x1ca   : > { %1485 = vmatpush.msra.mxu0 %v1462_v23  ;;  %v1976_v23 = vld [vmem:[#allocation8 + $0x468] sm:$0xff] }
 0x1cb   : > { %1392 = vmatmul.f32.vlgmr.msrb.gmra.mxu0 %v1358_v15  ;;  %v1458_v15 = vld [vmem:[#allocation8 + $0x200] sm:$0xff] }
 0x1cc   : > { %1486 = vmatpush.msra.mxu0 %v1461_v49  ;;  %v1973_v49 = vld [vmem:[#allocation8 + $0x450] sm:$0xff] }
 0x1ce   : > { %1487 = vmatpush.msra.mxu0 %v1460_v20  ;;  %v1972_v20 = vld [vmem:[#allocation8 + $0x448] sm:$0xff] }
 0x1d0   : > { %v9634_v10 = vpop.f32.mrf.mxu0  ;;  %1488 = vmatpush.msra.mxu0 %v1459_v2  ;;  %v1970_v2 = vld [vmem:[#allocation8 + $0x438] sm:$0xff] }
 0x1d2   : > { %1489 = vmatpush.msra.mxu0 %v1458_v15  ;;  %v1969_v15 = vld [vmem:[#allocation8 + $0x430] sm:$0xff] }
 0x1d3   : > { %1395 = vmatmul.f32.gmra.mxu0 %v9526_v8 }
 0x1d8   : > { %v9637_v62 = vpop.f32.mrf.mxu0 }
 0x1db   : > { %1398 = vmatmul.f32.gmra.mxu0 %v9544_v16 }
 0x1e0   : > { %v9640_v22 = vpop.f32.mrf.mxu0 }
 0x1e3   : > { %1401 = vmatmul.f32.gmra.mxu0 %v9443_v38 }
 0x1e8   : > { %v9643_v8 = vpop.f32.mrf.mxu0 }
 0x1eb   : > { %1404 = vmatmul.f32.gmra.mxu0 %v9458_v45 }
 0x1f0   : > { %v9646_v34 = vpop.f32.mrf.mxu0 }
 0x1f3   : > { %1407 = vmatmul.f32.gmra.mxu0 %v9475_v52 }
 0x1f8   : > { %v9649_v47 = vpop.f32.mrf.mxu0 }
 0x1fb   : > { %1490 = vmatmul.f32.vlgmr.msra.gmra.mxu0 %v9196_v57 }
 0x200   : > { %v9652_v16 = vpop.f32.mrf.mxu0 }
 0x203   : > { %1493 = vmatmul.f32.gmra.mxu0 %v9198_v59 }
 0x208   : > { %v9655_v48 = vpop.f32.mrf.mxu0 }
 0x20b   : > { %1496 = vmatmul.f32.gmra.mxu0 %v9201_v63 }
 0x210   : > { %v9658_v38 = vpop.f32.mrf.mxu0 }
 0x213   : > { %1499 = vmatmul.f32.gmra.mxu0 %v9203_v1  ;;  %v1978_v1 = vld [vmem:[#allocation8 + $0x478] sm:$0xff] }
 0x214   : > { %1979 = vmatpush.msrb.mxu0 %v1978_v1 }
 0x216   : > { %1980 = vmatpush.msrb.mxu0 %v1977_v6  ;;  %v14391_v6 = vrot.slane %v9584_v42, 7 }
 0x218   : > { %v9661_v45 = vpop.f32.mrf.mxu0  ;;  %1981 = vmatpush.msrb.mxu0 %v1976_v23  ;;  %v1718_v23 = vsel %vm1000_vm3, %v14391_v6, %v9420_v32  ;;  %v14397_v6 = vld [vmem:[#allocation25_spill] sm:$0xff] }
 0x21b   : > { %1502 = vmatmul.f32.gmra.mxu0 %v9231_v35 }
 0x220   : > { %v9664_v52 = vpop.f32.mrf.mxu0 }
 0x223   : > { %1505 = vmatmul.f32.gmra.mxu0 %v9233_v36  ;;  %v1975_v36 = vld [vmem:[#allocation8 + $0x460] sm:$0xff] }
 0x224   : > { %1982 = vmatpush.msrb.mxu0 %v1975_v36  ;;  %v1967_v36 = vld [vmem:[#allocation8 + $0x420] sm:$0xff] }
 0x228   : > { %v9667_v57 = vpop.f32.mrf.mxu0 }
 0x229   : > { %14385 = vst [vmem:[#allocation20_spill] sm:$0xff] %v9667_v57 }
 0x22b   : > { %1508 = vmatmul.f32.gmra.mxu0 %v9238_v46  ;;  %v1974_v46 = vld [vmem:[#allocation8 + $0x458] sm:$0xff] }
 0x22c   : > { %1983 = vmatpush.msrb.mxu0 %v1974_v46  ;;  %v9689_v46 = vpop.f32.mrf.mxu2  ;;  %1812 = vmatmul.f32.gmra.mxu2 %v1718_v23  ;;  %v14399_v23 = vld [vmem:[#allocation28_spill] sm:$0xff] }
 0x22e   : > { %1984 = vmatpush.msrb.mxu0 %v1973_v49  ;;  %v1965_v49 = vld [vmem:[#allocation8 + $0x410] sm:$0xff] }
 0x230   : > { %v9670_v59 = vpop.f32.mrf.mxu0  ;;  %1985 = vmatpush.msrb.mxu0 %v1972_v20 }
 0x231   : > { %14386 = vst [vmem:[#allocation21_spill] sm:$0xff] %v9670_v59 }
 0x233   : > { %1511 = vmatmul.f32.gmra.mxu0 %v9252_v7 }
 0x238   : > { %v9673_v63 = vpop.f32.mrf.mxu0 }
 0x239   : > { %14387 = vst [vmem:[#allocation33_spill] sm:$0xff] %v9673_v63 }
 0x23b   : > { %1514 = vmatmul.f32.gmra.mxu0 %v9276_v9  ;;  %v1971_v9 = vld [vmem:[#allocation8 + $0x440] sm:$0xff] }
 0x23c   : > { %1986 = vmatpush.msrb.mxu0 %v1971_v9  ;;  %v1964_v9 = vld [vmem:[#allocation8 + $0x408] sm:$0xff] }
 0x23e   : > { %1987 = vmatpush.msrb.mxu0 %v1970_v2  ;;  %v1963_v2 = vld [vmem:[#allocation8 + $0x400] sm:$0xff] }
 0x240   : > { %v9676_v35 = vpop.f32.mrf.mxu0  ;;  %1988 = vmatpush.msrb.mxu0 %v1969_v15 }
 0x241   : > { %14388 = vst [vmem:[#allocation22_spill] sm:$0xff] %v9676_v35 }
 0x243   : > { %1517 = vmatmul.f32.gmra.mxu0 %v9292_v11  ;;  %v1968_v11 = vld [vmem:[#allocation8 + $0x428] sm:$0xff] }
 0x244   : > { %1989 = vmatpush.msrb.mxu0 %v1968_v11 }
 0x246   : > { %1990 = vmatpush.msrb.mxu0 %v1967_v36  ;;  %v9710_v36 = vpop.f32.mrf.mxu2 }
 0x248   : > { %v9679_v7 = vpop.f32.mrf.mxu0 }
 0x249   : > { %14389 = vst [vmem:[#allocation34_spill] sm:$0xff] %v9679_v7 }
 0x24b   : > { %1520 = vmatmul.f32.gmra.mxu0 %v9308_v19  ;;  %v1966_v19 = vld [vmem:[#allocation8 + $0x418] sm:$0xff] }
 0x24c   : > { %1991 = vmatpush.msrb.mxu0 %v1966_v19  ;;  %v9712_v19 = vpop.f32.mrf.mxu3 }
 0x24d   : > { %14400 = vst [vmem:[#allocation28_spill] sm:$0xff] %v9712_v19 }
 0x24e   : > { %1992 = vmatpush.msrb.mxu0 %v1965_v49  ;;  %v14402_v49 = vld [vmem:[#allocation29_spill] sm:$0xff] }
 0x250   : > { %v9682_v1 = vpop.f32.mrf.mxu0  ;;  %1993 = vmatpush.msrb.mxu0 %v1964_v9 }
 0x251   : > { %14390 = vst [vmem:[#allocation35_spill] sm:$0xff] %v9682_v1 }
 0x252   : > { %1994 = vmatpush.msrb.mxu0 %v1963_v2  ;;  %v14405_v2 = vld [vmem:[#allocation30_spill] sm:$0xff] }
 0x253   : > { %1523 = vmatmul.f32.gmra.mxu0 %v9324_v21 }
 0x258   : > { %v9692_v20 = vpop.f32.mrf.mxu0 }
 0x259   : > { %14392 = vst [vmem:[#allocation36_spill] sm:$0xff] %v9692_v20 }
 0x25b   : > { %1526 = vmatmul.f32.gmra.mxu0 %v9340_v37 }
 0x260   : > { %v9695_v32 = vpop.f32.mrf.mxu0 }
 0x261   : > { %14393 = vst [vmem:[#allocation37_spill] sm:$0xff] %v9695_v32 }
 0x263   : > { %1529 = vmatmul.f32.gmra.mxu0 %v9356_v27 }
 0x268   : > { %v9698_v15 = vpop.f32.mrf.mxu0 }
 0x269   : > { %14394 = vst [vmem:[#allocation26_spill] sm:$0xff] %v9698_v15 }
 0x26b   : > { %1532 = vmatmul.f32.gmra.mxu0 %v9375_v30  ;;  %v9717_v30 = vpop.f32.mrf.mxu2 }
 0x270   : > { %v9701_v21 = vpop.f32.mrf.mxu0 }
 0x271   : > { %14395 = vst [vmem:[#allocation27_spill] sm:$0xff] %v9701_v21 }
 0x273   : > { %1535 = vmatmul.f32.gmra.mxu0 %v9398_v24  ;;  %v9721_v24 = vpop.f32.mrf.mxu3 }
 0x274   : > { %14404 = vst [vmem:[#allocation42_spill] sm:$0xff] %v9721_v24 }
 0x278   : > { %v9704_v11 = vpop.f32.mrf.mxu0 }
 0x279   : > { %14396 = vst [vmem:[#allocation40_spill] sm:$0xff] %v9704_v11 }
 0x27b   : > { %1995 = vmatmul.f32.vlgmr.msrb.gmra.mxu0 %v14397_v6  ;;  %v9724_v6 = vpop.f32.mrf.mxu2  ;;  %v9729_v11 = vpop.f32.mrf.mxu3 }
 0x280   : > { %v9707_v37 = vpop.f32.mrf.mxu0 }
 0x281   : > { %14398 = vst [vmem:[#allocation25_spill] sm:$0xff] %v9707_v37 }
 0x283   : > { %1998 = vmatmul.f32.gmra.mxu0 %v14399_v23  ;;  %v14407_v23 = vld [vmem:[#allocation31_spill] sm:$0xff]  ;;  %v9736_v15 = vpop.f32.mrf.mxu3 }
 0x288   : > { %v9714_v27 = vpop.f32.mrf.mxu0 }
 0x289   : > { %14401 = vst [vmem:[#allocation41_spill] sm:$0xff] %v9714_v27  ;;  %v9733_v27 = vpop.f32.mrf.mxu2 }
 0x28b   : > { %2001 = vmatmul.f32.gmra.mxu0 %v14402_v49  ;;  %v14409_v49 = vld [vmem:[#allocation32_spill] sm:$0xff]  ;;  %v9743_v32 = vpop.f32.mrf.mxu3 }
 0x290   : > { %v9719_v9 = vpop.f32.mrf.mxu0 }
 0x291   : > { %14403 = vst [vmem:[#allocation29_spill] sm:$0xff] %v9719_v9 }
 0x293   : > { %2004 = vmatmul.f32.gmra.mxu0 %v14405_v2  ;;  %v9741_v2 = vpop.f32.mrf.mxu2  ;;  %v9752_v20 = vpop.f32.mrf.mxu3 }
 0x298   : > { %v9726_v37 = vpop.f32.mrf.mxu0 }
 0x299   : > { %14406 = vst [vmem:[#allocation30_spill] sm:$0xff] %v9726_v37 }
 0x29b   : > { %2007 = vmatmul.f32.gmra.mxu0 %v14407_v23  ;;  %v9748_v23 = vpop.f32.mrf.mxu2  ;;  %v9762_v1 = vpop.f32.mrf.mxu3 }
 0x2a0   : > { %v9731_v21 = vpop.f32.mrf.mxu0 }
 0x2a1   : > { %14408 = vst [vmem:[#allocation31_spill] sm:$0xff] %v9731_v21 }
 0x2a3   : > { %2010 = vmatmul.f32.gmra.mxu0 %v14409_v49  ;;  %v9755_v49 = vpop.f32.mrf.mxu1 }
 0x2a8   : > { %v9738_v9 = vpop.f32.mrf.mxu0 }
 0x2a9   : > { %14410 = vst [vmem:[#allocation32_spill] sm:$0xff] %v9738_v9  ;;  %v9757_v9 = vpop.f32.mrf.mxu2 }
 0x2ab   : > { %2013 = vmatmul.f32.gmra.mxu0 %v9318_v33 }
 0x2b0   : > { %v9745_v37 = vpop.f32.mrf.mxu0 }
 0x2b1   : > { %14411 = vst [vmem:[#allocation43_spill] sm:$0xff] %v9745_v37  ;;  %v9764_v37 = vpop.f32.mrf.mxu1  ;;  %v9768_v7 = vpop.f32.mrf.mxu2 }
 0x2b2   : > { %14414 = vst [vmem:[#allocation46_spill] sm:$0xff] %v9764_v37 }
 0x2b3   : > { %2016 = vmatmul.f32.gmra.mxu0 %v9334_v29 }
 0x2b8   : > { %v9750_v21 = vpop.f32.mrf.mxu0 }
 0x2b9   : > { %14412 = vst [vmem:[#allocation44_spill] sm:$0xff] %v9750_v21  ;;  %v9771_v21 = vpop.f32.mrf.mxu3  ;;  %v9778_v63 = vpop.f32.mrf.mxu2 }
 0x2ba   : > { %14418 = vst [vmem:[#allocation50_spill] sm:$0xff] %v9778_v63 }
 0x2bb   : > { %2019 = vmatmul.f32.gmra.mxu0 %v9350_v31  ;;  %v9773_v31 = vpop.f32.mrf.mxu1 }
 0x2bc   : > { %14416 = vst [vmem:[#allocation48_spill] sm:$0xff] %v9773_v31  ;;  %v1944_v31 = vrot.slane %v9584_v42, 1 }
 0x2c0   : > { %v9759_v33 = vpop.f32.mrf.mxu0 }
 0x2c1   : > { %14413 = vst [vmem:[#allocation45_spill] sm:$0xff] %v9759_v33  ;;  %v9787_v59 = vpop.f32.mrf.mxu2 }
 0x2c2   : > { %14421 = vst [vmem:[#allocation53_spill] sm:$0xff] %v9787_v59 }
 0x2c3   : > { %2022 = vmatmul.f32.gmra.mxu0 %v9368_v61  ;;  %v9780_v61 = vpop.f32.mrf.mxu3  ;;  %v9784_v19 = vpop.f32.mrf.mxu1 }
 0x2c4   : > { %14419 = vst [vmem:[#allocation51_spill] sm:$0xff] %v9780_v61 }
 0x2c5   : > { %14420 = vst [vmem:[#allocation52_spill] sm:$0xff] %v9784_v19 }
 0x2c8   : > { %v9766_v29 = vpop.f32.mrf.mxu0 }
 0x2c9   : > { %14415 = vst [vmem:[#allocation47_spill] sm:$0xff] %v9766_v29  ;;  %v9799_v63 = vpop.f32.mrf.mxu2 }
 0x2ca   : > { %14424 = vst [vmem:[#allocation56_spill] sm:$0xff] %v9799_v63 }
 0x2cb   : > { %2025 = vmatmul.f32.gmra.mxu0 %v9388_v4  ;;  %v9792_v57 = vpop.f32.mrf.mxu3  ;;  %v9797_v61 = vpop.f32.mrf.mxu1 }
 0x2cc   : > { %14422 = vst [vmem:[#allocation54_spill] sm:$0xff] %v9792_v57  ;;  %v14428_v57 = vld [vmem:[#allocation24_spill] sm:$0xff] }
 0x2cd   : > { %14423 = vst [vmem:[#allocation55_spill] sm:$0xff] %v9797_v61 }
 0x2d0   : > { %v9775_v35 = vpop.f32.mrf.mxu0 }
 0x2d1   : > { %14417 = vst [vmem:[#allocation49_spill] sm:$0xff] %v9775_v35  ;;  %v9809_v42 = vpop.f32.mrf.mxu2 }
 0x2d2   : > { %14427 = vst [vmem:[#allocation59_spill] sm:$0xff] %v9809_v42 }
 0x2d3   : > { %2028 = vmatmul.f32.gmra.mxu0 %v9492_v0  ;;  %v1947_v0 = vsel %vm1196_vm2, %v9507_v5, %v1944_v31  ;;  %v9805_v59 = vpop.f32.mrf.mxu1  ;;  %v1961_v5 = vsel %vm1196_vm2, %v1944_v31, %v14428_v57 }
 0x2d4   : > { %14426 = vst [vmem:[#allocation58_spill] sm:$0xff] %v9805_v59 }
 0x2d8   : > { %v9782_v33 = vpop.f32.mrf.mxu0 }
 0x2d9   : > { %v9820_v24 = vpop.f32.mrf.mxu2 }
 0x2da   : > { %14432 = vst [vmem:[#allocation62_spill] sm:$0xff] %v9820_v24 }
 0x2db   : > { %2031 = vmatmul.f32.gmra.mxu0 %v9514_v28  ;;  %v9803_v28 = vpop.f32.mrf.mxu3  ;;  %v9816_v61 = vpop.f32.mrf.mxu1 }
 0x2dc   : > { %14425 = vst [vmem:[#allocation57_spill] sm:$0xff] %v9803_v28 }
 0x2dd   : > { %14430 = vst [vmem:[#allocation60_spill] sm:$0xff] %v9816_v61 }
 0x2e0   : > { %v9789_v4 = vpop.f32.mrf.mxu0 }
 0x2e1   : > { %v9828_v42 = vpop.f32.mrf.mxu2 }
 0x2e2   : > { %14436 = vst [vmem:[#allocation66_spill] sm:$0xff] %v9828_v42 }
 0x2e3   : > { %2034 = vmatmul.f32.gmra.mxu0 %v1947_v0  ;;  %v9814_v0 = vpop.f32.mrf.mxu3  ;;  %v9826_v37 = vpop.f32.mrf.mxu1 }
 0x2e4   : > { %14429 = vst [vmem:[#allocation24_spill] sm:$0xff] %v9814_v0 }
 0x2e5   : > { %14435 = vst [vmem:[#allocation65_spill] sm:$0xff] %v9826_v37 }
 0x2e8   : > { %v9801_v19 = vpop.f32.mrf.mxu0 }
 0x2eb   : > { %2037 = vmatmul.f32.gmra.mxu0 %v1944_v31  ;;  %v9822_v28 = vpop.f32.mrf.mxu3  ;;  %v9834_v31 = vpop.f32.mrf.mxu1 }
 0x2ec   : > { %14433 = vst [vmem:[#allocation63_spill] sm:$0xff] %v9822_v28 }
 0x2ed   : > { %14439 = vst [vmem:[#allocation69_spill] sm:$0xff] %v9834_v31 }
 0x2f0   : > { %v9807_v29 = vpop.f32.mrf.mxu0 }
 0x2f3   : > { %2040 = vmatmul.f32.gmra.mxu0 %v1961_v5  ;;  %v9832_v57 = vpop.f32.mrf.mxu3  ;;  %v9836_v5 = vpop.f32.mrf.mxu2 }
 0x2f4   : > { %14438 = vst [vmem:[#allocation68_spill] sm:$0xff] %v9832_v57  ;;  %v9842_v0 = vpop.f32.mrf.mxu1 }
 0x2f5   : > { %14440 = vst [vmem:[#allocation70_spill] sm:$0xff] %v9836_v5 }
 0x2f6   : > { %14443 = vst [vmem:[#allocation73_spill] sm:$0xff] %v9842_v0 }
 0x2f8   : > { %v9818_v63 = vpop.f32.mrf.mxu0 }
 0x2f9   : > { %14431 = vst [vmem:[#allocation61_spill] sm:$0xff] %v9818_v63 }
 0x2fb   : > { %v9840_v63 = vpop.f32.mrf.mxu3 }
 0x2fc   : > { %14442 = vst [vmem:[#allocation72_spill] sm:$0xff] %v9840_v63  ;;  %v9850_v42 = vpop.f32.mrf.mxu1 }
 0x2fd   : > { %14447 = vst [vmem:[#allocation77_spill] sm:$0xff] %v9850_v42 }
 0x300   : > { %v9824_v59 = vpop.f32.mrf.mxu0 }
 0x301   : > { %14434 = vst [vmem:[#allocation64_spill] sm:$0xff] %v9824_v59  ;;  %v9846_v59 = vpop.f32.mrf.mxu2 }
 0x302   : > { %14445 = vst [vmem:[#allocation75_spill] sm:$0xff] %v9846_v59 }
 0x303   : > { %v9848_v24 = vpop.f32.mrf.mxu3 }
 0x304   : > { %14446 = vst [vmem:[#allocation76_spill] sm:$0xff] %v9848_v24 }
 0x308   : > { %v9830_v35 = vpop.f32.mrf.mxu0 }
 0x309   : > { %14437 = vst [vmem:[#allocation67_spill] sm:$0xff] %v9830_v35  ;;  %v9854_v57 = vpop.f32.mrf.mxu2 }
 0x30a   : > { %14449 = vst [vmem:[#allocation79_spill] sm:$0xff] %v9854_v57 }
 0x30b   : > { %v9856_v61 = vpop.f32.mrf.mxu3 }
 0x30c   : > { %14450 = vst [vmem:[#allocation80_spill] sm:$0xff] %v9856_v61 }
 0x310   : > { %v9838_v40 = vpop.f32.mrf.mxu0 }
 0x311   : > { %14441 = vst [vmem:[#allocation71_spill] sm:$0xff] %v9838_v40  ;;  %v9860_v40 = vpop.f32.mrf.mxu1  ;;  %v9862_v63 = vpop.f32.mrf.mxu2 }
 0x312   : > { %14452 = vst [vmem:[#allocation82_spill] sm:$0xff] %v9860_v40 }
 0x313   : > { %14453 = vst [vmem:[#allocation83_spill] sm:$0xff] %v9862_v63 }
 0x318   : > { %v9844_v28 = vpop.f32.mrf.mxu0 }
 0x319   : > { %14444 = vst [vmem:[#allocation74_spill] sm:$0xff] %v9844_v28  ;;  %v9866_v28 = vpop.f32.mrf.mxu3  ;;  %v9868_v59 = vpop.f32.mrf.mxu1 }
 0x31a   : > { %14455 = vst [vmem:[#allocation85_spill] sm:$0xff] %v9866_v28  ;;  %v9870_v24 = vpop.f32.mrf.mxu2 }
 0x31b   : > { %14456 = vst [vmem:[#allocation86_spill] sm:$0xff] %v9870_v24 }
 0x320   : > { %v9852_v35 = vpop.f32.mrf.mxu0 }
 0x321   : > { %14448 = vst [vmem:[#allocation78_spill] sm:$0xff] %v9852_v35  ;;  %v9874_v35 = vpop.f32.mrf.mxu3  ;;  %v9876_v57 = vpop.f32.mrf.mxu1 }
 0x322   : > { %14458 = vst [vmem:[#allocation88_spill] sm:$0xff] %v9874_v35  ;;  %v1175_v35 = vadd.f32 %v9661_v45, %v9607_v44  ;;  %v1166_v44 = vadd.f32 %v9652_v16, %v9582_v17  ;;  %v1160_v17 = vadd.f32 %v9646_v34, %v9572_v58 }
 0x324   : > { %v1306_v16 = vadd.f32 %v9733_v27, %v1166_v44 }
 0x328   : > { %v9858_v5 = vpop.f32.mrf.mxu0 }
 0x329   : > { %14451 = vst [vmem:[#allocation81_spill] sm:$0xff] %v9858_v5  ;;  %v9880_v5 = vpop.f32.mrf.mxu2  ;;  %v9882_v0 = vpop.f32.mrf.mxu3 }
 0x32a   : > { %14460 = vst [vmem:[#allocation90_spill] sm:$0xff] %v9880_v5  ;;  %v1657_v63 = vpop.f32.mrf.mxu1 }
 0x32b   : > { %14461 = vst [vmem:[#allocation91_spill] sm:$0xff] %v9882_v0  ;;  %v1309_v0 = vadd.f32 %v9757_v9, %v1175_v35 }
 0x330   : > { %v9864_v37 = vpop.f32.mrf.mxu0 }
 0x331   : > { %14454 = vst [vmem:[#allocation84_spill] sm:$0xff] %v9864_v37  ;;  %v9886_v28 = vpop.f32.mrf.mxu2  ;;  %v9888_v42 = vpop.f32.mrf.mxu3 }
 0x332   : > { %14463 = vst [vmem:[#allocation93_spill] sm:$0xff] %v9886_v28 }
 0x333   : > { %14464 = vst [vmem:[#allocation94_spill] sm:$0xff] %v9888_v42  ;;  %v1178_v42 = vadd.f32 %v9664_v52, %v9610_v18  ;;  %v1151_v18 = vadd.f32 %v9637_v62, %v9557_v26  ;;  %v1154_v52 = vadd.f32 %v9640_v22, %v9562_v41  ;;  %v1145_v41 = vadd.f32 %v9628_v13, %v9538_v14 }
 0x338   : > { %v9872_v31 = vpop.f32.mrf.mxu0 }
 0x339   : > { %14457 = vst [vmem:[#allocation87_spill] sm:$0xff] %v9872_v31  ;;  %v1660_v31 = vpop.f32.mrf.mxu1  ;;  %v9894_v40 = vpop.f32.mrf.mxu2 }
 0x340   : > { %v9878_v61 = vpop.f32.mrf.mxu0 }
 0x341   : > { %14459 = vst [vmem:[#allocation89_spill] sm:$0xff] %v9878_v61  ;;  %v1172_v61 = vadd.f32 %v9658_v38, %v9604_v12  ;;  %v1663_v28 = vpop.f32.mrf.mxu1  ;;  %v1163_v12 = vadd.f32 %v9649_v47, %v9577_v60  ;;  %v1133_v47 = vadd.f32 %v9613_v25, %v9453_v43  ;;  %v1810_v62 = vpop.f32.mrf.mxu2  ;;  %v1148_v43 = vadd.f32 %v9634_v10, %v9552_v53 }
 0x342   : > { %v1301_v25 = vadd.f32 %v9595_v55, %v1151_v18 }
 0x343   : > { %v1308_v45 = vadd.f32 %v9748_v23, %v1172_v61  ;;  %v1305_v26 = vadd.f32 %v9724_v6, %v1163_v12  ;;  %v14469_v23 = vld [vmem:[#allocation46_spill] sm:$0xff]  ;;  %v14476_v12 = vld [vmem:[#allocation28_spill] sm:$0xff] }
 0x345   : > { %v1454_v35 = vadd.f32 %v9752_v20, %v1308_v45  ;;  %v1451_v10 = vadd.f32 %v9729_v11, %v1305_v26 }
 0x347   : > { %v1552_v22 = vadd.f32 %v9789_v4, %v1454_v35 }
 0x348   : > { %v9884_v37 = vpop.f32.mrf.mxu0 }
 0x349   : > { %14462 = vst [vmem:[#allocation92_spill] sm:$0xff] %v9884_v37  ;;  %v1169_v37 = vadd.f32 %v9655_v48, %v9598_v51  ;;  %v1310_v51 = vadd.f32 %v9768_v7, %v1178_v42  ;;  %v1455_v48 = vadd.f32 %v9762_v1, %v1309_v0  ;;  %v1157_v7 = vadd.f32 %v9643_v8, %v9567_v50 }
 0x34a   : > { %v1302_v50 = vadd.f32 %v9689_v46, %v1154_v52  ;;  %v1304_v8 = vadd.f32 %v9717_v30, %v1160_v17  ;;  %v14467_v46 = vld [vmem:[#allocation39_spill] sm:$0xff]  ;;  %v14468_v30 = vld [vmem:[#allocation49_spill] sm:$0xff]  ;;  %v1682_v6 = vadd.f32 %v1660_v31, %v1552_v22 }
 0x34b   : > { %v1307_v38 = vadd.f32 %v9741_v2, %v1169_v37  ;;  %v1553_v60 = vadd.f32 %v9801_v19, %v1455_v48  ;;  %v1456_v34 = vadd.f32 %v9771_v21, %v1310_v51  ;;  %v1452_v37 = vadd.f32 %v9736_v15, %v1306_v16  ;;  %v14466_v19 = vld [vmem:[#allocation38_spill] sm:$0xff]  ;;  %v1666_v2 = vpop.f32.mrf.mxu1  ;;  %v1813_v48 = vpop.f32.mrf.mxu2  ;;  %v14478_v52 = vld [vmem:[#allocation33_spill] sm:$0xff] }
 0x34c   : > { %v1136_v21 = vadd.f32 %v9616_v39, %v9478_v54  ;;  %v1139_v53 = vadd.f32 %v9622_v3, %v14466_v19  ;;  %v1303_v55 = vadd.f32 %v9710_v36, %v1157_v7  ;;  %v1142_v27 = vadd.f32 %v9625_v56, %v14467_v46  ;;  %v14471_v39 = vld [vmem:[#allocation42_spill] sm:$0xff]  ;;  %v14472_v3 = vld [vmem:[#allocation47_spill] sm:$0xff]  ;;  %v14474_v56 = vld [vmem:[#allocation20_spill] sm:$0xff] }
 0x34d   : > { %v1453_v58 = vadd.f32 %v9743_v32, %v1307_v38  ;;  %v1683_v13 = vadd.f32 %v1663_v28, %v1553_v60  ;;  %v1554_v32 = vadd.f32 %v9807_v29, %v1456_v34  ;;  %v1299_v15 = vadd.f32 %v9755_v49, %v1145_v41  ;;  %v14470_v29 = vld [vmem:[#allocation18_spill] sm:$0xff]  ;;  %v14473_v36 = vld [vmem:[#allocation19_spill] sm:$0xff]  ;;  %v14475_v49 = vld [vmem:[#allocation21_spill] sm:$0xff] }
 0x34e   : > { %v1550_v9 = vadd.f32 %v14468_v30, %v1452_v37  ;;  %v1447_v54 = vadd.f32 %v14470_v29, %v1301_v25  ;;  %v1450_v61 = vadd.f32 %v14471_v39, %v1304_v8  ;;  %v1549_v4 = vadd.f32 %v14472_v3, %v1451_v10  ;;  %v14477_v38 = vld [vmem:[#allocation45_spill] sm:$0xff]  ;;  %v14479_v16 = vld [vmem:[#allocation22_spill] sm:$0xff]  ;;  %v14482_v41 = vld [vmem:[#allocation44_spill] sm:$0xff] }
 0x34f   : > { %v1551_v14 = vadd.f32 %v9782_v33, %v1453_v58  ;;  %v1300_v33 = vadd.f32 %v14469_v23, %v1148_v43  ;;  %v1448_v28 = vadd.f32 %v14473_v36, %v1302_v50  ;;  %v1830_v42 = vadd.f32 %v1810_v62, %v1683_v13  ;;  %v14480_v7 = vld [vmem:[#allocation34_spill] sm:$0xff]  ;;  %v14481_v62 = vld [vmem:[#allocation35_spill] sm:$0xff]  ;;  %v14483_v34 = vld [vmem:[#allocation36_spill] sm:$0xff] }
 0x350   : > { %v9890_v24 = vpop.f32.mrf.mxu0  ;;  %v1684_v0 = vadd.f32 %v1666_v2, %v1554_v32  ;;  %v1295_v44 = vadd.f32 %v14474_v56, %v1133_v47  ;;  %v1296_v45 = vadd.f32 %v14475_v49, %v1136_v21  ;;  %v1449_v31 = vadd.f32 %v14476_v12, %v1303_v55  ;;  %v14484_v8 = vld [vmem:[#allocation93_spill] sm:$0xff]  ;;  %v14486_v32 = vld [vmem:[#allocation26_spill] sm:$0xff]  ;;  %v14487_v21 = vld [vmem:[#allocation43_spill] sm:$0xff] }
 0x351   : > { %14465 = vst [vmem:[#allocation95_spill] sm:$0xff] %v9890_v24  ;;  %v9905_v24 = vpop.f32.mrf.mxu3  ;;  %v1681_v11 = vadd.f32 %v1657_v63, %v1551_v14  ;;  %v1548_v51 = vadd.f32 %v14477_v38, %v1450_v61  ;;  %v1297_v17 = vadd.f32 %v14478_v52, %v1139_v53  ;;  %v1298_v35 = vadd.f32 %v14479_v16, %v1142_v27  ;;  %v14485_v14 = vld [vmem:[#allocation37_spill] sm:$0xff]  ;;  %v14488_v19 = vld [vmem:[#allocation82_spill] sm:$0xff]  ;;  %v14489_v10 = vld [vmem:[#allocation27_spill] sm:$0xff] }
 0x352   : > { %v1680_v60 = vadd.f32 %v9876_v57, %v1550_v9  ;;  %v1829_v63 = vadd.f32 %v9894_v40, %v1682_v6  ;;  %v1441_v26 = vadd.f32 %v14480_v7, %v1295_v44  ;;  %v1442_v47 = vadd.f32 %v14481_v62, %v1296_v45  ;;  %v14490_v27 = vld [vmem:[#allocation90_spill] sm:$0xff]  ;;  %v14492_v2 = vld [vmem:[#allocation32_spill] sm:$0xff]  ;;  %v14493_v29 = vld [vmem:[#allocation77_spill] sm:$0xff] }
 0x353   : > { %v1547_v58 = vadd.f32 %v14482_v41, %v1449_v31  ;;  %v1679_v22 = vadd.f32 %v9868_v59, %v1549_v4  ;;  %v1443_v43 = vadd.f32 %v14483_v34, %v1297_v17  ;;  %v1831_v50 = vadd.f32 %v1813_v48, %v1684_v0  ;;  %v14495_v3 = vld [vmem:[#allocation25_spill] sm:$0xff]  ;;  %v14498_v56 = vld [vmem:[#allocation31_spill] sm:$0xff]  ;;  %v14502_v17 = vld [vmem:[#allocation30_spill] sm:$0xff] }
 0x354   : > { %v1828_v37 = vadd.f32 %v14484_v8, %v1681_v11  ;;  %v1444_v13 = vadd.f32 %v14485_v14, %v1298_v35  ;;  %v1445_v57 = vadd.f32 %v14486_v32, %v1299_v15  ;;  %v1546_v40 = vadd.f32 %v14487_v21, %v1448_v28  ;;  %v14494_v15 = vld [vmem:[#allocation86_spill] sm:$0xff]  ;;  %v14499_v44 = vld [vmem:[#allocation73_spill] sm:$0xff]  ;;  %v14500_v45 = vld [vmem:[#allocation83_spill] sm:$0xff] }
 0x355   : > { %v1678_v53 = vadd.f32 %v14488_v19, %v1548_v51  ;;  %v1446_v46 = vadd.f32 %v14489_v10, %v1300_v33  ;;  %v1827_v30 = vadd.f32 %v14490_v27, %v1680_v60  ;;  %v1927_v59 = vadd.f32 %v9905_v24, %v1829_v63  ;;  %v9990_v33 = vld [vmem:[%s13930_s4] ss:$0 sm:$0xff]  ;;  %v14501_v38 = vld [vmem:[#allocation91_spill] sm:$0xff]  ;;  %v14503_v35 = vld [vmem:[#allocation69_spill] sm:$0xff] }
 0x356   : > { %v1545_v23 = vadd.f32 %v14492_v2, %v1447_v54  ;;  %v1677_v39 = vadd.f32 %v14493_v29, %v1547_v58  ;;  %v1826_v61 = vadd.f32 %v14494_v15, %v1679_v22  ;;  %v1540_v4 = vadd.f32 %v14495_v3, %v1442_v47  ;;  %v14496_v28 = vld [vmem:[#allocation94_spill] sm:$0xff]  ;;  %v14504_v60 = vld [vmem:[#allocation79_spill] sm:$0xff]  ;;  %v14505_v7 = vld [vmem:[#allocation88_spill] sm:$0xff] }
 0x357   : > { %v1926_v24 = vadd.f32 %v14496_v28, %v1828_v37  ;;  %v1544_v54 = vadd.f32 %v14498_v56, %v1446_v46  ;;  %v1676_v49 = vadd.f32 %v14499_v44, %v1546_v40  ;;  %v1825_v12 = vadd.f32 %v14500_v45, %v1678_v53  ;;  %v14506_v62 = vld [vmem:[#allocation29_spill] sm:$0xff]  ;;  %v14511_v14 = vld [vmem:[#allocation92_spill] sm:$0xff]  ;;  %v14513_v53 = vld [vmem:[#allocation70_spill] sm:$0xff] }
 0x358   : > { %v9898_v5 = vpop.f32.mrf.mxu0  ;;  %v1925_v51 = vadd.f32 %v14501_v38, %v1827_v30  ;;  %v1543_v16 = vadd.f32 %v14502_v17, %v1445_v57  ;;  %v1824_v63 = vadd.f32 %v14504_v60, %v1677_v39  ;;  %v1542_v47 = vadd.f32 %v14506_v62, %v1444_v13  ;;  %v14507_v41 = vld [vmem:[#allocation95_spill] sm:$0xff]  ;;  %v14510_v8 = vld [vmem:[#allocation85_spill] sm:$0xff]  ;;  %v14512_v13 = vld [vmem:[#allocation60_spill] sm:$0xff] }
 0x359   : > { %v1908_v20 = vpop.f32.mrf.mxu3  ;;  %v2056_v48 = vadd.f32 %v9898_v5, %v1926_v24  ;;  %v14508_v5 = vld [vmem:[#allocation65_spill] sm:$0xff]  ;;  %v1923_v37 = vadd.f32 %v14510_v8, %v1825_v12  ;;  %v14514_v10 = vld [vmem:[#allocation80_spill] sm:$0xff]  ;;  %v14516_v2 = vld [vmem:[#allocation58_spill] sm:$0xff] }
 0x35a   : > { %v1928_v25 = vadd.f32 %v1908_v20, %v1830_v42  ;;  %v14491_v20 = vld [vmem:[#allocation40_spill] sm:$0xff]  ;;  %v14497_v42 = vld [vmem:[#allocation41_spill] sm:$0xff]  ;;  %v2055_v58 = vadd.f32 %v14507_v41, %v1925_v51  ;;  %v1673_v19 = vadd.f32 %v14512_v13, %v1543_v16  ;;  %v1922_v46 = vadd.f32 %v14514_v10, %v1824_v63  ;;  %v14517_v29 = vld [vmem:[#allocation66_spill] sm:$0xff] }
 0x35b   : > { %v9981_v6 = vadd.f32 %v14491_v20, %v1441_v26  ;;  %v1541_v0 = vadd.f32 %v14497_v42, %v1443_v43  ;;  %v1924_v26 = vadd.f32 %v14505_v7, %v1826_v61  ;;  %v1674_v43 = vadd.f32 %v14508_v5, %v1544_v54  ;;  %v14515_v27 = vld [vmem:[#allocation89_spill] sm:$0xff]  ;;  %v14518_v15 = vld [vmem:[#allocation76_spill] sm:$0xff]  ;;  %v14519_v3 = vld [vmem:[#allocation87_spill] sm:$0xff] }
 0x35c   : > { %v2076_v57 = vadd.f32 %v9990_v33, %v2056_v48  ;;  %v2053_v30 = vadd.f32 %v14515_v27, %v1923_v37  ;;  %v14520_v42 = vld [vmem:[#allocation55_spill] sm:$0xff]  ;;  %v14521_v54 = vld [vmem:[#allocation62_spill] sm:$0xff]  ;;  %v14523_v12 = vld [vmem:[#allocation84_spill] sm:$0xff] }
 0x35d   : > { %v2054_v32 = vadd.f32 %v14511_v14, %v1924_v26  ;;  %v1821_v39 = vadd.f32 %v14517_v29, %v1674_v43  ;;  %v1671_v56 = vadd.f32 %v14520_v42, %v1541_v0  ;;  %v1820_v44 = vadd.f32 %v14521_v54, %v1673_v19  ;;  %v14525_v16 = vld [vmem:[#allocation59_spill] sm:$0xff]  ;;  %v14527_v0 = vld [vmem:[#allocation81_spill] sm:$0xff]  ;;  %v14528_v62 = vld [vmem:[#allocation48_spill] sm:$0xff] }
 0x35e   : > { %vm2092_vm7 = vcmp.ge.f32.partialorder %v2076_v57, 0.0  ;;  %v2073_v38 = vadd.f32 %v9990_v33, %v2053_v30  ;;  %v14529_v41 = vld [vmem:[#allocation56_spill] sm:$0xff]  ;;  %v14532_v8 = vld [vmem:[#allocation53_spill] sm:$0xff]  ;;  %v14535_v19 = vld [vmem:[#allocation50_spill] sm:$0xff] }
 0x35f   : > { %v2074_v28 = vadd.f32 %v9990_v33, %v2054_v32  ;;  %v14533_v14 = vld [vmem:[#allocation24_spill] sm:$0xff]  ;;  %v14542_v54 = vld [vmem:[#allocation61_spill] sm:$0xff] }
 0x360   : > { %v9929_v1 = vpop.f32.mrf.mxu0  ;;  %vm2089_vm10 = vcmp.ge.f32.partialorder %v2073_v38, 0.0 }
 0x361   : > { %v1911_v55 = vpop.f32.mrf.mxu3  ;;  %v2057_v11 = vadd.f32 %v9929_v1, %v1927_v59  ;;  %v1675_v1 = vadd.f32 %v14503_v35, %v1545_v23  ;;  %v2075_v59 = vadd.f32 %v9990_v33, %v2055_v58  ;;  %v1672_v23 = vadd.f32 %v14516_v2, %v1542_v47 }
 0x362   : > { %v1929_v36 = vadd.f32 %v1911_v55, %v1831_v50  ;;  %v2106_v26 = vmul.f32 0.2, %v2074_v28  ;;  %v1669_v47 = vadd.f32 %v14528_v62, %v9981_v6  ;;  %v1818_v58 = vadd.f32 %v14529_v41, %v1671_v56  ;;  %v2132_v62 = vld [vmem:[#allocation12 + $0x20] sm:$0xff]  ;;  %v2134_v41 = vld [vmem:[#allocation12 + $0x30] sm:$0xff] }
 0x363   : > { %v2077_v22 = vadd.f32 %v9990_v33, %v2057_v11  ;;  %v1822_v55 = vadd.f32 %v14513_v53, %v1675_v1  ;;  %v2108_v11 = vmul.f32 0.2, %v2076_v57  ;;  %v2107_v48 = vmul.f32 0.2, %v2075_v59 }
 0x364   : > { %v1819_v35 = vadd.f32 %v14525_v16, %v1672_v23  ;;  %vm2091_vm8 = vcmp.ge.f32.partialorder %v2075_v59, 0.0  ;;  %vm2090_vm9 = vcmp.ge.f32.partialorder %v2074_v28, 0.0  ;;  %v1816_v53 = vadd.f32 %v14535_v19, %v1669_v47  ;;  %v14539_v23 = vld [vmem:[#allocation67_spill] sm:$0xff]  ;;  %v2133_v47 = vld [vmem:[#allocation12 + $0x28] sm:$0xff]  ;;  %v2586_v19 = vld [vmem:[#allocation9 + $0xd0] sm:$0xff] }
 0x365   : > { %v2109_v20 = vmul.f32 0.2, %v2077_v22  ;;  %vm2093_vm6 = vcmp.ge.f32.partialorder %v2077_v22, 0.0  ;;  %v2124_v7 = vsel %vm2092_vm7, %v2076_v57, %v2108_v11  ;;  %v14534_v57 = vld [vmem:[#allocation74_spill] sm:$0xff] }
 0x366   : > { %v1917_v32 = vadd.f32 %v14533_v14, %v1819_v35  ;;  %v3022_v14 = vld [vmem:[#allocation9 + $0x158] sm:$0xff] }
 0x367   : > { %v2125_v51 = vsel %vm2093_vm6, %v2077_v22, %v2109_v20  ;;  %v14530_v22 = vld [vmem:[#allocation63_spill] sm:$0xff]  ;;  %v14538_v20 = vld [vmem:[#allocation54_spill] sm:$0xff] }
 0x368   : > { %v2038_v18 = vpop.f32.mrf.mxu0 }
 0x369   : > { %v2058_v9 = vadd.f32 %v2038_v18, %v1928_v25  ;;  %v14509_v25 = vld [vmem:[#allocation75_spill] sm:$0xff] }
 0x36a   : > { %v1823_v50 = vadd.f32 %v14509_v25, %v1676_v49  ;;  %v14522_v49 = vld [vmem:[#allocation72_spill] sm:$0xff]  ;;  %v2123_v25 = vsel %vm2091_vm8, %v2075_v59, %v2107_v48 }
 0x36b   : > { %v2078_v18 = vadd.f32 %v9990_v33, %v2058_v9  ;;  %v1920_v45 = vadd.f32 %v14522_v49, %v1822_v55  ;;  %v14536_v55 = vld [vmem:[#allocation57_spill] sm:$0xff] }
 0x36c   : > { %v1921_v61 = vadd.f32 %v14518_v15, %v1823_v50  ;;  %v2105_v50 = vmul.f32 0.2, %v2073_v38  ;;  %v1916_v10 = vadd.f32 %v14536_v55, %v1818_v58  ;;  %v2135_v58 = vld [vmem:[#allocation12 + $0x38] sm:$0xff] }
 0x36d   : > { %v2110_v40 = vmul.f32 0.2, %v2078_v18  ;;  %vm2094_vm5 = vcmp.ge.f32.partialorder %v2078_v18, 0.0  ;;  %v2050_v60 = vadd.f32 %v14527_v0, %v1920_v45  ;;  %v3018_v55 = vld [vmem:[#allocation9 + $0x138] sm:$0xff] }
 0x36e   : > { %v2121_v59 = vsel %vm2089_vm10, %v2073_v38, %v2105_v50  ;;  %v2046_v29 = vadd.f32 %v14539_v23, %v1916_v10  ;;  %v2591_v50 = vld [vmem:[#allocation9 + $0xf8] sm:$0xff]  ;;  %v2585_v10 = vld [vmem:[#allocation9 + $0xc8] sm:$0xff] }
 0x36f   : > { %v2126_v24 = vsel %vm2094_vm5, %v2078_v18, %v2110_v40  ;;  %v14526_v18 = vld [vmem:[#allocation68_spill] sm:$0xff]  ;;  %v2122_v40 = vsel %vm2090_vm9, %v2074_v28, %v2106_v26  ;;  %v2131_v26 = vld [vmem:[#allocation12 + $0x18] sm:$0xff]  ;;  %2592 = vmatpush.msra.mxu2 %v2591_v50 }
 0x370   : > { %v2041_v31 = vpop.f32.mrf.mxu0  ;;  %v1919_v1 = vadd.f32 %v14526_v18, %v1821_v39  ;;  %v14541_v28 = vld [vmem:[#allocation64_spill] sm:$0xff]  ;;  %v2066_v49 = vadd.f32 %v9990_v33, %v2046_v29  ;;  %v3014_v23 = vld [vmem:[#allocation9 + $0x118] sm:$0xff]  ;;  %v2581_v29 = vld [vmem:[#allocation9 + $0xa8] sm:$0xff] }
 0x371   : > { %v2059_v52 = vadd.f32 %v2041_v31, %v1929_v36  ;;  %v2052_v36 = vadd.f32 %v14519_v3, %v1922_v46  ;;  %v2051_v31 = vadd.f32 %v14523_v12, %v1921_v61  ;;  %v14537_v46 = vld [vmem:[#allocation71_spill] sm:$0xff] }
 0x372   : > { %v2047_v27 = vadd.f32 %v14537_v46, %v1917_v32  ;;  %v14540_v3 = vld [vmem:[#allocation51_spill] sm:$0xff]  ;;  %vm2082_vm1 = vcmp.ge.f32.partialorder %v2066_v49, 0.0  ;;  %v2589_v32 = vld [vmem:[#allocation9 + $0xe8] sm:$0xff]  ;;  %v3017_v46 = vld [vmem:[#allocation9 + $0x130] sm:$0xff] }
 0x373   : > { %v2079_v34 = vadd.f32 %v9990_v33, %v2059_v52  ;;  %v14524_v52 = vld [vmem:[#allocation52_spill] sm:$0xff]  ;;  %v2072_v63 = vadd.f32 %v9990_v33, %v2052_v36  ;;  %v2071_v43 = vadd.f32 %v9990_v33, %v2051_v31  ;;  %v1914_v36 = vadd.f32 %v14540_v3, %v1816_v53  ;;  %v2579_v3 = vld [vmem:[#allocation9 + $0x98] sm:$0xff] }
 0x374   : > { %v1670_v17 = vadd.f32 %v14524_v52, %v1540_v4  ;;  %v14531_v4 = vld [vmem:[#allocation78_spill] sm:$0xff]  ;;  %v2067_v11 = vadd.f32 %v9990_v33, %v2047_v27  ;;  %v3019_v53 = vld [vmem:[#allocation9 + $0x140] sm:$0xff] }
 0x375   : > { %vm2095_vm4 = vcmp.ge.f32.partialorder %v2079_v34, 0.0  ;;  %v2111_v21 = vmul.f32 0.2, %v2079_v34  ;;  %v2049_v5 = vadd.f32 %v14531_v4, %v1919_v1  ;;  %v2104_v13 = vmul.f32 0.2, %v2072_v63  ;;  %v3026_v4 = vld [vmem:[#allocation9 + $0x178] sm:$0xff] }
 0x376   : > { %v1817_v37 = vadd.f32 %v14532_v8, %v1670_v17  ;;  %vm2088_vm11 = vcmp.ge.f32.partialorder %v2072_v63, 0.0  ;;  %vm2087_vm12 = vcmp.ge.f32.partialorder %v2071_v43, 0.0  ;;  %vm2083_vm0 = vcmp.ge.f32.partialorder %v2067_v11, 0.0  ;;  %3027 = vmatpush.msra.mxu0 %v3026_v4  ;;  %v2590_v8 = vld [vmem:[#allocation9 + $0xf0] sm:$0xff]  ;;  %v2584_v27 = vld [vmem:[#allocation9 + $0xc0] sm:$0xff] }
 0x377   : > { %v2127_v9 = vsel %vm2095_vm4, %v2079_v34, %v2111_v21  ;;  %v1918_v34 = vadd.f32 %v14530_v22, %v1820_v44  ;;  %v2070_v21 = vadd.f32 %v9990_v33, %v2050_v60  ;;  %v2069_v30 = vadd.f32 %v9990_v33, %v2049_v5  ;;  %v2128_v60 = vld [vmem:[#allocation12] sm:$0xff]  ;;  %v3025_v5 = vld [vmem:[#allocation9 + $0x170] sm:$0xff]  ;;  %2593 = vmatpush.msra.mxu2 %v2590_v8 }
 0x378   : > { %2182 = vmatpush.msra.mxu1 %v2127_v9  ;;  %v2103_v9 = vmul.f32 0.2, %v2071_v43  ;;  %v1915_v2 = vadd.f32 %v14538_v20, %v1817_v37  ;;  %v2120_v15 = vsel %vm2088_vm11, %v2072_v63, %v2104_v13  ;;  %v2044_v44 = vadd.f32 %v14542_v54, %v1914_v36  ;;  %v2136_v22 = vld [vmem:[#allocation12 + $0x40] sm:$0xff]  ;;  %3028 = vmatpush.msra.mxu0 %v3025_v5  ;;  %v2587_v13 = vld [vmem:[#allocation9 + $0xd8] sm:$0xff]  ;;  %v2582_v20 = vld [vmem:[#allocation9 + $0xb0] sm:$0xff] }
 0x379   : > { %v2048_v6 = vadd.f32 %v14534_v57, %v1918_v34  ;;  %v2102_v61 = vmul.f32 0.2, %v2070_v21  ;;  %vm2086_vm13 = vcmp.ge.f32.partialorder %v2070_v21, 0.0  ;;  %v2101_v56 = vmul.f32 0.2, %v2069_v30  ;;  %v2137_v34 = vld [vmem:[#allocation12 + $0x48] sm:$0xff]  ;;  %2594 = vmatpush.msra.mxu2 %v2589_v32 }
 0x37a   : > { %2183 = vmatpush.msra.mxu1 %v2126_v24  ;;  %v2045_v24 = vadd.f32 %v14541_v28, %v1915_v2  ;;  %v2119_v42 = vsel %vm2087_vm12, %v2071_v43, %v2103_v9  ;;  %vm2085_vm14 = vcmp.ge.f32.partialorder %v2069_v30, 0.0  ;;  %v2064_v48 = vadd.f32 %v9990_v33, %v2044_v44  ;;  %v3024_v43 = vld [vmem:[#allocation9 + $0x168] sm:$0xff]  ;;  %v3023_v37 = vld [vmem:[#allocation9 + $0x160] sm:$0xff]  ;;  %v3021_v57 = vld [vmem:[#allocation9 + $0x150] sm:$0xff] }
 0x37b   : > { %v2068_v39 = vadd.f32 %v9990_v33, %v2048_v6  ;;  %v2118_v45 = vsel %vm2086_vm13, %v2070_v21, %v2102_v61  ;;  %v2117_v38 = vsel %vm2085_vm14, %v2069_v30, %v2101_v56  ;;  %v2098_v17 = vmul.f32 0.2, %v2066_v49  ;;  %3029 = vmatpush.msra.mxu0 %v3024_v43  ;;  %v2588_v6 = vld [vmem:[#allocation9 + $0xe0] sm:$0xff]  ;;  %v3020_v21 = vld [vmem:[#allocation9 + $0x148] sm:$0xff]  ;;  %v2578_v28 = vld [vmem:[#allocation9 + $0x90] sm:$0xff] }
 0x37c   : > { %2184 = vmatpush.msra.mxu1 %v2125_v51  ;;  %v2065_v31 = vadd.f32 %v9990_v33, %v2045_v24  ;;  %v2099_v51 = vmul.f32 0.2, %v2067_v11  ;;  %v2096_v1 = vmul.f32 0.2, %v2064_v48  ;;  %vm2080_vm5 = vcmp.ge.f32.partialorder %v2064_v48, 0.0  ;;  %v2130_v33 = vld [vmem:[#allocation12 + $0x10] sm:$0xff]  ;;  %2595 = vmatpush.msra.mxu2 %v2588_v6 }
 0x37d   : > { %v2100_v12 = vmul.f32 0.2, %v2068_v39  ;;  %vm2084_vm15 = vcmp.ge.f32.partialorder %v2068_v39, 0.0  ;;  %v2114_v18 = vsel %vm2082_vm1, %v2066_v49, %v2098_v17  ;;  %3030 = vmatpush.msra.mxu0 %v3023_v37  ;;  %v2140_v30 = vld [vmem:[#allocation12 + $0x60] sm:$0xff]  ;;  %v3016_v9 = vld [vmem:[#allocation9 + $0x128] sm:$0xff]  ;;  %v2142_v56 = vld [vmem:[#allocation12 + $0x70] sm:$0xff] }
 0x37e   : > { %2185 = vmatpush.msra.mxu1 %v2124_v7  ;;  %v2115_v16 = vsel %vm2083_vm0, %v2067_v11, %v2099_v51  ;;  %v2097_v35 = vmul.f32 0.2, %v2065_v31  ;;  %vm2081_vm4 = vcmp.ge.f32.partialorder %v2065_v31, 0.0  ;;  %v2112_v63 = vsel %vm2080_vm5, %v2064_v48, %v2096_v1  ;;  %v2129_v7 = vld [vmem:[#allocation12 + $0x8] sm:$0xff]  ;;  %2596 = vmatpush.msra.mxu2 %v2587_v13  ;;  %v3015_v2 = vld [vmem:[#allocation9 + $0x120] sm:$0xff]  ;;  %v2143_v54 = vld [vmem:[#allocation12 + $0x78] sm:$0xff] }
 0x37f   : > { %v2116_v52 = vsel %vm2084_vm15, %v2068_v39, %v2100_v12  ;;  %3031 = vmatpush.msra.mxu0 %v3022_v14  ;;  %v3013_v39 = vld [vmem:[#allocation9 + $0x110] sm:$0xff]  ;;  %v2141_v61 = vld [vmem:[#allocation12 + $0x68] sm:$0xff]  ;;  %v3011_v24 = vld [vmem:[#allocation9 + $0x100] sm:$0xff] }
 0x380   : > { %2186 = vmatpush.msra.mxu1 %v2123_v25  ;;  %v2113_v0 = vsel %vm2081_vm4, %v2065_v31, %v2097_v35  ;;  %v2138_v25 = vld [vmem:[#allocation12 + $0x50] sm:$0xff]  ;;  %2597 = vmatpush.msra.mxu2 %v2586_v19  ;;  %v3012_v36 = vld [vmem:[#allocation9 + $0x108] sm:$0xff]  ;;  %v2144_v49 = vld [vmem:[#allocation12 + $0x80] sm:$0xff] }
 0x381   : > { %3032 = vmatpush.msra.mxu0 %v3021_v57  ;;  %v2577_v11 = vld [vmem:[#allocation9 + $0x88] sm:$0xff]  ;;  %v14544_v51 = vld [vmem:[#allocation23_spill] sm:$0xff]  ;;  %v2146_v17 = vld [vmem:[#allocation12 + $0x90] sm:$0xff] }
 0x382   : > { %2187 = vmatpush.msra.mxu1 %v2122_v40  ;;  %v2139_v40 = vld [vmem:[#allocation12 + $0x58] sm:$0xff]  ;;  %2598 = vmatpush.msra.mxu2 %v2585_v10  ;;  %v2145_v12 = vld [vmem:[#allocation12 + $0x88] sm:$0xff]  ;;  %v2152_v14 = vld [vmem:[#allocation12 + $0xc0] sm:$0xff]  ;;  %vm5272_vm7 = vcmp.ge.s32.totalorder %v14544_v51, 1 }
 0x383   : > { %3033 = vmatpush.msra.mxu0 %v3020_v21  ;;  %v2147_v1 = vld [vmem:[#allocation12 + $0x98] sm:$0xff]  ;;  %v2153_v21 = vld [vmem:[#allocation12 + $0xc8] sm:$0xff] }
 0x384   : > { %2188 = vmatpush.msra.mxu1 %v2121_v59  ;;  %2599 = vmatpush.msra.mxu2 %v2584_v27  ;;  %v2583_v59 = vld [vmem:[#allocation9 + $0xb8] sm:$0xff] }
 0x385   : > { %3034 = vmatpush.msra.mxu0 %v3019_v53  ;;  %v2154_v53 = vld [vmem:[#allocation12 + $0xd0] sm:$0xff]  ;;  %v2155_v27 = vld [vmem:[#allocation12 + $0xd8] sm:$0xff] }
 0x386   : > { %2189 = vmatpush.msra.mxu1 %v2120_v15  ;;  %2600 = vmatpush.msra.mxu2 %v2583_v59  ;;  %v2580_v15 = vld [vmem:[#allocation9 + $0xa0] sm:$0xff] }
 0x387   : > { %3035 = vmatpush.msra.mxu0 %v3018_v55 }
 0x388   : > { %2190 = vmatpush.msra.mxu1 %v2119_v42  ;;  %2601 = vmatpush.msra.mxu2 %v2582_v20  ;;  %v2576_v42 = vld [vmem:[#allocation9 + $0x80] sm:$0xff] }
 0x389   : > { %3036 = vmatpush.msra.mxu0 %v3017_v46  ;;  %v2156_v20 = vld [vmem:[#allocation12 + $0xe0] sm:$0xff] }
 0x38a   : > { %2191 = vmatpush.msra.mxu1 %v2118_v45  ;;  %2602 = vmatpush.msra.mxu2 %v2581_v29 }
 0x38b   : > { %3037 = vmatpush.msra.mxu0 %v3016_v9 }
 0x38c   : > { %2192 = vmatpush.msra.mxu1 %v2117_v38  ;;  %2603 = vmatpush.msra.mxu2 %v2580_v15 }
 0x38d   : > { %3038 = vmatpush.msra.mxu0 %v3015_v2 }
 0x38e   : > { %2193 = vmatpush.msra.mxu1 %v2116_v52  ;;  %2604 = vmatpush.msra.mxu2 %v2579_v3 }
 0x38f   : > { %3039 = vmatpush.msra.mxu0 %v3014_v23 }
 0x390   : > { %2194 = vmatpush.msra.mxu1 %v2115_v16  ;;  %2605 = vmatpush.msra.mxu2 %v2578_v28 }
 0x391   : > { %3040 = vmatpush.msra.mxu0 %v3013_v39  ;;  %v2157_v39 = vld [vmem:[#allocation12 + $0xe8] sm:$0xff] }
 0x392   : > { %2195 = vmatpush.msra.mxu1 %v2114_v18  ;;  %2606 = vmatpush.msra.mxu2 %v2577_v11 }
 0x393   : > { %3041 = vmatpush.msra.mxu0 %v3012_v36  ;;  %v2158_v36 = vld [vmem:[#allocation12 + $0xf0] sm:$0xff] }
 0x394   : > { %2196 = vmatpush.msra.mxu1 %v2113_v0  ;;  %2607 = vmatpush.msra.mxu2 %v2576_v42  ;;  %v2159_v42 = vld [vmem:[#allocation12 + $0xf8] sm:$0xff] }
 0x395   : > { %3042 = vmatpush.msra.mxu0 %v3011_v24 }
 0x396   : > { %2197 = vmatpush.msra.mxu1 %v2112_v63 }
 0x397   : > { %2198 = vmatmul.f32.vlgmr.msra.gmra.mxu1 %v2128_v60 }
 0x39f   : > { %2201 = vmatmul.f32.gmra.mxu1 %v2129_v7  ;;  %v2148_v7 = vld [vmem:[#allocation12 + $0xa0] sm:$0xff] }
 0x3a7   : > { %2204 = vmatmul.f32.gmra.mxu1 %v2130_v33 }
 0x3af   : > { %2207 = vmatmul.f32.gmra.mxu1 %v2131_v26 }
 0x3b7   : > { %2210 = vmatmul.f32.gmra.mxu1 %v2132_v62 }
 0x3bf   : > { %2213 = vmatmul.f32.gmra.mxu1 %v2133_v47  ;;  %v2149_v47 = vld [vmem:[#allocation12 + $0xa8] sm:$0xff] }
 0x3c7   : > { %2216 = vmatmul.f32.gmra.mxu1 %v2134_v41 }
 0x3cf   : > { %2219 = vmatmul.f32.gmra.mxu1 %v2135_v58 }
 0x3d7   : > { %2222 = vmatmul.f32.gmra.mxu1 %v2136_v22 }
 0x3df   : > { %2225 = vmatmul.f32.gmra.mxu1 %v2137_v34  ;;  %v2150_v34 = vld [vmem:[#allocation12 + $0xb0] sm:$0xff] }
 0x3e7   : > { %2228 = vmatmul.f32.gmra.mxu1 %v2138_v25  ;;  %v2151_v25 = vld [vmem:[#allocation12 + $0xb8] sm:$0xff] }
 0x3ef   : > { %2231 = vmatmul.f32.gmra.mxu1 %v2139_v40 }
 0x3f7   : > { %2234 = vmatmul.f32.gmra.mxu1 %v2140_v30 }
 0x3ff   : > { %2237 = vmatmul.f32.gmra.mxu1 %v2141_v61 }
 0x407   : > { %2240 = vmatmul.f32.gmra.mxu1 %v2142_v56 }
 0x40f   : > { %2243 = vmatmul.f32.gmra.mxu1 %v2143_v54 }
 0x414   : > { %v10058_v44 = vpop.f32.mrf.mxu1 }
 0x415   : > { %2608 = vmatmul.f32.vlgmr.msra.gmra.mxu2 %v10058_v44  ;;  %v10064_v31 = vrot.slane %v10058_v44, 1 }
 0x417   : > { %2246 = vmatmul.f32.gmra.mxu1 %v2144_v49  ;;  %14543 = vst [vmem:[#allocation38_spill] sm:$0xff] %v10064_v31 }
 0x41c   : > { %v10061_v45 = vpop.f32.mrf.mxu1 }
 0x41d   : > { %v2915_v38 = vrot.slane %v10061_v45, 1  ;;  %2611 = vmatmul.f32.gmra.mxu2 %v10061_v45 }
 0x41f   : > { %2249 = vmatmul.f32.gmra.mxu1 %v2145_v12  ;;  %v10071_v48 = vsel %vm1196_vm2, %v10064_v31, %v2915_v38  ;;  %v2160_v12 = vld [vmem:[#allocation12 + $0x100] sm:$0xff] }
 0x420   : > { %14545 = vst [vmem:[#allocation39_spill] sm:$0xff] %v10071_v48  ;;  %3043 = vmatmul.f32.vlgmr.msra.gmra.mxu0 %v10071_v48 }
 0x424   : > { %v10074_v52 = vpop.f32.mrf.mxu1 }
 0x425   : > { %v10077_v16 = vrot.slane %v10074_v52, 1  ;;  %2614 = vmatmul.f32.gmra.mxu2 %v10074_v52 }
 0x427   : > { %14546 = vst [vmem:[#allocation49_spill] sm:$0xff] %v10077_v16  ;;  %2252 = vmatmul.f32.gmra.mxu1 %v2146_v17  ;;  %v10083_v35 = vsel %vm1196_vm2, %v2915_v38, %v10077_v16 }
 0x428   : > { %14547 = vst [vmem:[#allocation46_spill] sm:$0xff] %v10083_v35  ;;  %3046 = vmatmul.f32.gmra.mxu0 %v10083_v35  ;;  %v2167_v35 = vld [vmem:[#allocation12 + $0x138] sm:$0xff] }
 0x42c   : > { %v10086_v18 = vpop.f32.mrf.mxu1 }
 0x42d   : > { %v10089_v0 = vrot.slane %v10086_v18, 1  ;;  %2617 = vmatmul.f32.gmra.mxu2 %v10086_v18 }
 0x42f   : > { %14548 = vst [vmem:[#allocation18_spill] sm:$0xff] %v10089_v0  ;;  %2255 = vmatmul.f32.gmra.mxu1 %v2147_v1  ;;  %v3006_v60 = vsel %vm1196_vm2, %v10077_v16, %v10089_v0 }
 0x430   : > { %3049 = vmatmul.f32.gmra.mxu0 %v3006_v60 }
 0x434   : > { %v10096_v63 = vpop.f32.mrf.mxu1 }
 0x435   : > { %v2918_v33 = vrot.slane %v10096_v63, 1  ;;  %2620 = vmatmul.f32.gmra.mxu2 %v10096_v63 }
 0x437   : > { %2258 = vmatmul.f32.gmra.mxu1 %v2148_v7  ;;  %v10103_v26 = vsel %vm1196_vm2, %v10089_v0, %v2918_v33  ;;  %v2161_v7 = vld [vmem:[#allocation12 + $0x108] sm:$0xff] }
 0x438   : > { %3052 = vmatmul.f32.gmra.mxu0 %v10103_v26 }
 0x43c   : > { %v10106_v62 = vpop.f32.mrf.mxu1 }
 0x43d   : > { %v2919_v41 = vrot.slane %v10106_v62, 1  ;;  %2623 = vmatmul.f32.gmra.mxu2 %v10106_v62 }
 0x43f   : > { %2261 = vmatmul.f32.gmra.mxu1 %v2149_v47  ;;  %v10112_v58 = vsel %vm1196_vm2, %v2918_v33, %v2919_v41 }
 0x440   : > { %3055 = vmatmul.f32.gmra.mxu0 %v10112_v58 }
 0x444   : > { %v10115_v22 = vpop.f32.mrf.mxu1 }
 0x445   : > { %v10118_v4 = vrot.slane %v10115_v22, 1  ;;  %2626 = vmatmul.f32.gmra.mxu2 %v10115_v22 }
 0x447   : > { %14549 = vst [vmem:[#allocation42_spill] sm:$0xff] %v10118_v4  ;;  %2264 = vmatmul.f32.gmra.mxu1 %v2150_v34  ;;  %v10124_v5 = vsel %vm1196_vm2, %v2919_v41, %v10118_v4 }
 0x448   : > { %3058 = vmatmul.f32.gmra.mxu0 %v10124_v5 }
 0x44c   : > { %v10127_v43 = vpop.f32.mrf.mxu1 }
 0x44d   : > { %v2921_v50 = vrot.slane %v10127_v43, 1  ;;  %2629 = vmatmul.f32.gmra.mxu2 %v10127_v43 }
 0x44f   : > { %2267 = vmatmul.f32.gmra.mxu1 %v2151_v25  ;;  %v10134_v8 = vsel %vm1196_vm2, %v10118_v4, %v2921_v50 }
 0x450   : > { %14550 = vst [vmem:[#allocation47_spill] sm:$0xff] %v10134_v8  ;;  %3061 = vmatmul.f32.gmra.mxu0 %v10134_v8 }
 0x454   : > { %v10137_v37 = vpop.f32.mrf.mxu1 }
 0x455   : > { %v2922_v32 = vrot.slane %v10137_v37, 1  ;;  %2632 = vmatmul.f32.gmra.mxu2 %v10137_v37 }
 0x457   : > { %2270 = vmatmul.f32.gmra.mxu1 %v2152_v14  ;;  %v10143_v57 = vsel %vm1196_vm2, %v2921_v50, %v2922_v32  ;;  %v2162_v50 = vld [vmem:[#allocation12 + $0x110] sm:$0xff] }
 0x458   : > { %14551 = vst [vmem:[#allocation19_spill] sm:$0xff] %v10143_v57  ;;  %3064 = vmatmul.f32.gmra.mxu0 %v10143_v57 }
 0x45c   : > { %v10146_v6 = vpop.f32.mrf.mxu1 }
 0x45d   : > { %v2923_v40 = vrot.slane %v10146_v6, 1  ;;  %2635 = vmatmul.f32.gmra.mxu2 %v10146_v6 }
 0x45f   : > { %2273 = vmatmul.f32.gmra.mxu1 %v2153_v21  ;;  %v10152_v13 = vsel %vm1196_vm2, %v2922_v32, %v2923_v40 }
 0x460   : > { %14552 = vst [vmem:[#allocation20_spill] sm:$0xff] %v10152_v13  ;;  %3067 = vmatmul.f32.gmra.mxu0 %v10152_v13 }
 0x464   : > { %v10155_v19 = vpop.f32.mrf.mxu1 }
 0x465   : > { %v2924_v55 = vrot.slane %v10155_v19, 1  ;;  %2638 = vmatmul.f32.gmra.mxu2 %v10155_v19 }
 0x467   : > { %2276 = vmatmul.f32.gmra.mxu1 %v2154_v53  ;;  %v10161_v10 = vsel %vm1196_vm2, %v2923_v40, %v2924_v55 }
 0x468   : > { %14553 = vst [vmem:[#allocation21_spill] sm:$0xff] %v10161_v10  ;;  %3070 = vmatmul.f32.gmra.mxu0 %v10161_v10 }
 0x46c   : > { %v10164_v46 = vpop.f32.mrf.mxu1 }
 0x46d   : > { %v2925_v30 = vrot.slane %v10164_v46, 1  ;;  %2641 = vmatmul.f32.gmra.mxu2 %v10164_v46 }
 0x46f   : > { %2279 = vmatmul.f32.gmra.mxu1 %v2155_v27  ;;  %v10170_v59 = vsel %vm1196_vm2, %v2924_v55, %v2925_v30  ;;  %v2163_v55 = vld [vmem:[#allocation12 + $0x118] sm:$0xff] }
 0x470   : > { %14554 = vst [vmem:[#allocation28_spill] sm:$0xff] %v10170_v59  ;;  %3073 = vmatmul.f32.gmra.mxu0 %v10170_v59 }
 0x474   : > { %v10173_v9 = vpop.f32.mrf.mxu1 }
 0x475   : > { %v2926_v2 = vrot.slane %v10173_v9, 1  ;;  %2644 = vmatmul.f32.gmra.mxu2 %v10173_v9 }
 0x477   : > { %2282 = vmatmul.f32.gmra.mxu1 %v2156_v20  ;;  %v10179_v23 = vsel %vm1196_vm2, %v2925_v30, %v2926_v2 }
 0x478   : > { %14555 = vst [vmem:[#allocation45_spill] sm:$0xff] %v10179_v23  ;;  %3076 = vmatmul.f32.gmra.mxu0 %v10179_v23 }
 0x47c   : > { %v10182_v29 = vpop.f32.mrf.mxu1 }
 0x47d   : > { %v2927_v15 = vrot.slane %v10182_v29, 1  ;;  %2647 = vmatmul.f32.gmra.mxu2 %v10182_v29 }
 0x47f   : > { %2285 = vmatmul.f32.gmra.mxu1 %v2157_v39  ;;  %v10188_v61 = vsel %vm1196_vm2, %v2926_v2, %v2927_v15 }
 0x480   : > { %14556 = vst [vmem:[#allocation33_spill] sm:$0xff] %v10188_v61  ;;  %3079 = vmatmul.f32.gmra.mxu0 %v10188_v61 }
 0x484   : > { %v10191_v3 = vpop.f32.mrf.mxu1 }
 0x485   : > { %v2928_v28 = vrot.slane %v10191_v3, 1  ;;  %2650 = vmatmul.f32.gmra.mxu2 %v10191_v3 }
 0x487   : > { %2288 = vmatmul.f32.gmra.mxu1 %v2158_v36  ;;  %v10197_v24 = vsel %vm1196_vm2, %v2927_v15, %v2928_v28  ;;  %v2164_v15 = vld [vmem:[#allocation12 + $0x120] sm:$0xff] }
 0x488   : > { %14557 = vst [vmem:[#allocation22_spill] sm:$0xff] %v10197_v24  ;;  %3082 = vmatmul.f32.gmra.mxu0 %v10197_v24 }
 0x48c   : > { %v10200_v11 = vpop.f32.mrf.mxu1 }
 0x48d   : > { %14558 = vst [vmem:[#allocation34_spill] sm:$0xff] %v10200_v11  ;;  %v2929_v56 = vrot.slane %v10200_v11, 1  ;;  %2653 = vmatmul.f32.gmra.mxu2 %v10200_v11 }
 0x48f   : > { %2291 = vmatmul.f32.gmra.mxu1 %v2159_v42  ;;  %v10206_v54 = vsel %vm1196_vm2, %v2928_v28, %v2929_v56 }
 0x490   : > { %14559 = vst [vmem:[#allocation35_spill] sm:$0xff] %v10206_v54  ;;  %3085 = vmatmul.f32.gmra.mxu0 %v10206_v54 }
 0x494   : > { %v10209_v49 = vpop.f32.mrf.mxu1 }
 0x495   : > { %14560 = vst [vmem:[#allocation44_spill] sm:$0xff] %v10209_v49  ;;  %v2930_v38 = vrot.slane %v10209_v49, 1  ;;  %2656 = vmatmul.f32.gmra.mxu2 %v10209_v49 }
 0x497   : > { %2294 = vmatmul.f32.gmra.mxu1 %v2160_v12  ;;  %v10215_v17 = vsel %vm1196_vm2, %v2929_v56, %v2930_v38 }
 0x498   : > { %14561 = vst [vmem:[#allocation36_spill] sm:$0xff] %v10215_v17  ;;  %3088 = vmatmul.f32.gmra.mxu0 %v10215_v17  ;;  %v10218_v1 = vpop.f32.mrf.mxu2 }
 0x49c   : > { %v10220_v60 = vpop.f32.mrf.mxu1 }
 0x49d   : > { %14562 = vst [vmem:[#allocation93_spill] sm:$0xff] %v10220_v60  ;;  %v10222_v33 = vpop.f32.mrf.mxu0  ;;  %v2931_v47 = vrot.slane %v10220_v60, 1  ;;  %2659 = vmatmul.f32.gmra.mxu2 %v10220_v60 }
 0x49e   : > { %14563 = vst [vmem:[#allocation37_spill] sm:$0xff] %v10222_v33 }
 0x49f   : > { %2297 = vmatmul.f32.gmra.mxu1 %v2161_v7  ;;  %v10228_v41 = vsel %vm1196_vm2, %v2930_v38, %v2931_v47  ;;  %v2165_v38 = vld [vmem:[#allocation12 + $0x128] sm:$0xff] }
 0x4a0   : > { %14564 = vst [vmem:[#allocation26_spill] sm:$0xff] %v10228_v41  ;;  %3091 = vmatmul.f32.gmra.mxu0 %v10228_v41  ;;  %v10231_v34 = vpop.f32.mrf.mxu2 }
 0x4a1   : > { %14565 = vst [vmem:[#allocation43_spill] sm:$0xff] %v10231_v34  ;;  %v2176_v34 = vld [vmem:[#allocation12 + $0x180] sm:$0xff] }
 0x4a4   : > { %v10233_v25 = vpop.f32.mrf.mxu1 }
 0x4a5   : > { %14566 = vst [vmem:[#allocation82_spill] sm:$0xff] %v10233_v25  ;;  %v10235_v14 = vpop.f32.mrf.mxu0  ;;  %v2932_v32 = vrot.slane %v10233_v25, 1  ;;  %2662 = vmatmul.f32.gmra.mxu2 %v10233_v25 }
 0x4a6   : > { %14567 = vst [vmem:[#allocation27_spill] sm:$0xff] %v10235_v14 }
 0x4a7   : > { %2300 = vmatmul.f32.gmra.mxu1 %v2162_v50  ;;  %v10241_v21 = vsel %vm1196_vm2, %v2931_v47, %v2932_v32 }
 0x4a8   : > { %14568 = vst [vmem:[#allocation90_spill] sm:$0xff] %v10241_v21  ;;  %3094 = vmatmul.f32.gmra.mxu0 %v10241_v21  ;;  %v10244_v40 = vpop.f32.mrf.mxu2 }
 0x4a9   : > { %14569 = vst [vmem:[#allocation40_spill] sm:$0xff] %v10244_v40 }
 0x4ac   : > { %v10246_v53 = vpop.f32.mrf.mxu1 }
 0x4ad   : > { %14570 = vst [vmem:[#allocation32_spill] sm:$0xff] %v10246_v53  ;;  %v10248_v27 = vpop.f32.mrf.mxu0  ;;  %v2933_v30 = vrot.slane %v10246_v53, 1  ;;  %2665 = vmatmul.f32.gmra.mxu2 %v10246_v53 }
 0x4ae   : > { %14571 = vst [vmem:[#allocation77_spill] sm:$0xff] %v10248_v27 }
 0x4af   : > { %2303 = vmatmul.f32.gmra.mxu1 %v2163_v55  ;;  %v10254_v20 = vsel %vm1196_vm2, %v2932_v32, %v2933_v30 }
 0x4b0   : > { %14572 = vst [vmem:[#allocation86_spill] sm:$0xff] %v10254_v20  ;;  %3097 = vmatmul.f32.gmra.mxu0 %v10254_v20  ;;  %v10257_v2 = vpop.f32.mrf.mxu2 }
 0x4b1   : > { %14573 = vst [vmem:[#allocation25_spill] sm:$0xff] %v10257_v2 }
 0x4b4   : > { %v10259_v39 = vpop.f32.mrf.mxu1 }
 0x4b5   : > { %14574 = vst [vmem:[#allocation94_spill] sm:$0xff] %v10259_v39  ;;  %v10261_v36 = vpop.f32.mrf.mxu0  ;;  %v2934_v28 = vrot.slane %v10259_v39, 1  ;;  %2668 = vmatmul.f32.gmra.mxu2 %v10259_v39  ;;  %v2177_v39 = vld [vmem:[#allocation12 + $0x188] sm:$0xff] }
 0x4b6   : > { %14575 = vst [vmem:[#allocation41_spill] sm:$0xff] %v10261_v36 }
 0x4b7   : > { %2306 = vmatmul.f32.gmra.mxu1 %v2164_v15  ;;  %v10267_v42 = vsel %vm1196_vm2, %v2933_v30, %v2934_v28  ;;  %v2166_v30 = vld [vmem:[#allocation12 + $0x130] sm:$0xff] }
 0x4b8   : > { %14576 = vst [vmem:[#allocation31_spill] sm:$0xff] %v10267_v42  ;;  %3100 = vmatmul.f32.gmra.mxu0 %v10267_v42  ;;  %v10270_v56 = vpop.f32.mrf.mxu2 }
 0x4b9   : > { %14577 = vst [vmem:[#allocation73_spill] sm:$0xff] %v10270_v56 }
 0x4bc   : > { %v10272_v12 = vpop.f32.mrf.mxu1 }
 0x4bd   : > { %14578 = vst [vmem:[#allocation83_spill] sm:$0xff] %v10272_v12  ;;  %v10274_v7 = vpop.f32.mrf.mxu0  ;;  %v2935_v47 = vrot.slane %v10272_v12, 1  ;;  %2671 = vmatmul.f32.gmra.mxu2 %v10272_v12  ;;  %v3943_v12 = vld [vmem:[#allocation9 + $0x2e8] sm:$0xff] }
 0x4be   : > { %14579 = vst [vmem:[#allocation91_spill] sm:$0xff] %v10274_v7 }
 0x4bf   : > { %2309 = vmatmul.f32.gmra.mxu1 %v2165_v38  ;;  %v10280_v50 = vsel %vm1196_vm2, %v2934_v28, %v2935_v47 }
 0x4c0   : > { %14580 = vst [vmem:[#allocation30_spill] sm:$0xff] %v10280_v50  ;;  %3103 = vmatmul.f32.gmra.mxu0 %v10280_v50  ;;  %v10283_v32 = vpop.f32.mrf.mxu2 }
 0x4c1   : > { %14581 = vst [vmem:[#allocation69_spill] sm:$0xff] %v10283_v32 }
 0x4c4   : > { %v10285_v55 = vpop.f32.mrf.mxu1 }
 0x4c5   : > { %14582 = vst [vmem:[#allocation79_spill] sm:$0xff] %v10285_v55  ;;  %v10287_v15 = vpop.f32.mrf.mxu0  ;;  %v2936_v4 = vrot.slane %v10285_v55, 1  ;;  %2674 = vmatmul.f32.gmra.mxu2 %v10285_v55 }
 0x4c6   : > { %14583 = vst [vmem:[#allocation88_spill] sm:$0xff] %v10287_v15 }
 0x4c7   : > { %2312 = vmatmul.f32.gmra.mxu1 %v2166_v30  ;;  %v10293_v38 = vsel %vm1196_vm2, %v2935_v47, %v2936_v4 }
 0x4c8   : > { %14584 = vst [vmem:[#allocation29_spill] sm:$0xff] %v10293_v38  ;;  %3106 = vmatmul.f32.gmra.mxu0 %v10293_v38  ;;  %v10296_v28 = vpop.f32.mrf.mxu2 }
 0x4c9   : > { %14585 = vst [vmem:[#allocation95_spill] sm:$0xff] %v10296_v28  ;;  %v2168_v28 = vld [vmem:[#allocation12 + $0x140] sm:$0xff] }
 0x4cc   : > { %v10298_v16 = vpop.f32.mrf.mxu1 }
 0x4cd   : > { %14586 = vst [vmem:[#allocation65_spill] sm:$0xff] %v10298_v16  ;;  %v10300_v48 = vpop.f32.mrf.mxu0  ;;  %v2937_v0 = vrot.slane %v10298_v16, 1  ;;  %2677 = vmatmul.f32.gmra.mxu2 %v10298_v16 }
 0x4ce   : > { %14587 = vst [vmem:[#allocation75_spill] sm:$0xff] %v10300_v48 }
 0x4cf   : > { %2315 = vmatmul.f32.gmra.mxu1 %v2167_v35  ;;  %v10306_v30 = vsel %vm1196_vm2, %v2936_v4, %v2937_v0 }
 0x4d0   : > { %14588 = vst [vmem:[#allocation85_spill] sm:$0xff] %v10306_v30  ;;  %3109 = vmatmul.f32.gmra.mxu0 %v10306_v30  ;;  %v10309_v47 = vpop.f32.mrf.mxu2 }
 0x4d1   : > { %14589 = vst [vmem:[#allocation92_spill] sm:$0xff] %v10309_v47  ;;  %v2169_v47 = vld [vmem:[#allocation12 + $0x148] sm:$0xff] }
 0x4d4   : > { %v10311_v15 = vpop.f32.mrf.mxu1 }
 0x4d5   : > { %14590 = vst [vmem:[#allocation60_spill] sm:$0xff] %v10311_v15  ;;  %v10313_v32 = vpop.f32.mrf.mxu0  ;;  %v2938_v48 = vrot.slane %v10311_v15, 1  ;;  %2680 = vmatmul.f32.gmra.mxu2 %v10311_v15 }
 0x4d6   : > { %14591 = vst [vmem:[#allocation70_spill] sm:$0xff] %v10313_v32 }
 0x4d7   : > { %2318 = vmatmul.f32.gmra.mxu1 %v2168_v28  ;;  %v10319_v35 = vsel %vm1196_vm2, %v2937_v0, %v2938_v48 }
 0x4d8   : > { %14592 = vst [vmem:[#allocation80_spill] sm:$0xff] %v10319_v35  ;;  %3112 = vmatmul.f32.gmra.mxu0 %v10319_v35  ;;  %v10322_v4 = vpop.f32.mrf.mxu2 }
 0x4d9   : > { %14593 = vst [vmem:[#allocation89_spill] sm:$0xff] %v10322_v4  ;;  %v2170_v4 = vld [vmem:[#allocation12 + $0x150] sm:$0xff] }
 0x4dc   : > { %v10324_v7 = vpop.f32.mrf.mxu1 }
 0x4dd   : > { %14594 = vst [vmem:[#allocation58_spill] sm:$0xff] %v10324_v7  ;;  %v10326_v56 = vpop.f32.mrf.mxu0  ;;  %v2939_v32 = vrot.slane %v10324_v7, 1  ;;  %2683 = vmatmul.f32.gmra.mxu2 %v10324_v7 }
 0x4de   : > { %14595 = vst [vmem:[#allocation66_spill] sm:$0xff] %v10326_v56 }
 0x4df   : > { %2321 = vmatmul.f32.gmra.mxu1 %v2169_v47  ;;  %v10332_v28 = vsel %vm1196_vm2, %v2938_v48, %v2939_v32 }
 0x4e0   : > { %14596 = vst [vmem:[#allocation76_spill] sm:$0xff] %v10332_v28  ;;  %3115 = vmatmul.f32.gmra.mxu0 %v10332_v28  ;;  %v10335_v0 = vpop.f32.mrf.mxu2 }
 0x4e1   : > { %14597 = vst [vmem:[#allocation87_spill] sm:$0xff] %v10335_v0  ;;  %v2171_v0 = vld [vmem:[#allocation12 + $0x158] sm:$0xff] }
 0x4e4   : > { %v10337_v15 = vpop.f32.mrf.mxu1 }
 0x4e5   : > { %14598 = vst [vmem:[#allocation55_spill] sm:$0xff] %v10337_v15  ;;  %v10339_v16 = vpop.f32.mrf.mxu0  ;;  %v2940_v56 = vrot.slane %v10337_v15, 1  ;;  %2686 = vmatmul.f32.gmra.mxu2 %v10337_v15 }
 0x4e6   : > { %14599 = vst [vmem:[#allocation62_spill] sm:$0xff] %v10339_v16 }
 0x4e7   : > { %2324 = vmatmul.f32.gmra.mxu1 %v2170_v4  ;;  %v10345_v47 = vsel %vm1196_vm2, %v2939_v32, %v2940_v56 }
 0x4e8   : > { %14600 = vst [vmem:[#allocation72_spill] sm:$0xff] %v10345_v47  ;;  %3118 = vmatmul.f32.gmra.mxu0 %v10345_v47  ;;  %v10348_v48 = vpop.f32.mrf.mxu2 }
 0x4e9   : > { %14601 = vst [vmem:[#allocation84_spill] sm:$0xff] %v10348_v48  ;;  %v2172_v48 = vld [vmem:[#allocation12 + $0x160] sm:$0xff] }
 0x4ec   : > { %v10350_v7 = vpop.f32.mrf.mxu1 }
 0x4ed   : > { %14602 = vst [vmem:[#allocation52_spill] sm:$0xff] %v10350_v7  ;;  %v10352_v36 = vpop.f32.mrf.mxu0  ;;  %v2941_v16 = vrot.slane %v10350_v7, 1  ;;  %2689 = vmatmul.f32.gmra.mxu2 %v10350_v7 }
 0x4ee   : > { %14603 = vst [vmem:[#allocation59_spill] sm:$0xff] %v10352_v36 }
 0x4ef   : > { %2327 = vmatmul.f32.gmra.mxu1 %v2171_v0  ;;  %v10358_v4 = vsel %vm1196_vm2, %v2940_v56, %v2941_v16 }
 0x4f0   : > { %14604 = vst [vmem:[#allocation68_spill] sm:$0xff] %v10358_v4  ;;  %3121 = vmatmul.f32.gmra.mxu0 %v10358_v4  ;;  %v10361_v32 = vpop.f32.mrf.mxu2 }
 0x4f1   : > { %14605 = vst [vmem:[#allocation81_spill] sm:$0xff] %v10361_v32  ;;  %v2173_v32 = vld [vmem:[#allocation12 + $0x168] sm:$0xff] }
 0x4f4   : > { %v10363_v15 = vpop.f32.mrf.mxu1 }
 0x4f5   : > { %14606 = vst [vmem:[#allocation48_spill] sm:$0xff] %v10363_v15  ;;  %v10365_v2 = vpop.f32.mrf.mxu0  ;;  %v2942_v36 = vrot.slane %v10363_v15, 1  ;;  %2692 = vmatmul.f32.gmra.mxu2 %v10363_v15 }
 0x4f6   : > { %14607 = vst [vmem:[#allocation56_spill] sm:$0xff] %v10365_v2 }
 0x4f7   : > { %2330 = vmatmul.f32.gmra.mxu1 %v2172_v48  ;;  %v10371_v0 = vsel %vm1196_vm2, %v2941_v16, %v2942_v36 }
 0x4f8   : > { %14608 = vst [vmem:[#allocation63_spill] sm:$0xff] %v10371_v0  ;;  %3124 = vmatmul.f32.gmra.mxu0 %v10371_v0  ;;  %v10374_v56 = vpop.f32.mrf.mxu2 }
 0x4f9   : > { %14609 = vst [vmem:[#allocation78_spill] sm:$0xff] %v10374_v56  ;;  %v2174_v56 = vld [vmem:[#allocation12 + $0x170] sm:$0xff] }
 0x4fc   : > { %v10376_v7 = vpop.f32.mrf.mxu1 }
 0x4fd   : > { %14610 = vst [vmem:[#allocation53_spill] sm:$0xff] %v10376_v7  ;;  %v10378_v55 = vpop.f32.mrf.mxu0  ;;  %v2943_v2 = vrot.slane %v10376_v7, 1  ;;  %2695 = vmatmul.f32.gmra.mxu2 %v10376_v7  ;;  %v3945_v7 = vld [vmem:[#allocation9 + $0x2f8] sm:$0xff] }
 0x4fe   : > { %14611 = vst [vmem:[#allocation24_spill] sm:$0xff] %v10378_v55  ;;  %3946 = vmatpush.msrb.mxu1 %v3945_v7 }
 0x4ff   : > { %2333 = vmatmul.f32.gmra.mxu1 %v2173_v32  ;;  %v10384_v48 = vsel %vm1196_vm2, %v2942_v36, %v2943_v2 }
 0x500   : > { %14612 = vst [vmem:[#allocation74_spill] sm:$0xff] %v10384_v48  ;;  %3127 = vmatmul.f32.gmra.mxu0 %v10384_v48  ;;  %v10387_v16 = vpop.f32.mrf.mxu2 }
 0x501   : > { %14613 = vst [vmem:[#allocation50_spill] sm:$0xff] %v10387_v16  ;;  %v3944_v16 = vld [vmem:[#allocation9 + $0x2f0] sm:$0xff] }
 0x502   : > { %3947 = vmatpush.msrb.mxu1 %v3944_v16  ;;  %v3941_v16 = vld [vmem:[#allocation9 + $0x2d8] sm:$0xff] }
 0x504   : > { %v10389_v15 = vpop.f32.mrf.mxu1  ;;  %3948 = vmatpush.msrb.mxu1 %v3943_v12 }
 0x505   : > { %14614 = vst [vmem:[#allocation57_spill] sm:$0xff] %v10389_v15  ;;  %v10391_v27 = vpop.f32.mrf.mxu0  ;;  %v2944_v55 = vrot.slane %v10389_v15, 1  ;;  %2698 = vmatmul.f32.gmra.mxu2 %v10389_v15  ;;  %v3940_v15 = vld [vmem:[#allocation9 + $0x2d0] sm:$0xff] }
 0x506   : > { %14615 = vst [vmem:[#allocation71_spill] sm:$0xff] %v10391_v27  ;;  %v2175_v27 = vld [vmem:[#allocation12 + $0x178] sm:$0xff] }
 0x507   : > { %2336 = vmatmul.f32.gmra.mxu1 %v2174_v56  ;;  %v10397_v32 = vsel %vm1196_vm2, %v2943_v2, %v2944_v55  ;;  %v3942_v2 = vld [vmem:[#allocation9 + $0x2e0] sm:$0xff] }
 0x508   : > { %14616 = vst [vmem:[#allocation54_spill] sm:$0xff] %v10397_v32  ;;  %3130 = vmatmul.f32.gmra.mxu0 %v10397_v32  ;;  %v10400_v36 = vpop.f32.mrf.mxu2  ;;  %3949 = vmatpush.msrb.mxu1 %v3942_v2 }
 0x509   : > { %14617 = vst [vmem:[#allocation67_spill] sm:$0xff] %v10400_v36 }
 0x50a   : > { %3950 = vmatpush.msrb.mxu1 %v3941_v16 }
 0x50c   : > { %v10402_v40 = vpop.f32.mrf.mxu1  ;;  %3951 = vmatpush.msrb.mxu1 %v3940_v15  ;;  %v3937_v15 = vld [vmem:[#allocation9 + $0x2b8] sm:$0xff] }
 0x50d   : > { %14618 = vst [vmem:[#allocation51_spill] sm:$0xff] %v10402_v40  ;;  %v10404_v14 = vpop.f32.mrf.mxu0  ;;  %v2945_v56 = vrot.slane %v10402_v40, 1  ;;  %2701 = vmatmul.f32.gmra.mxu2 %v10402_v40  ;;  %v3939_v40 = vld [vmem:[#allocation9 + $0x2c8] sm:$0xff] }
 0x50e   : > { %14619 = vst [vmem:[#allocation64_spill] sm:$0xff] %v10404_v14  ;;  %3952 = vmatpush.msrb.mxu1 %v3939_v40  ;;  %v3934_v40 = vld [vmem:[#allocation9 + $0x2a0] sm:$0xff] }
 0x50f   : > { %2339 = vmatmul.f32.gmra.mxu1 %v2175_v27  ;;  %v10410_v36 = vsel %vm1196_vm2, %v2944_v55, %v2945_v56  ;;  %v3938_v55 = vld [vmem:[#allocation9 + $0x2c0] sm:$0xff] }
 0x510   : > { %14620 = vst [vmem:[#allocation61_spill] sm:$0xff] %v10410_v36  ;;  %3133 = vmatmul.f32.gmra.mxu0 %v10410_v36  ;;  %v10413_v7 = vpop.f32.mrf.mxu2  ;;  %3953 = vmatpush.msrb.mxu1 %v3938_v55 }
 0x511   : > { %14621 = vst [vmem:[#allocation23_spill] sm:$0xff] %v10413_v7  ;;  %v3936_v7 = vld [vmem:[#allocation9 + $0x2b0] sm:$0xff] }
 0x512   : > { %3954 = vmatpush.msrb.mxu1 %v3937_v15  ;;  %v3932_v15 = vld [vmem:[#allocation9 + $0x290] sm:$0xff] }
 0x514   : > { %v10415_v14 = vpop.f32.mrf.mxu1  ;;  %3955 = vmatpush.msrb.mxu1 %v3936_v7  ;;  %v3933_v7 = vld [vmem:[#allocation9 + $0x298] sm:$0xff] }
 0x515   : > { %14622 = vst [vmem:[#allocation96_spill] sm:$0xff] %v10415_v14  ;;  %v10417_v12 = vpop.f32.mrf.mxu0  ;;  %v2946_v27 = vrot.slane %v10415_v14, 1  ;;  %2704 = vmatmul.f32.gmra.mxu2 %v10415_v14  ;;  %v3935_v14 = vld [vmem:[#allocation9 + $0x2a8] sm:$0xff] }
 0x516   : > { %14623 = vst [vmem:[#allocation97_spill] sm:$0xff] %v10417_v12  ;;  %3956 = vmatpush.msrb.mxu1 %v3935_v14 }
 0x517   : > { %2342 = vmatmul.f32.gmra.mxu1 %v2176_v34  ;;  %v10423_v2 = vsel %vm1196_vm2, %v2945_v56, %v2946_v27 }
 0x518   : > { %14624 = vst [vmem:[#allocation98_spill] sm:$0xff] %v10423_v2  ;;  %3136 = vmatmul.f32.gmra.mxu0 %v10423_v2  ;;  %v10426_v16 = vpop.f32.mrf.mxu2  ;;  %3957 = vmatpush.msrb.mxu1 %v3934_v40 }
 0x519   : > { %14625 = vst [vmem:[#allocation99_spill] sm:$0xff] %v10426_v16  ;;  %v2178_v16 = vld [vmem:[#allocation12 + $0x190] sm:$0xff] }
 0x51a   : > { %3958 = vmatpush.msrb.mxu1 %v3933_v7 }
 0x51c   : > { %v10428_v12 = vpop.f32.mrf.mxu1  ;;  %3959 = vmatpush.msrb.mxu1 %v3932_v15  ;;  %v2179_v15 = vld [vmem:[#allocation12 + $0x198] sm:$0xff] }
 0x51d   : > { %14626 = vst [vmem:[#allocation100_spill] sm:$0xff] %v10428_v12  ;;  %v10430_v33 = vpop.f32.mrf.mxu0  ;;  %v2947_v34 = vrot.slane %v10428_v12, 1  ;;  %2707 = vmatmul.f32.gmra.mxu2 %v10428_v12  ;;  %v3931_v12 = vld [vmem:[#allocation9 + $0x288] sm:$0xff] }
 0x51e   : > { %14627 = vst [vmem:[#allocation101_spill] sm:$0xff] %v10430_v33  ;;  %3960 = vmatpush.msrb.mxu1 %v3931_v12 }
 0x51f   : > { %2345 = vmatmul.f32.gmra.mxu1 %v2177_v39  ;;  %v10436_v56 = vsel %vm1196_vm2, %v2946_v27, %v2947_v34  ;;  %v3930_v39 = vld [vmem:[#allocation9 + $0x280] sm:$0xff] }
 0x520   : > { %14628 = vst [vmem:[#allocation102_spill] sm:$0xff] %v10436_v56  ;;  %3139 = vmatmul.f32.gmra.mxu0 %v10436_v56  ;;  %v10439_v55 = vpop.f32.mrf.mxu2  ;;  %3961 = vmatpush.msrb.mxu1 %v3930_v39  ;;  %v2180_v39 = vld [vmem:[#allocation12 + $0x1a0] sm:$0xff] }
 0x521   : > { %14629 = vst [vmem:[#allocation103_spill] sm:$0xff] %v10439_v55 }
 0x524   : > { %v10441_v33 = vpop.f32.mrf.mxu1 }
 0x525   : > { %14630 = vst [vmem:[#allocation104_spill] sm:$0xff] %v10441_v33  ;;  %v10443_v2 = vpop.f32.mrf.mxu0  ;;  %v2948_v14 = vrot.slane %v10441_v33, 1  ;;  %2710 = vmatmul.f32.gmra.mxu2 %v10441_v33 }
 0x526   : > { %14631 = vst [vmem:[#allocation105_spill] sm:$0xff] %v10443_v2 }
 0x527   : > { %2348 = vmatmul.f32.gmra.mxu1 %v2178_v16  ;;  %v10449_v27 = vsel %vm1196_vm2, %v2947_v34, %v2948_v14 }
 0x528   : > { %14632 = vst [vmem:[#allocation106_spill] sm:$0xff] %v10449_v27  ;;  %3142 = vmatmul.f32.gmra.mxu0 %v10449_v27  ;;  %v10452_v40 = vpop.f32.mrf.mxu2 }
 0x529   : > { %14633 = vst [vmem:[#allocation107_spill] sm:$0xff] %v10452_v40 }
 0x52c   : > { %v10454_v7 = vpop.f32.mrf.mxu1 }
 0x52d   : > { %14634 = vst [vmem:[#allocation108_spill] sm:$0xff] %v10454_v7  ;;  %v10456_v2 = vpop.f32.mrf.mxu0  ;;  %v2949_v55 = vrot.slane %v10454_v7, 1  ;;  %2713 = vmatmul.f32.gmra.mxu2 %v10454_v7 }
 0x52e   : > { %14635 = vst [vmem:[#allocation109_spill] sm:$0xff] %v10456_v2 }
 0x52f   : > { %2351 = vmatmul.f32.gmra.mxu1 %v2179_v15  ;;  %v10462_v12 = vsel %vm1196_vm2, %v2948_v14, %v2949_v55 }
 0x530   : > { %14636 = vst [vmem:[#allocation110_spill] sm:$0xff] %v10462_v12  ;;  %3145 = vmatmul.f32.gmra.mxu0 %v10462_v12  ;;  %v10465_v16 = vpop.f32.mrf.mxu2 }
 0x531   : > { %14637 = vst [vmem:[#allocation111_spill] sm:$0xff] %v10465_v16  ;;  %v2181_v16 = vld [vmem:[#allocation12 + $0x1a8] sm:$0xff] }
 0x534   : > { %v10467_v34 = vpop.f32.mrf.mxu1 }
 0x535   : > { %14638 = vst [vmem:[#allocation112_spill] sm:$0xff] %v10467_v34  ;;  %v2950_v40 = vrot.slane %v10467_v34, 1  ;;  %2716 = vmatmul.f32.gmra.mxu2 %v10467_v34  ;;  %v10471_v2 = vpop.f32.mrf.mxu0 }
 0x536   : > { %14639 = vst [vmem:[#allocation113_spill] sm:$0xff] %v10471_v2 }
 0x537   : > { %2354 = vmatmul.f32.gmra.mxu1 %v2180_v39  ;;  %v10475_v15 = vsel %vm1196_vm2, %v2949_v55, %v2950_v40 }
 0x538   : > { %14640 = vst [vmem:[#allocation114_spill] sm:$0xff] %v10475_v15  ;;  %3148 = vmatmul.f32.gmra.mxu0 %v10475_v15  ;;  %v10478_v14 = vpop.f32.mrf.mxu2 }
 0x539   : > { %14641 = vst [vmem:[#allocation115_spill] sm:$0xff] %v10478_v14 }
 0x53c   : > { %v10480_v7 = vpop.f32.mrf.mxu1 }
 0x53d   : > { %14642 = vst [vmem:[#allocation116_spill] sm:$0xff] %v10480_v7  ;;  %v2951_v33 = vrot.slane %v10480_v7, 1  ;;  %2719 = vmatmul.f32.gmra.mxu2 %v10480_v7  ;;  %v10488_v39 = vpop.f32.mrf.mxu0 }
 0x53e   : > { %14644 = vst [vmem:[#allocation118_spill] sm:$0xff] %v10488_v39 }
 0x53f   : > { %2357 = vmatmul.f32.gmra.mxu1 %v2181_v16  ;;  %v10486_v2 = vsel %vm1196_vm2, %v2950_v40, %v2951_v33 }
 0x540   : > { %14643 = vst [vmem:[#allocation117_spill] sm:$0xff] %v10486_v2  ;;  %3151 = vmatmul.f32.gmra.mxu0 %v10486_v2  ;;  %v10491_v55 = vpop.f32.mrf.mxu2  ;;  %v2572_v2 = vld [vmem:[#allocation9 + $0x68] sm:$0xff] }
 0x541   : > { %14645 = vst [vmem:[#allocation119_spill] sm:$0xff] %v10491_v55 }
 0x544   : > { %v10493_v34 = vpop.f32.mrf.mxu1 }
 0x545   : > { %14646 = vst [vmem:[#allocation120_spill] sm:$0xff] %v10493_v34  ;;  %v2952_v14 = vrot.slane %v10493_v34, 1  ;;  %2722 = vmatmul.f32.gmra.mxu2 %v10493_v34  ;;  %v10505_v39 = vpop.f32.mrf.mxu0  ;;  %v2574_v34 = vld [vmem:[#allocation9 + $0x78] sm:$0xff] }
 0x546   : > { %14649 = vst [vmem:[#allocation123_spill] sm:$0xff] %v10505_v39  ;;  %2753 = vmatpush.msra.mxu3 %v2574_v34 }
 0x547   : > { %3962 = vmatmul.f32.vlgmr.msrb.gmra.mxu1 %v10103_v26  ;;  %v10500_v16 = vsel %vm1196_vm2, %v2951_v33, %v2952_v14 }
 0x548   : > { %14647 = vst [vmem:[#allocation121_spill] sm:$0xff] %v10500_v16  ;;  %3154 = vmatmul.f32.gmra.mxu0 %v10500_v16  ;;  %v10503_v40 = vpop.f32.mrf.mxu2 }
 0x549   : > { %14648 = vst [vmem:[#allocation122_spill] sm:$0xff] %v10503_v40  ;;  %v2573_v40 = vld [vmem:[#allocation9 + $0x70] sm:$0xff] }
 0x54a   : > { %2754 = vmatpush.msra.mxu3 %v2573_v40  ;;  %v2570_v40 = vld [vmem:[#allocation9 + $0x58] sm:$0xff] }
 0x54c   : > { %v10507_v7 = vpop.f32.mrf.mxu1  ;;  %2755 = vmatpush.msra.mxu3 %v2572_v2 }
 0x54d   : > { %14650 = vst [vmem:[#allocation124_spill] sm:$0xff] %v10507_v7  ;;  %v2953_v55 = vrot.slane %v10507_v7, 1  ;;  %2725 = vmatmul.f32.gmra.mxu2 %v10507_v7  ;;  %v10519_v39 = vpop.f32.mrf.mxu0 }
 0x54e   : > { %14653 = vst [vmem:[#allocation127_spill] sm:$0xff] %v10519_v39 }
 0x54f   : > { %3965 = vmatmul.f32.gmra.mxu1 %v10112_v58  ;;  %v10514_v26 = vsel %vm1196_vm2, %v2952_v14, %v2953_v55  ;;  %v2571_v58 = vld [vmem:[#allocation9 + $0x60] sm:$0xff] }
 0x550   : > { %14651 = vst [vmem:[#allocation125_spill] sm:$0xff] %v10514_v26  ;;  %3157 = vmatmul.f32.gmra.mxu0 %v10514_v26  ;;  %v10517_v33 = vpop.f32.mrf.mxu2  ;;  %2756 = vmatpush.msra.mxu3 %v2571_v58 }
 0x551   : > { %14652 = vst [vmem:[#allocation126_spill] sm:$0xff] %v10517_v33  ;;  %v2569_v33 = vld [vmem:[#allocation9 + $0x50] sm:$0xff] }
 0x552   : > { %2757 = vmatpush.msra.mxu3 %v2570_v40  ;;  %v2566_v40 = vld [vmem:[#allocation9 + $0x38] sm:$0xff] }
 0x554   : > { %v10521_v16 = vpop.f32.mrf.mxu1  ;;  %2758 = vmatpush.msra.mxu3 %v2569_v33 }
 0x555   : > { %14654 = vst [vmem:[#allocation128_spill] sm:$0xff] %v10521_v16  ;;  %v2954_v7 = vrot.slane %v10521_v16, 1  ;;  %2728 = vmatmul.f32.gmra.mxu2 %v10521_v16  ;;  %v2568_v16 = vld [vmem:[#allocation9 + $0x48] sm:$0xff] }
 0x556   : > { %2759 = vmatpush.msra.mxu3 %v2568_v16  ;;  %v2564_v16 = vld [vmem:[#allocation9 + $0x28] sm:$0xff] }
 0x557   : > { %3968 = vmatmul.f32.gmra.mxu1 %v10124_v5  ;;  %v10528_v14 = vsel %vm1196_vm2, %v2953_v55, %v2954_v7  ;;  %v2567_v5 = vld [vmem:[#allocation9 + $0x40] sm:$0xff]  ;;  %v10537_v55 = vpop.f32.mrf.mxu0 }
 0x558   : > { %14655 = vst [vmem:[#allocation129_spill] sm:$0xff] %v10528_v14  ;;  %3160 = vmatmul.f32.gmra.mxu0 %v10528_v14  ;;  %v10531_v34 = vpop.f32.mrf.mxu2  ;;  %2760 = vmatpush.msra.mxu3 %v2567_v5 }
 0x559   : > { %14656 = vst [vmem:[#allocation130_spill] sm:$0xff] %v10531_v34  ;;  %v2565_v34 = vld [vmem:[#allocation9 + $0x30] sm:$0xff] }
 0x55a   : > { %14658 = vst [vmem:[#allocation132_spill] sm:$0xff] %v10537_v55  ;;  %2761 = vmatpush.msra.mxu3 %v2566_v40  ;;  %v2562_v40 = vld [vmem:[#allocation9 + $0x18] sm:$0xff] }
 0x55c   : > { %v10533_v39 = vpop.f32.mrf.mxu1  ;;  %2762 = vmatpush.msra.mxu3 %v2565_v34 }
 0x55d   : > { %14657 = vst [vmem:[#allocation131_spill] sm:$0xff] %v10533_v39  ;;  %v2955_v2 = vrot.slane %v10533_v39, 1  ;;  %2731 = vmatmul.f32.gmra.mxu2 %v10533_v39 }
 0x55e   : > { %2763 = vmatpush.msra.mxu3 %v2564_v16  ;;  %v3396_v16 = vld [vmem:[#allocation9 + $0x1f0] sm:$0xff] }
 0x55f   : > { %3971 = vmatmul.f32.gmra.mxu1 %v10134_v8  ;;  %v10542_v58 = vsel %vm1196_vm2, %v2954_v7, %v2955_v2  ;;  %v2563_v8 = vld [vmem:[#allocation9 + $0x20] sm:$0xff]  ;;  %v10556_v5 = vpop.f32.mrf.mxu0 }
 0x560   : > { %14659 = vst [vmem:[#allocation133_spill] sm:$0xff] %v10542_v58  ;;  %3163 = vmatmul.f32.gmra.mxu0 %v10542_v58  ;;  %v10545_v33 = vpop.f32.mrf.mxu2  ;;  %2764 = vmatpush.msra.mxu3 %v2563_v8  ;;  %v2561_v58 = vld [vmem:[#allocation9 + $0x10] sm:$0xff]  ;;  %v3395_v8 = vld [vmem:[#allocation9 + $0x1e8] sm:$0xff] }
 0x561   : > { %14660 = vst [vmem:[#allocation134_spill] sm:$0xff] %v10545_v33  ;;  %v3397_v33 = vld [vmem:[#allocation9 + $0x1f8] sm:$0xff] }
 0x562   : > { %14663 = vst [vmem:[#allocation137_spill] sm:$0xff] %v10556_v5  ;;  %2765 = vmatpush.msra.mxu3 %v2562_v40  ;;  %3398 = vmatpush.msrb.mxu2 %v3397_v33  ;;  %v2559_v5 = vld [vmem:[#allocation9] sm:$0xff]  ;;  %v3393_v40 = vld [vmem:[#allocation9 + $0x1d8] sm:$0xff] }
 0x564   : > { %v10547_v39 = vpop.f32.mrf.mxu1  ;;  %2766 = vmatpush.msra.mxu3 %v2561_v58  ;;  %3399 = vmatpush.msrb.mxu2 %v3396_v16  ;;  %v3392_v16 = vld [vmem:[#allocation9 + $0x1d0] sm:$0xff] }
 0x565   : > { %14661 = vst [vmem:[#allocation135_spill] sm:$0xff] %v10547_v39  ;;  %v2956_v55 = vrot.slane %v10547_v39, 1  ;;  %2734 = vmatmul.f32.gmra.mxu2 %v10547_v39  ;;  %v2560_v39 = vld [vmem:[#allocation9 + $0x8] sm:$0xff] }
 0x566   : > { %2767 = vmatpush.msra.mxu3 %v2560_v39  ;;  %3400 = vmatpush.msrb.mxu2 %v3395_v8 }
 0x567   : > { %3974 = vmatmul.f32.gmra.mxu1 %v10143_v57  ;;  %v10554_v7 = vsel %vm1196_vm2, %v2955_v2, %v2956_v55 }
 0x568   : > { %14662 = vst [vmem:[#allocation136_spill] sm:$0xff] %v10554_v7  ;;  %3166 = vmatmul.f32.gmra.mxu0 %v10554_v7  ;;  %v10559_v34 = vpop.f32.mrf.mxu2  ;;  %v3394_v7 = vld [vmem:[#allocation9 + $0x1e0] sm:$0xff]  ;;  %2768 = vmatpush.msra.mxu3 %v2559_v5 }
 0x569   : > { %14664 = vst [vmem:[#allocation138_spill] sm:$0xff] %v10559_v34  ;;  %3401 = vmatpush.msrb.mxu2 %v3394_v7  ;;  %v10573_v34 = vpop.f32.mrf.mxu0 }
 0x56a   : > { %14668 = vst [vmem:[#allocation142_spill] sm:$0xff] %v10573_v34 }
 0x56b   : > { %3402 = vmatpush.msrb.mxu2 %v3393_v40  ;;  %v3389_v40 = vld [vmem:[#allocation9 + $0x1b8] sm:$0xff] }
 0x56c   : > { %v10561_v57 = vpop.f32.mrf.mxu1 }
 0x56d   : > { %14665 = vst [vmem:[#allocation139_spill] sm:$0xff] %v10561_v57  ;;  %v2957_v2 = vrot.slane %v10561_v57, 1  ;;  %2737 = vmatmul.f32.gmra.mxu2 %v10561_v57  ;;  %v3382_v57 = vld [vmem:[#allocation9 + $0x180] sm:$0xff] }
 0x56e   : > { %3403 = vmatpush.msrb.mxu2 %v3392_v16  ;;  %v3388_v16 = vld [vmem:[#allocation9 + $0x1b0] sm:$0xff] }
 0x56f   : > { %3977 = vmatmul.f32.gmra.mxu1 %v10152_v13  ;;  %v10568_v33 = vsel %vm1196_vm2, %v2956_v55, %v2957_v2  ;;  %v3391_v55 = vld [vmem:[#allocation9 + $0x1c8] sm:$0xff]  ;;  %v3390_v13 = vld [vmem:[#allocation9 + $0x1c0] sm:$0xff] }
 0x570   : > { %14666 = vst [vmem:[#allocation140_spill] sm:$0xff] %v10568_v33  ;;  %3169 = vmatmul.f32.gmra.mxu0 %v10568_v33  ;;  %v10571_v58 = vpop.f32.mrf.mxu2  ;;  %3404 = vmatpush.msrb.mxu2 %v3391_v55 }
 0x571   : > { %14667 = vst [vmem:[#allocation141_spill] sm:$0xff] %v10571_v58  ;;  %v10587_v58 = vpop.f32.mrf.mxu0 }
 0x572   : > { %3405 = vmatpush.msrb.mxu2 %v3390_v13  ;;  %14672 = vst [vmem:[#allocation146_spill] sm:$0xff] %v10587_v58  ;;  %v3384_v58 = vld [vmem:[#allocation9 + $0x190] sm:$0xff] }
 0x574   : > { %v10575_v39 = vpop.f32.mrf.mxu1  ;;  %3406 = vmatpush.msrb.mxu2 %v3389_v40 }
 0x575   : > { %14669 = vst [vmem:[#allocation143_spill] sm:$0xff] %v10575_v39  ;;  %v2958_v8 = vrot.slane %v10575_v39, 1  ;;  %2740 = vmatmul.f32.gmra.mxu2 %v10575_v39  ;;  %v4315_v39 = vld [vmem:[#allocation9 + $0x370] sm:$0xff] }
 0x576   : > { %3407 = vmatpush.msrb.mxu2 %v3388_v16  ;;  %v4316_v16 = vld [vmem:[#allocation9 + $0x378] sm:$0xff] }
 0x577   : > { %3980 = vmatmul.f32.gmra.mxu1 %v10161_v10  ;;  %v10582_v7 = vsel %vm1196_vm2, %v2957_v2, %v2958_v8  ;;  %v3387_v10 = vld [vmem:[#allocation9 + $0x1a8] sm:$0xff]  ;;  %v3386_v2 = vld [vmem:[#allocation9 + $0x1a0] sm:$0xff]  ;;  %4317 = vmatpush.msrb.mxu0 %v4316_v16  ;;  %v4311_v16 = vld [vmem:[#allocation9 + $0x350] sm:$0xff] }
 0x578   : > { %14670 = vst [vmem:[#allocation144_spill] sm:$0xff] %v10582_v7  ;;  %3172 = vmatmul.f32.gmra.mxu0 %v10582_v7  ;;  %v10585_v5 = vpop.f32.mrf.mxu2  ;;  %3408 = vmatpush.msrb.mxu2 %v3387_v10 }
 0x579   : > { %14671 = vst [vmem:[#allocation145_spill] sm:$0xff] %v10585_v5  ;;  %v3385_v5 = vld [vmem:[#allocation9 + $0x198] sm:$0xff]  ;;  %4318 = vmatpush.msrb.mxu0 %v4315_v39  ;;  %v4313_v39 = vld [vmem:[#allocation9 + $0x360] sm:$0xff] }
 0x57a   : > { %3409 = vmatpush.msrb.mxu2 %v3386_v2  ;;  %v4312_v2 = vld [vmem:[#allocation9 + $0x358] sm:$0xff] }
 0x57c   : > { %v10589_v34 = vpop.f32.mrf.mxu1  ;;  %3410 = vmatpush.msrb.mxu2 %v3385_v5 }
 0x57d   : > { %14673 = vst [vmem:[#allocation147_spill] sm:$0xff] %v10589_v34  ;;  %v2959_v55 = vrot.slane %v10589_v34, 1  ;;  %2743 = vmatmul.f32.gmra.mxu2 %v10589_v34 }
 0x57e   : > { %3411 = vmatpush.msrb.mxu2 %v3384_v58 }
 0x57f   : > { %3983 = vmatmul.f32.gmra.mxu1 %v10170_v59  ;;  %v10596_v13 = vsel %vm1196_vm2, %v2958_v8, %v2959_v55  ;;  %v3383_v8 = vld [vmem:[#allocation9 + $0x188] sm:$0xff] }
 0x580   : > { %14674 = vst [vmem:[#allocation148_spill] sm:$0xff] %v10596_v13  ;;  %3175 = vmatmul.f32.gmra.mxu0 %v10596_v13  ;;  %v10599_v40 = vpop.f32.mrf.mxu2  ;;  %v4314_v59 = vld [vmem:[#allocation9 + $0x368] sm:$0xff]  ;;  %v10605_v13 = vpop.f32.mrf.mxu0  ;;  %3412 = vmatpush.msrb.mxu2 %v3383_v8 }
 0x581   : > { %14675 = vst [vmem:[#allocation149_spill] sm:$0xff] %v10599_v40  ;;  %4319 = vmatpush.msrb.mxu0 %v4314_v59  ;;  %v10618_v59 = vrot.slane %v10058_v44, 7 }
 0x582   : > { %14677 = vst [vmem:[#allocation151_spill] sm:$0xff] %v10605_v13  ;;  %3413 = vmatpush.msrb.mxu2 %v3382_v57  ;;  %v2464_v13 = vrot.slane %v10061_v45, 7 }
 0x583   : > { %4320 = vmatpush.msrb.mxu0 %v4313_v39  ;;  %14681 = vst [vmem:[#allocation155_spill] sm:$0xff] %v10618_v59 }
 0x584   : > { %v10601_v34 = vpop.f32.mrf.mxu1 }
 0x585   : > { %14676 = vst [vmem:[#allocation150_spill] sm:$0xff] %v10601_v34  ;;  %v2960_v10 = vrot.slane %v10601_v34, 1  ;;  %2746 = vmatmul.f32.gmra.mxu2 %v10601_v34  ;;  %4321 = vmatpush.msrb.mxu0 %v4312_v2  ;;  %v4309_v2 = vld [vmem:[#allocation9 + $0x340] sm:$0xff] }
 0x587   : > { %3986 = vmatmul.f32.gmra.mxu1 %v10179_v23  ;;  %v10610_v5 = vsel %vm1196_vm2, %v2959_v55, %v2960_v10  ;;  %4322 = vmatpush.msrb.mxu0 %v4311_v16  ;;  %v4310_v23 = vld [vmem:[#allocation9 + $0x348] sm:$0xff] }
 0x588   : > { %14678 = vst [vmem:[#allocation152_spill] sm:$0xff] %v10610_v5  ;;  %3178 = vmatmul.f32.gmra.mxu0 %v10610_v5  ;;  %v10613_v58 = vpop.f32.mrf.mxu2 }
 0x589   : > { %14679 = vst [vmem:[#allocation153_spill] sm:$0xff] %v10613_v58  ;;  %4323 = vmatpush.msrb.mxu0 %v4310_v23  ;;  %v10637_v58 = vpop.f32.mrf.mxu0  ;;  %v10649_v23 = vsel %vm1000_vm3, %v10618_v59, %v2464_v13 }
 0x58a   : > { %14684 = vst [vmem:[#allocation158_spill] sm:$0xff] %v10637_v58 }
 0x58b   : > { %4324 = vmatpush.msrb.mxu0 %v4309_v2  ;;  %14686 = vst [vmem:[#allocation160_spill] sm:$0xff] %v10649_v23  ;;  %v4305_v2 = vld [vmem:[#allocation9 + $0x320] sm:$0xff] }
 0x58c   : > { %v10615_v40 = vpop.f32.mrf.mxu1 }
 0x58d   : > { %14680 = vst [vmem:[#allocation154_spill] sm:$0xff] %v10615_v40  ;;  %v10621_v8 = vrot.slane %v10615_v40, 7  ;;  %v10624_v55 = vrot.slane %v10615_v40, 1  ;;  %2749 = vmatmul.f32.gmra.mxu2 %v10615_v40  ;;  %v4307_v40 = vld [vmem:[#allocation9 + $0x330] sm:$0xff] }
 0x58f   : > { %14682 = vst [vmem:[#allocation156_spill] sm:$0xff] %v10621_v8  ;;  %3989 = vmatmul.f32.gmra.mxu1 %v10188_v61  ;;  %v2558_v57 = vsel %vm1000_vm3, %v10621_v8, %v10618_v59  ;;  %v10635_v39 = vsel %vm1196_vm2, %v2960_v10, %v10624_v55  ;;  %v4308_v61 = vld [vmem:[#allocation9 + $0x338] sm:$0xff]  ;;  %v4306_v10 = vld [vmem:[#allocation9 + $0x328] sm:$0xff]  ;;  %v10661_v59 = vrot.slane %v10074_v52, 7 }
 0x590   : > { %14683 = vst [vmem:[#allocation157_spill] sm:$0xff] %v10635_v39  ;;  %2769 = vmatmul.f32.vlgmr.msra.gmra.mxu3 %v2558_v57  ;;  %3181 = vmatmul.f32.gmra.mxu0 %v10635_v39  ;;  %v10640_v16 = vpop.f32.mrf.mxu2  ;;  %v3009_v57 = vsel %vm1196_vm2, %v10624_v55, %v10064_v31  ;;  %v4302_v31 = vld [vmem:[#allocation9 + $0x308] sm:$0xff] }
 0x591   : > { %14685 = vst [vmem:[#allocation159_spill] sm:$0xff] %v10640_v16  ;;  %4325 = vmatpush.msrb.mxu0 %v4308_v61  ;;  %v4303_v16 = vld [vmem:[#allocation9 + $0x310] sm:$0xff] }
 0x592   : > { %14688 = vst [vmem:[#allocation162_spill] sm:$0xff] %v10661_v59 }
 0x593   : > { %4326 = vmatpush.msrb.mxu0 %v4307_v40  ;;  %v4304_v40 = vld [vmem:[#allocation9 + $0x318] sm:$0xff] }
 0x594   : > { %v10643_v8 = vpop.f32.mrf.mxu1 }
 0x595   : > { %4327 = vmatpush.msrb.mxu0 %v4306_v10  ;;  %v10669_v10 = vsel %vm1000_vm3, %v2464_v13, %v10661_v59 }
 0x596   : > { %14689 = vst [vmem:[#allocation163_spill] sm:$0xff] %v10669_v10 }
 0x597   : > { %3992 = vmatmul.f32.gmra.mxu1 %v10197_v24  ;;  %4328 = vmatpush.msrb.mxu0 %v4305_v2  ;;  %v10658_v24 = vpop.f32.mrf.mxu0 }
 0x598   : > { %2772 = vmatmul.f32.gmra.mxu3 %v10649_v23  ;;  %3184 = vmatmul.f32.gmra.mxu0 %v3009_v57  ;;  %v10656_v61 = vpop.f32.mrf.mxu2  ;;  %v4301_v57 = vld [vmem:[#allocation9 + $0x300] sm:$0xff] }
 0x599   : > { %14687 = vst [vmem:[#allocation161_spill] sm:$0xff] %v10656_v61  ;;  %4329 = vmatpush.msrb.mxu0 %v4304_v40  ;;  %v2466_v40 = vrot.slane %v10086_v18, 7 }
 0x59b   : > { %4330 = vmatpush.msrb.mxu0 %v4303_v16 }
 0x59c   : > { %v10663_v58 = vpop.f32.mrf.mxu1 }
 0x59d   : > { %4331 = vmatpush.msrb.mxu0 %v4302_v31  ;;  %v2555_v31 = vsel %vm1000_vm3, %v10661_v59, %v2466_v40 }
 0x59f   : > { %3995 = vmatmul.f32.gmra.mxu1 %v10206_v54  ;;  %4332 = vmatpush.msrb.mxu0 %v4301_v57  ;;  %v10675_v23 = vpop.f32.mrf.mxu0 }
 0x5a0   : > { %2775 = vmatmul.f32.gmra.mxu3 %v10669_v10  ;;  %v10672_v2 = vpop.f32.mrf.mxu2  ;;  %v2467_v10 = vrot.slane %v10096_v63, 7 }
 0x5a1   : > { %14690 = vst [vmem:[#allocation164_spill] sm:$0xff] %v10672_v2 }
 0x5a4   : > { %v10677_v16 = vpop.f32.mrf.mxu1 }
 0x5a5   : > { %14691 = vst [vmem:[#allocation165_spill] sm:$0xff] %v10677_v16  ;;  %v10680_v54 = vrot.slane %v10677_v16, 7 }
 0x5a7   : > { %3998 = vmatmul.f32.gmra.mxu1 %v10215_v17  ;;  %v3380_v13 = vsel %vm1000_vm3, %v10680_v54, %v2466_v40  ;;  %v10694_v61 = vpop.f32.mrf.mxu0  ;;  %v2554_v17 = vsel %vm1000_vm3, %v2466_v40, %v2467_v10  ;;  %v2469_v40 = vrot.slane %v10115_v22, 7 }
 0x5a8   : > { %2778 = vmatmul.f32.gmra.mxu3 %v2555_v31  ;;  %3414 = vmatmul.f32.vlgmr.msrb.gmra.mxu2 %v3380_v13  ;;  %v10689_v57 = vpop.f32.mrf.mxu2  ;;  %v2468_v31 = vrot.slane %v10106_v62, 7 }
 0x5a9   : > { %14692 = vst [vmem:[#allocation166_spill] sm:$0xff] %v10689_v57 }
 0x5aa   : > { %v2553_v57 = vsel %vm1000_vm3, %v2467_v10, %v2468_v31 }
 0x5ac   : > { %v10692_v2 = vpop.f32.mrf.mxu1 }
 0x5ad   : > { %14693 = vst [vmem:[#allocation167_spill] sm:$0xff] %v10692_v2 }
 0x5af   : > { %4001 = vmatmul.f32.gmra.mxu1 %v10228_v41  ;;  %v10707_v2 = vpop.f32.mrf.mxu0 }
 0x5b0   : > { %2781 = vmatmul.f32.gmra.mxu3 %v2554_v17  ;;  %3417 = vmatmul.f32.gmra.mxu2 %v2554_v17  ;;  %v10699_v59 = vpop.f32.mrf.mxu2 }
 0x5b1   : > { %14694 = vst [vmem:[#allocation168_spill] sm:$0xff] %v10699_v59 }
 0x5b4   : > { %v10702_v13 = vpop.f32.mrf.mxu1 }
 0x5b5   : > { %14695 = vst [vmem:[#allocation169_spill] sm:$0xff] %v10702_v13 }
 0x5b7   : > { %4004 = vmatmul.f32.gmra.mxu1 %v10241_v21  ;;  %v2552_v21 = vsel %vm1000_vm3, %v2468_v31, %v2469_v40  ;;  %v10725_v13 = vpop.f32.mrf.mxu0 }
 0x5b8   : > { %2784 = vmatmul.f32.gmra.mxu3 %v2553_v57  ;;  %3420 = vmatmul.f32.gmra.mxu2 %v2553_v57  ;;  %v10709_v41 = vpop.f32.mrf.mxu2 }
 0x5b9   : > { %14696 = vst [vmem:[#allocation170_spill] sm:$0xff] %v10709_v41  ;;  %v2470_v41 = vrot.slane %v10127_v43, 7 }
 0x5bc   : > { %v10712_v17 = vpop.f32.mrf.mxu1 }
 0x5bd   : > { %14697 = vst [vmem:[#allocation171_spill] sm:$0xff] %v10712_v17  ;;  %v10715_v59 = vrot.slane %v10712_v17, 7  ;;  %v2471_v17 = vrot.slane %v10137_v37, 7 }
 0x5bf   : > { %14698 = vst [vmem:[#allocation172_spill] sm:$0xff] %v10715_v59  ;;  %4007 = vmatmul.f32.gmra.mxu1 %v10254_v20  ;;  %v4299_v10 = vsel %vm1000_vm3, %v10715_v59, %v2469_v40  ;;  %v2551_v20 = vsel %vm1000_vm3, %v2469_v40, %v2470_v41 }
 0x5c0   : > { %2787 = vmatmul.f32.gmra.mxu3 %v2552_v21  ;;  %3423 = vmatmul.f32.gmra.mxu2 %v2552_v21  ;;  %v10723_v57 = vpop.f32.mrf.mxu2  ;;  %v10734_v21 = vpop.f32.mrf.mxu0 }
 0x5c1   : > { %4333 = vmatmul.f32.vlgmr.msrb.gmra.mxu0 %v4299_v10  ;;  %v2550_v10 = vsel %vm1000_vm3, %v2470_v41, %v2471_v17  ;;  %v2473_v41 = vrot.slane %v10155_v19, 7 }
 0x5c4   : > { %v10739_v59 = vpop.f32.mrf.mxu1 }
 0x5c5   : > { %14700 = vst [vmem:[#allocation174_spill] sm:$0xff] %v10739_v59 }
 0x5c7   : > { %4010 = vmatmul.f32.gmra.mxu1 %v10267_v42  ;;  %v3623_v42 = vld [vmem:[#allocation9 + $0x278] sm:$0xff] }
 0x5c8   : > { %2790 = vmatmul.f32.gmra.mxu3 %v2551_v20  ;;  %3426 = vmatmul.f32.gmra.mxu2 %v2551_v20  ;;  %v10731_v31 = vpop.f32.mrf.mxu2 }
 0x5c9   : > { %4336 = vmatmul.f32.gmra.mxu0 %v2551_v20  ;;  %14699 = vst [vmem:[#allocation173_spill] sm:$0xff] %v10731_v31  ;;  %3624 = vmatpush.msrb.mxu3 %v3623_v42  ;;  %v2472_v20 = vrot.slane %v10146_v6, 7  ;;  %v10744_v31 = vpop.f32.mrf.mxu0 }
 0x5cb   : > { %v2548_v42 = vsel %vm1000_vm3, %v2472_v20, %v2473_v41 }
 0x5cf   : > { %4013 = vmatmul.f32.gmra.mxu1 %v10280_v50  ;;  %v2549_v50 = vsel %vm1000_vm3, %v2471_v17, %v2472_v20  ;;  %v2474_v17 = vrot.slane %v10164_v46, 7  ;;  %v3622_v20 = vld [vmem:[#allocation9 + $0x270] sm:$0xff] }
 0x5d0   : > { %2793 = vmatmul.f32.gmra.mxu3 %v2550_v10  ;;  %3429 = vmatmul.f32.gmra.mxu2 %v2550_v10  ;;  %v10742_v40 = vpop.f32.mrf.mxu2 }
 0x5d1   : > { %4339 = vmatmul.f32.gmra.mxu0 %v2550_v10  ;;  %14701 = vst [vmem:[#allocation175_spill] sm:$0xff] %v10742_v40  ;;  %v10750_v10 = vpop.f32.mrf.mxu1  ;;  %v10757_v40 = vpop.f32.mrf.mxu0  ;;  %3625 = vmatpush.msrb.mxu3 %v3622_v20 }
 0x5d2   : > { %14702 = vst [vmem:[#allocation176_spill] sm:$0xff] %v10750_v10 }
 0x5d7   : > { %4016 = vmatmul.f32.gmra.mxu1 %v10293_v38 }
 0x5d8   : > { %2796 = vmatmul.f32.gmra.mxu3 %v2549_v50  ;;  %3432 = vmatmul.f32.gmra.mxu2 %v2549_v50  ;;  %v10752_v59 = vpop.f32.mrf.mxu2 }
 0x5d9   : > { %4342 = vmatmul.f32.gmra.mxu0 %v2549_v50  ;;  %v10760_v38 = vpop.f32.mrf.mxu1  ;;  %v2547_v50 = vsel %vm1000_vm3, %v2473_v41, %v2474_v17 }
 0x5da   : > { %14703 = vst [vmem:[#allocation177_spill] sm:$0xff] %v10760_v38 }
 0x5df   : > { %4019 = vmatmul.f32.gmra.mxu1 %v10306_v30  ;;  %v10767_v30 = vpop.f32.mrf.mxu0 }
 0x5e0   : > { %2799 = vmatmul.f32.gmra.mxu3 %v2548_v42  ;;  %3435 = vmatmul.f32.gmra.mxu2 %v2548_v42  ;;  %v10765_v10 = vpop.f32.mrf.mxu2 }
 0x5e1   : > { %4345 = vmatmul.f32.gmra.mxu0 %v2548_v42  ;;  %14704 = vst [vmem:[#allocation178_spill] sm:$0xff] %v10765_v10  ;;  %v2475_v42 = vrot.slane %v10173_v9, 7 }
 0x5e3   : > { %v2546_v38 = vsel %vm1000_vm3, %v2474_v17, %v2475_v42 }
 0x5e7   : > { %4022 = vmatmul.f32.gmra.mxu1 %v10319_v35  ;;  %v10773_v35 = vpop.f32.mrf.mxu1  ;;  %v10778_v10 = vpop.f32.mrf.mxu0 }
 0x5e8   : > { %2802 = vmatmul.f32.gmra.mxu3 %v2547_v50  ;;  %3438 = vmatmul.f32.gmra.mxu2 %v2547_v50  ;;  %14705 = vst [vmem:[#allocation179_spill] sm:$0xff] %v10773_v35  ;;  %v10775_v41 = vpop.f32.mrf.mxu2 }
 0x5e9   : > { %4348 = vmatmul.f32.gmra.mxu0 %v2547_v50  ;;  %14706 = vst [vmem:[#allocation180_spill] sm:$0xff] %v10775_v41  ;;  %v2476_v50 = vrot.slane %v10182_v29, 7 }
 0x5eb   : > { %v2545_v20 = vsel %vm1000_vm3, %v2475_v42, %v2476_v50  ;;  %v3621_v42 = vld [vmem:[#allocation9 + $0x268] sm:$0xff] }
 0x5ec   : > { %3626 = vmatpush.msrb.mxu3 %v3621_v42 }
 0x5ef   : > { %4025 = vmatmul.f32.gmra.mxu1 %v10332_v28  ;;  %v10783_v17 = vpop.f32.mrf.mxu1  ;;  %v2477_v28 = vrot.slane %v10191_v3, 7 }
 0x5f0   : > { %2805 = vmatmul.f32.gmra.mxu3 %v2546_v38  ;;  %3441 = vmatmul.f32.gmra.mxu2 %v2546_v38  ;;  %14707 = vst [vmem:[#allocation181_spill] sm:$0xff] %v10783_v17  ;;  %v10786_v35 = vpop.f32.mrf.mxu2 }
 0x5f1   : > { %4351 = vmatmul.f32.gmra.mxu0 %v2546_v38  ;;  %14708 = vst [vmem:[#allocation182_spill] sm:$0xff] %v10786_v35  ;;  %v10788_v38 = vpop.f32.mrf.mxu0  ;;  %v2544_v41 = vsel %vm1000_vm3, %v2476_v50, %v2477_v28 }
 0x5f7   : > { %4028 = vmatmul.f32.gmra.mxu1 %v10345_v47  ;;  %v10794_v47 = vpop.f32.mrf.mxu1 }
 0x5f8   : > { %2808 = vmatmul.f32.gmra.mxu3 %v2545_v20  ;;  %3444 = vmatmul.f32.gmra.mxu2 %v2545_v20  ;;  %14709 = vst [vmem:[#allocation183_spill] sm:$0xff] %v10794_v47  ;;  %v10796_v17 = vpop.f32.mrf.mxu2 }
 0x5f9   : > { %4354 = vmatmul.f32.gmra.mxu0 %v2545_v20  ;;  %v2478_v20 = vrot.slane %v10200_v11, 7  ;;  %14710 = vst [vmem:[#allocation184_spill] sm:$0xff] %v10796_v17  ;;  %v2480_v17 = vrot.slane %v10220_v60, 7  ;;  %v14720_v60 = vld [vmem:[#allocation98_spill] sm:$0xff] }
 0x5fb   : > { %v2543_v35 = vsel %vm1000_vm3, %v2477_v28, %v2478_v20 }
 0x5ff   : > { %4031 = vmatmul.f32.gmra.mxu1 %v10358_v4  ;;  %v10801_v4 = vpop.f32.mrf.mxu0  ;;  %v10804_v50 = vpop.f32.mrf.mxu1 }
 0x600   : > { %2811 = vmatmul.f32.gmra.mxu3 %v2544_v41  ;;  %3447 = vmatmul.f32.gmra.mxu2 %v2544_v41  ;;  %14711 = vst [vmem:[#allocation185_spill] sm:$0xff] %v10804_v50  ;;  %v10809_v47 = vpop.f32.mrf.mxu2 }
 0x601   : > { %4357 = vmatmul.f32.gmra.mxu0 %v2544_v41  ;;  %v2479_v41 = vrot.slane %v10209_v49, 7  ;;  %14712 = vst [vmem:[#allocation186_spill] sm:$0xff] %v10809_v47  ;;  %v2481_v47 = vrot.slane %v10233_v25, 7 }
 0x603   : > { %v2542_v42 = vsel %vm1000_vm3, %v2478_v20, %v2479_v41 }
 0x607   : > { %4034 = vmatmul.f32.gmra.mxu1 %v10371_v0  ;;  %v10811_v28 = vpop.f32.mrf.mxu0  ;;  %v10817_v50 = vpop.f32.mrf.mxu1 }
 0x608   : > { %2814 = vmatmul.f32.gmra.mxu3 %v2543_v35  ;;  %3450 = vmatmul.f32.gmra.mxu2 %v2543_v35  ;;  %14713 = vst [vmem:[#allocation187_spill] sm:$0xff] %v10811_v28  ;;  %v10819_v20 = vpop.f32.mrf.mxu2 }
 0x609   : > { %4360 = vmatmul.f32.gmra.mxu0 %v2543_v35  ;;  %v2541_v35 = vsel %vm1000_vm3, %v2479_v41, %v2480_v17  ;;  %14714 = vst [vmem:[#allocation188_spill] sm:$0xff] %v10817_v50 }
 0x60a   : > { %14715 = vst [vmem:[#allocation189_spill] sm:$0xff] %v10819_v20 }
 0x60f   : > { %4037 = vmatmul.f32.gmra.mxu1 %v10384_v48  ;;  %v3620_v48 = vld [vmem:[#allocation9 + $0x260] sm:$0xff]  ;;  %v10822_v49 = vpop.f32.mrf.mxu0  ;;  %v10827_v41 = vpop.f32.mrf.mxu1 }
 0x610   : > { %2817 = vmatmul.f32.gmra.mxu3 %v2542_v42  ;;  %3453 = vmatmul.f32.gmra.mxu2 %v2542_v42  ;;  %14716 = vst [vmem:[#allocation190_spill] sm:$0xff] %v10822_v49 }
 0x611   : > { %4363 = vmatmul.f32.gmra.mxu0 %v2542_v42  ;;  %3627 = vmatpush.msrb.mxu3 %v3620_v48  ;;  %14717 = vst [vmem:[#allocation191_spill] sm:$0xff] %v10827_v41  ;;  %v2482_v48 = vrot.slane %v10246_v53, 7 }
 0x613   : > { %v2770_v0 = vpop.f32.mrf.mxu3 }
 0x614   : > { %v2771_v25 = vadd.f32 %v2770_v0, %v10218_v1 }
 0x617   : > { %4040 = vmatmul.f32.gmra.mxu1 %v10397_v32  ;;  %v2540_v32 = vsel %vm1000_vm3, %v2480_v17, %v2481_v47  ;;  %v10832_v20 = vpop.f32.mrf.mxu0  ;;  %v10840_v11 = vpop.f32.mrf.mxu1 }
 0x618   : > { %2820 = vmatmul.f32.gmra.mxu3 %v2541_v35  ;;  %3456 = vmatmul.f32.gmra.mxu2 %v2541_v35  ;;  %14719 = vst [vmem:[#allocation193_spill] sm:$0xff] %v10832_v20  ;;  %v14725_v20 = vld [vmem:[#allocation43_spill] sm:$0xff] }
 0x619   : > { %4366 = vmatmul.f32.gmra.mxu0 %v2541_v35  ;;  %v10829_v35 = vpop.f32.mrf.mxu2 }
 0x61a   : > { %14718 = vst [vmem:[#allocation192_spill] sm:$0xff] %v10829_v35  ;;  %v14722_v35 = vld [vmem:[#allocation94_spill] sm:$0xff] }
 0x61b   : > { %v2773_v42 = vpop.f32.mrf.mxu3  ;;  %v2483_v28 = vrot.slane %v14722_v35, 7 }
 0x61c   : > { %v2774_v1 = vadd.f32 %v2773_v42, %v14725_v20  ;;  %v14730_v42 = vld [vmem:[#allocation40_spill] sm:$0xff] }
 0x61f   : > { %4043 = vmatmul.f32.gmra.mxu1 %v10410_v36  ;;  %v2539_v36 = vsel %vm1000_vm3, %v2481_v47, %v2482_v48  ;;  %v2538_v47 = vsel %vm1000_vm3, %v2482_v48, %v2483_v28  ;;  %v10848_v0 = vpop.f32.mrf.mxu0  ;;  %v10854_v20 = vpop.f32.mrf.mxu1 }
 0x620   : > { %2823 = vmatmul.f32.gmra.mxu3 %v2540_v32  ;;  %3459 = vmatmul.f32.gmra.mxu2 %v2540_v32 }
 0x621   : > { %4369 = vmatmul.f32.gmra.mxu0 %v2540_v32  ;;  %v14721_v32 = vld [vmem:[#allocation37_spill] sm:$0xff] }
 0x622   : > { %v3188_v17 = vadd.f32 %v14721_v32, %v2771_v25  ;;  %14723 = vst [vmem:[#allocation37_spill] sm:$0xff] %v10840_v11  ;;  %v3619_v25 = vld [vmem:[#allocation9 + $0x258] sm:$0xff] }
 0x623   : > { %v2776_v50 = vpop.f32.mrf.mxu3  ;;  %3628 = vmatpush.msrb.mxu3 %v3619_v25 }
 0x627   : > { %4046 = vmatmul.f32.gmra.mxu1 %v14720_v60 }
 0x628   : > { %2826 = vmatmul.f32.gmra.mxu3 %v2539_v36  ;;  %3462 = vmatmul.f32.gmra.mxu2 %v2539_v36 }
 0x629   : > { %4372 = vmatmul.f32.gmra.mxu0 %v2539_v36  ;;  %v14726_v36 = vld [vmem:[#allocation27_spill] sm:$0xff] }
 0x62a   : > { %v3189_v32 = vadd.f32 %v14726_v36, %v2774_v1  ;;  %14729 = vst [vmem:[#allocation27_spill] sm:$0xff] %v10854_v20  ;;  %v10860_v1 = vpop.f32.mrf.mxu0  ;;  %v14734_v20 = vld [vmem:[#allocation25_spill] sm:$0xff] }
 0x62b   : > { %v2779_v41 = vpop.f32.mrf.mxu3  ;;  %v3415_v49 = vpop.f32.mrf.mxu2 }
 0x62c   : > { %v10842_v53 = vadd.f32 %v3415_v49, %v3188_v17  ;;  %v14727_v49 = vld [vmem:[#allocation83_spill] sm:$0xff] }
 0x62d   : > { %v2484_v17 = vrot.slane %v14727_v49, 7 }
 0x62e   : > { %14724 = vst [vmem:[#allocation194_spill] sm:$0xff] %v10842_v53  ;;  %v14737_v53 = vld [vmem:[#allocation65_spill] sm:$0xff] }
 0x62f   : > { %4049 = vmatmul.f32.gmra.mxu1 %v10436_v56  ;;  %v2777_v56 = vadd.f32 %v2776_v50, %v14730_v42  ;;  %v2537_v48 = vsel %vm1000_vm3, %v2483_v28, %v2484_v17  ;;  %v2780_v50 = vadd.f32 %v2779_v41, %v14734_v20  ;;  %v10870_v42 = vpop.f32.mrf.mxu1  ;;  %v14739_v41 = vld [vmem:[#allocation73_spill] sm:$0xff] }
 0x630   : > { %2829 = vmatmul.f32.gmra.mxu3 %v2538_v47  ;;  %3465 = vmatmul.f32.gmra.mxu2 %v2538_v47 }
 0x631   : > { %4375 = vmatmul.f32.gmra.mxu0 %v2538_v47  ;;  %v14731_v47 = vld [vmem:[#allocation77_spill] sm:$0xff] }
 0x632   : > { %v3190_v25 = vadd.f32 %v14731_v47, %v2777_v56  ;;  %14735 = vst [vmem:[#allocation77_spill] sm:$0xff] %v10870_v42 }
 0x633   : > { %v2782_v60 = vpop.f32.mrf.mxu3  ;;  %v3418_v11 = vpop.f32.mrf.mxu2 }
 0x634   : > { %v10852_v35 = vadd.f32 %v3418_v11, %v3189_v32  ;;  %v14732_v11 = vld [vmem:[#allocation79_spill] sm:$0xff]  ;;  %v2783_v20 = vadd.f32 %v2782_v60, %v14739_v41  ;;  %v14745_v41 = vld [vmem:[#allocation69_spill] sm:$0xff] }
 0x635   : > { %v2485_v32 = vrot.slane %v14732_v11, 7  ;;  %v2486_v11 = vrot.slane %v14737_v53, 7 }
 0x636   : > { %14728 = vst [vmem:[#allocation43_spill] sm:$0xff] %v10852_v35 }
 0x637   : > { %4052 = vmatmul.f32.gmra.mxu1 %v10449_v27  ;;  %v2536_v28 = vsel %vm1000_vm3, %v2484_v17, %v2485_v32  ;;  %v2535_v17 = vsel %vm1000_vm3, %v2485_v32, %v2486_v11  ;;  %v14746_v32 = vld [vmem:[#allocation117_spill] sm:$0xff] }
 0x638   : > { %2832 = vmatmul.f32.gmra.mxu3 %v2537_v48  ;;  %3468 = vmatmul.f32.gmra.mxu2 %v2537_v48 }
 0x639   : > { %4378 = vmatmul.f32.gmra.mxu0 %v2537_v48  ;;  %v14736_v48 = vld [vmem:[#allocation41_spill] sm:$0xff] }
 0x63a   : > { %v3191_v56 = vadd.f32 %v14736_v48, %v2780_v50  ;;  %v10882_v50 = vpop.f32.mrf.mxu1  ;;  %v14741_v48 = vld [vmem:[#allocation91_spill] sm:$0xff] }
 0x63b   : > { %v2785_v36 = vpop.f32.mrf.mxu3  ;;  %v3421_v49 = vpop.f32.mrf.mxu2  ;;  %14740 = vst [vmem:[#allocation41_spill] sm:$0xff] %v10882_v50 }
 0x63c   : > { %v10864_v35 = vadd.f32 %v3421_v49, %v3190_v25  ;;  %v10874_v49 = vpop.f32.mrf.mxu0 }
 0x63e   : > { %14733 = vst [vmem:[#allocation40_spill] sm:$0xff] %v10864_v35  ;;  %v14748_v35 = vld [vmem:[#allocation58_spill] sm:$0xff] }
 0x63f   : > { %4055 = vmatmul.f32.gmra.mxu1 %v10462_v12  ;;  %v3192_v12 = vadd.f32 %v14741_v48, %v2783_v20  ;;  %v14747_v20 = vld [vmem:[#allocation88_spill] sm:$0xff] }
 0x640   : > { %2835 = vmatmul.f32.gmra.mxu3 %v2536_v28  ;;  %3471 = vmatmul.f32.gmra.mxu2 %v2536_v28 }
 0x641   : > { %4381 = vmatmul.f32.gmra.mxu0 %v2536_v28  ;;  %v3618_v28 = vld [vmem:[#allocation9 + $0x250] sm:$0xff] }
 0x642   : > { %3629 = vmatpush.msrb.mxu3 %v3618_v28 }
 0x643   : > { %v2788_v47 = vpop.f32.mrf.mxu3  ;;  %v3424_v27 = vpop.f32.mrf.mxu2 }
 0x644   : > { %v10876_v25 = vadd.f32 %v3424_v27, %v3191_v56  ;;  %v14742_v27 = vld [vmem:[#allocation60_spill] sm:$0xff]  ;;  %v10888_v60 = vpop.f32.mrf.mxu0 }
 0x645   : > { %v2487_v56 = vrot.slane %v14742_v27, 7  ;;  %14744 = vst [vmem:[#allocation91_spill] sm:$0xff] %v10888_v60  ;;  %v2488_v27 = vrot.slane %v14748_v35, 7  ;;  %v14754_v60 = vld [vmem:[#allocation55_spill] sm:$0xff] }
 0x646   : > { %14738 = vst [vmem:[#allocation25_spill] sm:$0xff] %v10876_v25 }
 0x647   : > { %4058 = vmatmul.f32.gmra.mxu1 %v10475_v15  ;;  %v2786_v15 = vadd.f32 %v2785_v36, %v14745_v41  ;;  %v14751_v36 = vld [vmem:[#allocation95_spill] sm:$0xff] }
 0x648   : > { %2838 = vmatmul.f32.gmra.mxu3 %v2535_v17  ;;  %3474 = vmatmul.f32.gmra.mxu2 %v2535_v17  ;;  %v2789_v41 = vadd.f32 %v2788_v47, %v14751_v36 }
 0x649   : > { %4384 = vmatmul.f32.gmra.mxu0 %v2535_v17  ;;  %v2534_v17 = vsel %vm1000_vm3, %v2486_v11, %v2487_v56  ;;  %v3193_v28 = vadd.f32 %v14747_v20, %v2786_v15  ;;  %v2533_v11 = vsel %vm1000_vm3, %v2487_v56, %v2488_v27  ;;  %v14753_v15 = vld [vmem:[#allocation75_spill] sm:$0xff] }
 0x64b   : > { %v2791_v42 = vpop.f32.mrf.mxu3  ;;  %v3427_v53 = vpop.f32.mrf.mxu2 }
 0x64c   : > { %v10886_v25 = vadd.f32 %v3427_v53, %v3192_v12  ;;  %v10896_v53 = vpop.f32.mrf.mxu1 }
 0x64d   : > { %14749 = vst [vmem:[#allocation69_spill] sm:$0xff] %v10896_v53  ;;  %v2489_v53 = vrot.slane %v14754_v60, 7 }
 0x64e   : > { %14743 = vst [vmem:[#allocation73_spill] sm:$0xff] %v10886_v25  ;;  %v10900_v25 = vpop.f32.mrf.mxu0 }
 0x64f   : > { %4061 = vmatmul.f32.gmra.mxu1 %v14746_v32  ;;  %v14752_v32 = vld [vmem:[#allocation121_spill] sm:$0xff]  ;;  %v2532_v56 = vsel %vm1000_vm3, %v2488_v27, %v2489_v53 }
 0x650   : > { %2841 = vmatmul.f32.gmra.mxu3 %v2534_v17  ;;  %3477 = vmatmul.f32.gmra.mxu2 %v2534_v17 }
 0x651   : > { %4387 = vmatmul.f32.gmra.mxu0 %v2534_v17  ;;  %v3194_v17 = vadd.f32 %v14753_v15, %v2789_v41  ;;  %v3617_v41 = vld [vmem:[#allocation9 + $0x248] sm:$0xff] }
 0x652   : > { %3630 = vmatpush.msrb.mxu3 %v3617_v41 }
 0x653   : > { %v2794_v48 = vpop.f32.mrf.mxu3  ;;  %v3430_v50 = vpop.f32.mrf.mxu2 }
 0x654   : > { %v10898_v12 = vadd.f32 %v3430_v50, %v3193_v28  ;;  %v10910_v28 = vpop.f32.mrf.mxu1 }
 0x655   : > { %14756 = vst [vmem:[#allocation75_spill] sm:$0xff] %v10910_v28 }
 0x656   : > { %14750 = vst [vmem:[#allocation88_spill] sm:$0xff] %v10898_v12  ;;  %v14757_v12 = vld [vmem:[#allocation92_spill] sm:$0xff]  ;;  %v10916_v36 = vpop.f32.mrf.mxu0 }
 0x657   : > { %4064 = vmatmul.f32.gmra.mxu1 %v14752_v32  ;;  %v2792_v47 = vadd.f32 %v2791_v42, %v14757_v12  ;;  %v14759_v32 = vld [vmem:[#allocation52_spill] sm:$0xff]  ;;  %v14761_v42 = vld [vmem:[#allocation89_spill] sm:$0xff] }
 0x658   : > { %2844 = vmatmul.f32.gmra.mxu3 %v2533_v11  ;;  %3480 = vmatmul.f32.gmra.mxu2 %v2533_v11  ;;  %v2490_v28 = vrot.slane %v14759_v32, 7  ;;  %v2795_v12 = vadd.f32 %v2794_v48, %v14761_v42  ;;  %v14767_v48 = vld [vmem:[#allocation87_spill] sm:$0xff] }
 0x659   : > { %4390 = vmatmul.f32.gmra.mxu0 %v2533_v11  ;;  %v14758_v11 = vld [vmem:[#allocation70_spill] sm:$0xff] }
 0x65a   : > { %v3195_v15 = vadd.f32 %v14758_v11, %v2792_v47  ;;  %v2531_v27 = vsel %vm1000_vm3, %v2489_v53, %v2490_v28 }
 0x65b   : > { %v2797_v20 = vpop.f32.mrf.mxu3  ;;  %v3433_v35 = vpop.f32.mrf.mxu2 }
 0x65c   : > { %v10908_v50 = vadd.f32 %v3433_v35, %v3194_v17  ;;  %v2798_v42 = vadd.f32 %v2797_v20, %v14767_v48  ;;  %v14774_v20 = vld [vmem:[#allocation84_spill] sm:$0xff] }
 0x65e   : > { %14755 = vst [vmem:[#allocation95_spill] sm:$0xff] %v10908_v50  ;;  %v10928_v47 = vpop.f32.mrf.mxu0 }
 0x65f   : > { %4067 = vmatmul.f32.gmra.mxu1 %v10514_v26  ;;  %v10926_v26 = vpop.f32.mrf.mxu1  ;;  %14763 = vst [vmem:[#allocation89_spill] sm:$0xff] %v10928_v47  ;;  %v14771_v47 = vld [vmem:[#allocation53_spill] sm:$0xff] }
 0x660   : > { %2847 = vmatmul.f32.gmra.mxu3 %v2532_v56  ;;  %3483 = vmatmul.f32.gmra.mxu2 %v2532_v56  ;;  %14762 = vst [vmem:[#allocation70_spill] sm:$0xff] %v10926_v26  ;;  %v14770_v26 = vld [vmem:[#allocation62_spill] sm:$0xff] }
 0x661   : > { %4393 = vmatmul.f32.gmra.mxu0 %v2532_v56  ;;  %v14764_v56 = vld [vmem:[#allocation66_spill] sm:$0xff] }
 0x662   : > { %v3196_v41 = vadd.f32 %v14764_v56, %v2795_v12  ;;  %v3197_v12 = vadd.f32 %v14770_v26, %v2798_v42  ;;  %v14776_v26 = vld [vmem:[#allocation59_spill] sm:$0xff] }
 0x663   : > { %v2800_v35 = vpop.f32.mrf.mxu3  ;;  %v3436_v17 = vpop.f32.mrf.mxu2 }
 0x664   : > { %v10920_v60 = vadd.f32 %v3436_v17, %v3195_v15  ;;  %v14765_v15 = vld [vmem:[#allocation48_spill] sm:$0xff]  ;;  %v2801_v48 = vadd.f32 %v2800_v35, %v14774_v20  ;;  %v14780_v20 = vld [vmem:[#allocation81_spill] sm:$0xff] }
 0x665   : > { %v2491_v17 = vrot.slane %v14765_v15, 7  ;;  %v2492_v15 = vrot.slane %v14771_v47, 7 }
 0x666   : > { %14760 = vst [vmem:[#allocation92_spill] sm:$0xff] %v10920_v60  ;;  %v3198_v42 = vadd.f32 %v14776_v26, %v2801_v48  ;;  %v14781_v48 = vld [vmem:[#allocation56_spill] sm:$0xff] }
 0x667   : > { %4070 = vmatmul.f32.gmra.mxu1 %v10528_v14  ;;  %v14768_v14 = vld [vmem:[#allocation133_spill] sm:$0xff]  ;;  %v2530_v53 = vsel %vm1000_vm3, %v2490_v28, %v2491_v17  ;;  %v2529_v28 = vsel %vm1000_vm3, %v2491_v17, %v2492_v15 }
 0x668   : > { %2850 = vmatmul.f32.gmra.mxu3 %v2531_v27  ;;  %3486 = vmatmul.f32.gmra.mxu2 %v2531_v27 }
 0x669   : > { %4396 = vmatmul.f32.gmra.mxu0 %v2531_v27  ;;  %v10938_v27 = vpop.f32.mrf.mxu1 }
 0x66a   : > { %14769 = vst [vmem:[#allocation87_spill] sm:$0xff] %v10938_v27 }
 0x66b   : > { %v2803_v11 = vpop.f32.mrf.mxu3  ;;  %v3439_v32 = vpop.f32.mrf.mxu2 }
 0x66c   : > { %v10932_v60 = vadd.f32 %v3439_v32, %v3196_v41  ;;  %v10942_v32 = vpop.f32.mrf.mxu0 }
 0x66d   : > { %14772 = vst [vmem:[#allocation62_spill] sm:$0xff] %v10942_v32 }
 0x66e   : > { %14766 = vst [vmem:[#allocation66_spill] sm:$0xff] %v10932_v60  ;;  %v14777_v60 = vld [vmem:[#allocation57_spill] sm:$0xff] }
 0x66f   : > { %4073 = vmatmul.f32.gmra.mxu1 %v14768_v14  ;;  %v14775_v14 = vld [vmem:[#allocation136_spill] sm:$0xff]  ;;  %v2493_v32 = vrot.slane %v14777_v60, 7  ;;  %v14782_v60 = vld [vmem:[#allocation51_spill] sm:$0xff] }
 0x670   : > { %2853 = vmatmul.f32.gmra.mxu3 %v2530_v53  ;;  %3489 = vmatmul.f32.gmra.mxu2 %v2530_v53 }
 0x671   : > { %4399 = vmatmul.f32.gmra.mxu0 %v2530_v53  ;;  %v3616_v53 = vld [vmem:[#allocation9 + $0x240] sm:$0xff]  ;;  %v2528_v17 = vsel %vm1000_vm3, %v2492_v15, %v2493_v32 }
 0x672   : > { %3631 = vmatpush.msrb.mxu3 %v3616_v53 }
 0x673   : > { %v2806_v56 = vpop.f32.mrf.mxu3  ;;  %v3442_v50 = vpop.f32.mrf.mxu2 }
 0x674   : > { %v10944_v41 = vadd.f32 %v3442_v50, %v3197_v12  ;;  %v10952_v50 = vpop.f32.mrf.mxu1  ;;  %v10956_v35 = vpop.f32.mrf.mxu0 }
 0x675   : > { %14778 = vst [vmem:[#allocation84_spill] sm:$0xff] %v10952_v50  ;;  %v2494_v50 = vrot.slane %v14782_v60, 7 }
 0x676   : > { %14773 = vst [vmem:[#allocation195_spill] sm:$0xff] %v10944_v41  ;;  %v14791_v41 = vld [vmem:[#allocation148_spill] sm:$0xff] }
 0x677   : > { %4076 = vmatmul.f32.gmra.mxu1 %v14775_v14  ;;  %v2804_v14 = vadd.f32 %v2803_v11, %v14780_v20  ;;  %v2527_v15 = vsel %vm1000_vm3, %v2493_v32, %v2494_v50 }
 0x678   : > { %2856 = vmatmul.f32.gmra.mxu3 %v2529_v28  ;;  %3492 = vmatmul.f32.gmra.mxu2 %v2529_v28 }
 0x679   : > { %4402 = vmatmul.f32.gmra.mxu0 %v2529_v28  ;;  %v3199_v28 = vadd.f32 %v14781_v48, %v2804_v14  ;;  %v5553_v14 = vld [vmem:[#allocation11 + $0xf8] sm:$0xff]  ;;  %v14787_v48 = vld [vmem:[#allocation24_spill] sm:$0xff] }
 0x67a   : > { %5554 = vmatpush.msra.mxu1 %v5553_v14 }
 0x67b   : > { %v2809_v27 = vpop.f32.mrf.mxu3  ;;  %v3445_v47 = vpop.f32.mrf.mxu2 }
 0x67c   : > { %v10954_v12 = vadd.f32 %v3445_v47, %v3198_v42  ;;  %v10966_v42 = vpop.f32.mrf.mxu1  ;;  %v10972_v20 = vpop.f32.mrf.mxu0 }
 0x67d   : > { %14784 = vst [vmem:[#allocation56_spill] sm:$0xff] %v10966_v42  ;;  %v14788_v42 = vld [vmem:[#allocation96_spill] sm:$0xff] }
 0x67e   : > { %14779 = vst [vmem:[#allocation59_spill] sm:$0xff] %v10954_v12  ;;  %v14785_v12 = vld [vmem:[#allocation78_spill] sm:$0xff]  ;;  %v2495_v60 = vrot.slane %v14788_v42, 7 }
 0x67f   : > { %4079 = vmatmul.f32.gmra.mxu1 %v10568_v33  ;;  %v2807_v11 = vadd.f32 %v2806_v56, %v14785_v12  ;;  %14786 = vst [vmem:[#allocation78_spill] sm:$0xff] %v10972_v20  ;;  %v5551_v12 = vld [vmem:[#allocation11 + $0xe8] sm:$0xff] }
 0x680   : > { %2859 = vmatmul.f32.gmra.mxu3 %v2528_v17  ;;  %3495 = vmatmul.f32.gmra.mxu2 %v2528_v17 }
 0x681   : > { %4405 = vmatmul.f32.gmra.mxu0 %v2528_v17  ;;  %v5552_v17 = vld [vmem:[#allocation11 + $0xf0] sm:$0xff]  ;;  %v3200_v33 = vadd.f32 %v14787_v48, %v2807_v11  ;;  %v5549_v11 = vld [vmem:[#allocation11 + $0xd8] sm:$0xff] }
 0x682   : > { %5555 = vmatpush.msra.mxu1 %v5552_v17  ;;  %v14793_v17 = vld [vmem:[#allocation71_spill] sm:$0xff] }
 0x683   : > { %v2812_v53 = vpop.f32.mrf.mxu3  ;;  %v3448_v26 = vpop.f32.mrf.mxu2 }
 0x684   : > { %v10964_v47 = vadd.f32 %v3448_v26, %v3199_v28  ;;  %5556 = vmatpush.msra.mxu1 %v5551_v12  ;;  %v10982_v20 = vpop.f32.mrf.mxu1  ;;  %v10984_v14 = vpop.f32.mrf.mxu0  ;;  %v14794_v12 = vld [vmem:[#allocation100_spill] sm:$0xff] }
 0x686   : > { %14783 = vst [vmem:[#allocation81_spill] sm:$0xff] %v10964_v47  ;;  %v5550_v47 = vld [vmem:[#allocation11 + $0xe0] sm:$0xff] }
 0x687   : > { %4082 = vmatmul.f32.gmra.mxu1 %v10582_v7  ;;  %v14790_v7 = vld [vmem:[#allocation50_spill] sm:$0xff] }
 0x688   : > { %2862 = vmatmul.f32.gmra.mxu3 %v2527_v15  ;;  %3498 = vmatmul.f32.gmra.mxu2 %v2527_v15  ;;  %v2810_v32 = vadd.f32 %v2809_v27, %v14790_v7  ;;  %14792 = vst [vmem:[#allocation50_spill] sm:$0xff] %v10982_v20  ;;  %v5548_v7 = vld [vmem:[#allocation11 + $0xd0] sm:$0xff]  ;;  %v14796_v20 = vld [vmem:[#allocation67_spill] sm:$0xff] }
 0x689   : > { %4408 = vmatmul.f32.gmra.mxu0 %v2527_v15  ;;  %v2526_v15 = vsel %vm1000_vm3, %v2494_v50, %v2495_v60  ;;  %5557 = vmatpush.msra.mxu1 %v5550_v47  ;;  %v2813_v42 = vadd.f32 %v2812_v53, %v14796_v20 }
 0x68a   : > { %v3201_v48 = vadd.f32 %v14793_v17, %v2810_v32  ;;  %v5546_v32 = vld [vmem:[#allocation11 + $0xc0] sm:$0xff] }
 0x68b   : > { %v2815_v28 = vpop.f32.mrf.mxu3  ;;  %v3451_v26 = vpop.f32.mrf.mxu2  ;;  %5558 = vmatpush.msra.mxu1 %v5549_v11  ;;  %v14798_v17 = vld [vmem:[#allocation64_spill] sm:$0xff] }
 0x68c   : > { %v10976_v56 = vadd.f32 %v3451_v26, %v3200_v33  ;;  %v3615_v33 = vld [vmem:[#allocation9 + $0x238] sm:$0xff]  ;;  %v3202_v11 = vadd.f32 %v14798_v17, %v2813_v42  ;;  %v10998_v20 = vpop.f32.mrf.mxu0  ;;  %v5543_v42 = vld [vmem:[#allocation11 + $0xa8] sm:$0xff]  ;;  %v3878_v17 = vrot.slane %v10643_v8, 1 }
 0x68d   : > { %3632 = vmatpush.msrb.mxu3 %v3615_v33  ;;  %5559 = vmatpush.msra.mxu1 %v5548_v7  ;;  %v10994_v33 = vpop.f32.mrf.mxu1 }
 0x68e   : > { %14789 = vst [vmem:[#allocation24_spill] sm:$0xff] %v10976_v56  ;;  %v5544_v56 = vld [vmem:[#allocation11 + $0xb0] sm:$0xff] }
 0x68f   : > { %4085 = vmatmul.f32.gmra.mxu1 %v14791_v41  ;;  %v2496_v41 = vrot.slane %v14794_v12, 7  ;;  %14797 = vst [vmem:[#allocation67_spill] sm:$0xff] %v10994_v33  ;;  %v14799_v12 = vld [vmem:[#allocation104_spill] sm:$0xff] }
 0x690   : > { %2865 = vmatmul.f32.gmra.mxu3 %v2526_v15  ;;  %3501 = vmatmul.f32.gmra.mxu2 %v2526_v15  ;;  %v2497_v53 = vrot.slane %v14799_v12, 7  ;;  %v14803_v33 = vld [vmem:[#allocation108_spill] sm:$0xff]  ;;  %v14807_v12 = vld [vmem:[#allocation99_spill] sm:$0xff] }
 0x691   : > { %4411 = vmatmul.f32.gmra.mxu0 %v2526_v15  ;;  %v5547_v15 = vld [vmem:[#allocation11 + $0xc8] sm:$0xff]  ;;  %v2525_v47 = vsel %vm1000_vm3, %v2495_v60, %v2496_v41  ;;  %v14801_v60 = vld [vmem:[#allocation23_spill] sm:$0xff] }
 0x692   : > { %5560 = vmatpush.msra.mxu1 %v5547_v15  ;;  %v2524_v15 = vsel %vm1000_vm3, %v2496_v41, %v2497_v53 }
 0x693   : > { %v2818_v27 = vpop.f32.mrf.mxu3  ;;  %v3454_v26 = vpop.f32.mrf.mxu2 }
 0x694   : > { %v10988_v50 = vadd.f32 %v3454_v26, %v3201_v48  ;;  %v5545_v48 = vld [vmem:[#allocation11 + $0xb8] sm:$0xff]  ;;  %5561 = vmatpush.msra.mxu1 %v5546_v32  ;;  %v11013_v41 = vpop.f32.mrf.mxu0 }
 0x695   : > { %14806 = vst [vmem:[#allocation196_spill] sm:$0xff] %v11013_v41  ;;  %v5538_v41 = vld [vmem:[#allocation11 + $0x80] sm:$0xff] }
 0x696   : > { %14795 = vst [vmem:[#allocation71_spill] sm:$0xff] %v10988_v50  ;;  %5562 = vmatpush.msra.mxu1 %v5545_v48  ;;  %v2816_v50 = vadd.f32 %v2815_v28, %v14801_v60  ;;  %v2498_v28 = vrot.slane %v14803_v33, 7  ;;  %v11009_v60 = vpop.f32.mrf.mxu1  ;;  %v14810_v33 = vld [vmem:[#allocation112_spill] sm:$0xff] }
 0x697   : > { %4088 = vmatmul.f32.gmra.mxu1 %v10610_v5  ;;  %14804 = vst [vmem:[#allocation23_spill] sm:$0xff] %v11009_v60 }
 0x698   : > { %2868 = vmatmul.f32.gmra.mxu3 %v2525_v47  ;;  %3504 = vmatmul.f32.gmra.mxu2 %v2525_v47 }
 0x699   : > { %4414 = vmatmul.f32.gmra.mxu0 %v2525_v47  ;;  %5563 = vmatpush.msra.mxu1 %v5544_v56  ;;  %v14802_v47 = vld [vmem:[#allocation97_spill] sm:$0xff]  ;;  %v11019_v56 = vsel %vm1196_vm2, %v10624_v55, %v3878_v17 }
 0x69a   : > { %v3203_v32 = vadd.f32 %v14802_v47, %v2816_v50  ;;  %14808 = vst [vmem:[#allocation99_spill] sm:$0xff] %v11019_v56  ;;  %v5541_v50 = vld [vmem:[#allocation11 + $0x98] sm:$0xff]  ;;  %v3879_v47 = vrot.slane %v10663_v58, 1 }
 0x69b   : > { %v2821_v26 = vpop.f32.mrf.mxu3  ;;  %v3457_v7 = vpop.f32.mrf.mxu2  ;;  %5564 = vmatpush.msra.mxu1 %v5543_v42  ;;  %v2523_v42 = vsel %vm1000_vm3, %v2497_v53, %v2498_v28 }
 0x69c   : > { %v11000_v5 = vadd.f32 %v3457_v7, %v3202_v11  ;;  %v5542_v11 = vld [vmem:[#allocation11 + $0xa0] sm:$0xff]  ;;  %v11031_v53 = vsel %vm1196_vm2, %v3878_v17, %v3879_v47 }
 0x69d   : > { %5565 = vmatpush.msra.mxu1 %v5542_v11  ;;  %v3614_v11 = vld [vmem:[#allocation9 + $0x230] sm:$0xff]  ;;  %14812 = vst [vmem:[#allocation197_spill] sm:$0xff] %v11031_v53 }
 0x69e   : > { %14800 = vst [vmem:[#allocation64_spill] sm:$0xff] %v11000_v5  ;;  %3633 = vmatpush.msrb.mxu3 %v3614_v11  ;;  %v11033_v5 = vpop.f32.mrf.mxu1  ;;  %v11039_v11 = vpop.f32.mrf.mxu0 }
 0x69f   : > { %4091 = vmatmul.f32.gmra.mxu1 %v10635_v39  ;;  %14813 = vst [vmem:[#allocation198_spill] sm:$0xff] %v11033_v5 }
 0x6a0   : > { %2871 = vmatmul.f32.gmra.mxu3 %v2524_v15  ;;  %3507 = vmatmul.f32.gmra.mxu2 %v2524_v15 }
 0x6a1   : > { %4417 = vmatmul.f32.gmra.mxu0 %v2524_v15  ;;  %v2819_v15 = vadd.f32 %v2818_v27, %v14807_v12  ;;  %5566 = vmatpush.msra.mxu1 %v5541_v50  ;;  %v14809_v27 = vld [vmem:[#allocation101_spill] sm:$0xff]  ;;  %v14814_v50 = vld [vmem:[#allocation103_spill] sm:$0xff] }
 0x6a3   : > { %v2824_v7 = vpop.f32.mrf.mxu3  ;;  %v3460_v48 = vpop.f32.mrf.mxu2  ;;  %v3204_v12 = vadd.f32 %v14809_v27, %v2819_v15 }
 0x6a4   : > { %v11011_v39 = vadd.f32 %v3460_v48, %v3203_v32  ;;  %v5540_v32 = vld [vmem:[#allocation11 + $0x90] sm:$0xff]  ;;  %v5539_v48 = vld [vmem:[#allocation11 + $0x88] sm:$0xff] }
 0x6a5   : > { %5567 = vmatpush.msra.mxu1 %v5540_v32  ;;  %v11043_v32 = vrot.slane %v10677_v16, 1 }
 0x6a6   : > { %14805 = vst [vmem:[#allocation97_spill] sm:$0xff] %v11011_v39  ;;  %v2499_v39 = vrot.slane %v14810_v33, 7 }
 0x6a7   : > { %4094 = vmatmul.f32.gmra.mxu1 %v11019_v56  ;;  %14816 = vst [vmem:[#allocation103_spill] sm:$0xff] %v11043_v32 }
 0x6a8   : > { %2874 = vmatmul.f32.gmra.mxu3 %v2523_v42  ;;  %3510 = vmatmul.f32.gmra.mxu2 %v2523_v42  ;;  %v2522_v15 = vsel %vm1000_vm3, %v2498_v28, %v2499_v39  ;;  %v11051_v28 = vsel %vm1196_vm2, %v3879_v47, %v11043_v32  ;;  %v14823_v47 = vld [vmem:[#allocation120_spill] sm:$0xff] }
 0x6a9   : > { %4420 = vmatmul.f32.gmra.mxu0 %v2523_v42  ;;  %5568 = vmatpush.msra.mxu1 %v5539_v48  ;;  %v2822_v42 = vadd.f32 %v2821_v26, %v14814_v50  ;;  %v14817_v26 = vld [vmem:[#allocation116_spill] sm:$0xff]  ;;  %14819 = vst [vmem:[#allocation199_spill] sm:$0xff] %v11051_v28 }
 0x6aa   : > { %v2500_v48 = vrot.slane %v14817_v26, 7  ;;  %v2501_v26 = vrot.slane %v14823_v47, 7 }
 0x6ab   : > { %v2827_v55 = vpop.f32.mrf.mxu3  ;;  %v3463_v60 = vpop.f32.mrf.mxu2  ;;  %5569 = vmatpush.msra.mxu1 %v5538_v41 }
 0x6ac   : > { %v11027_v56 = vadd.f32 %v3463_v60, %v3204_v12  ;;  %v14815_v60 = vld [vmem:[#allocation105_spill] sm:$0xff]  ;;  %v2521_v41 = vsel %vm1000_vm3, %v2499_v39, %v2500_v48 }
 0x6ad   : > { %v3205_v17 = vadd.f32 %v14815_v60, %v2822_v42  ;;  %v11057_v42 = vpop.f32.mrf.mxu1  ;;  %v14822_v60 = vld [vmem:[#allocation109_spill] sm:$0xff] }
 0x6ae   : > { %14811 = vst [vmem:[#allocation101_spill] sm:$0xff] %v11027_v56 }
 0x6af   : > { %4097 = vmatmul.f32.gmra.mxu1 %v11031_v53  ;;  %v14820_v53 = vld [vmem:[#allocation107_spill] sm:$0xff] }
 0x6b0   : > { %2877 = vmatmul.f32.gmra.mxu3 %v2522_v15  ;;  %3513 = vmatmul.f32.gmra.mxu2 %v2522_v15  ;;  %v2825_v5 = vadd.f32 %v2824_v7, %v14820_v53  ;;  %14821 = vst [vmem:[#allocation107_spill] sm:$0xff] %v11057_v42  ;;  %v14825_v7 = vld [vmem:[#allocation111_spill] sm:$0xff]  ;;  %v14828_v42 = vld [vmem:[#allocation113_spill] sm:$0xff] }
 0x6b1   : > { %4423 = vmatmul.f32.gmra.mxu0 %v2522_v15  ;;  %v11059_v15 = vpop.f32.mrf.mxu0  ;;  %v2828_v53 = vadd.f32 %v2827_v55, %v14825_v7  ;;  %v14829_v7 = vld [vmem:[#allocation124_spill] sm:$0xff] }
 0x6b2   : > { %v2502_v47 = vrot.slane %v14829_v7, 7 }
 0x6b3   : > { %v2830_v27 = vpop.f32.mrf.mxu3  ;;  %v3466_v12 = vpop.f32.mrf.mxu2 }
 0x6b4   : > { %v11046_v50 = vadd.f32 %v3466_v12, %v3205_v17  ;;  %v3206_v17 = vadd.f32 %v14822_v60, %v2825_v5  ;;  %v3613_v5 = vld [vmem:[#allocation9 + $0x228] sm:$0xff] }
 0x6b5   : > { %v11072_v60 = vpop.f32.mrf.mxu1  ;;  %3634 = vmatpush.msrb.mxu3 %v3613_v5 }
 0x6b6   : > { %14818 = vst [vmem:[#allocation105_spill] sm:$0xff] %v11046_v50 }
 0x6b7   : > { %4100 = vmatmul.f32.gmra.mxu1 %v11051_v28  ;;  %v14826_v28 = vld [vmem:[#allocation18_spill] sm:$0xff]  ;;  %14827 = vst [vmem:[#allocation111_spill] sm:$0xff] %v11072_v60  ;;  %v14833_v60 = vld [vmem:[#allocation128_spill] sm:$0xff] }
 0x6b8   : > { %2880 = vmatmul.f32.gmra.mxu3 %v2521_v41  ;;  %3516 = vmatmul.f32.gmra.mxu2 %v2521_v41  ;;  %v3928_v39 = vsel %vm1196_vm2, %v11043_v32, %v14826_v28  ;;  %v2503_v7 = vrot.slane %v14833_v60, 7 }
 0x6b9   : > { %4426 = vmatmul.f32.gmra.mxu0 %v2521_v41  ;;  %v2520_v41 = vsel %vm1000_vm3, %v2500_v48, %v2501_v26  ;;  %v2519_v48 = vsel %vm1000_vm3, %v2501_v26, %v2502_v47 }
 0x6ba   : > { %v2518_v26 = vsel %vm1000_vm3, %v2502_v47, %v2503_v7  ;;  %v3612_v47 = vld [vmem:[#allocation9 + $0x220] sm:$0xff] }
 0x6bb   : > { %v2833_v12 = vpop.f32.mrf.mxu3  ;;  %v3469_v16 = vpop.f32.mrf.mxu2  ;;  %3635 = vmatpush.msrb.mxu3 %v3612_v47 }
 0x6bc   : > { %v11063_v50 = vadd.f32 %v3469_v16, %v3206_v17  ;;  %v3207_v16 = vadd.f32 %v14828_v42, %v2828_v53  ;;  %v14832_v42 = vld [vmem:[#allocation118_spill] sm:$0xff] }
 0x6be   : > { %14824 = vst [vmem:[#allocation109_spill] sm:$0xff] %v11063_v50  ;;  %v11076_v50 = vpop.f32.mrf.mxu0 }
 0x6bf   : > { %4103 = vmatmul.f32.gmra.mxu1 %v3928_v39  ;;  %v14831_v39 = vld [vmem:[#allocation115_spill] sm:$0xff] }
 0x6c0   : > { %2883 = vmatmul.f32.gmra.mxu3 %v2520_v41  ;;  %3519 = vmatmul.f32.gmra.mxu2 %v2520_v41  ;;  %v2831_v32 = vadd.f32 %v2830_v27, %v14831_v39  ;;  %v14836_v27 = vld [vmem:[#allocation119_spill] sm:$0xff] }
 0x6c1   : > { %4429 = vmatmul.f32.gmra.mxu0 %v2520_v41 }
 0x6c2   : > { %v3208_v53 = vadd.f32 %v14832_v42, %v2831_v32  ;;  %v14837_v32 = vld [vmem:[#allocation123_spill] sm:$0xff] }
 0x6c3   : > { %v2836_v17 = vpop.f32.mrf.mxu3  ;;  %v3472_v55 = vpop.f32.mrf.mxu2 }
 0x6c4   : > { %v11078_v28 = vadd.f32 %v3472_v55, %v3207_v16  ;;  %v11088_v16 = vpop.f32.mrf.mxu1 }
 0x6c5   : > { %14835 = vst [vmem:[#allocation115_spill] sm:$0xff] %v11088_v16  ;;  %v14840_v16 = vld [vmem:[#allocation122_spill] sm:$0xff] }
 0x6c6   : > { %14830 = vst [vmem:[#allocation18_spill] sm:$0xff] %v11078_v28  ;;  %v11090_v55 = vpop.f32.mrf.mxu0 }
 0x6c7   : > { %5570 = vmatmul.f32.vlgmr.msra.gmra.mxu1 %v10058_v44  ;;  %v2834_v44 = vadd.f32 %v2833_v12, %v14836_v27  ;;  %v14843_v27 = vld [vmem:[#allocation127_spill] sm:$0xff] }
 0x6c8   : > { %2886 = vmatmul.f32.gmra.mxu3 %v2519_v48  ;;  %3522 = vmatmul.f32.gmra.mxu2 %v2519_v48 }
 0x6c9   : > { %4432 = vmatmul.f32.gmra.mxu0 %v2519_v48  ;;  %v3209_v39 = vadd.f32 %v14837_v32, %v2834_v44 }
 0x6cb   : > { %v2839_v41 = vpop.f32.mrf.mxu3  ;;  %v3475_v5 = vpop.f32.mrf.mxu2 }
 0x6cc   : > { %v11086_v33 = vadd.f32 %v3475_v5, %v3208_v53  ;;  %v14838_v53 = vld [vmem:[#allocation131_spill] sm:$0xff]  ;;  %v11101_v28 = vpop.f32.mrf.mxu1 }
 0x6cd   : > { %v2504_v5 = vrot.slane %v14838_v53, 7  ;;  %14841 = vst [vmem:[#allocation119_spill] sm:$0xff] %v11101_v28 }
 0x6ce   : > { %14834 = vst [vmem:[#allocation113_spill] sm:$0xff] %v11086_v33  ;;  %v2837_v33 = vadd.f32 %v2836_v17, %v14840_v16  ;;  %v11106_v12 = vpop.f32.mrf.mxu0 }
 0x6cf   : > { %5573 = vmatmul.f32.gmra.mxu1 %v10061_v45  ;;  %v2517_v45 = vsel %vm1000_vm3, %v2503_v7, %v2504_v5  ;;  %14842 = vst [vmem:[#allocation123_spill] sm:$0xff] %v11106_v12  ;;  %v3608_v12 = vld [vmem:[#allocation9 + $0x200] sm:$0xff] }
 0x6d0   : > { %2889 = vmatmul.f32.gmra.mxu3 %v2518_v26  ;;  %3525 = vmatmul.f32.gmra.mxu2 %v2518_v26  ;;  %v3210_v44 = vadd.f32 %v14843_v27, %v2837_v33  ;;  %v14849_v27 = vld [vmem:[#allocation139_spill] sm:$0xff] }
 0x6d1   : > { %4435 = vmatmul.f32.gmra.mxu0 %v2518_v26 }
 0x6d3   : > { %v2842_v48 = vpop.f32.mrf.mxu3  ;;  %v3478_v42 = vpop.f32.mrf.mxu2 }
 0x6d4   : > { %v11098_v60 = vadd.f32 %v3478_v42, %v3209_v39  ;;  %v14844_v39 = vld [vmem:[#allocation135_spill] sm:$0xff]  ;;  %v14846_v42 = vld [vmem:[#allocation126_spill] sm:$0xff] }
 0x6d5   : > { %v2505_v17 = vrot.slane %v14844_v39, 7 }
 0x6d6   : > { %14839 = vst [vmem:[#allocation118_spill] sm:$0xff] %v11098_v60  ;;  %v11115_v28 = vpop.f32.mrf.mxu0  ;;  %v2506_v60 = vrot.slane %v14849_v27, 7 }
 0x6d7   : > { %5576 = vmatmul.f32.gmra.mxu1 %v10074_v52  ;;  %v2840_v52 = vadd.f32 %v2839_v41, %v14846_v42  ;;  %v2516_v7 = vsel %vm1000_vm3, %v2504_v5, %v2505_v17  ;;  %14847 = vst [vmem:[#allocation127_spill] sm:$0xff] %v11115_v28  ;;  %v3611_v5 = vld [vmem:[#allocation9 + $0x218] sm:$0xff]  ;;  %v4540_v28 = vld [vmem:[#allocation9 + $0x3e8] sm:$0xff] }
 0x6d8   : > { %2892 = vmatmul.f32.gmra.mxu3 %v2517_v45  ;;  %3528 = vmatmul.f32.gmra.mxu2 %v2517_v45  ;;  %v2515_v41 = vsel %vm1000_vm3, %v2505_v17, %v2506_v60  ;;  %v4542_v42 = vld [vmem:[#allocation9 + $0x3f8] sm:$0xff]  ;;  %v3609_v17 = vld [vmem:[#allocation9 + $0x208] sm:$0xff] }
 0x6d9   : > { %4438 = vmatmul.f32.gmra.mxu0 %v2517_v45  ;;  %v14848_v45 = vld [vmem:[#allocation132_spill] sm:$0xff]  ;;  %3636 = vmatpush.msrb.mxu3 %v3611_v5 }
 0x6da   : > { %v3211_v53 = vadd.f32 %v14848_v45, %v2840_v52  ;;  %4543 = vmatpush.msra.mxu2 %v4542_v42  ;;  %v4539_v5 = vld [vmem:[#allocation9 + $0x3e0] sm:$0xff]  ;;  %v14856_v42 = vld [vmem:[#allocation142_spill] sm:$0xff] }
 0x6db   : > { %v2845_v26 = vpop.f32.mrf.mxu3  ;;  %v3481_v32 = vpop.f32.mrf.mxu2 }
 0x6dc   : > { %v11110_v16 = vadd.f32 %v3481_v32, %v3210_v44  ;;  %v14851_v44 = vld [vmem:[#allocation130_spill] sm:$0xff] }
 0x6dd   : > { %v2843_v32 = vadd.f32 %v2842_v48, %v14851_v44  ;;  %v3610_v48 = vld [vmem:[#allocation9 + $0x210] sm:$0xff] }
 0x6de   : > { %14845 = vst [vmem:[#allocation122_spill] sm:$0xff] %v11110_v16  ;;  %v14853_v16 = vld [vmem:[#allocation143_spill] sm:$0xff]  ;;  %v4541_v44 = vld [vmem:[#allocation9 + $0x3f0] sm:$0xff]  ;;  %3637 = vmatpush.msrb.mxu3 %v3610_v48 }
 0x6df   : > { %v2507_v27 = vrot.slane %v14853_v16, 7  ;;  %4544 = vmatpush.msra.mxu2 %v4541_v44  ;;  %v14857_v44 = vld [vmem:[#allocation147_spill] sm:$0xff]  ;;  %v4537_v16 = vld [vmem:[#allocation9 + $0x3d0] sm:$0xff] }
 0x6e0   : > { %2895 = vmatmul.f32.gmra.mxu3 %v2516_v7  ;;  %3531 = vmatmul.f32.gmra.mxu2 %v2516_v7 }
 0x6e1   : > { %4441 = vmatmul.f32.gmra.mxu0 %v2516_v7  ;;  %v14852_v7 = vld [vmem:[#allocation137_spill] sm:$0xff]  ;;  %3638 = vmatpush.msrb.mxu3 %v3609_v17 }
 0x6e2   : > { %v3212_v39 = vadd.f32 %v14852_v7, %v2843_v32  ;;  %v2514_v32 = vsel %vm1000_vm3, %v2506_v60, %v2507_v27  ;;  %4545 = vmatpush.msra.mxu2 %v4540_v28  ;;  %v14859_v28 = vld [vmem:[#allocation138_spill] sm:$0xff] }
 0x6e3   : > { %v2848_v33 = vpop.f32.mrf.mxu3  ;;  %v3484_v47 = vpop.f32.mrf.mxu2  ;;  %3639 = vmatpush.msrb.mxu3 %v3608_v12 }
 0x6e4   : > { %v11119_v56 = vadd.f32 %v3484_v47, %v3211_v53  ;;  %v11126_v53 = vpop.f32.mrf.mxu0  ;;  %4546 = vmatpush.msra.mxu2 %v4539_v5  ;;  %v2849_v17 = vadd.f32 %v2848_v33, %v14859_v28  ;;  %v14862_v33 = vld [vmem:[#allocation141_spill] sm:$0xff] }
 0x6e6   : > { %14850 = vst [vmem:[#allocation126_spill] sm:$0xff] %v11119_v56 }
 0x6e8   : > { %2898 = vmatmul.f32.gmra.mxu3 %v2515_v41  ;;  %3534 = vmatmul.f32.gmra.mxu2 %v2515_v41 }
 0x6e9   : > { %4444 = vmatmul.f32.gmra.mxu0 %v2515_v41  ;;  %v14855_v41 = vld [vmem:[#allocation134_spill] sm:$0xff] }
 0x6ea   : > { %v2846_v56 = vadd.f32 %v2845_v26, %v14855_v41  ;;  %v2508_v26 = vrot.slane %v14857_v44, 7 }
 0x6eb   : > { %v2851_v52 = vpop.f32.mrf.mxu3  ;;  %v3487_v45 = vpop.f32.mrf.mxu2 }
 0x6ec   : > { %v11128_v47 = vadd.f32 %v3487_v45, %v3212_v39  ;;  %v4538_v39 = vld [vmem:[#allocation9 + $0x3d8] sm:$0xff]  ;;  %v3213_v7 = vadd.f32 %v14856_v42, %v2846_v56  ;;  %v11137_v60 = vpop.f32.mrf.mxu0  ;;  %v2513_v12 = vsel %vm1000_vm3, %v2507_v27, %v2508_v26  ;;  %v4535_v56 = vld [vmem:[#allocation9 + $0x3c0] sm:$0xff]  ;;  %v2852_v28 = vadd.f32 %v2851_v52, %v14862_v33  ;;  %v4532_v27 = vld [vmem:[#allocation9 + $0x3a8] sm:$0xff] }
 0x6ed   : > { %4547 = vmatpush.msra.mxu2 %v4538_v39  ;;  %v4534_v42 = vld [vmem:[#allocation9 + $0x3b8] sm:$0xff]  ;;  %v4529_v52 = vld [vmem:[#allocation9 + $0x390] sm:$0xff]  ;;  %v14864_v33 = vld [vmem:[#allocation145_spill] sm:$0xff] }
 0x6ee   : > { %14854 = vst [vmem:[#allocation132_spill] sm:$0xff] %v11128_v47  ;;  %v4536_v47 = vld [vmem:[#allocation9 + $0x3c8] sm:$0xff] }
 0x6ef   : > { %4548 = vmatpush.msra.mxu2 %v4537_v16  ;;  %v4533_v16 = vld [vmem:[#allocation9 + $0x3b0] sm:$0xff] }
 0x6f0   : > { %2901 = vmatmul.f32.gmra.mxu3 %v2514_v32  ;;  %3537 = vmatmul.f32.gmra.mxu2 %v2514_v32 }
 0x6f1   : > { %4447 = vmatmul.f32.gmra.mxu0 %v2514_v32  ;;  %4549 = vmatpush.msra.mxu2 %v4536_v47  ;;  %v14860_v32 = vld [vmem:[#allocation146_spill] sm:$0xff] }
 0x6f2   : > { %v3214_v5 = vadd.f32 %v14860_v32, %v2849_v17  ;;  %v4531_v17 = vld [vmem:[#allocation9 + $0x3a0] sm:$0xff]  ;;  %v4530_v32 = vld [vmem:[#allocation9 + $0x398] sm:$0xff] }
 0x6f3   : > { %v2854_v45 = vpop.f32.mrf.mxu3  ;;  %v3490_v48 = vpop.f32.mrf.mxu2  ;;  %4550 = vmatpush.msra.mxu2 %v4535_v56 }
 0x6f4   : > { %v11135_v41 = vadd.f32 %v3490_v48, %v3213_v7  ;;  %v2509_v48 = vrot.slane %v10601_v34, 7  ;;  %v11149_v47 = vpop.f32.mrf.mxu0  ;;  %v14865_v34 = vld [vmem:[#allocation156_spill] sm:$0xff] }
 0x6f5   : > { %4551 = vmatpush.msra.mxu2 %v4534_v42 }
 0x6f6   : > { %14858 = vst [vmem:[#allocation130_spill] sm:$0xff] %v11135_v41  ;;  %v2512_v41 = vsel %vm1000_vm3, %v2508_v26, %v2509_v48  ;;  %v2855_v26 = vadd.f32 %v2854_v45, %v14864_v33 }
 0x6f7   : > { %4552 = vmatpush.msra.mxu2 %v4533_v16  ;;  %v4528_v16 = vld [vmem:[#allocation9 + $0x388] sm:$0xff] }
 0x6f8   : > { %2904 = vmatmul.f32.gmra.mxu3 %v2513_v12  ;;  %3540 = vmatmul.f32.gmra.mxu2 %v2513_v12 }
 0x6f9   : > { %4450 = vmatmul.f32.gmra.mxu0 %v2513_v12  ;;  %4553 = vmatpush.msra.mxu2 %v4532_v27  ;;  %v14863_v12 = vld [vmem:[#allocation151_spill] sm:$0xff]  ;;  %v14866_v27 = vld [vmem:[#allocation158_spill] sm:$0xff] }
 0x6fa   : > { %v3215_v56 = vadd.f32 %v14863_v12, %v2852_v28 }
 0x6fb   : > { %v2857_v7 = vpop.f32.mrf.mxu3  ;;  %v3493_v39 = vpop.f32.mrf.mxu2  ;;  %4554 = vmatpush.msra.mxu2 %v4531_v17  ;;  %v3216_v17 = vadd.f32 %v14866_v27, %v2855_v26 }
 0x6fc   : > { %v11144_v44 = vadd.f32 %v3493_v39, %v3214_v5  ;;  %v11158_v28 = vpop.f32.mrf.mxu0 }
 0x6fd   : > { %4555 = vmatpush.msra.mxu2 %v4530_v32  ;;  %v3330_v32 = vrot.slane %v10643_v8, 7 }
 0x6fe   : > { %14861 = vst [vmem:[#allocation137_spill] sm:$0xff] %v11144_v44  ;;  %v2511_v44 = vsel %vm1000_vm3, %v2509_v48, %v14865_v34 }
 0x6ff   : > { %4556 = vmatpush.msra.mxu2 %v4529_v52  ;;  %v3335_v48 = vsel %vm1000_vm3, %v14865_v34, %v3330_v32 }
 0x700   : > { %2907 = vmatmul.f32.gmra.mxu3 %v2512_v41  ;;  %3543 = vmatmul.f32.gmra.mxu2 %v2512_v41 }
 0x701   : > { %4453 = vmatmul.f32.gmra.mxu0 %v2512_v41  ;;  %v4527_v41 = vld [vmem:[#allocation9 + $0x380] sm:$0xff]  ;;  %4557 = vmatpush.msra.mxu2 %v4528_v16  ;;  %v3331_v16 = vrot.slane %v10663_v58, 7 }
 0x703   : > { %v2860_v5 = vpop.f32.mrf.mxu3  ;;  %v3496_v39 = vpop.f32.mrf.mxu2  ;;  %4558 = vmatpush.msra.mxu2 %v4527_v41 }
 0x704   : > { %v11152_v42 = vadd.f32 %v3496_v39, %v3215_v56  ;;  %v14867_v39 = vld [vmem:[#allocation149_spill] sm:$0xff]  ;;  %v11173_v41 = vpop.f32.mrf.mxu0 }
 0x705   : > { %v2858_v33 = vadd.f32 %v2857_v7, %v14867_v39 }
 0x708   : > { %2910 = vmatmul.f32.gmra.mxu3 %v2511_v44  ;;  %3546 = vmatmul.f32.gmra.mxu2 %v2511_v44 }
 0x709   : > { %4456 = vmatmul.f32.gmra.mxu0 %v2511_v44  ;;  %v3217_v44 = vadd.f32 %v10658_v24, %v2858_v33  ;;  %v14869_v33 = vld [vmem:[#allocation159_spill] sm:$0xff] }
 0x70b   : > { %v2863_v12 = vpop.f32.mrf.mxu3  ;;  %v3499_v56 = vpop.f32.mrf.mxu2 }
 0x70c   : > { %v11162_v45 = vadd.f32 %v3499_v56, %v3216_v17  ;;  %v14868_v17 = vld [vmem:[#allocation153_spill] sm:$0xff]  ;;  %v3334_v56 = vsel %vm1000_vm3, %v3330_v32, %v3331_v16 }
 0x70d   : > { %v2861_v7 = vadd.f32 %v2860_v5, %v14868_v17  ;;  %v3333_v5 = vsel %vm1000_vm3, %v3331_v16, %v10680_v54  ;;  %v14870_v17 = vld [vmem:[#allocation167_spill] sm:$0xff] }
 0x710   : > { %3549 = vmatmul.f32.gmra.mxu2 %v3335_v48  ;;  %3640 = vmatmul.f32.vlgmr.msrb.gmra.mxu3 %v10086_v18  ;;  %v3218_v18 = vadd.f32 %v10675_v23, %v2861_v7  ;;  %v11193_v7 = vrot.slane %v14870_v17, 7 }
 0x711   : > { %4459 = vmatmul.f32.gmra.mxu0 %v3335_v48  ;;  %v2864_v48 = vadd.f32 %v2863_v12, %v14869_v33  ;;  %v14872_v12 = vld [vmem:[#allocation161_spill] sm:$0xff] }
 0x712   : > { %14871 = vst [vmem:[#allocation134_spill] sm:$0xff] %v11193_v7 }
 0x713   : > { %v2866_v52 = vpop.f32.mrf.mxu3  ;;  %v3502_v26 = vpop.f32.mrf.mxu2 }
 0x714   : > { %v11171_v27 = vadd.f32 %v3502_v26, %v3217_v44  ;;  %v11183_v44 = vpop.f32.mrf.mxu0 }
 0x718   : > { %3552 = vmatmul.f32.gmra.mxu2 %v3334_v56  ;;  %3643 = vmatmul.f32.gmra.mxu3 %v10096_v63  ;;  %v3219_v63 = vadd.f32 %v10694_v61, %v2864_v48  ;;  %v14873_v48 = vld [vmem:[#allocation164_spill] sm:$0xff] }
 0x719   : > { %4462 = vmatmul.f32.gmra.mxu0 %v3334_v56  ;;  %v2867_v56 = vadd.f32 %v2866_v52, %v14872_v12 }
 0x71b   : > { %v2869_v24 = vpop.f32.mrf.mxu3  ;;  %v3505_v34 = vpop.f32.mrf.mxu2  ;;  %v3220_v61 = vadd.f32 %v10707_v2, %v2867_v56 }
 0x71c   : > { %v11180_v39 = vadd.f32 %v3505_v34, %v3218_v18  ;;  %v11202_v16 = vpop.f32.mrf.mxu0  ;;  %v2870_v52 = vadd.f32 %v2869_v24, %v14873_v48 }
 0x720   : > { %3555 = vmatmul.f32.gmra.mxu2 %v3333_v5  ;;  %3646 = vmatmul.f32.gmra.mxu3 %v10106_v62  ;;  %v4254_v62 = vsel %vm1000_vm3, %v10680_v54, %v11193_v7 }
 0x721   : > { %4465 = vmatmul.f32.gmra.mxu0 %v3333_v5 }
 0x723   : > { %v2872_v32 = vpop.f32.mrf.mxu3  ;;  %v3508_v23 = vpop.f32.mrf.mxu2 }
 0x724   : > { %v11190_v26 = vadd.f32 %v3508_v23, %v3219_v63  ;;  %v14874_v23 = vld [vmem:[#allocation166_spill] sm:$0xff] }
 0x725   : > { %v2873_v12 = vadd.f32 %v2872_v32, %v14874_v23 }
 0x727   : > { %v3222_v2 = vadd.f32 %v10734_v21, %v2873_v12 }
 0x728   : > { %3649 = vmatmul.f32.gmra.mxu3 %v10115_v22  ;;  %4559 = vmatmul.f32.vlgmr.msra.gmra.mxu2 %v10115_v22  ;;  %v3221_v22 = vadd.f32 %v10725_v13, %v2870_v52  ;;  %v14876_v52 = vld [vmem:[#allocation170_spill] sm:$0xff] }
 0x729   : > { %4468 = vmatmul.f32.gmra.mxu0 %v4254_v62 }
 0x72b   : > { %v2875_v18 = vpop.f32.mrf.mxu3  ;;  %v3511_v34 = vpop.f32.mrf.mxu2 }
 0x72c   : > { %v11205_v33 = vadd.f32 %v3511_v34, %v3220_v61  ;;  %v14875_v61 = vld [vmem:[#allocation168_spill] sm:$0xff] }
 0x730   : > { %3652 = vmatmul.f32.gmra.mxu3 %v10127_v43  ;;  %4562 = vmatmul.f32.gmra.mxu2 %v10127_v43  ;;  %v2876_v43 = vadd.f32 %v2875_v18, %v14875_v61 }
 0x732   : > { %v3223_v13 = vadd.f32 %v10744_v31, %v2876_v43  ;;  %v4864_v31 = vld [vmem:[#allocation9 + $0x478] sm:$0xff] }
 0x733   : > { %v2878_v5 = vpop.f32.mrf.mxu3  ;;  %v3514_v63 = vpop.f32.mrf.mxu2  ;;  %4865 = vmatpush.msra.mxu3 %v4864_v31 }
 0x734   : > { %v11211_v54 = vadd.f32 %v3514_v63, %v3221_v22 }
 0x738   : > { %3655 = vmatmul.f32.gmra.mxu3 %v10137_v37  ;;  %4565 = vmatmul.f32.gmra.mxu2 %v10137_v37  ;;  %v2879_v37 = vadd.f32 %v2878_v5, %v14876_v52 }
 0x73a   : > { %v3224_v21 = vadd.f32 %v10757_v40, %v2879_v37 }
 0x73b   : > { %v2881_v56 = vpop.f32.mrf.mxu3  ;;  %v3517_v24 = vpop.f32.mrf.mxu2 }
 0x73c   : > { %v11217_v62 = vadd.f32 %v3517_v24, %v3222_v2 }
 0x740   : > { %3658 = vmatmul.f32.gmra.mxu3 %v10146_v6  ;;  %4568 = vmatmul.f32.gmra.mxu2 %v10146_v6  ;;  %v2882_v6 = vadd.f32 %v2881_v56, %v10723_v57 }
 0x742   : > { %v3225_v5 = vadd.f32 %v10767_v30, %v2882_v6  ;;  %v14881_v6 = vld [vmem:[#allocation187_spill] sm:$0xff] }
 0x743   : > { %v2884_v34 = vpop.f32.mrf.mxu3  ;;  %v3520_v32 = vpop.f32.mrf.mxu2 }
 0x744   : > { %v11223_v48 = vadd.f32 %v3520_v32, %v3223_v13 }
 0x748   : > { %3661 = vmatmul.f32.gmra.mxu3 %v10155_v19  ;;  %4571 = vmatmul.f32.gmra.mxu2 %v10155_v19  ;;  %v14877_v19 = vld [vmem:[#allocation173_spill] sm:$0xff] }
 0x749   : > { %v2885_v40 = vadd.f32 %v2884_v34, %v14877_v19  ;;  %v14883_v19 = vld [vmem:[#allocation44_spill] sm:$0xff] }
 0x74b   : > { %v2887_v22 = vpop.f32.mrf.mxu3  ;;  %v3523_v18 = vpop.f32.mrf.mxu2  ;;  %v3226_v57 = vadd.f32 %v10778_v10, %v2885_v40  ;;  %v4863_v10 = vld [vmem:[#allocation9 + $0x470] sm:$0xff] }
 0x74c   : > { %v11229_v63 = vadd.f32 %v3523_v18, %v3224_v21  ;;  %4866 = vmatpush.msra.mxu3 %v4863_v10  ;;  %v14880_v18 = vld [vmem:[#allocation34_spill] sm:$0xff] }
 0x750   : > { %3664 = vmatmul.f32.gmra.mxu3 %v10164_v46  ;;  %4574 = vmatmul.f32.gmra.mxu2 %v10164_v46  ;;  %v14878_v46 = vld [vmem:[#allocation175_spill] sm:$0xff] }
 0x751   : > { %v2888_v43 = vadd.f32 %v2887_v22, %v14878_v46  ;;  %v14885_v46 = vld [vmem:[#allocation182_spill] sm:$0xff] }
 0x753   : > { %v2890_v23 = vpop.f32.mrf.mxu3  ;;  %v3526_v12 = vpop.f32.mrf.mxu2  ;;  %v3227_v30 = vadd.f32 %v10788_v38, %v2888_v43 }
 0x754   : > { %v11235_v2 = vadd.f32 %v3526_v12, %v3225_v5 }
 0x758   : > { %3667 = vmatmul.f32.gmra.mxu3 %v10173_v9  ;;  %4577 = vmatmul.f32.gmra.mxu2 %v10173_v9  ;;  %v2891_v9 = vadd.f32 %v2890_v23, %v10752_v59 }
 0x75a   : > { %v3228_v52 = vadd.f32 %v10801_v4, %v2891_v9  ;;  %v14884_v4 = vld [vmem:[#allocation190_spill] sm:$0xff]  ;;  %v14887_v9 = vld [vmem:[#allocation193_spill] sm:$0xff] }
 0x75b   : > { %v2893_v56 = vpop.f32.mrf.mxu3  ;;  %v3529_v24 = vpop.f32.mrf.mxu2 }
 0x75c   : > { %v11241_v61 = vadd.f32 %v3529_v24, %v3226_v57 }
 0x760   : > { %3670 = vmatmul.f32.gmra.mxu3 %v10182_v29  ;;  %4580 = vmatmul.f32.gmra.mxu2 %v10182_v29  ;;  %v14879_v29 = vld [vmem:[#allocation178_spill] sm:$0xff] }
 0x761   : > { %v2894_v38 = vadd.f32 %v2893_v56, %v14879_v29  ;;  %v14888_v29 = vld [vmem:[#allocation184_spill] sm:$0xff] }
 0x763   : > { %v2896_v13 = vpop.f32.mrf.mxu3  ;;  %v3532_v34 = vpop.f32.mrf.mxu2  ;;  %v3229_v59 = vadd.f32 %v14881_v6, %v2894_v38 }
 0x764   : > { %v11247_v32 = vadd.f32 %v3532_v34, %v3227_v30  ;;  %v14886_v30 = vld [vmem:[#allocation93_spill] sm:$0xff] }
 0x765   : > { %v4862_v34 = vld [vmem:[#allocation9 + $0x468] sm:$0xff] }
 0x766   : > { %4867 = vmatpush.msra.mxu3 %v4862_v34  ;;  %v14894_v34 = vld [vmem:[#allocation94_spill] sm:$0xff] }
 0x768   : > { %3673 = vmatmul.f32.gmra.mxu3 %v10191_v3  ;;  %4583 = vmatmul.f32.gmra.mxu2 %v10191_v3  ;;  %v14882_v3 = vld [vmem:[#allocation180_spill] sm:$0xff] }
 0x769   : > { %v2897_v12 = vadd.f32 %v2896_v13, %v14882_v3  ;;  %v14890_v3 = vld [vmem:[#allocation186_spill] sm:$0xff] }
 0x76b   : > { %v2899_v37 = vpop.f32.mrf.mxu3  ;;  %v3535_v21 = vpop.f32.mrf.mxu2  ;;  %v3230_v40 = vadd.f32 %v14884_v4, %v2897_v12 }
 0x76c   : > { %v11253_v22 = vadd.f32 %v3535_v21, %v3228_v52  ;;  %v2900_v43 = vadd.f32 %v2899_v37, %v14885_v46  ;;  %v14892_v46 = vld [vmem:[#allocation194_spill] sm:$0xff] }
 0x76e   : > { %v3231_v13 = vadd.f32 %v14887_v9, %v2900_v43  ;;  %v4861_v9 = vld [vmem:[#allocation9 + $0x460] sm:$0xff] }
 0x76f   : > { %4868 = vmatpush.msra.mxu3 %v4861_v9  ;;  %v14902_v9 = vld [vmem:[#allocation25_spill] sm:$0xff] }
 0x770   : > { %3676 = vmatmul.f32.gmra.mxu3 %v14880_v18  ;;  %4586 = vmatmul.f32.gmra.mxu2 %v14880_v18  ;;  %v14889_v18 = vld [vmem:[#allocation82_spill] sm:$0xff] }
 0x773   : > { %v2902_v31 = vpop.f32.mrf.mxu3  ;;  %v3538_v5 = vpop.f32.mrf.mxu2 }
 0x774   : > { %v11259_v23 = vadd.f32 %v3538_v5, %v3229_v59  ;;  %v2903_v38 = vadd.f32 %v2902_v31, %v14888_v29 }
 0x776   : > { %v3232_v37 = vadd.f32 %v10848_v0, %v2903_v38 }
 0x778   : > { %3679 = vmatmul.f32.gmra.mxu3 %v14883_v19  ;;  %4589 = vmatmul.f32.gmra.mxu2 %v14883_v19  ;;  %v14891_v19 = vld [vmem:[#allocation32_spill] sm:$0xff] }
 0x77b   : > { %v2905_v57 = vpop.f32.mrf.mxu3  ;;  %v3541_v56 = vpop.f32.mrf.mxu2 }
 0x77c   : > { %v11265_v24 = vadd.f32 %v3541_v56, %v3230_v40  ;;  %v2906_v12 = vadd.f32 %v2905_v57, %v14890_v3 }
 0x77e   : > { %v3233_v4 = vadd.f32 %v10860_v1, %v2906_v12  ;;  %v14895_v1 = vld [vmem:[#allocation43_spill] sm:$0xff] }
 0x780   : > { %3682 = vmatmul.f32.gmra.mxu3 %v14886_v30  ;;  %4592 = vmatmul.f32.gmra.mxu2 %v14886_v30  ;;  %v14893_v30 = vld [vmem:[#allocation189_spill] sm:$0xff] }
 0x783   : > { %v2908_v10 = vpop.f32.mrf.mxu3  ;;  %v3544_v52 = vpop.f32.mrf.mxu2 }
 0x784   : > { %v11271_v21 = vadd.f32 %v3544_v52, %v3231_v13  ;;  %v2909_v0 = vadd.f32 %v2908_v10, %v14893_v30  ;;  %v14898_v10 = vld [vmem:[#allocation91_spill] sm:$0xff] }
 0x785   : > { %v14901_v30 = vld [vmem:[#allocation79_spill] sm:$0xff] }
 0x786   : > { %v3234_v57 = vadd.f32 %v10874_v49, %v2909_v0 }
 0x788   : > { %3685 = vmatmul.f32.gmra.mxu3 %v14889_v18  ;;  %4595 = vmatmul.f32.gmra.mxu2 %v14889_v18  ;;  %v14896_v18 = vld [vmem:[#allocation192_spill] sm:$0xff] }
 0x78b   : > { %v2911_v6 = vpop.f32.mrf.mxu3  ;;  %v3547_v59 = vpop.f32.mrf.mxu2 }
 0x78c   : > { %v11277_v5 = vadd.f32 %v3547_v59, %v3232_v37  ;;  %v2912_v37 = vadd.f32 %v2911_v6, %v14896_v18  ;;  %v14897_v59 = vld [vmem:[#allocation83_spill] sm:$0xff]  ;;  %v14904_v18 = vld [vmem:[#allocation65_spill] sm:$0xff] }
 0x78e   : > { %v3235_v3 = vadd.f32 %v14898_v10, %v2912_v37  ;;  %v4860_v37 = vld [vmem:[#allocation9 + $0x458] sm:$0xff] }
 0x78f   : > { %4869 = vmatpush.msra.mxu3 %v4860_v37 }
 0x790   : > { %3688 = vmatmul.f32.gmra.mxu3 %v14891_v19  ;;  %4598 = vmatmul.f32.gmra.mxu2 %v14891_v19 }
 0x793   : > { %v3550_v40 = vpop.f32.mrf.mxu2  ;;  %v3641_v31 = vpop.f32.mrf.mxu3 }
 0x794   : > { %v11283_v56 = vadd.f32 %v3550_v40, %v3233_v4  ;;  %v3785_v43 = vadd.f32 %v3641_v31, %v14892_v46  ;;  %v14899_v40 = vld [vmem:[#allocation40_spill] sm:$0xff]  ;;  %v14900_v31 = vld [vmem:[#allocation174_spill] sm:$0xff] }
 0x796   : > { %v4107_v46 = vadd.f32 %v14900_v31, %v3785_v43  ;;  %v14907_v31 = vld [vmem:[#allocation60_spill] sm:$0xff] }
 0x798   : > { %3691 = vmatmul.f32.gmra.mxu3 %v14894_v34  ;;  %4601 = vmatmul.f32.gmra.mxu2 %v14894_v34  ;;  %v4478_v6 = vadd.f32 %v10900_v25, %v4107_v46 }
 0x79b   : > { %v3553_v13 = vpop.f32.mrf.mxu2  ;;  %v3644_v52 = vpop.f32.mrf.mxu3 }
 0x79c   : > { %v11290_v29 = vadd.f32 %v3553_v13, %v3234_v57  ;;  %v3786_v38 = vadd.f32 %v3644_v52, %v14895_v1  ;;  %v14903_v52 = vld [vmem:[#allocation176_spill] sm:$0xff] }
 0x79e   : > { %v4108_v1 = vadd.f32 %v14903_v52, %v3786_v38  ;;  %v14908_v38 = vld [vmem:[#allocation89_spill] sm:$0xff] }
 0x7a0   : > { %3694 = vmatmul.f32.gmra.mxu3 %v14897_v59  ;;  %4604 = vmatmul.f32.gmra.mxu2 %v14897_v59  ;;  %v4479_v43 = vadd.f32 %v10916_v36, %v4108_v1  ;;  %v14910_v36 = vld [vmem:[#allocation179_spill] sm:$0xff]  ;;  %v14911_v1 = vld [vmem:[#allocation58_spill] sm:$0xff] }
 0x7a3   : > { %v3556_v12 = vpop.f32.mrf.mxu2  ;;  %v3647_v19 = vpop.f32.mrf.mxu3 }
 0x7a4   : > { %v11297_v4 = vadd.f32 %v3556_v12, %v3235_v3  ;;  %v3787_v49 = vadd.f32 %v3647_v19, %v14899_v40  ;;  %v14905_v3 = vld [vmem:[#allocation73_spill] sm:$0xff] }
 0x7a5   : > { %v14906_v19 = vld [vmem:[#allocation177_spill] sm:$0xff] }
 0x7a6   : > { %v4109_v40 = vadd.f32 %v14906_v19, %v3787_v49  ;;  %v14914_v19 = vld [vmem:[#allocation181_spill] sm:$0xff] }
 0x7a8   : > { %3697 = vmatmul.f32.gmra.mxu3 %v14901_v30  ;;  %4607 = vmatmul.f32.gmra.mxu2 %v14901_v30  ;;  %v4480_v46 = vadd.f32 %v14908_v38, %v4109_v40  ;;  %v4859_v38 = vld [vmem:[#allocation9 + $0x450] sm:$0xff] }
 0x7a9   : > { %4870 = vmatpush.msra.mxu3 %v4859_v38  ;;  %v14922_v38 = vld [vmem:[#allocation48_spill] sm:$0xff] }
 0x7ab   : > { %v3650_v0 = vpop.f32.mrf.mxu3  ;;  %v4560_v34 = vpop.f32.mrf.mxu2 }
 0x7ac   : > { %v3788_v57 = vadd.f32 %v3650_v0, %v14902_v9  ;;  %v11305_v13 = vadd.f32 %v4560_v34, %v4478_v6  ;;  %v14909_v0 = vld [vmem:[#allocation88_spill] sm:$0xff] }
 0x7ae   : > { %v4110_v52 = vadd.f32 %v14910_v36, %v3788_v57 }
 0x7b0   : > { %3700 = vmatmul.f32.gmra.mxu3 %v14904_v18  ;;  %4610 = vmatmul.f32.gmra.mxu2 %v14904_v18  ;;  %v14912_v18 = vld [vmem:[#allocation62_spill] sm:$0xff] }
 0x7b1   : > { %v4481_v49 = vadd.f32 %v14912_v18, %v4110_v52  ;;  %v14917_v52 = vld [vmem:[#allocation183_spill] sm:$0xff]  ;;  %v14918_v18 = vld [vmem:[#allocation52_spill] sm:$0xff] }
 0x7b3   : > { %v3653_v59 = vpop.f32.mrf.mxu3  ;;  %v4563_v10 = vpop.f32.mrf.mxu2 }
 0x7b4   : > { %v3789_v25 = vadd.f32 %v3653_v59, %v14905_v3  ;;  %v11312_v12 = vadd.f32 %v4563_v10, %v4479_v43  ;;  %v14913_v59 = vld [vmem:[#allocation95_spill] sm:$0xff] }
 0x7b6   : > { %v4111_v40 = vadd.f32 %v14914_v19, %v3789_v25  ;;  %v14919_v25 = vld [vmem:[#allocation78_spill] sm:$0xff] }
 0x7b8   : > { %3703 = vmatmul.f32.gmra.mxu3 %v14907_v31  ;;  %4613 = vmatmul.f32.gmra.mxu2 %v14907_v31  ;;  %v14915_v31 = vld [vmem:[#allocation55_spill] sm:$0xff]  ;;  %v4482_v57 = vadd.f32 %v10956_v35, %v4111_v40  ;;  %v14921_v35 = vld [vmem:[#allocation185_spill] sm:$0xff] }
 0x7bb   : > { %v3656_v30 = vpop.f32.mrf.mxu3  ;;  %v4566_v6 = vpop.f32.mrf.mxu2 }
 0x7bc   : > { %v3790_v34 = vadd.f32 %v3656_v30, %v14909_v0  ;;  %v11319_v9 = vadd.f32 %v4566_v6, %v4480_v46  ;;  %v14916_v6 = vld [vmem:[#allocation92_spill] sm:$0xff] }
 0x7c0   : > { %3706 = vmatmul.f32.gmra.mxu3 %v14911_v1  ;;  %4616 = vmatmul.f32.gmra.mxu2 %v14911_v1  ;;  %v4112_v1 = vadd.f32 %v14917_v52, %v3790_v34 }
 0x7c3   : > { %v3659_v37 = vpop.f32.mrf.mxu3  ;;  %v4569_v43 = vpop.f32.mrf.mxu2 }
 0x7c4   : > { %v3791_v10 = vadd.f32 %v3659_v37, %v14913_v59  ;;  %v11326_v3 = vadd.f32 %v4569_v43, %v4481_v49  ;;  %v4483_v49 = vadd.f32 %v14919_v25, %v4112_v1  ;;  %v14920_v59 = vld [vmem:[#allocation66_spill] sm:$0xff]  ;;  %v14925_v1 = vld [vmem:[#allocation188_spill] sm:$0xff]  ;;  %v14926_v25 = vld [vmem:[#allocation53_spill] sm:$0xff] }
 0x7c6   : > { %v4113_v40 = vadd.f32 %v14921_v35, %v3791_v10 }
 0x7c8   : > { %3709 = vmatmul.f32.gmra.mxu3 %v14915_v31  ;;  %4619 = vmatmul.f32.gmra.mxu2 %v14915_v31  ;;  %v4484_v34 = vadd.f32 %v10984_v14, %v4113_v40  ;;  %v14928_v40 = vld [vmem:[#allocation191_spill] sm:$0xff] }
 0x7cb   : > { %v3662_v46 = vpop.f32.mrf.mxu3  ;;  %v4572_v30 = vpop.f32.mrf.mxu2 }
 0x7cc   : > { %v3792_v0 = vadd.f32 %v3662_v46, %v14916_v6  ;;  %v11333_v36 = vadd.f32 %v4572_v30, %v4482_v57  ;;  %v14923_v30 = vld [vmem:[#allocation195_spill] sm:$0xff] }
 0x7d0   : > { %3712 = vmatmul.f32.gmra.mxu3 %v14918_v18  ;;  %4622 = vmatmul.f32.gmra.mxu2 %v14918_v18  ;;  %v4114_v18 = vadd.f32 %v14925_v1, %v3792_v0  ;;  %v14930_v0 = vld [vmem:[#allocation196_spill] sm:$0xff]  ;;  %v14931_v1 = vld [vmem:[#allocation81_spill] sm:$0xff] }
 0x7d2   : > { %v4485_v10 = vadd.f32 %v10998_v20, %v4114_v18  ;;  %v14932_v20 = vld [vmem:[#allocation37_spill] sm:$0xff] }
 0x7d3   : > { %v3665_v37 = vpop.f32.mrf.mxu3  ;;  %v4575_v43 = vpop.f32.mrf.mxu2 }
 0x7d4   : > { %v3793_v19 = vadd.f32 %v3665_v37, %v14920_v59  ;;  %v11340_v31 = vadd.f32 %v4575_v43, %v4483_v49  ;;  %v4858_v49 = vld [vmem:[#allocation9 + $0x448] sm:$0xff]  ;;  %v14927_v59 = vld [vmem:[#allocation59_spill] sm:$0xff] }
 0x7d5   : > { %4871 = vmatpush.msra.mxu3 %v4858_v49 }
 0x7d8   : > { %3715 = vmatmul.f32.gmra.mxu3 %v14922_v38  ;;  %4625 = vmatmul.f32.gmra.mxu2 %v14922_v38  ;;  %v4115_v38 = vadd.f32 %v14928_v40, %v3793_v19 }
 0x7db   : > { %v3668_v57 = vpop.f32.mrf.mxu3  ;;  %v4578_v46 = vpop.f32.mrf.mxu2 }
 0x7dc   : > { %v3794_v6 = vadd.f32 %v3668_v57, %v14923_v30  ;;  %v11347_v52 = vadd.f32 %v4578_v46, %v4484_v34  ;;  %v14929_v34 = vld [vmem:[#allocation57_spill] sm:$0xff]  ;;  %v4486_v57 = vadd.f32 %v14930_v0, %v4115_v38  ;;  %v11371_v0 = vpop.f32.mrf.mxu0 }
 0x7dd   : > { %v14936_v38 = vld [vmem:[#allocation169_spill] sm:$0xff] }
 0x7de   : > { %14924 = vst [vmem:[#allocation142_spill] sm:$0xff] %v11347_v52  ;;  %v4116_v18 = vadd.f32 %v14932_v20, %v3794_v6  ;;  %v14933_v52 = vld [vmem:[#allocation51_spill] sm:$0xff] }
 0x7e0   : > { %3718 = vmatmul.f32.gmra.mxu3 %v14926_v25  ;;  %4628 = vmatmul.f32.gmra.mxu2 %v14926_v25  ;;  %v4487_v19 = vadd.f32 %v11039_v11, %v4116_v18  ;;  %v14939_v11 = vld [vmem:[#allocation96_spill] sm:$0xff]  ;;  %v14940_v18 = vld [vmem:[#allocation71_spill] sm:$0xff] }
 0x7e3   : > { %v3671_v37 = vpop.f32.mrf.mxu3  ;;  %v4581_v43 = vpop.f32.mrf.mxu2 }
 0x7e4   : > { %v3795_v14 = vadd.f32 %v3671_v37, %v14927_v59  ;;  %v11354_v35 = vadd.f32 %v4581_v43, %v4485_v10  ;;  %v14934_v43 = vld [vmem:[#allocation24_spill] sm:$0xff] }
 0x7e8   : > { %3721 = vmatmul.f32.gmra.mxu3 %v14929_v34  ;;  %4631 = vmatmul.f32.gmra.mxu2 %v14929_v34  ;;  %v4250_v34 = vrot.slane %v14936_v38, 7 }
 0x7ea   : > { %v11377_v6 = vsel %vm1000_vm3, %v11193_v7, %v4250_v34 }
 0x7eb   : > { %v3674_v46 = vpop.f32.mrf.mxu3  ;;  %v4584_v30 = vpop.f32.mrf.mxu2  ;;  %14938 = vst [vmem:[#allocation146_spill] sm:$0xff] %v11377_v6  ;;  %4471 = vmatmul.f32.gmra.mxu0 %v11377_v6 }
 0x7ec   : > { %v3796_v25 = vadd.f32 %v3674_v46, %v14931_v1  ;;  %v11361_v49 = vadd.f32 %v4584_v30, %v4486_v57  ;;  %v14937_v57 = vld [vmem:[#allocation27_spill] sm:$0xff]  ;;  %v11392_v6 = vpop.f32.mrf.mxu0 }
 0x7ed   : > { %v4117_v46 = vadd.f32 %v14937_v57, %v3795_v14 }
 0x7ef   : > { %v4488_v30 = vadd.f32 %v11059_v15, %v4117_v46 }
 0x7f0   : > { %3724 = vmatmul.f32.gmra.mxu3 %v14933_v52  ;;  %4634 = vmatmul.f32.gmra.mxu2 %v14933_v52  ;;  %v4857_v52 = vld [vmem:[#allocation9 + $0x440] sm:$0xff] }
 0x7f1   : > { %4872 = vmatpush.msra.mxu3 %v4857_v52 }
 0x7f3   : > { %v3677_v10 = vpop.f32.mrf.mxu3  ;;  %v4587_v37 = vpop.f32.mrf.mxu2 }
 0x7f4   : > { %v3797_v59 = vadd.f32 %v3677_v10, %v14934_v43  ;;  %v11368_v40 = vadd.f32 %v4587_v37, %v4487_v19  ;;  %v14942_v10 = vld [vmem:[#allocation77_spill] sm:$0xff]  ;;  %v14943_v43 = vld [vmem:[#allocation172_spill] sm:$0xff] }
 0x7f5   : > { %v4118_v37 = vadd.f32 %v14942_v10, %v3796_v25  ;;  %v11390_v57 = vsel %vm1000_vm3, %v4250_v34, %v14943_v43  ;;  %v14949_v34 = vld [vmem:[#allocation104_spill] sm:$0xff]  ;;  %v14950_v43 = vld [vmem:[#allocation97_spill] sm:$0xff] }
 0x7f6   : > { %14935 = vst [vmem:[#allocation138_spill] sm:$0xff] %v11368_v40  ;;  %4474 = vmatmul.f32.gmra.mxu0 %v11390_v57  ;;  %v14953_v40 = vld [vmem:[#allocation108_spill] sm:$0xff] }
 0x7f7   : > { %14944 = vst [vmem:[#allocation151_spill] sm:$0xff] %v11390_v57  ;;  %v4489_v15 = vadd.f32 %v11076_v50, %v4118_v37  ;;  %v14952_v50 = vld [vmem:[#allocation69_spill] sm:$0xff] }
 0x7f8   : > { %3727 = vmatmul.f32.gmra.mxu3 %v14939_v11  ;;  %4637 = vmatmul.f32.gmra.mxu2 %v14939_v11  ;;  %v14945_v11 = vld [vmem:[#allocation100_spill] sm:$0xff] }
 0x7fb   : > { %v3680_v1 = vpop.f32.mrf.mxu3  ;;  %v4590_v20 = vpop.f32.mrf.mxu2 }
 0x7fc   : > { %v3798_v19 = vadd.f32 %v3680_v1, %v14940_v18  ;;  %v11384_v14 = vadd.f32 %v4590_v20, %v4488_v30  ;;  %v14946_v30 = vld [vmem:[#allocation64_spill] sm:$0xff]  ;;  %v14948_v20 = vld [vmem:[#allocation41_spill] sm:$0xff] }
 0x7fd   : > { %v4119_v18 = vadd.f32 %v14948_v20, %v3797_v59  ;;  %v14954_v59 = vld [vmem:[#allocation123_spill] sm:$0xff]  ;;  %v14955_v20 = vld [vmem:[#allocation101_spill] sm:$0xff] }
 0x7fe   : > { %14941 = vst [vmem:[#allocation141_spill] sm:$0xff] %v11384_v14  ;;  %v4120_v37 = vadd.f32 %v14952_v50, %v3798_v19  ;;  %v14958_v19 = vld [vmem:[#allocation127_spill] sm:$0xff]  ;;  %v14959_v50 = vld [vmem:[#allocation105_spill] sm:$0xff] }
 0x7ff   : > { %v4490_v10 = vadd.f32 %v11090_v55, %v4119_v18 }
 0x800   : > { %3730 = vmatmul.f32.gmra.mxu3 %v14945_v11  ;;  %4640 = vmatmul.f32.gmra.mxu2 %v14945_v11 }
 0x803   : > { %v3683_v46 = vpop.f32.mrf.mxu3  ;;  %v4593_v52 = vpop.f32.mrf.mxu2 }
 0x804   : > { %v3799_v1 = vadd.f32 %v3683_v46, %v14946_v30  ;;  %v11399_v25 = vadd.f32 %v4593_v52, %v4489_v15  ;;  %v4856_v15 = vld [vmem:[#allocation9 + $0x438] sm:$0xff]  ;;  %v4491_v46 = vadd.f32 %v14954_v59, %v4120_v37  ;;  %v14960_v37 = vld [vmem:[#allocation70_spill] sm:$0xff] }
 0x805   : > { %4873 = vmatpush.msra.mxu3 %v4856_v15 }
 0x806   : > { %14947 = vst [vmem:[#allocation145_spill] sm:$0xff] %v11399_v25  ;;  %v14961_v25 = vld [vmem:[#allocation116_spill] sm:$0xff] }
 0x808   : > { %3733 = vmatmul.f32.gmra.mxu3 %v14949_v34  ;;  %4643 = vmatmul.f32.gmra.mxu2 %v14949_v34  ;;  %v14956_v34 = vld [vmem:[#allocation75_spill] sm:$0xff] }
 0x80b   : > { %v3686_v57 = vpop.f32.mrf.mxu3  ;;  %v4596_v7 = vpop.f32.mrf.mxu2 }
 0x80c   : > { %v3800_v11 = vadd.f32 %v3686_v57, %v14950_v43  ;;  %v11406_v14 = vadd.f32 %v4596_v7, %v4490_v10  ;;  %v4121_v43 = vadd.f32 %v14956_v34, %v3799_v1  ;;  %v14957_v7 = vld [vmem:[#allocation112_spill] sm:$0xff] }
 0x80e   : > { %14951 = vst [vmem:[#allocation156_spill] sm:$0xff] %v11406_v14  ;;  %v4492_v57 = vadd.f32 %v14958_v19, %v4121_v43  ;;  %v4122_v59 = vadd.f32 %v14960_v37, %v3800_v11  ;;  %v14963_v43 = vld [vmem:[#allocation87_spill] sm:$0xff]  ;;  %v14964_v19 = vld [vmem:[#allocation120_spill] sm:$0xff] }
 0x80f   : > { %v14966_v37 = vld [vmem:[#allocation84_spill] sm:$0xff] }
 0x810   : > { %3736 = vmatmul.f32.gmra.mxu3 %v14953_v40  ;;  %4646 = vmatmul.f32.gmra.mxu2 %v14953_v40  ;;  %v4493_v1 = vadd.f32 %v11126_v53, %v4122_v59 }
 0x813   : > { %v3689_v52 = vpop.f32.mrf.mxu3  ;;  %v4599_v30 = vpop.f32.mrf.mxu2 }
 0x814   : > { %v3801_v55 = vadd.f32 %v3689_v52, %v14955_v20  ;;  %v11413_v18 = vadd.f32 %v4599_v30, %v4491_v46  ;;  %v14962_v30 = vld [vmem:[#allocation109_spill] sm:$0xff] }
 0x818   : > { %3739 = vmatmul.f32.gmra.mxu3 %v14957_v7  ;;  %4649 = vmatmul.f32.gmra.mxu2 %v14957_v7  ;;  %v4123_v7 = vadd.f32 %v14963_v43, %v3801_v55 }
 0x81a   : > { %v4494_v11 = vadd.f32 %v11137_v60, %v4123_v7  ;;  %v14969_v60 = vld [vmem:[#allocation56_spill] sm:$0xff] }
 0x81b   : > { %v3692_v10 = vpop.f32.mrf.mxu3  ;;  %v4602_v40 = vpop.f32.mrf.mxu2 }
 0x81c   : > { %v3802_v15 = vadd.f32 %v3692_v10, %v14959_v50  ;;  %v11420_v14 = vadd.f32 %v4602_v40, %v4492_v57  ;;  %v4855_v57 = vld [vmem:[#allocation9 + $0x430] sm:$0xff] }
 0x81d   : > { %4874 = vmatpush.msra.mxu3 %v4855_v57  ;;  %v14965_v40 = vld [vmem:[#allocation18_spill] sm:$0xff]  ;;  %v14970_v57 = vld [vmem:[#allocation128_spill] sm:$0xff] }
 0x81e   : > { %v4124_v59 = vadd.f32 %v14966_v37, %v3802_v15 }
 0x820   : > { %3742 = vmatmul.f32.gmra.mxu3 %v14961_v25  ;;  %4652 = vmatmul.f32.gmra.mxu2 %v14961_v25  ;;  %v4495_v55 = vadd.f32 %v11149_v47, %v4124_v59  ;;  %v14972_v47 = vld [vmem:[#allocation50_spill] sm:$0xff] }
 0x823   : > { %v3695_v46 = vpop.f32.mrf.mxu3  ;;  %v4605_v52 = vpop.f32.mrf.mxu2 }
 0x824   : > { %v3803_v20 = vadd.f32 %v3695_v46, %v14962_v30  ;;  %v11427_v34 = vadd.f32 %v4605_v52, %v4493_v1  ;;  %v14967_v1 = vld [vmem:[#allocation124_spill] sm:$0xff]  ;;  %v14968_v30 = vld [vmem:[#allocation113_spill] sm:$0xff] }
 0x826   : > { %v4125_v7 = vadd.f32 %v14969_v60, %v3803_v20 }
 0x828   : > { %3745 = vmatmul.f32.gmra.mxu3 %v14964_v19  ;;  %4655 = vmatmul.f32.gmra.mxu2 %v14964_v19  ;;  %v4496_v15 = vadd.f32 %v11158_v28, %v4125_v7  ;;  %v14975_v7 = vld [vmem:[#allocation67_spill] sm:$0xff] }
 0x82b   : > { %v3698_v10 = vpop.f32.mrf.mxu3  ;;  %v4608_v25 = vpop.f32.mrf.mxu2 }
 0x82c   : > { %v3804_v53 = vadd.f32 %v3698_v10, %v14965_v40  ;;  %v11434_v50 = vadd.f32 %v4608_v25, %v4494_v11  ;;  %v14971_v25 = vld [vmem:[#allocation118_spill] sm:$0xff] }
 0x82e   : > { %v4126_v59 = vadd.f32 %v14972_v47, %v3804_v53 }
 0x830   : > { %3748 = vmatmul.f32.gmra.mxu3 %v14967_v1  ;;  %4658 = vmatmul.f32.gmra.mxu2 %v14967_v1  ;;  %v14973_v1 = vld [vmem:[#allocation131_spill] sm:$0xff]  ;;  %v4497_v20 = vadd.f32 %v11173_v41, %v4126_v59 }
 0x831   : > { %v14978_v41 = vld [vmem:[#allocation23_spill] sm:$0xff] }
 0x833   : > { %v3701_v46 = vpop.f32.mrf.mxu3  ;;  %v4611_v52 = vpop.f32.mrf.mxu2 }
 0x834   : > { %v3805_v43 = vadd.f32 %v3701_v46, %v14968_v30  ;;  %v11441_v19 = vadd.f32 %v4611_v52, %v4495_v55  ;;  %v4854_v55 = vld [vmem:[#allocation9 + $0x428] sm:$0xff]  ;;  %v14974_v30 = vld [vmem:[#allocation122_spill] sm:$0xff] }
 0x835   : > { %4875 = vmatpush.msra.mxu3 %v4854_v55  ;;  %v14979_v55 = vld [vmem:[#allocation139_spill] sm:$0xff] }
 0x838   : > { %3751 = vmatmul.f32.gmra.mxu3 %v14970_v57  ;;  %4661 = vmatmul.f32.gmra.mxu2 %v14970_v57  ;;  %v4127_v57 = vadd.f32 %v14975_v7, %v3805_v43 }
 0x83a   : > { %v4498_v53 = vadd.f32 %v11183_v44, %v4127_v57  ;;  %v14981_v44 = vld [vmem:[#allocation198_spill] sm:$0xff] }
 0x83b   : > { %v3704_v11 = vpop.f32.mrf.mxu3  ;;  %v4614_v10 = vpop.f32.mrf.mxu2 }
 0x83c   : > { %v3806_v40 = vadd.f32 %v3704_v11, %v14971_v25  ;;  %v11448_v37 = vadd.f32 %v4614_v10, %v4496_v15  ;;  %v14976_v15 = vld [vmem:[#allocation135_spill] sm:$0xff]  ;;  %v14977_v25 = vld [vmem:[#allocation126_spill] sm:$0xff] }
 0x83e   : > { %v4128_v59 = vadd.f32 %v14978_v41, %v3806_v40 }
 0x840   : > { %3754 = vmatmul.f32.gmra.mxu3 %v14973_v1  ;;  %4664 = vmatmul.f32.gmra.mxu2 %v14973_v1  ;;  %v4499_v43 = vadd.f32 %v11202_v16, %v4128_v59  ;;  %v14984_v59 = vld [vmem:[#allocation107_spill] sm:$0xff] }
 0x843   : > { %v3707_v46 = vpop.f32.mrf.mxu3  ;;  %v4617_v52 = vpop.f32.mrf.mxu2 }
 0x844   : > { %v3807_v28 = vadd.f32 %v3707_v46, %v14974_v30  ;;  %v11455_v60 = vadd.f32 %v4617_v52, %v4497_v20  ;;  %v14980_v52 = vld [vmem:[#allocation132_spill] sm:$0xff] }
 0x846   : > { %v4129_v57 = vadd.f32 %v14981_v44, %v3807_v28 }
 0x848   : > { %3757 = vmatmul.f32.gmra.mxu3 %v14976_v15  ;;  %4667 = vmatmul.f32.gmra.mxu2 %v14976_v15  ;;  %v14982_v15 = vld [vmem:[#allocation143_spill] sm:$0xff]  ;;  %v4500_v40 = vadd.f32 %v11371_v0, %v4129_v57 }
 0x849   : > { %v14987_v57 = vld [vmem:[#allocation111_spill] sm:$0xff] }
 0x84b   : > { %v3710_v11 = vpop.f32.mrf.mxu3  ;;  %v4620_v10 = vpop.f32.mrf.mxu2 }
 0x84c   : > { %v3808_v47 = vadd.f32 %v3710_v11, %v14977_v25  ;;  %v11462_v1 = vadd.f32 %v4620_v10, %v4498_v53  ;;  %v4853_v53 = vld [vmem:[#allocation9 + $0x420] sm:$0xff]  ;;  %v14983_v25 = vld [vmem:[#allocation130_spill] sm:$0xff] }
 0x84d   : > { %4876 = vmatpush.msra.mxu3 %v4853_v53  ;;  %v4406_v53 = vpop.f32.mrf.mxu0 }
 0x850   : > { %3760 = vmatmul.f32.gmra.mxu3 %v14979_v55  ;;  %4670 = vmatmul.f32.gmra.mxu2 %v14979_v55  ;;  %v4130_v55 = vadd.f32 %v14984_v59, %v3808_v47  ;;  %v4852_v47 = vld [vmem:[#allocation9 + $0x418] sm:$0xff] }
 0x851   : > { %4877 = vmatpush.msra.mxu3 %v4852_v47  ;;  %v5984_v47 = vld [vmem:[#allocation11 + $0x158] sm:$0xff] }
 0x852   : > { %v4501_v28 = vadd.f32 %v11392_v6, %v4130_v55 }
 0x853   : > { %v3713_v20 = vpop.f32.mrf.mxu3  ;;  %v4623_v46 = vpop.f32.mrf.mxu2 }
 0x854   : > { %v3809_v30 = vadd.f32 %v3713_v20, %v14980_v52  ;;  %v11469_v7 = vadd.f32 %v4623_v46, %v4499_v43  ;;  %v14985_v43 = vld [vmem:[#allocation147_spill] sm:$0xff]  ;;  %v14986_v52 = vld [vmem:[#allocation137_spill] sm:$0xff] }
 0x858   : > { %3763 = vmatmul.f32.gmra.mxu3 %v14982_v15  ;;  %4673 = vmatmul.f32.gmra.mxu2 %v14982_v15  ;;  %v4131_v15 = vadd.f32 %v14987_v57, %v3809_v30  ;;  %v4851_v30 = vld [vmem:[#allocation9 + $0x410] sm:$0xff] }
 0x859   : > { %4878 = vmatpush.msra.mxu3 %v4851_v30  ;;  %v14990_v57 = vld [vmem:[#allocation154_spill] sm:$0xff]  ;;  %v5981_v30 = vld [vmem:[#allocation11 + $0x140] sm:$0xff] }
 0x85b   : > { %v3716_v11 = vpop.f32.mrf.mxu3  ;;  %v4626_v10 = vpop.f32.mrf.mxu2 }
 0x85c   : > { %v3810_v16 = vadd.f32 %v3716_v11, %v14983_v25  ;;  %v11476_v41 = vadd.f32 %v4626_v10, %v4500_v40  ;;  %v14988_v40 = vld [vmem:[#allocation150_spill] sm:$0xff]  ;;  %v5988_v11 = vld [vmem:[#allocation11 + $0x178] sm:$0xff]  ;;  %v4502_v10 = vadd.f32 %v4406_v53, %v4131_v15  ;;  %v4849_v15 = vld [vmem:[#allocation9 + $0x400] sm:$0xff] }
 0x85d   : > { %5989 = vmatpush.msrb.mxu2 %v5988_v11  ;;  %v5985_v53 = vld [vmem:[#allocation11 + $0x160] sm:$0xff] }
 0x860   : > { %3766 = vmatmul.f32.gmra.mxu3 %v14985_v43  ;;  %4676 = vmatmul.f32.gmra.mxu2 %v14985_v43  ;;  %v14989_v43 = vld [vmem:[#allocation115_spill] sm:$0xff] }
 0x863   : > { %v3719_v20 = vpop.f32.mrf.mxu3  ;;  %v4629_v46 = vpop.f32.mrf.mxu2 }
 0x864   : > { %v11483_v44 = vadd.f32 %v3719_v20, %v14986_v52  ;;  %v11485_v0 = vadd.f32 %v4629_v46, %v4501_v28  ;;  %v4132_v28 = vadd.f32 %v14989_v43, %v3810_v16  ;;  %v5987_v20 = vld [vmem:[#allocation11 + $0x170] sm:$0xff]  ;;  %v4850_v46 = vld [vmem:[#allocation9 + $0x408] sm:$0xff] }
 0x865   : > { %5990 = vmatpush.msrb.mxu2 %v5987_v20  ;;  %v5986_v52 = vld [vmem:[#allocation11 + $0x168] sm:$0xff]  ;;  %4879 = vmatpush.msra.mxu3 %v4850_v46 }
 0x866   : > { %v5982_v43 = vld [vmem:[#allocation11 + $0x148] sm:$0xff] }
 0x867   : > { %5991 = vmatpush.msrb.mxu2 %v5986_v52  ;;  %4880 = vmatpush.msra.mxu3 %v4849_v15  ;;  %v5978_v52 = vld [vmem:[#allocation11 + $0x128] sm:$0xff]  ;;  %v5976_v15 = vld [vmem:[#allocation11 + $0x118] sm:$0xff] }
 0x868   : > { %3769 = vmatmul.f32.gmra.mxu3 %v14988_v40  ;;  %4679 = vmatmul.f32.gmra.mxu2 %v14988_v40  ;;  %v4409_v40 = vpop.f32.mrf.mxu0 }
 0x869   : > { %5992 = vmatpush.msrb.mxu2 %v5985_v53 }
 0x86b   : > { %v3722_v6 = vpop.f32.mrf.mxu3  ;;  %v4632_v25 = vpop.f32.mrf.mxu2  ;;  %5993 = vmatpush.msrb.mxu2 %v5984_v47  ;;  %v5973_v47 = vld [vmem:[#allocation11 + $0x100] sm:$0xff] }
 0x86c   : > { %v11491_v59 = vadd.f32 %v3722_v6, %v11152_v42  ;;  %v11493_v55 = vadd.f32 %v4632_v25, %v4502_v10  ;;  %v4503_v42 = vadd.f32 %v4409_v40, %v4132_v28  ;;  %v5983_v25 = vld [vmem:[#allocation11 + $0x150] sm:$0xff]  ;;  %v5980_v28 = vld [vmem:[#allocation11 + $0x138] sm:$0xff] }
 0x86d   : > { %5994 = vmatpush.msrb.mxu2 %v5983_v25  ;;  %v5975_v40 = vld [vmem:[#allocation11 + $0x110] sm:$0xff] }
 0x86f   : > { %5995 = vmatpush.msrb.mxu2 %v5982_v43  ;;  %v14993_v43 = vld [vmem:[#allocation19_spill] sm:$0xff] }
 0x870   : > { %3772 = vmatmul.f32.gmra.mxu3 %v14990_v57  ;;  %4682 = vmatmul.f32.gmra.mxu2 %v14990_v57  ;;  %v5977_v57 = vld [vmem:[#allocation11 + $0x120] sm:$0xff] }
 0x871   : > { %5996 = vmatpush.msrb.mxu2 %v5981_v30 }
 0x873   : > { %v3725_v11 = vpop.f32.mrf.mxu3  ;;  %v4635_v10 = vpop.f32.mrf.mxu2  ;;  %5997 = vmatpush.msrb.mxu2 %v5980_v28 }
 0x874   : > { %v11499_v16 = vadd.f32 %v3725_v11, %v11162_v45  ;;  %v11501_v6 = vadd.f32 %v4635_v10, %v4503_v42  ;;  %v5979_v45 = vld [vmem:[#allocation11 + $0x130] sm:$0xff]  ;;  %v14991_v42 = vld [vmem:[#allocation165_spill] sm:$0xff]  ;;  %v14992_v10 = vld [vmem:[#allocation47_spill] sm:$0xff] }
 0x875   : > { %5998 = vmatpush.msrb.mxu2 %v5979_v45 }
 0x877   : > { %5999 = vmatpush.msrb.mxu2 %v5978_v52 }
 0x878   : > { %3775 = vmatmul.f32.gmra.mxu3 %v10643_v8  ;;  %4685 = vmatmul.f32.gmra.mxu2 %v10643_v8 }
 0x879   : > { %6000 = vmatpush.msrb.mxu2 %v5977_v57  ;;  %v14996_v57 = vld [vmem:[#allocation21_spill] sm:$0xff] }
 0x87b   : > { %v3728_v20 = vpop.f32.mrf.mxu3  ;;  %6001 = vmatpush.msrb.mxu2 %v5976_v15  ;;  %v11535_v15 = vpop.f32.mrf.mxu1 }
 0x87c   : > { %v11506_v46 = vadd.f32 %v3728_v20, %v11171_v27  ;;  %v5974_v27 = vld [vmem:[#allocation11 + $0x108] sm:$0xff]  ;;  %v14994_v20 = vld [vmem:[#allocation171_spill] sm:$0xff] }
 0x87d   : > { %6002 = vmatpush.msrb.mxu2 %v5975_v40 }
 0x87f   : > { %6003 = vmatpush.msrb.mxu2 %v5974_v27  ;;  %v15000_v27 = vld [vmem:[#allocation46_spill] sm:$0xff] }
 0x880   : > { %3778 = vmatmul.f32.gmra.mxu3 %v10663_v58  ;;  %4688 = vmatmul.f32.gmra.mxu2 %v10663_v58 }
 0x881   : > { %6004 = vmatpush.msrb.mxu2 %v5973_v47 }
 0x883   : > { %v3731_v8 = vpop.f32.mrf.mxu3  ;;  %v11542_v47 = vpop.f32.mrf.mxu1 }
 0x884   : > { %v11511_v53 = vadd.f32 %v3731_v8, %v11180_v39 }
 0x888   : > { %3781 = vmatmul.f32.gmra.mxu3 %v14991_v42  ;;  %4691 = vmatmul.f32.gmra.mxu2 %v14991_v42 }
 0x88b   : > { %v3734_v11 = vpop.f32.mrf.mxu3 }
 0x88c   : > { %v11516_v58 = vadd.f32 %v3734_v11, %v11190_v26  ;;  %v14995_v26 = vld [vmem:[#allocation20_spill] sm:$0xff]  ;;  %v11544_v11 = vpop.f32.mrf.mxu2 }
 0x890   : > { %4694 = vmatmul.f32.gmra.mxu2 %v14870_v17  ;;  %4881 = vmatmul.f32.vlgmr.msra.gmra.mxu3 %v14992_v10  ;;  %v15002_v10 = vld [vmem:[#allocation45_spill] sm:$0xff] }
 0x893   : > { %v3737_v39 = vpop.f32.mrf.mxu3 }
 0x894   : > { %v11521_v25 = vadd.f32 %v3737_v39, %v11205_v33  ;;  %v14997_v33 = vld [vmem:[#allocation39_spill] sm:$0xff] }
 0x898   : > { %4697 = vmatmul.f32.gmra.mxu2 %v14936_v38  ;;  %4884 = vmatmul.f32.gmra.mxu3 %v14993_v43 }
 0x89b   : > { %v3740_v30 = vpop.f32.mrf.mxu3 }
 0x89c   : > { %v11526_v28 = vadd.f32 %v3740_v30, %v11211_v54  ;;  %v14999_v54 = vld [vmem:[#allocation28_spill] sm:$0xff]  ;;  %v11555_v30 = vpop.f32.mrf.mxu2 }
 0x8a0   : > { %4700 = vmatmul.f32.gmra.mxu2 %v14994_v20  ;;  %4887 = vmatmul.f32.gmra.mxu3 %v14995_v26  ;;  %v15004_v26 = vld [vmem:[#allocation33_spill] sm:$0xff] }
 0x8a3   : > { %v3743_v45 = vpop.f32.mrf.mxu3 }
 0x8a4   : > { %v11531_v52 = vadd.f32 %v3743_v45, %v11217_v62 }
 0x8a8   : > { %4890 = vmatmul.f32.gmra.mxu3 %v14996_v57  ;;  %6005 = vmatmul.f32.vlgmr.msrb.gmra.mxu2 %v14997_v33 }
 0x8ab   : > { %v3746_v8 = vpop.f32.mrf.mxu3 }
 0x8ac   : > { %v11538_v40 = vadd.f32 %v3746_v8, %v11223_v48  ;;  %v11553_v48 = vpop.f32.mrf.mxu1  ;;  %v15006_v8 = vld [vmem:[#allocation22_spill] sm:$0xff] }
 0x8ae   : > { %14998 = vst [vmem:[#allocation158_spill] sm:$0xff] %v11538_v40 }
 0x8b0   : > { %4893 = vmatmul.f32.gmra.mxu3 %v14999_v54  ;;  %6008 = vmatmul.f32.gmra.mxu2 %v15000_v27  ;;  %v15008_v27 = vld [vmem:[#allocation35_spill] sm:$0xff] }
 0x8b3   : > { %v3749_v42 = vpop.f32.mrf.mxu3 }
 0x8b4   : > { %v11547_v62 = vadd.f32 %v3749_v42, %v11229_v63  ;;  %v11561_v33 = vpop.f32.mrf.mxu1  ;;  %v11563_v63 = vpop.f32.mrf.mxu2 }
 0x8b6   : > { %15001 = vst [vmem:[#allocation149_spill] sm:$0xff] %v11547_v62 }
 0x8b8   : > { %4896 = vmatmul.f32.gmra.mxu3 %v15002_v10 }
 0x8bb   : > { %v3752_v39 = vpop.f32.mrf.mxu3 }
 0x8bc   : > { %v11551_v43 = vadd.f32 %v3752_v39, %v11235_v2  ;;  %v11570_v42 = vpop.f32.mrf.mxu1  ;;  %v11572_v10 = vpop.f32.mrf.mxu2 }
 0x8be   : > { %15003 = vst [vmem:[#allocation153_spill] sm:$0xff] %v11551_v43 }
 0x8c0   : > { %4899 = vmatmul.f32.gmra.mxu3 %v15004_v26  ;;  %v15010_v26 = vld [vmem:[#allocation36_spill] sm:$0xff] }
 0x8c3   : > { %v3755_v45 = vpop.f32.mrf.mxu3 }
 0x8c4   : > { %v11559_v57 = vadd.f32 %v3755_v45, %v11241_v61 }
 0x8c6   : > { %15005 = vst [vmem:[#allocation159_spill] sm:$0xff] %v11559_v57  ;;  %v11578_v57 = vpop.f32.mrf.mxu1 }
 0x8c8   : > { %4902 = vmatmul.f32.gmra.mxu3 %v15006_v8  ;;  %v11580_v8 = vpop.f32.mrf.mxu2 }
 0x8cb   : > { %v3758_v54 = vpop.f32.mrf.mxu3 }
 0x8cc   : > { %v11567_v2 = vadd.f32 %v3758_v54, %v11247_v32  ;;  %v15012_v54 = vld [vmem:[#allocation26_spill] sm:$0xff] }
 0x8ce   : > { %15007 = vst [vmem:[#allocation161_spill] sm:$0xff] %v11567_v2  ;;  %v11589_v43 = vpop.f32.mrf.mxu1 }
 0x8d0   : > { %4905 = vmatmul.f32.gmra.mxu3 %v15008_v27 }
 0x8d3   : > { %v3761_v39 = vpop.f32.mrf.mxu3 }
 0x8d4   : > { %v11575_v61 = vadd.f32 %v3761_v39, %v11253_v22  ;;  %v11591_v22 = vpop.f32.mrf.mxu2  ;;  %v15014_v39 = vld [vmem:[#allocation90_spill] sm:$0xff] }
 0x8d6   : > { %15009 = vst [vmem:[#allocation164_spill] sm:$0xff] %v11575_v61  ;;  %v11597_v62 = vpop.f32.mrf.mxu1 }
 0x8d8   : > { %4908 = vmatmul.f32.gmra.mxu3 %v15010_v26 }
 0x8db   : > { %v3764_v45 = vpop.f32.mrf.mxu3 }
 0x8dc   : > { %v11583_v32 = vadd.f32 %v3764_v45, %v11259_v23  ;;  %v11599_v23 = vpop.f32.mrf.mxu2  ;;  %v15016_v45 = vld [vmem:[#allocation86_spill] sm:$0xff] }
 0x8de   : > { %15011 = vst [vmem:[#allocation166_spill] sm:$0xff] %v11583_v32 }
 0x8e0   : > { %4911 = vmatmul.f32.gmra.mxu3 %v15012_v54 }
 0x8e3   : > { %v3767_v27 = vpop.f32.mrf.mxu3 }
 0x8e4   : > { %v11587_v2 = vadd.f32 %v3767_v27, %v11265_v24  ;;  %v15018_v27 = vld [vmem:[#allocation31_spill] sm:$0xff]  ;;  %v11608_v32 = vpop.f32.mrf.mxu2 }
 0x8e6   : > { %15013 = vst [vmem:[#allocation168_spill] sm:$0xff] %v11587_v2  ;;  %v11606_v2 = vpop.f32.mrf.mxu1 }
 0x8e7   : > { %15019 = vst [vmem:[#allocation175_spill] sm:$0xff] %v11606_v2 }
 0x8e8   : > { %4914 = vmatmul.f32.gmra.mxu3 %v15014_v39 }
 0x8eb   : > { %v3770_v26 = vpop.f32.mrf.mxu3 }
 0x8ec   : > { %v11595_v61 = vadd.f32 %v3770_v26, %v11271_v21  ;;  %v15021_v26 = vld [vmem:[#allocation30_spill] sm:$0xff] }
 0x8ee   : > { %15015 = vst [vmem:[#allocation170_spill] sm:$0xff] %v11595_v61  ;;  %v11614_v40 = vpop.f32.mrf.mxu1 }
 0x8f0   : > { %4917 = vmatmul.f32.gmra.mxu3 %v15016_v45  ;;  %v11616_v45 = vpop.f32.mrf.mxu2 }
 0x8f3   : > { %v3773_v54 = vpop.f32.mrf.mxu3 }
 0x8f4   : > { %v11603_v24 = vadd.f32 %v3773_v54, %v11277_v5  ;;  %v15023_v54 = vld [vmem:[#allocation29_spill] sm:$0xff] }
 0x8f6   : > { %15017 = vst [vmem:[#allocation173_spill] sm:$0xff] %v11603_v24  ;;  %v11625_v2 = vpop.f32.mrf.mxu1 }
 0x8f7   : > { %15025 = vst [vmem:[#allocation180_spill] sm:$0xff] %v11625_v2 }
 0x8f8   : > { %4920 = vmatmul.f32.gmra.mxu3 %v15018_v27 }
 0x8fb   : > { %v3776_v39 = vpop.f32.mrf.mxu3 }
 0x8fc   : > { %v11611_v21 = vadd.f32 %v3776_v39, %v11283_v56  ;;  %v11627_v56 = vpop.f32.mrf.mxu2  ;;  %v15026_v39 = vld [vmem:[#allocation85_spill] sm:$0xff] }
 0x8fe   : > { %15020 = vst [vmem:[#allocation178_spill] sm:$0xff] %v11611_v21 }
 0x900   : > { %4923 = vmatmul.f32.gmra.mxu3 %v15021_v26  ;;  %v11633_v26 = vld [vmem:[%s13932_s6] ss:$0 sm:$0xff] }
 0x903   : > { %v3779_v61 = vpop.f32.mrf.mxu3 }
 0x904   : > { %v11619_v5 = vadd.f32 %v3779_v61, %v11290_v29 }
 0x906   : > { %15022 = vst [vmem:[#allocation34_spill] sm:$0xff] %v11619_v5 }
 0x908   : > { %4926 = vmatmul.f32.gmra.mxu3 %v15023_v54  ;;  %v11637_v54 = vpop.f32.mrf.mxu1 }
 0x909   : > { %15027 = vst [vmem:[#allocation44_spill] sm:$0xff] %v11637_v54 }
 0x90b   : > { %v3782_v27 = vpop.f32.mrf.mxu3 }
 0x90c   : > { %v11623_v24 = vadd.f32 %v3782_v27, %v11297_v4  ;;  %v11639_v4 = vpop.f32.mrf.mxu2  ;;  %v15029_v27 = vld [vmem:[#allocation80_spill] sm:$0xff] }
 0x90d   : > { %15028 = vst [vmem:[#allocation190_spill] sm:$0xff] %v11639_v4 }
 0x90e   : > { %15024 = vst [vmem:[#allocation187_spill] sm:$0xff] %v11623_v24 }
 0x910   : > { %4929 = vmatmul.f32.gmra.mxu3 %v15026_v39  ;;  %v11663_v4 = vpop.f32.mrf.mxu1 }
 0x911   : > { %15035 = vst [vmem:[#allocation184_spill] sm:$0xff] %v11663_v4  ;;  %v15045_v4 = vld [vmem:[#allocation68_spill] sm:$0xff] }
 0x913   : > { %v4882_v21 = vpop.f32.mrf.mxu3 }
 0x914   : > { %v5026_v29 = vadd.f32 %v4882_v21, %v11305_v13 }
 0x916   : > { %v5078_v61 = vadd.f32 %v11633_v26, %v5026_v29 }
 0x918   : > { %4932 = vmatmul.f32.gmra.mxu3 %v15029_v27  ;;  %vm5126_vm6 = vcmp.ge.f32.partialorder %v5078_v61, 0.0  ;;  %v5174_v5 = vmul.f32 0.2, %v5078_v61  ;;  %v15034_v27 = vld [vmem:[#allocation76_spill] sm:$0xff] }
 0x91a   : > { %v11643_v39 = vsel %vm5126_vm6, %v5078_v61, %v5174_v5  ;;  %v15033_v5 = vld [vmem:[#allocation49_spill] sm:$0xff] }
 0x91b   : > { %15030 = vst [vmem:[#allocation182_spill] sm:$0xff] %v11643_v39  ;;  %v4885_v24 = vpop.f32.mrf.mxu3  ;;  %v11648_v2 = vsel %vm5272_vm7, %v11643_v39, 0.0  ;;  %8346 = vmatmul.msk.f32.gmra.mxu1 %vm5272_vm7, %v11643_v39  ;;  %v11665_v39 = vpop.f32.mrf.mxu2 }
 0x91c   : > { %15031 = vst [vmem:[#allocation93_spill] sm:$0xff] %v11648_v2  ;;  %v5027_v13 = vadd.f32 %v4885_v24, %v11312_v12  ;;  %v11655_v21 = vrot.slane %v11648_v2, 1 }
 0x91d   : > { %15036 = vst [vmem:[#allocation82_spill] sm:$0xff] %v11665_v39 }
 0x91e   : > { %15032 = vst [vmem:[#allocation193_spill] sm:$0xff] %v11655_v21  ;;  %v5079_v29 = vadd.f32 %v11633_v26, %v5027_v13  ;;  %v5968_v61 = vsel %vm1196_vm2, %v15033_v5, %v11655_v21  ;;  %v11673_v5 = vadd.s32 16, %v14544_v51 }
 0x91f   : > { %6011 = vmatmul.f32.gmra.mxu2 %v5968_v61 }
 0x920   : > { %4935 = vmatmul.f32.gmra.mxu3 %v15034_v27  ;;  %vm5127_vm8 = vcmp.ge.f32.partialorder %v5079_v29, 0.0  ;;  %v5175_v54 = vmul.f32 0.2, %v5079_v29  ;;  %vm5277_vm10 = vcmp.le.s32.totalorder %v11673_v5, 16 }
 0x922   : > { %v11667_v12 = vsel %vm5127_vm8, %v5079_v29, %v5175_v54  ;;  %v15039_v54 = vld [vmem:[#allocation72_spill] sm:$0xff] }
 0x923   : > { %15037 = vst [vmem:[#allocation186_spill] sm:$0xff] %v11667_v12  ;;  %v4888_v24 = vpop.f32.mrf.mxu3  ;;  %5582 = vmatmul.f32.gmra.mxu1 %v11667_v12  ;;  %v5880_v13 = vrot.slane %v11667_v12, 1 }
 0x924   : > { %v5028_v2 = vadd.f32 %v4888_v24, %v11319_v9 }
 0x925   : > { %v11678_v61 = vsel %vm1196_vm2, %v11655_v21, %v5880_v13  ;;  %v11696_v21 = vpop.f32.mrf.mxu2 }
 0x926   : > { %15038 = vst [vmem:[#allocation32_spill] sm:$0xff] %v11678_v61  ;;  %v5080_v27 = vadd.f32 %v11633_v26, %v5028_v2  ;;  %v11694_v2 = vpop.f32.mrf.mxu1 }
 0x927   : > { %6014 = vmatmul.f32.gmra.mxu2 %v11678_v61  ;;  %15042 = vst [vmem:[#allocation94_spill] sm:$0xff] %v11694_v2 }
 0x928   : > { %4938 = vmatmul.f32.gmra.mxu3 %v15039_v54  ;;  %vm5128_vm9 = vcmp.ge.f32.partialorder %v5080_v27, 0.0  ;;  %v5176_v29 = vmul.f32 0.2, %v5080_v27  ;;  %15043 = vst [vmem:[#allocation43_spill] sm:$0xff] %v11696_v21 }
 0x92a   : > { %v11684_v12 = vsel %vm5128_vm9, %v5080_v27, %v5176_v29 }
 0x92b   : > { %15040 = vst [vmem:[#allocation194_spill] sm:$0xff] %v11684_v12  ;;  %v4891_v9 = vpop.f32.mrf.mxu3  ;;  %v11689_v24 = vsel %vm5277_vm10, %v11684_v12, 0.0  ;;  %8347 = vmatmul.msk.f32.gmra.mxu1 %vm5277_vm10, %v11684_v12 }
 0x92c   : > { %15041 = vst [vmem:[#allocation189_spill] sm:$0xff] %v11689_v24  ;;  %v5029_v54 = vadd.f32 %v4891_v9, %v11326_v3  ;;  %v5881_v61 = vrot.slane %v11689_v24, 1 }
 0x92e   : > { %v5081_v27 = vadd.f32 %v11633_v26, %v5029_v54  ;;  %v11703_v29 = vsel %vm1196_vm2, %v5880_v13, %v5881_v61 }
 0x92f   : > { %15044 = vst [vmem:[#allocation192_spill] sm:$0xff] %v11703_v29  ;;  %6017 = vmatmul.f32.gmra.mxu2 %v11703_v29  ;;  %v11721_v29 = vpop.f32.mrf.mxu1 }
 0x930   : > { %4941 = vmatmul.f32.gmra.mxu3 %v15045_v4  ;;  %vm5129_vm11 = vcmp.ge.f32.partialorder %v5081_v27, 0.0  ;;  %v5177_v12 = vmul.f32 0.2, %v5081_v27  ;;  %v14117_v4 = vrot.slane %v11689_v24, 7  ;;  %15049 = vst [vmem:[#allocation174_spill] sm:$0xff] %v11721_v29 }
 0x932   : > { %v11707_v39 = vsel %vm5129_vm11, %v5081_v27, %v5177_v12  ;;  %v11723_v12 = vpop.f32.mrf.mxu2 }
 0x933   : > { %15046 = vst [vmem:[#allocation83_spill] sm:$0xff] %v11707_v39  ;;  %v4894_v2 = vpop.f32.mrf.mxu3  ;;  %8348 = vmatmul.msk.f32.gmra.mxu1 %vm5272_vm7, %v11707_v39  ;;  %v5284_v3 = vsel %vm5272_vm7, %v11707_v39, 0.0 }
 0x934   : > { %v5030_v13 = vadd.f32 %v4894_v2, %v11333_v36  ;;  %v11716_v9 = vrot.slane %v5284_v3, 7  ;;  %v11718_v54 = vrot.slane %v5284_v3, 1  ;;  %v15052_v3 = vld [vmem:[#allocation63_spill] sm:$0xff] }
 0x936   : > { %15047 = vst [vmem:[#allocation91_spill] sm:$0xff] %v11716_v9  ;;  %v5082_v27 = vadd.f32 %v11633_v26, %v5030_v13  ;;  %v11729_v21 = vsel %vm1196_vm2, %v5881_v61, %v11718_v54  ;;  %v11736_v36 = vsel %vm1000_vm3, %v14117_v4, %v11716_v9 }
 0x937   : > { %15048 = vst [vmem:[#allocation40_spill] sm:$0xff] %v11718_v54  ;;  %6020 = vmatmul.f32.gmra.mxu2 %v11729_v21 }
 0x938   : > { %15050 = vst [vmem:[#allocation79_spill] sm:$0xff] %v11729_v21  ;;  %v5178_v2 = vmul.f32 0.2, %v5082_v27  ;;  %4944 = vmatmul.f32.gmra.mxu3 %v15052_v3  ;;  %vm5130_vm12 = vcmp.ge.f32.partialorder %v5082_v27, 0.0  ;;  %v11752_v3 = vpop.f32.mrf.mxu1 }
 0x939   : > { %15051 = vst [vmem:[#allocation25_spill] sm:$0xff] %v11736_v36 }
 0x93a   : > { %v11740_v39 = vsel %vm5130_vm12, %v5082_v27, %v5178_v2  ;;  %15055 = vst [vmem:[#allocation73_spill] sm:$0xff] %v11752_v3  ;;  %v11754_v27 = vpop.f32.mrf.mxu2  ;;  %v15056_v2 = vld [vmem:[#allocation74_spill] sm:$0xff] }
 0x93b   : > { %15053 = vst [vmem:[#allocation176_spill] sm:$0xff] %v11740_v39  ;;  %v4897_v13 = vpop.f32.mrf.mxu3  ;;  %5591 = vmatmul.f32.gmra.mxu1 %v11740_v39  ;;  %v5883_v61 = vrot.slane %v11740_v39, 1 }
 0x93c   : > { %v5031_v29 = vadd.f32 %v4897_v13, %v11340_v31  ;;  %v15059_v13 = vld [vmem:[#allocation142_spill] sm:$0xff] }
 0x93d   : > { %v11748_v4 = vsel %vm1196_vm2, %v11718_v54, %v5883_v61 }
 0x93e   : > { %15054 = vst [vmem:[#allocation65_spill] sm:$0xff] %v11748_v4  ;;  %v5083_v21 = vadd.f32 %v11633_v26, %v5031_v29 }
 0x93f   : > { %6023 = vmatmul.f32.gmra.mxu2 %v11748_v4 }
 0x940   : > { %4947 = vmatmul.f32.gmra.mxu3 %v15056_v2  ;;  %vm5131_vm13 = vcmp.ge.f32.partialorder %v5083_v21, 0.0  ;;  %v5179_v36 = vmul.f32 0.2, %v5083_v21  ;;  %v11776_v9 = vpop.f32.mrf.mxu1 }
 0x941   : > { %15062 = vst [vmem:[#allocation88_spill] sm:$0xff] %v11776_v9 }
 0x942   : > { %v11757_v24 = vsel %vm5131_vm13, %v5083_v21, %v5179_v36  ;;  %v15061_v36 = vld [vmem:[#allocation54_spill] sm:$0xff] }
 0x943   : > { %15057 = vst [vmem:[#allocation177_spill] sm:$0xff] %v11757_v24  ;;  %v4900_v31 = vpop.f32.mrf.mxu3  ;;  %8349 = vmatmul.msk.f32.gmra.mxu1 %vm5277_vm10, %v11757_v24  ;;  %v11765_v29 = vsel %vm5277_vm10, %v11757_v24, 0.0  ;;  %v11778_v24 = vpop.f32.mrf.mxu2 }
 0x944   : > { %15058 = vst [vmem:[#allocation60_spill] sm:$0xff] %v11765_v29  ;;  %v5032_v54 = vadd.f32 %v4900_v31, %v15059_v13  ;;  %v5884_v4 = vrot.slane %v11765_v29, 1 }
 0x946   : > { %v5084_v2 = vadd.f32 %v11633_v26, %v5032_v54  ;;  %v11772_v21 = vsel %vm1196_vm2, %v5883_v61, %v5884_v4 }
 0x947   : > { %15060 = vst [vmem:[#allocation89_spill] sm:$0xff] %v11772_v21  ;;  %6026 = vmatmul.f32.gmra.mxu2 %v11772_v21 }
 0x948   : > { %4950 = vmatmul.f32.gmra.mxu3 %v15061_v36  ;;  %vm5132_vm14 = vcmp.ge.f32.partialorder %v5084_v2, 0.0  ;;  %v5180_v39 = vmul.f32 0.2, %v5084_v2  ;;  %v14137_v36 = vrot.slane %v11765_v29, 7 }
 0x94a   : > { %v11780_v3 = vsel %vm5132_vm14, %v5084_v2, %v5180_v39 }
 0x94b   : > { %15063 = vst [vmem:[#allocation179_spill] sm:$0xff] %v11780_v3  ;;  %v4903_v31 = vpop.f32.mrf.mxu3  ;;  %8350 = vmatmul.msk.f32.gmra.mxu1 %vm5272_vm7, %v11780_v3  ;;  %v11788_v54 = vsel %vm5272_vm7, %v11780_v3, 0.0  ;;  %v11815_v29 = vpop.f32.mrf.mxu2 }
 0x94c   : > { %15064 = vst [vmem:[#allocation58_spill] sm:$0xff] %v11788_v54  ;;  %v5033_v61 = vadd.f32 %v4903_v31, %v11354_v35  ;;  %v5885_v13 = vrot.slane %v11788_v54, 1  ;;  %v14136_v21 = vrot.slane %v11788_v54, 7  ;;  %v15067_v31 = vld [vmem:[#allocation61_spill] sm:$0xff]  ;;  %v11813_v54 = vpop.f32.mrf.mxu1 }
 0x94d   : > { %15069 = vst [vmem:[#allocation55_spill] sm:$0xff] %v11813_v54 }
 0x94e   : > { %v5085_v39 = vadd.f32 %v11633_v26, %v5033_v61  ;;  %v11797_v2 = vsel %vm1196_vm2, %v5884_v4, %v5885_v13  ;;  %v11805_v3 = vsel %vm1000_vm3, %v14137_v36, %v14136_v21  ;;  %15070 = vst [vmem:[#allocation92_spill] sm:$0xff] %v11815_v29 }
 0x94f   : > { %15065 = vst [vmem:[#allocation62_spill] sm:$0xff] %v11797_v2  ;;  %6029 = vmatmul.f32.gmra.mxu2 %v11797_v2  ;;  %v6358_v2 = vld [vmem:[#allocation11 + $0x1f8] sm:$0xff] }
 0x950   : > { %15066 = vst [vmem:[#allocation95_spill] sm:$0xff] %v11805_v3  ;;  %v5181_v35 = vmul.f32 0.2, %v5085_v39  ;;  %4953 = vmatmul.f32.gmra.mxu3 %v15067_v31  ;;  %vm5133_vm15 = vcmp.ge.f32.partialorder %v5085_v39, 0.0 }
 0x951   : > { %6359 = vmatpush.msrb.mxu3 %v6358_v2 }
 0x952   : > { %v11809_v9 = vsel %vm5133_vm15, %v5085_v39, %v5181_v35  ;;  %v15072_v39 = vld [vmem:[#allocation98_spill] sm:$0xff] }
 0x953   : > { %15068 = vst [vmem:[#allocation181_spill] sm:$0xff] %v11809_v9  ;;  %v4906_v61 = vpop.f32.mrf.mxu3  ;;  %5600 = vmatmul.f32.gmra.mxu1 %v11809_v9  ;;  %v5886_v4 = vrot.slane %v11809_v9, 1  ;;  %v5536_v9 = vld [vmem:[#allocation11 + $0x78] sm:$0xff]  ;;  %v11839_v2 = vpop.f32.mrf.mxu2 }
 0x954   : > { %v5034_v21 = vadd.f32 %v4906_v61, %v11361_v49  ;;  %5715 = vmatpush.msra.mxu0 %v5536_v9  ;;  %15077 = vst [vmem:[#allocation185_spill] sm:$0xff] %v11839_v2 }
 0x955   : > { %v11820_v36 = vsel %vm1196_vm2, %v5885_v13, %v5886_v4 }
 0x956   : > { %15071 = vst [vmem:[#allocation183_spill] sm:$0xff] %v11820_v36  ;;  %v5086_v31 = vadd.f32 %v11633_v26, %v5034_v21  ;;  %v15075_v21 = vld [vmem:[#allocation138_spill] sm:$0xff] }
 0x957   : > { %6032 = vmatmul.f32.gmra.mxu2 %v11820_v36 }
 0x958   : > { %4956 = vmatmul.f32.gmra.mxu3 %v15072_v39  ;;  %vm5134_vm0 = vcmp.ge.f32.partialorder %v5086_v31, 0.0  ;;  %v5182_v35 = vmul.f32 0.2, %v5086_v31  ;;  %v11837_v39 = vpop.f32.mrf.mxu1 }
 0x959   : > { %15076 = vst [vmem:[#allocation66_spill] sm:$0xff] %v11837_v39 }
 0x95a   : > { %v11825_v3 = vsel %vm5134_vm0, %v5086_v31, %v5182_v35  ;;  %v15079_v35 = vld [vmem:[#allocation102_spill] sm:$0xff] }
 0x95b   : > { %15073 = vst [vmem:[#allocation52_spill] sm:$0xff] %v11825_v3  ;;  %v4909_v54 = vpop.f32.mrf.mxu3  ;;  %8351 = vmatmul.msk.f32.gmra.mxu1 %vm5277_vm10, %v11825_v3  ;;  %v11833_v49 = vsel %vm5277_vm10, %v11825_v3, 0.0  ;;  %v6584_v3 = vld [vmem:[#allocation11 + $0x278] sm:$0xff] }
 0x95c   : > { %15074 = vst [vmem:[#allocation78_spill] sm:$0xff] %v11833_v49  ;;  %v5035_v13 = vadd.f32 %v4909_v54, %v15075_v21  ;;  %v5887_v61 = vrot.slane %v11833_v49, 1  ;;  %6585 = vmatpush.msrb.mxu1 %v6584_v3  ;;  %v14154_v39 = vrot.slane %v11833_v49, 7  ;;  %v15088_v49 = vld [vmem:[#allocation145_spill] sm:$0xff] }
 0x95e   : > { %v5087_v9 = vadd.f32 %v11633_v26, %v5035_v13  ;;  %v11844_v31 = vsel %vm1196_vm2, %v5886_v4, %v5887_v61  ;;  %v15082_v13 = vld [vmem:[#allocation141_spill] sm:$0xff] }
 0x95f   : > { %15078 = vst [vmem:[#allocation48_spill] sm:$0xff] %v11844_v31  ;;  %6035 = vmatmul.f32.gmra.mxu2 %v11844_v31 }
 0x960   : > { %4959 = vmatmul.f32.gmra.mxu3 %v15079_v35  ;;  %vm5135_vm1 = vcmp.ge.f32.partialorder %v5087_v9, 0.0  ;;  %v5183_v36 = vmul.f32 0.2, %v5087_v9 }
 0x962   : > { %v11848_v54 = vsel %vm5135_vm1, %v5087_v9, %v5183_v36 }
 0x963   : > { %15080 = vst [vmem:[#allocation195_spill] sm:$0xff] %v11848_v54  ;;  %v4912_v21 = vpop.f32.mrf.mxu3  ;;  %8352 = vmatmul.msk.f32.gmra.mxu1 %vm5272_vm7, %v11848_v54  ;;  %v11856_v4 = vsel %vm5272_vm7, %v11848_v54, 0.0 }
 0x964   : > { %15081 = vst [vmem:[#allocation188_spill] sm:$0xff] %v11856_v4  ;;  %v5036_v31 = vadd.f32 %v4912_v21, %v15082_v13  ;;  %v5888_v35 = vrot.slane %v11856_v4, 1  ;;  %v14153_v3 = vrot.slane %v11856_v4, 7  ;;  %v11876_v21 = vpop.f32.mrf.mxu1  ;;  %v11878_v13 = vpop.f32.mrf.mxu2 }
 0x965   : > { %15085 = vst [vmem:[#allocation191_spill] sm:$0xff] %v11876_v21  ;;  %v15090_v21 = vld [vmem:[#allocation110_spill] sm:$0xff] }
 0x966   : > { %v5088_v36 = vadd.f32 %v11633_v26, %v5036_v31  ;;  %v11865_v9 = vsel %vm1196_vm2, %v5887_v61, %v5888_v35  ;;  %v11873_v54 = vsel %vm1000_vm3, %v14154_v39, %v14153_v3  ;;  %v15086_v31 = vld [vmem:[#allocation106_spill] sm:$0xff] }
 0x967   : > { %15083 = vst [vmem:[#allocation53_spill] sm:$0xff] %v11865_v9  ;;  %6038 = vmatmul.f32.gmra.mxu2 %v11865_v9 }
 0x968   : > { %15084 = vst [vmem:[#allocation59_spill] sm:$0xff] %v11873_v54  ;;  %v5184_v2 = vmul.f32 0.2, %v5088_v36  ;;  %4962 = vmatmul.f32.gmra.mxu3 %v15086_v31  ;;  %vm5136_vm4 = vcmp.ge.f32.partialorder %v5088_v36, 0.0  ;;  %v5535_v31 = vld [vmem:[#allocation11 + $0x70] sm:$0xff] }
 0x969   : > { %5716 = vmatpush.msra.mxu0 %v5535_v31 }
 0x96a   : > { %v11881_v61 = vsel %vm5136_vm4, %v5088_v36, %v5184_v2  ;;  %v6357_v36 = vld [vmem:[#allocation11 + $0x1f0] sm:$0xff] }
 0x96b   : > { %15087 = vst [vmem:[#allocation57_spill] sm:$0xff] %v11881_v61  ;;  %v4915_v29 = vpop.f32.mrf.mxu3  ;;  %5609 = vmatmul.f32.gmra.mxu1 %v11881_v61  ;;  %v5889_v4 = vrot.slane %v11881_v61, 1  ;;  %6360 = vmatpush.msrb.mxu3 %v6357_v36 }
 0x96c   : > { %v5037_v3 = vadd.f32 %v4915_v29, %v15088_v49  ;;  %v11893_v54 = vpop.f32.mrf.mxu1  ;;  %v11895_v61 = vpop.f32.mrf.mxu2 }
 0x96d   : > { %v11888_v39 = vsel %vm1196_vm2, %v5888_v35, %v5889_v4  ;;  %15091 = vst [vmem:[#allocation81_spill] sm:$0xff] %v11893_v54  ;;  %v6583_v54 = vld [vmem:[#allocation11 + $0x270] sm:$0xff] }
 0x96e   : > { %15089 = vst [vmem:[#allocation196_spill] sm:$0xff] %v11888_v39  ;;  %v5089_v9 = vadd.f32 %v11633_v26, %v5037_v3  ;;  %v15094_v3 = vld [vmem:[#allocation156_spill] sm:$0xff]  ;;  %6586 = vmatpush.msrb.mxu1 %v6583_v54 }
 0x96f   : > { %6041 = vmatmul.f32.gmra.mxu2 %v11888_v39  ;;  %15092 = vst [vmem:[#allocation37_spill] sm:$0xff] %v11895_v61 }
 0x970   : > { %4965 = vmatmul.f32.gmra.mxu3 %v15090_v21  ;;  %vm5137_vm5 = vcmp.ge.f32.partialorder %v5089_v9, 0.0  ;;  %v5185_v2 = vmul.f32 0.2, %v5089_v9 }
 0x972   : > { %v11897_v29 = vsel %vm5137_vm5, %v5089_v9, %v5185_v2  ;;  %v15096_v2 = vld [vmem:[#allocation114_spill] sm:$0xff] }
 0x973   : > { %15093 = vst [vmem:[#allocation51_spill] sm:$0xff] %v11897_v29  ;;  %v4918_v49 = vpop.f32.mrf.mxu3  ;;  %8353 = vmatmul.msk.f32.gmra.mxu1 %vm5277_vm10, %v11897_v29  ;;  %v11905_v35 = vsel %vm5277_vm10, %v11897_v29, 0.0 }
 0x974   : > { %v5038_v21 = vadd.f32 %v4918_v49, %v15094_v3  ;;  %v5890_v36 = vrot.slane %v11905_v35, 1  ;;  %v11926_v49 = vpop.f32.mrf.mxu1  ;;  %v11928_v3 = vpop.f32.mrf.mxu2 }
 0x975   : > { %15099 = vst [vmem:[#allocation71_spill] sm:$0xff] %v11926_v49 }
 0x976   : > { %v5090_v31 = vadd.f32 %v11633_v26, %v5038_v21  ;;  %v11912_v9 = vsel %vm1196_vm2, %v5889_v4, %v5890_v36  ;;  %15100 = vst [vmem:[#allocation77_spill] sm:$0xff] %v11928_v3 }
 0x977   : > { %15095 = vst [vmem:[#allocation24_spill] sm:$0xff] %v11912_v9  ;;  %6044 = vmatmul.f32.gmra.mxu2 %v11912_v9 }
 0x978   : > { %4968 = vmatmul.f32.gmra.mxu3 %v15096_v2  ;;  %vm5138_vm6 = vcmp.ge.f32.partialorder %v5090_v31, 0.0  ;;  %v5186_v39 = vmul.f32 0.2, %v5090_v31 }
 0x97a   : > { %v11916_v29 = vsel %vm5138_vm6, %v5090_v31, %v5186_v39  ;;  %v14170_v39 = vrot.slane %v11905_v35, 7 }
 0x97b   : > { %15097 = vst [vmem:[#allocation27_spill] sm:$0xff] %v11916_v29  ;;  %v4921_v61 = vpop.f32.mrf.mxu3  ;;  %8354 = vmatmul.msk.f32.gmra.mxu1 %vm5272_vm7, %v11916_v29  ;;  %v11924_v4 = vsel %vm5272_vm7, %v11916_v29, 0.0 }
 0x97c   : > { %15098 = vst [vmem:[#allocation96_spill] sm:$0xff] %v11924_v4  ;;  %v5039_v21 = vadd.f32 %v4921_v61, %v11413_v18  ;;  %v5891_v54 = vrot.slane %v11924_v4, 1  ;;  %v14169_v31 = vrot.slane %v11924_v4, 7  ;;  %v15102_v61 = vld [vmem:[#allocation117_spill] sm:$0xff] }
 0x97e   : > { %v5091_v2 = vadd.f32 %v11633_v26, %v5039_v21  ;;  %v11937_v9 = vsel %vm1196_vm2, %v5890_v36, %v5891_v54  ;;  %v11945_v3 = vsel %vm1000_vm3, %v14170_v39, %v14169_v31  ;;  %v11958_v31 = vpop.f32.mrf.mxu1  ;;  %v11960_v39 = vpop.f32.mrf.mxu2 }
 0x97f   : > { %15101 = vst [vmem:[#allocation100_spill] sm:$0xff] %v11937_v9  ;;  %6047 = vmatmul.f32.gmra.mxu2 %v11937_v9  ;;  %v6356_v9 = vld [vmem:[#allocation11 + $0x1e8] sm:$0xff] }
 0x980   : > { %v5187_v18 = vmul.f32 0.2, %v5091_v2  ;;  %4971 = vmatmul.f32.gmra.mxu3 %v15102_v61  ;;  %vm5139_vm8 = vcmp.ge.f32.partialorder %v5091_v2, 0.0  ;;  %15105 = vst [vmem:[#allocation104_spill] sm:$0xff] %v11958_v31 }
 0x981   : > { %6361 = vmatpush.msrb.mxu3 %v6356_v9 }
 0x982   : > { %v11949_v49 = vsel %vm5139_vm8, %v5091_v2, %v5187_v18  ;;  %v15106_v2 = vld [vmem:[#allocation121_spill] sm:$0xff] }
 0x983   : > { %15103 = vst [vmem:[#allocation64_spill] sm:$0xff] %v11949_v49  ;;  %v4924_v21 = vpop.f32.mrf.mxu3  ;;  %5618 = vmatmul.f32.gmra.mxu1 %v11949_v49  ;;  %v5892_v36 = vrot.slane %v11949_v49, 1  ;;  %v5534_v49 = vld [vmem:[#allocation11 + $0x68] sm:$0xff] }
 0x984   : > { %v5040_v29 = vadd.f32 %v4924_v21, %v11420_v14  ;;  %5717 = vmatpush.msra.mxu0 %v5534_v49 }
 0x985   : > { %v11956_v4 = vsel %vm1196_vm2, %v5891_v54, %v5892_v36 }
 0x986   : > { %15104 = vst [vmem:[#allocation41_spill] sm:$0xff] %v11956_v4  ;;  %v5092_v61 = vadd.f32 %v11633_v26, %v5040_v29  ;;  %v11983_v49 = vpop.f32.mrf.mxu1 }
 0x987   : > { %6050 = vmatmul.f32.gmra.mxu2 %v11956_v4  ;;  %15109 = vst [vmem:[#allocation108_spill] sm:$0xff] %v11983_v49 }
 0x988   : > { %4974 = vmatmul.f32.gmra.mxu3 %v15106_v2  ;;  %vm5140_vm9 = vcmp.ge.f32.partialorder %v5092_v61, 0.0  ;;  %v5188_v18 = vmul.f32 0.2, %v5092_v61 }
 0x98a   : > { %v11965_v14 = vsel %vm5140_vm9, %v5092_v61, %v5188_v18  ;;  %v11985_v61 = vpop.f32.mrf.mxu2  ;;  %v15111_v18 = vld [vmem:[#allocation125_spill] sm:$0xff] }
 0x98b   : > { %15107 = vst [vmem:[#allocation97_spill] sm:$0xff] %v11965_v14  ;;  %v4927_v54 = vpop.f32.mrf.mxu3  ;;  %8355 = vmatmul.msk.f32.gmra.mxu1 %vm5277_vm10, %v11965_v14  ;;  %v11973_v29 = vsel %vm5277_vm10, %v11965_v14, 0.0  ;;  %v6582_v14 = vld [vmem:[#allocation11 + $0x268] sm:$0xff] }
 0x98c   : > { %v5041_v21 = vadd.f32 %v4927_v54, %v11427_v34  ;;  %v5893_v2 = vrot.slane %v11973_v29, 1  ;;  %15110 = vst [vmem:[#allocation123_spill] sm:$0xff] %v11985_v61  ;;  %6587 = vmatpush.msrb.mxu1 %v6582_v14 }
 0x98e   : > { %v5093_v4 = vadd.f32 %v11633_v26, %v5041_v21  ;;  %v11980_v9 = vsel %vm1196_vm2, %v5892_v36, %v5893_v2 }
 0x98f   : > { %15108 = vst [vmem:[#allocation69_spill] sm:$0xff] %v11980_v9  ;;  %6053 = vmatmul.f32.gmra.mxu2 %v11980_v9  ;;  %v14185_v9 = vrot.slane %v11973_v29, 7 }
 0x990   : > { %4977 = vmatmul.f32.gmra.mxu3 %v15111_v18  ;;  %vm5141_vm11 = vcmp.ge.f32.partialorder %v5093_v4, 0.0  ;;  %v5189_v31 = vmul.f32 0.2, %v5093_v4 }
 0x992   : > { %v11988_v34 = vsel %vm5141_vm11, %v5093_v4, %v5189_v31 }
 0x993   : > { %15112 = vst [vmem:[#allocation101_spill] sm:$0xff] %v11988_v34  ;;  %v4930_v54 = vpop.f32.mrf.mxu3  ;;  %8356 = vmatmul.msk.f32.gmra.mxu1 %vm5272_vm7, %v11988_v34  ;;  %v11996_v36 = vsel %vm5272_vm7, %v11988_v34, 0.0 }
 0x994   : > { %15113 = vst [vmem:[#allocation75_spill] sm:$0xff] %v11996_v36  ;;  %v5042_v21 = vadd.f32 %v4930_v54, %v11434_v50  ;;  %v5894_v18 = vrot.slane %v11996_v36, 1  ;;  %v14184_v14 = vrot.slane %v11996_v36, 7  ;;  %v15115_v54 = vld [vmem:[#allocation129_spill] sm:$0xff] }
 0x996   : > { %v5094_v4 = vadd.f32 %v11633_v26, %v5042_v21  ;;  %v12005_v31 = vsel %vm1196_vm2, %v5893_v2, %v5894_v18  ;;  %v12013_v49 = vsel %vm1000_vm3, %v14185_v9, %v14184_v14  ;;  %v12019_v21 = vpop.f32.mrf.mxu2 }
 0x997   : > { %15114 = vst [vmem:[#allocation112_spill] sm:$0xff] %v12005_v31  ;;  %6056 = vmatmul.f32.gmra.mxu2 %v12005_v31  ;;  %v15120_v31 = vld [vmem:[#allocation133_spill] sm:$0xff] }
 0x998   : > { %v5190_v50 = vmul.f32 0.2, %v5094_v4  ;;  %4980 = vmatmul.f32.gmra.mxu3 %v15115_v54  ;;  %v12017_v61 = vpop.f32.mrf.mxu1  ;;  %vm5142_vm12 = vcmp.ge.f32.partialorder %v5094_v4, 0.0  ;;  %15117 = vst [vmem:[#allocation105_spill] sm:$0xff] %v12019_v21  ;;  %v5533_v21 = vld [vmem:[#allocation11 + $0x60] sm:$0xff] }
 0x999   : > { %15116 = vst [vmem:[#allocation127_spill] sm:$0xff] %v12017_v61  ;;  %5718 = vmatpush.msra.mxu0 %v5533_v21 }
 0x99a   : > { %v12021_v2 = vsel %vm5142_vm12, %v5094_v4, %v5190_v50  ;;  %v6355_v50 = vld [vmem:[#allocation11 + $0x1e0] sm:$0xff] }
 0x99b   : > { %15118 = vst [vmem:[#allocation70_spill] sm:$0xff] %v12021_v2  ;;  %v4933_v34 = vpop.f32.mrf.mxu3  ;;  %5627 = vmatmul.f32.gmra.mxu1 %v12021_v2  ;;  %v5895_v36 = vrot.slane %v12021_v2, 1  ;;  %6362 = vmatpush.msrb.mxu3 %v6355_v50 }
 0x99c   : > { %v5043_v14 = vadd.f32 %v4933_v34, %v11441_v19 }
 0x99d   : > { %v12028_v9 = vsel %vm1196_vm2, %v5894_v18, %v5895_v36 }
 0x99e   : > { %15119 = vst [vmem:[#allocation116_spill] sm:$0xff] %v12028_v9  ;;  %v5095_v54 = vadd.f32 %v11633_v26, %v5043_v14 }
 0x99f   : > { %6059 = vmatmul.f32.gmra.mxu2 %v12028_v9 }
 0x9a0   : > { %4983 = vmatmul.f32.gmra.mxu3 %v15120_v31  ;;  %v12033_v61 = vpop.f32.mrf.mxu1  ;;  %vm5143_vm13 = vcmp.ge.f32.partialorder %v5095_v54, 0.0  ;;  %v5191_v4 = vmul.f32 0.2, %v5095_v54 }
 0x9a1   : > { %15121 = vst [vmem:[#allocation109_spill] sm:$0xff] %v12033_v61  ;;  %v6581_v61 = vld [vmem:[#allocation11 + $0x260] sm:$0xff] }
 0x9a2   : > { %v12035_v2 = vpop.f32.mrf.mxu2  ;;  %v12037_v19 = vsel %vm5143_vm13, %v5095_v54, %v5191_v4  ;;  %v15125_v4 = vld [vmem:[#allocation136_spill] sm:$0xff]  ;;  %6588 = vmatpush.msrb.mxu1 %v6581_v61 }
 0x9a3   : > { %15122 = vst [vmem:[#allocation87_spill] sm:$0xff] %v12035_v2  ;;  %v4936_v34 = vpop.f32.mrf.mxu3  ;;  %8357 = vmatmul.msk.f32.gmra.mxu1 %vm5277_vm10, %v12037_v19  ;;  %v12045_v18 = vsel %vm5277_vm10, %v12037_v19, 0.0 }
 0x9a4   : > { %15123 = vst [vmem:[#allocation120_spill] sm:$0xff] %v12037_v19  ;;  %v5044_v14 = vadd.f32 %v4936_v34, %v11448_v37  ;;  %v5896_v31 = vrot.slane %v12045_v18, 1  ;;  %v14198_v61 = vrot.slane %v12045_v18, 7 }
 0x9a6   : > { %v5096_v21 = vadd.f32 %v11633_v26, %v5044_v14  ;;  %v12052_v54 = vsel %vm1196_vm2, %v5895_v36, %v5896_v31 }
 0x9a7   : > { %15124 = vst [vmem:[#allocation18_spill] sm:$0xff] %v12052_v54  ;;  %6062 = vmatmul.f32.gmra.mxu2 %v12052_v54 }
 0x9a8   : > { %4986 = vmatmul.f32.gmra.mxu3 %v15125_v4  ;;  %v12056_v50 = vpop.f32.mrf.mxu1  ;;  %vm5144_vm14 = vcmp.ge.f32.partialorder %v5096_v21, 0.0  ;;  %v5192_v9 = vmul.f32 0.2, %v5096_v21 }
 0x9a9   : > { %15126 = vst [vmem:[#allocation84_spill] sm:$0xff] %v12056_v50 }
 0x9aa   : > { %v12058_v2 = vpop.f32.mrf.mxu2  ;;  %v12060_v37 = vsel %vm5144_vm14, %v5096_v21, %v5192_v9 }
 0x9ab   : > { %15127 = vst [vmem:[#allocation124_spill] sm:$0xff] %v12058_v2  ;;  %v4939_v34 = vpop.f32.mrf.mxu3  ;;  %8358 = vmatmul.msk.f32.gmra.mxu1 %vm5272_vm7, %v12060_v37  ;;  %v12068_v36 = vsel %vm5272_vm7, %v12060_v37, 0.0 }
 0x9ac   : > { %15128 = vst [vmem:[#allocation113_spill] sm:$0xff] %v12060_v37  ;;  %v5045_v14 = vadd.f32 %v4939_v34, %v11455_v60  ;;  %v5897_v4 = vrot.slane %v12068_v36, 1  ;;  %v14197_v54 = vrot.slane %v12068_v36, 7  ;;  %v15131_v34 = vld [vmem:[#allocation140_spill] sm:$0xff] }
 0x9ad   : > { %15129 = vst [vmem:[#allocation56_spill] sm:$0xff] %v12068_v36 }
 0x9ae   : > { %v5097_v9 = vadd.f32 %v11633_v26, %v5045_v14  ;;  %v12077_v21 = vsel %vm1196_vm2, %v5896_v31, %v5897_v4  ;;  %v12085_v50 = vsel %vm1000_vm3, %v14198_v61, %v14197_v54 }
 0x9af   : > { %15130 = vst [vmem:[#allocation128_spill] sm:$0xff] %v12077_v21  ;;  %6065 = vmatmul.f32.gmra.mxu2 %v12077_v21  ;;  %v12103_v21 = vpop.f32.mrf.mxu0 }
 0x9b0   : > { %v5193_v60 = vmul.f32 0.2, %v5097_v9  ;;  %4989 = vmatmul.f32.gmra.mxu3 %v15131_v34  ;;  %v12089_v2 = vpop.f32.mrf.mxu1  ;;  %vm5145_vm15 = vcmp.ge.f32.partialorder %v5097_v9, 0.0 }
 0x9b1   : > { %15132 = vst [vmem:[#allocation118_spill] sm:$0xff] %v12089_v2  ;;  %v15136_v2 = vld [vmem:[#allocation144_spill] sm:$0xff] }
 0x9b2   : > { %v12091_v14 = vpop.f32.mrf.mxu2  ;;  %v12093_v31 = vsel %vm5145_vm15, %v5097_v9, %v5193_v60 }
 0x9b3   : > { %15133 = vst [vmem:[#allocation50_spill] sm:$0xff] %v12091_v14  ;;  %v4942_v37 = vpop.f32.mrf.mxu3  ;;  %5636 = vmatmul.f32.gmra.mxu1 %v12093_v31  ;;  %v5898_v36 = vrot.slane %v12093_v31, 1  ;;  %v6354_v14 = vld [vmem:[#allocation11 + $0x1d8] sm:$0xff] }
 0x9b4   : > { %15134 = vst [vmem:[#allocation131_spill] sm:$0xff] %v12093_v31  ;;  %v5046_v54 = vadd.f32 %v4942_v37, %v11462_v1  ;;  %v5532_v31 = vld [vmem:[#allocation11 + $0x58] sm:$0xff]  ;;  %6363 = vmatpush.msrb.mxu3 %v6354_v14 }
 0x9b5   : > { %v12100_v61 = vsel %vm1196_vm2, %v5897_v4, %v5898_v36  ;;  %5719 = vmatpush.msra.mxu0 %v5532_v31 }
 0x9b6   : > { %15135 = vst [vmem:[#allocation122_spill] sm:$0xff] %v12100_v61  ;;  %v5098_v34 = vadd.f32 %v11633_v26, %v5046_v54 }
 0x9b7   : > { %6068 = vmatmul.f32.gmra.mxu2 %v12100_v61 }
 0x9b8   : > { %4992 = vmatmul.f32.gmra.mxu3 %v15136_v2  ;;  %v12107_v9 = vpop.f32.mrf.mxu1  ;;  %vm5146_vm0 = vcmp.ge.f32.partialorder %v5098_v34, 0.0  ;;  %v5194_v60 = vmul.f32 0.2, %v5098_v34 }
 0x9b9   : > { %15137 = vst [vmem:[#allocation67_spill] sm:$0xff] %v12107_v9 }
 0x9ba   : > { %v12109_v1 = vpop.f32.mrf.mxu2  ;;  %v12111_v37 = vsel %vm5146_vm0, %v5098_v34, %v5194_v60  ;;  %v15142_v34 = vld [vmem:[#allocation148_spill] sm:$0xff] }
 0x9bb   : > { %15138 = vst [vmem:[#allocation135_spill] sm:$0xff] %v12109_v1  ;;  %v4945_v4 = vpop.f32.mrf.mxu3  ;;  %8359 = vmatmul.msk.f32.gmra.mxu1 %vm5277_vm10, %v12111_v37  ;;  %v12119_v2 = vsel %vm5277_vm10, %v12111_v37, 0.0  ;;  %v6580_v1 = vld [vmem:[#allocation11 + $0x258] sm:$0xff] }
 0x9bc   : > { %15139 = vst [vmem:[#allocation126_spill] sm:$0xff] %v12111_v37  ;;  %v5047_v54 = vadd.f32 %v4945_v4, %v11469_v7  ;;  %v5899_v61 = vrot.slane %v12119_v2, 1  ;;  %v12132_v37 = vpop.f32.mrf.mxu0  ;;  %6589 = vmatpush.msrb.mxu1 %v6580_v1  ;;  %v14215_v1 = vrot.slane %v12119_v2, 7 }
 0x9bd   : > { %15140 = vst [vmem:[#allocation23_spill] sm:$0xff] %v12119_v2 }
 0x9be   : > { %v5099_v14 = vadd.f32 %v11633_v26, %v5047_v54  ;;  %v12126_v31 = vsel %vm1196_vm2, %v5898_v36, %v5899_v61 }
 0x9bf   : > { %15141 = vst [vmem:[#allocation139_spill] sm:$0xff] %v12126_v31  ;;  %6071 = vmatmul.f32.gmra.mxu2 %v12126_v31 }
 0x9c0   : > { %4995 = vmatmul.f32.gmra.mxu3 %v15142_v34  ;;  %v12130_v60 = vpop.f32.mrf.mxu1  ;;  %vm5147_vm1 = vcmp.ge.f32.partialorder %v5099_v14, 0.0  ;;  %v5195_v9 = vmul.f32 0.2, %v5099_v14 }
 0x9c1   : > { %15143 = vst [vmem:[#allocation132_spill] sm:$0xff] %v12130_v60 }
 0x9c2   : > { %v12134_v7 = vpop.f32.mrf.mxu2  ;;  %v12136_v4 = vsel %vm5147_vm1, %v5099_v14, %v5195_v9 }
 0x9c3   : > { %15144 = vst [vmem:[#allocation198_spill] sm:$0xff] %v12134_v7  ;;  %v4948_v54 = vpop.f32.mrf.mxu3  ;;  %8360 = vmatmul.msk.f32.gmra.mxu1 %vm5272_vm7, %v12136_v4  ;;  %v12144_v36 = vsel %vm5272_vm7, %v12136_v4, 0.0 }
 0x9c4   : > { %15145 = vst [vmem:[#allocation143_spill] sm:$0xff] %v12136_v4  ;;  %v5048_v34 = vadd.f32 %v4948_v54, %v11476_v41  ;;  %v5900_v31 = vrot.slane %v12144_v36, 1  ;;  %v14214_v60 = vrot.slane %v12144_v36, 7  ;;  %v15149_v54 = vld [vmem:[#allocation152_spill] sm:$0xff]  ;;  %v12171_v19 = vpop.f32.mrf.mxu0 }
 0x9c5   : > { %15146 = vst [vmem:[#allocation130_spill] sm:$0xff] %v12144_v36 }
 0x9c6   : > { %v5100_v9 = vadd.f32 %v11633_v26, %v5048_v34  ;;  %v12153_v14 = vsel %vm1196_vm2, %v5899_v61, %v5900_v31  ;;  %v12161_v7 = vsel %vm1000_vm3, %v14215_v1, %v14214_v60 }
 0x9c7   : > { %15147 = vst [vmem:[#allocation107_spill] sm:$0xff] %v12153_v14  ;;  %6074 = vmatmul.f32.gmra.mxu2 %v12153_v14 }
 0x9c8   : > { %15148 = vst [vmem:[#allocation147_spill] sm:$0xff] %v12161_v7  ;;  %v5196_v41 = vmul.f32 0.2, %v5100_v9  ;;  %4998 = vmatmul.f32.gmra.mxu3 %v15149_v54  ;;  %v12165_v4 = vpop.f32.mrf.mxu1  ;;  %vm5148_vm4 = vcmp.ge.f32.partialorder %v5100_v9, 0.0  ;;  %v5531_v7 = vld [vmem:[#allocation11 + $0x50] sm:$0xff] }
 0x9c9   : > { %15150 = vst [vmem:[#allocation137_spill] sm:$0xff] %v12165_v4  ;;  %v15154_v4 = vld [vmem:[#allocation157_spill] sm:$0xff]  ;;  %5720 = vmatpush.msra.mxu0 %v5531_v7 }
 0x9ca   : > { %v12167_v34 = vpop.f32.mrf.mxu2  ;;  %v12169_v61 = vsel %vm5148_vm4, %v5100_v9, %v5196_v41 }
 0x9cb   : > { %15151 = vst [vmem:[#allocation111_spill] sm:$0xff] %v12167_v34  ;;  %v4951_v36 = vpop.f32.mrf.mxu3  ;;  %5645 = vmatmul.f32.gmra.mxu1 %v12169_v61  ;;  %v5901_v60 = vrot.slane %v12169_v61, 1  ;;  %v6353_v34 = vld [vmem:[#allocation11 + $0x1d0] sm:$0xff] }
 0x9cc   : > { %15152 = vst [vmem:[#allocation150_spill] sm:$0xff] %v12169_v61  ;;  %v5049_v1 = vadd.f32 %v4951_v36, %v11485_v0  ;;  %6364 = vmatpush.msrb.mxu3 %v6353_v34  ;;  %v12199_v34 = vpop.f32.mrf.mxu0 }
 0x9cd   : > { %v12178_v14 = vsel %vm1196_vm2, %v5900_v31, %v5901_v60 }
 0x9ce   : > { %15153 = vst [vmem:[#allocation115_spill] sm:$0xff] %v12178_v14  ;;  %v5101_v54 = vadd.f32 %v11633_v26, %v5049_v1 }
 0x9cf   : > { %6077 = vmatmul.f32.gmra.mxu2 %v12178_v14 }
 0x9d0   : > { %5001 = vmatmul.f32.gmra.mxu3 %v15154_v4  ;;  %v12183_v9 = vpop.f32.mrf.mxu1  ;;  %vm5149_vm5 = vcmp.ge.f32.partialorder %v5101_v54, 0.0  ;;  %v5197_v41 = vmul.f32 0.2, %v5101_v54 }
 0x9d1   : > { %15155 = vst [vmem:[#allocation154_spill] sm:$0xff] %v12183_v9 }
 0x9d2   : > { %v12185_v61 = vpop.f32.mrf.mxu2  ;;  %v12187_v0 = vsel %vm5149_vm5, %v5101_v54, %v5197_v41  ;;  %v15159_v41 = vld [vmem:[#allocation99_spill] sm:$0xff] }
 0x9d3   : > { %15156 = vst [vmem:[#allocation165_spill] sm:$0xff] %v12185_v61  ;;  %v4954_v31 = vpop.f32.mrf.mxu3  ;;  %8361 = vmatmul.msk.f32.gmra.mxu1 %vm5277_vm10, %v12187_v0  ;;  %v12195_v4 = vsel %vm5277_vm10, %v12187_v0, 0.0  ;;  %v6579_v61 = vld [vmem:[#allocation11 + $0x250] sm:$0xff] }
 0x9d4   : > { %15157 = vst [vmem:[#allocation47_spill] sm:$0xff] %v12187_v0  ;;  %v5050_v36 = vadd.f32 %v4954_v31, %v11493_v55  ;;  %v5902_v1 = vrot.slane %v12195_v4, 1  ;;  %6590 = vmatpush.msrb.mxu1 %v6579_v61 }
 0x9d6   : > { %v5102_v7 = vadd.f32 %v11633_v26, %v5050_v36  ;;  %v12204_v54 = vsel %vm1196_vm2, %v5901_v60, %v5902_v1  ;;  %v15163_v36 = vld [vmem:[#allocation119_spill] sm:$0xff] }
 0x9d7   : > { %15158 = vst [vmem:[#allocation19_spill] sm:$0xff] %v12204_v54  ;;  %6080 = vmatmul.f32.gmra.mxu2 %v12204_v54  ;;  %v4133_v0 = vadd.f32 %v15163_v36, %v11483_v44 }
 0x9d8   : > { %5004 = vmatmul.f32.gmra.mxu3 %v15159_v41  ;;  %v12208_v14 = vpop.f32.mrf.mxu1  ;;  %vm5150_vm6 = vcmp.ge.f32.partialorder %v5102_v7, 0.0  ;;  %v5198_v9 = vmul.f32 0.2, %v5102_v7 }
 0x9d9   : > { %15160 = vst [vmem:[#allocation20_spill] sm:$0xff] %v12208_v14 }
 0x9da   : > { %v12210_v55 = vpop.f32.mrf.mxu2  ;;  %v12212_v31 = vsel %vm5150_vm6, %v5102_v7, %v5198_v9  ;;  %v14232_v9 = vrot.slane %v12195_v4, 7 }
 0x9db   : > { %15161 = vst [vmem:[#allocation21_spill] sm:$0xff] %v12210_v55  ;;  %v4957_v2 = vpop.f32.mrf.mxu3  ;;  %8362 = vmatmul.msk.f32.gmra.mxu1 %vm5272_vm7, %v12212_v31  ;;  %v12222_v60 = vsel %vm5272_vm7, %v12212_v31, 0.0 }
 0x9dc   : > { %15162 = vst [vmem:[#allocation39_spill] sm:$0xff] %v12212_v31  ;;  %v5051_v41 = vadd.f32 %v4957_v2, %v11501_v6  ;;  %v5903_v61 = vrot.slane %v12222_v60, 1  ;;  %v14231_v7 = vrot.slane %v12222_v60, 7  ;;  %v12241_v6 = vpop.f32.mrf.mxu0  ;;  %v4504_v2 = vadd.f32 %v12103_v21, %v4133_v0 }
 0x9dd   : > { %15164 = vst [vmem:[#allocation28_spill] sm:$0xff] %v12222_v60  ;;  %v4134_v21 = vadd.f32 %v11535_v15, %v11491_v59 }
 0x9de   : > { %v5103_v44 = vadd.f32 %v11633_v26, %v5051_v41  ;;  %v12231_v36 = vsel %vm1196_vm2, %v5902_v1, %v5903_v61  ;;  %v12239_v54 = vsel %vm1000_vm3, %v14232_v9, %v14231_v7  ;;  %v15166_v41 = vld [vmem:[#allocation197_spill] sm:$0xff]  ;;  %v4730_v1 = vadd.f32 %v11544_v11, %v4504_v2 }
 0x9df   : > { %15165 = vst [vmem:[#allocation46_spill] sm:$0xff] %v12231_v36  ;;  %6083 = vmatmul.f32.gmra.mxu2 %v12231_v36  ;;  %v4505_v11 = vadd.f32 %v12132_v37, %v4134_v21  ;;  %v12283_v21 = vrot.slane %v14870_v17, 1 }
 0x9e0   : > { %v5199_v14 = vmul.f32 0.2, %v5103_v44  ;;  %5007 = vmatmul.f32.gmra.mxu3 %v15166_v41  ;;  %v12246_v55 = vpop.f32.mrf.mxu1  ;;  %vm5151_vm8 = vcmp.ge.f32.partialorder %v5103_v44, 0.0 }
 0x9e1   : > { %15167 = vst [vmem:[#allocation45_spill] sm:$0xff] %v12246_v55  ;;  %v6352_v55 = vld [vmem:[#allocation11 + $0x1c8] sm:$0xff]  ;;  %v4731_v15 = vadd.f32 %v11555_v30, %v4505_v11  ;;  %v4135_v30 = vadd.f32 %v11542_v47, %v11499_v16  ;;  %v15175_v11 = vld [vmem:[#allocation103_spill] sm:$0xff] }
 0x9e2   : > { %v12249_v31 = vpop.f32.mrf.mxu2  ;;  %v12251_v60 = vsel %vm5151_vm8, %v5103_v44, %v5199_v14  ;;  %v15171_v14 = vld [vmem:[#allocation199_spill] sm:$0xff]  ;;  %6365 = vmatpush.msrb.mxu3 %v6352_v55  ;;  %15173 = vst [vmem:[#allocation26_spill] sm:$0xff] %v12283_v21 }
 0x9e3   : > { %15168 = vst [vmem:[#allocation33_spill] sm:$0xff] %v12249_v31  ;;  %v4960_v7 = vpop.f32.mrf.mxu3  ;;  %5654 = vmatmul.f32.gmra.mxu1 %v12251_v60  ;;  %v5904_v9 = vrot.slane %v12251_v60, 1  ;;  %v5530_v31 = vld [vmem:[#allocation11 + $0x48] sm:$0xff] }
 0x9e4   : > { %15169 = vst [vmem:[#allocation22_spill] sm:$0xff] %v12251_v60  ;;  %v5052_v0 = vadd.f32 %v4960_v7, %v4730_v1  ;;  %v12267_v59 = vpop.f32.mrf.mxu0  ;;  %5721 = vmatpush.msra.mxu0 %v5530_v31 }
 0x9e5   : > { %v12259_v41 = vsel %vm1196_vm2, %v5903_v61, %v5904_v9 }
 0x9e6   : > { %15170 = vst [vmem:[#allocation35_spill] sm:$0xff] %v12259_v41  ;;  %v5104_v36 = vadd.f32 %v11633_v26, %v5052_v0 }
 0x9e7   : > { %6086 = vmatmul.f32.gmra.mxu2 %v12259_v41 }
 0x9e8   : > { %5010 = vmatmul.f32.gmra.mxu3 %v15171_v14  ;;  %v12265_v44 = vpop.f32.mrf.mxu1  ;;  %vm5152_vm9 = vcmp.ge.f32.partialorder %v5104_v36, 0.0  ;;  %v5200_v2 = vmul.f32 0.2, %v5104_v36  ;;  %v4802_v14 = vsel %vm1196_vm2, %v15175_v11, %v12283_v21  ;;  %v4136_v11 = vadd.f32 %v11553_v48, %v11506_v46 }
 0x9ea   : > { %v12270_v61 = vpop.f32.mrf.mxu2  ;;  %v12272_v7 = vsel %vm5152_vm9, %v5104_v36, %v5200_v2  ;;  %v4506_v2 = vadd.f32 %v12171_v19, %v4135_v30 }
 0x9eb   : > { %15172 = vst [vmem:[#allocation36_spill] sm:$0xff] %v12272_v7  ;;  %v4963_v1 = vpop.f32.mrf.mxu3  ;;  %8363 = vmatmul.msk.f32.gmra.mxu1 %vm5277_vm10, %v12272_v7  ;;  %v12280_v37 = vsel %vm5277_vm10, %v12272_v7, 0.0 }
 0x9ec   : > { %v5053_v55 = vadd.f32 %v4963_v1, %v4731_v15  ;;  %v5905_v31 = vrot.slane %v12280_v37, 1  ;;  %v6578_v15 = vld [vmem:[#allocation11 + $0x248] sm:$0xff]  ;;  %v4732_v1 = vadd.f32 %v11563_v63, %v4506_v2  ;;  %v12306_v17 = vpop.f32.mrf.mxu0  ;;  %v4798_v63 = vrot.slane %v14936_v38, 1 }
 0x9ed   : > { %6591 = vmatpush.msrb.mxu1 %v6578_v15  ;;  %v4507_v15 = vadd.f32 %v12199_v34, %v4136_v11  ;;  %v4137_v34 = vadd.f32 %v11561_v33, %v11511_v53 }
 0x9ee   : > { %v5105_v36 = vadd.f32 %v11633_v26, %v5053_v55  ;;  %v12291_v0 = vsel %vm1196_vm2, %v5904_v9, %v5905_v31 }
 0x9ef   : > { %15174 = vst [vmem:[#allocation90_spill] sm:$0xff] %v12291_v0  ;;  %6089 = vmatmul.f32.gmra.mxu2 %v12291_v0  ;;  %v4508_v53 = vadd.f32 %v12241_v6, %v4137_v34  ;;  %v4138_v34 = vadd.f32 %v11570_v42, %v11516_v58 }
 0x9f0   : > { %5013 = vmatmul.f32.gmra.mxu3 %v4802_v14  ;;  %v12299_v16 = vpop.f32.mrf.mxu1  ;;  %vm5153_vm11 = vcmp.ge.f32.partialorder %v5105_v36, 0.0  ;;  %v5201_v47 = vmul.f32 0.2, %v5105_v36  ;;  %v14240_v14 = vrot.slane %v12280_v37, 7 }
 0x9f1   : > { %v4509_v58 = vadd.f32 %v12267_v59, %v4138_v34 }
 0x9f2   : > { %v12302_v9 = vpop.f32.mrf.mxu2  ;;  %v12304_v55 = vsel %vm5153_vm11, %v5105_v36, %v5201_v47 }
 0x9f3   : > { %15176 = vst [vmem:[#allocation86_spill] sm:$0xff] %v12304_v55  ;;  %v4966_v0 = vpop.f32.mrf.mxu3  ;;  %8364 = vmatmul.msk.f32.gmra.mxu1 %vm5272_vm7, %v12304_v55  ;;  %v12316_v19 = vsel %vm5272_vm7, %v12304_v55, 0.0 }
 0x9f4   : > { %v5054_v30 = vadd.f32 %v4966_v0, %v4732_v1  ;;  %v5906_v36 = vrot.slane %v12316_v19, 1  ;;  %v14239_v2 = vrot.slane %v12316_v19, 7  ;;  %v12339_v0 = vsel %vm1196_vm2, %v12283_v21, %v4798_v63 }
 0x9f5   : > { %15178 = vst [vmem:[#allocation30_spill] sm:$0xff] %v12339_v0 }
 0x9f6   : > { %v5106_v46 = vadd.f32 %v11633_v26, %v5054_v30  ;;  %v12325_v48 = vsel %vm1196_vm2, %v5905_v31, %v5906_v36  ;;  %v12333_v47 = vsel %vm1000_vm3, %v14240_v14, %v14239_v2  ;;  %v4733_v30 = vadd.f32 %v11572_v10, %v4507_v15 }
 0x9f7   : > { %15177 = vst [vmem:[#allocation31_spill] sm:$0xff] %v12325_v48  ;;  %6092 = vmatmul.f32.gmra.mxu2 %v12325_v48  ;;  %v12354_v48 = vpop.f32.mrf.mxu0  ;;  %v12361_v10 = vrot.slane %v14994_v20, 1 }
 0x9f8   : > { %v5202_v1 = vmul.f32 0.2, %v5106_v46  ;;  %5016 = vmatmul.f32.gmra.mxu3 %v12339_v0  ;;  %v12343_v31 = vpop.f32.mrf.mxu1  ;;  %vm5154_vm12 = vcmp.ge.f32.partialorder %v5106_v46, 0.0 }
 0x9f9   : > { %15180 = vst [vmem:[#allocation85_spill] sm:$0xff] %v12361_v10  ;;  %v12368_v15 = vsel %vm1196_vm2, %v4798_v63, %v12361_v10 }
 0x9fa   : > { %v12346_v38 = vpop.f32.mrf.mxu2  ;;  %v12348_v2 = vsel %vm5154_vm12, %v5106_v46, %v5202_v1  ;;  %15181 = vst [vmem:[#allocation80_spill] sm:$0xff] %v12368_v15  ;;  %v5529_v1 = vld [vmem:[#allocation11 + $0x40] sm:$0xff] }
 0x9fb   : > { %v4969_v14 = vpop.f32.mrf.mxu3  ;;  %5663 = vmatmul.f32.gmra.mxu1 %v12348_v2  ;;  %v5907_v21 = vrot.slane %v12348_v2, 1  ;;  %5722 = vmatpush.msra.mxu0 %v5529_v1  ;;  %v15183_v1 = vld [vmem:[#allocation42_spill] sm:$0xff] }
 0x9fc   : > { %v5055_v11 = vadd.f32 %v4969_v14, %v4733_v30  ;;  %v6351_v14 = vld [vmem:[#allocation11 + $0x1c0] sm:$0xff]  ;;  %v4734_v30 = vadd.f32 %v11580_v8, %v4508_v53 }
 0x9fd   : > { %v12358_v0 = vsel %vm1196_vm2, %v5906_v36, %v5907_v21  ;;  %6366 = vmatpush.msrb.mxu3 %v6351_v14 }
 0x9fe   : > { %15179 = vst [vmem:[#allocation29_spill] sm:$0xff] %v12358_v0  ;;  %v5107_v46 = vadd.f32 %v11633_v26, %v5055_v11 }
 0x9ff   : > { %6095 = vmatmul.f32.gmra.mxu2 %v12358_v0 }
 0xa00   : > { %5019 = vmatmul.f32.gmra.mxu3 %v12368_v15  ;;  %v12372_v33 = vpop.f32.mrf.mxu1  ;;  %vm5155_vm13 = vcmp.ge.f32.partialorder %v5107_v46, 0.0  ;;  %v5203_v36 = vmul.f32 0.2, %v5107_v46  ;;  %v4847_v15 = vsel %vm1196_vm2, %v12361_v10, %v15183_v1 }
 0xa02   : > { %v12375_v11 = vpop.f32.mrf.mxu2  ;;  %v12377_v20 = vsel %vm5155_vm13, %v5107_v46, %v5203_v36  ;;  %v12395_v36 = vpop.f32.mrf.mxu0 }
 0xa03   : > { %v4972_v63 = vpop.f32.mrf.mxu3  ;;  %8365 = vmatmul.msk.f32.gmra.mxu1 %vm5277_vm10, %v12377_v20  ;;  %v12385_v6 = vsel %vm5277_vm10, %v12377_v20, 0.0 }
 0xa04   : > { %v5056_v14 = vadd.f32 %v4972_v63, %v4734_v30  ;;  %v5908_v8 = vrot.slane %v12385_v6, 1  ;;  %v6577_v30 = vld [vmem:[#allocation11 + $0x240] sm:$0xff]  ;;  %v14255_v34 = vrot.slane %v12385_v6, 7 }
 0xa05   : > { %6592 = vmatpush.msrb.mxu1 %v6577_v30 }
 0xa06   : > { %v5108_v53 = vadd.f32 %v11633_v26, %v5056_v14  ;;  %v12393_v46 = vsel %vm1196_vm2, %v5907_v21, %v5908_v8  ;;  %v4735_v21 = vadd.f32 %v11591_v22, %v4509_v58 }
 0xa07   : > { %15182 = vst [vmem:[#allocation49_spill] sm:$0xff] %v12393_v46  ;;  %6098 = vmatmul.f32.gmra.mxu2 %v12393_v46  ;;  %v4139_v46 = vadd.f32 %v11578_v57, %v11521_v25  ;;  %v12426_v25 = vld [vmem:[%s13932_s6] ss:$0 sm:$0xff] }
 0xa08   : > { %5022 = vmatmul.f32.gmra.mxu3 %v4847_v15  ;;  %v12403_v42 = vpop.f32.mrf.mxu1  ;;  %vm5156_vm14 = vcmp.ge.f32.partialorder %v5108_v53, 0.0  ;;  %v5204_v26 = vmul.f32 0.2, %v5108_v53 }
 0xa09   : > { %15184 = vst [vmem:[#allocation76_spill] sm:$0xff] %v12403_v42  ;;  %v4510_v58 = vadd.f32 %v12306_v17, %v4139_v46 }
 0xa0a   : > { %v12406_v63 = vpop.f32.mrf.mxu2  ;;  %v12408_v14 = vsel %vm5156_vm14, %v5108_v53, %v5204_v26 }
 0xa0b   : > { %v4975_v0 = vpop.f32.mrf.mxu3  ;;  %8366 = vmatmul.msk.f32.gmra.mxu1 %vm5272_vm7, %v12408_v14  ;;  %v12418_v59 = vsel %vm5272_vm7, %v12408_v14, 0.0 }
 0xa0c   : > { %v5057_v15 = vadd.f32 %v4975_v0, %v4735_v21  ;;  %v5909_v22 = vrot.slane %v12418_v59, 1  ;;  %v14254_v53 = vrot.slane %v12418_v59, 7  ;;  %v4439_v21 = vpop.f32.mrf.mxu0 }
 0xa0e   : > { %v5109_v57 = vadd.f32 %v12426_v25, %v5057_v15  ;;  %v12431_v1 = vsel %vm1196_vm2, %v5908_v8, %v5909_v22  ;;  %v12439_v0 = vsel %vm1000_vm3, %v14255_v34, %v14254_v53  ;;  %v4736_v8 = vadd.f32 %v11599_v23, %v4510_v58 }
 0xa0f   : > { %15185 = vst [vmem:[#allocation72_spill] sm:$0xff] %v12431_v1  ;;  %6101 = vmatmul.f32.gmra.mxu2 %v12431_v1  ;;  %v4140_v34 = vadd.f32 %v11589_v43, %v11526_v28 }
 0xa10   : > { %v5205_v26 = vmul.f32 0.2, %v5109_v57  ;;  %v12443_v30 = vpop.f32.mrf.mxu1  ;;  %vm5157_vm15 = vcmp.ge.f32.partialorder %v5109_v57, 0.0 }
 0xa11   : > { %15186 = vst [vmem:[#allocation68_spill] sm:$0xff] %v12443_v30  ;;  %v4511_v23 = vadd.f32 %v12354_v48, %v4140_v34  ;;  %v5528_v30 = vld [vmem:[#allocation11 + $0x38] sm:$0xff]  ;;  %v4141_v34 = vadd.f32 %v11597_v62, %v11531_v52 }
 0xa12   : > { %v12446_v15 = vpop.f32.mrf.mxu2  ;;  %v12448_v10 = vsel %vm5157_vm15, %v5109_v57, %v5205_v26  ;;  %v6350_v26 = vld [vmem:[#allocation11 + $0x1b8] sm:$0xff]  ;;  %5723 = vmatpush.msra.mxu0 %v5528_v30 }
 0xa13   : > { %15187 = vst [vmem:[#allocation63_spill] sm:$0xff] %v12446_v15  ;;  %v4978_v41 = vpop.f32.mrf.mxu3  ;;  %5672 = vmatmul.f32.gmra.mxu1 %v12448_v10  ;;  %v5910_v53 = vrot.slane %v12448_v10, 1  ;;  %6367 = vmatpush.msrb.mxu3 %v6350_v26  ;;  %v4737_v28 = vadd.f32 %v11608_v32, %v4511_v23  ;;  %v4512_v23 = vadd.f32 %v12395_v36, %v4141_v34 }
 0xa14   : > { %v5058_v17 = vadd.f32 %v4978_v41, %v4736_v8 }
 0xa15   : > { %v12456_v46 = vsel %vm1196_vm2, %v5909_v22, %v5910_v53  ;;  %v4442_v22 = vpop.f32.mrf.mxu0  ;;  %v4738_v52 = vadd.f32 %v11616_v45, %v4512_v23 }
 0xa16   : > { %15188 = vst [vmem:[#allocation74_spill] sm:$0xff] %v12456_v46  ;;  %v5110_v1 = vadd.f32 %v12426_v25, %v5058_v17 }
 0xa17   : > { %6104 = vmatmul.f32.gmra.mxu2 %v12456_v46  ;;  %v6576_v46 = vld [vmem:[#allocation11 + $0x238] sm:$0xff] }
 0xa18   : > { %v12461_v57 = vpop.f32.mrf.mxu1  ;;  %vm5158_vm0 = vcmp.ge.f32.partialorder %v5110_v1, 0.0  ;;  %v5206_v58 = vmul.f32 0.2, %v5110_v1  ;;  %6593 = vmatpush.msrb.mxu1 %v6576_v46 }
 0xa19   : > { %15189 = vst [vmem:[#allocation142_spill] sm:$0xff] %v12461_v57 }
 0xa1a   : > { %v12464_v43 = vpop.f32.mrf.mxu2  ;;  %v12466_v41 = vsel %vm5158_vm0, %v5110_v1, %v5206_v58 }
 0xa1b   : > { %15190 = vst [vmem:[#allocation54_spill] sm:$0xff] %v12464_v43  ;;  %v4981_v8 = vpop.f32.mrf.mxu3  ;;  %8367 = vmatmul.msk.f32.gmra.mxu1 %vm5277_vm10, %v12466_v41  ;;  %v12474_v48 = vsel %vm5277_vm10, %v12466_v41, 0.0 }
 0xa1c   : > { %v5059_v30 = vadd.f32 %v4981_v8, %v4737_v28  ;;  %v5911_v32 = vrot.slane %v12474_v48, 1  ;;  %v15194_v8 = vld [vmem:[#allocation158_spill] sm:$0xff]  ;;  %v14263_v34 = vrot.slane %v12474_v48, 7 }
 0xa1d   : > { %v4445_v23 = vpop.f32.mrf.mxu0 }
 0xa1e   : > { %v5111_v1 = vadd.f32 %v12426_v25, %v5059_v30  ;;  %v12482_v17 = vsel %vm1196_vm2, %v5910_v53, %v5911_v32  ;;  %v15195_v30 = vld [vmem:[#allocation175_spill] sm:$0xff] }
 0xa1f   : > { %15191 = vst [vmem:[#allocation61_spill] sm:$0xff] %v12482_v17  ;;  %6107 = vmatmul.f32.gmra.mxu2 %v12482_v17  ;;  %v4142_v53 = vadd.f32 %v15195_v30, %v15194_v8 }
 0xa20   : > { %v12486_v58 = vpop.f32.mrf.mxu1  ;;  %vm5159_vm1 = vcmp.ge.f32.partialorder %v5111_v1, 0.0  ;;  %v5207_v26 = vmul.f32 0.2, %v5111_v1 }
 0xa21   : > { %15192 = vst [vmem:[#allocation98_spill] sm:$0xff] %v12486_v58 }
 0xa22   : > { %v12489_v62 = vpop.f32.mrf.mxu2  ;;  %v12491_v28 = vsel %vm5159_vm1, %v5111_v1, %v5207_v26 }
 0xa23   : > { %15193 = vst [vmem:[#allocation138_spill] sm:$0xff] %v12489_v62  ;;  %v4984_v57 = vpop.f32.mrf.mxu3  ;;  %8368 = vmatmul.msk.f32.gmra.mxu1 %vm5272_vm7, %v12491_v28  ;;  %v12501_v36 = vsel %vm5272_vm7, %v12491_v28, 0.0 }
 0xa24   : > { %v5060_v46 = vadd.f32 %v4984_v57, %v4738_v52  ;;  %v5912_v45 = vrot.slane %v12501_v36, 1  ;;  %v14262_v1 = vrot.slane %v12501_v36, 7  ;;  %v4513_v52 = vadd.f32 %v4439_v21, %v4142_v53 }
 0xa26   : > { %v5112_v26 = vadd.f32 %v12426_v25, %v5060_v46  ;;  %v12509_v8 = vsel %vm1196_vm2, %v5911_v32, %v5912_v45  ;;  %v12517_v57 = vsel %vm1000_vm3, %v14263_v34, %v14262_v1  ;;  %v4739_v46 = vadd.f32 %v11627_v56, %v4513_v52  ;;  %v15200_v1 = vld [vmem:[#allocation149_spill] sm:$0xff]  ;;  %v4448_v56 = vpop.f32.mrf.mxu0 }
 0xa27   : > { %15196 = vst [vmem:[#allocation102_spill] sm:$0xff] %v12509_v8  ;;  %6110 = vmatmul.f32.gmra.mxu2 %v12509_v8  ;;  %v4143_v34 = vadd.f32 %v11614_v40, %v15200_v1  ;;  %v15203_v40 = vld [vmem:[#allocation190_spill] sm:$0xff] }
 0xa28   : > { %v5208_v30 = vmul.f32 0.2, %v5112_v26  ;;  %v12520_v17 = vpop.f32.mrf.mxu1  ;;  %vm5160_vm4 = vcmp.ge.f32.partialorder %v5112_v26, 0.0 }
 0xa29   : > { %15197 = vst [vmem:[#allocation141_spill] sm:$0xff] %v12520_v17  ;;  %v6349_v17 = vld [vmem:[#allocation11 + $0x1b0] sm:$0xff] }
 0xa2a   : > { %v12523_v58 = vpop.f32.mrf.mxu2  ;;  %v12525_v32 = vsel %vm5160_vm4, %v5112_v26, %v5208_v30  ;;  %v4514_v26 = vadd.f32 %v4442_v22, %v4143_v34  ;;  %6368 = vmatpush.msrb.mxu3 %v6349_v17  ;;  %v15206_v34 = vld [vmem:[#allocation153_spill] sm:$0xff] }
 0xa2b   : > { %15198 = vst [vmem:[#allocation106_spill] sm:$0xff] %v12523_v58  ;;  %v4987_v62 = vpop.f32.mrf.mxu3  ;;  %5681 = vmatmul.f32.gmra.mxu1 %v12525_v32  ;;  %v5913_v43 = vrot.slane %v12525_v32, 1  ;;  %v5527_v58 = vld [vmem:[#allocation11 + $0x30] sm:$0xff] }
 0xa2c   : > { %15199 = vst [vmem:[#allocation145_spill] sm:$0xff] %v12525_v32  ;;  %v5061_v8 = vadd.f32 %v4987_v62, %v4739_v46  ;;  %5724 = vmatpush.msra.mxu0 %v5527_v58  ;;  %v4740_v62 = vadd.f32 %v15203_v40, %v4514_v26 }
 0xa2d   : > { %v12533_v21 = vsel %vm1196_vm2, %v5912_v45, %v5913_v43 }
 0xa2e   : > { %15201 = vst [vmem:[#allocation110_spill] sm:$0xff] %v12533_v21  ;;  %v5113_v53 = vadd.f32 %v12426_v25, %v5061_v8  ;;  %v15207_v8 = vld [vmem:[#allocation180_spill] sm:$0xff]  ;;  %v4451_v42 = vpop.f32.mrf.mxu0 }
 0xa2f   : > { %6113 = vmatmul.f32.gmra.mxu2 %v12533_v21  ;;  %v4144_v17 = vadd.f32 %v15207_v8, %v15206_v34  ;;  %v15210_v34 = vld [vmem:[#allocation82_spill] sm:$0xff] }
 0xa30   : > { %v12537_v52 = vpop.f32.mrf.mxu1  ;;  %vm5161_vm5 = vcmp.ge.f32.partialorder %v5113_v53, 0.0  ;;  %v5209_v30 = vmul.f32 0.2, %v5113_v53 }
 0xa31   : > { %15202 = vst [vmem:[#allocation156_spill] sm:$0xff] %v12537_v52 }
 0xa32   : > { %v12540_v1 = vpop.f32.mrf.mxu2  ;;  %v12542_v45 = vsel %vm5161_vm5, %v5113_v53, %v5209_v30  ;;  %v4515_v30 = vadd.f32 %v4445_v23, %v4144_v17 }
 0xa33   : > { %15204 = vst [vmem:[#allocation114_spill] sm:$0xff] %v12540_v1  ;;  %v4990_v46 = vpop.f32.mrf.mxu3  ;;  %8369 = vmatmul.msk.f32.gmra.mxu1 %vm5277_vm10, %v12542_v45  ;;  %v12550_v22 = vsel %vm5277_vm10, %v12542_v45, 0.0  ;;  %v6575_v1 = vld [vmem:[#allocation11 + $0x230] sm:$0xff] }
 0xa34   : > { %15205 = vst [vmem:[#allocation117_spill] sm:$0xff] %v12542_v45  ;;  %v5062_v58 = vadd.f32 %v4990_v46, %v4740_v62  ;;  %v5914_v26 = vrot.slane %v12550_v22, 1  ;;  %6594 = vmatpush.msrb.mxu1 %v6575_v1  ;;  %v4741_v62 = vadd.f32 %v15210_v34, %v4515_v30  ;;  %v15214_v45 = vld [vmem:[#allocation44_spill] sm:$0xff]  ;;  %v14275_v30 = vrot.slane %v12550_v22, 7 }
 0xa36   : > { %v5114_v40 = vadd.f32 %v12426_v25, %v5062_v58  ;;  %v12558_v53 = vsel %vm1196_vm2, %v5913_v43, %v5914_v26  ;;  %v15213_v58 = vld [vmem:[#allocation159_spill] sm:$0xff] }
 0xa37   : > { %15208 = vst [vmem:[#allocation121_spill] sm:$0xff] %v12558_v53  ;;  %6116 = vmatmul.f32.gmra.mxu2 %v12558_v53  ;;  %v4145_v43 = vadd.f32 %v15214_v45, %v15213_v58 }
 0xa38   : > { %v12561_v21 = vpop.f32.mrf.mxu1  ;;  %vm5162_vm6 = vcmp.ge.f32.partialorder %v5114_v40, 0.0  ;;  %v5210_v52 = vmul.f32 0.2, %v5114_v40 }
 0xa39   : > { %15209 = vst [vmem:[#allocation125_spill] sm:$0xff] %v12561_v21 }
 0xa3a   : > { %v12564_v46 = vpop.f32.mrf.mxu2  ;;  %v12566_v8 = vsel %vm5162_vm6, %v5114_v40, %v5210_v52 }
 0xa3b   : > { %15211 = vst [vmem:[#allocation129_spill] sm:$0xff] %v12564_v46  ;;  %v4993_v15 = vpop.f32.mrf.mxu3  ;;  %8370 = vmatmul.msk.f32.gmra.mxu1 %vm5272_vm7, %v12566_v8  ;;  %v12576_v23 = vsel %vm5272_vm7, %v12566_v8, 0.0  ;;  %v4454_v46 = vpop.f32.mrf.mxu0 }
 0xa3c   : > { %15212 = vst [vmem:[#allocation133_spill] sm:$0xff] %v12566_v8  ;;  %v5063_v1 = vadd.f32 %v4993_v15, %v4741_v62  ;;  %v5915_v17 = vrot.slane %v12576_v23, 1  ;;  %v14274_v52 = vrot.slane %v12576_v23, 7  ;;  %v4516_v15 = vadd.f32 %v4448_v56, %v4145_v43 }
 0xa3d   : > { %15215 = vst [vmem:[#allocation136_spill] sm:$0xff] %v12576_v23  ;;  %v15222_v23 = vld [vmem:[#allocation184_spill] sm:$0xff] }
 0xa3e   : > { %v5115_v40 = vadd.f32 %v12426_v25, %v5063_v1  ;;  %v12584_v45 = vsel %vm1196_vm2, %v5914_v26, %v5915_v17  ;;  %v12592_v34 = vsel %vm1000_vm3, %v14275_v30, %v14274_v52  ;;  %v15218_v1 = vld [vmem:[#allocation43_spill] sm:$0xff]  ;;  %v15221_v30 = vld [vmem:[#allocation161_spill] sm:$0xff] }
 0xa3f   : > { %15216 = vst [vmem:[#allocation140_spill] sm:$0xff] %v12584_v45  ;;  %6119 = vmatmul.f32.gmra.mxu2 %v12584_v45  ;;  %v4742_v53 = vadd.f32 %v15218_v1, %v4516_v15  ;;  %v4146_v45 = vadd.f32 %v15222_v23, %v15221_v30  ;;  %v15228_v30 = vld [vmem:[#allocation164_spill] sm:$0xff] }
 0xa40   : > { %v5211_v62 = vmul.f32 0.2, %v5115_v40  ;;  %v12595_v58 = vpop.f32.mrf.mxu1  ;;  %vm5163_vm8 = vcmp.ge.f32.partialorder %v5115_v40, 0.0 }
 0xa41   : > { %15217 = vst [vmem:[#allocation144_spill] sm:$0xff] %v12595_v58  ;;  %v6348_v58 = vld [vmem:[#allocation11 + $0x1a8] sm:$0xff] }
 0xa42   : > { %v12598_v21 = vpop.f32.mrf.mxu2  ;;  %v12600_v26 = vsel %vm5163_vm8, %v5115_v40, %v5211_v62  ;;  %v4517_v40 = vadd.f32 %v4451_v42, %v4146_v45  ;;  %6369 = vmatpush.msrb.mxu3 %v6348_v58  ;;  %v15229_v45 = vld [vmem:[#allocation94_spill] sm:$0xff] }
 0xa43   : > { %15219 = vst [vmem:[#allocation148_spill] sm:$0xff] %v12598_v21  ;;  %v4996_v8 = vpop.f32.mrf.mxu3  ;;  %5690 = vmatmul.f32.gmra.mxu1 %v12600_v26  ;;  %v5916_v52 = vrot.slane %v12600_v26, 1  ;;  %v5526_v21 = vld [vmem:[#allocation11 + $0x28] sm:$0xff]  ;;  %v4147_v58 = vadd.f32 %v15229_v45, %v15228_v30  ;;  %v7275_v45 = vld [vmem:[#allocation11 + $0x370] sm:$0xff] }
 0xa44   : > { %15220 = vst [vmem:[#allocation152_spill] sm:$0xff] %v12600_v26  ;;  %v5064_v56 = vadd.f32 %v4996_v8, %v4742_v53  ;;  %5725 = vmatpush.msra.mxu0 %v5526_v21  ;;  %v4743_v23 = vadd.f32 %v11723_v12, %v4517_v40 }
 0xa45   : > { %v12608_v43 = vsel %vm1196_vm2, %v5915_v17, %v5916_v52 }
 0xa46   : > { %15223 = vst [vmem:[#allocation157_spill] sm:$0xff] %v12608_v43  ;;  %v5116_v15 = vadd.f32 %v12426_v25, %v5064_v56  ;;  %v4457_v56 = vpop.f32.mrf.mxu0 }
 0xa47   : > { %6122 = vmatmul.f32.gmra.mxu2 %v12608_v43 }
 0xa48   : > { %v12612_v62 = vpop.f32.mrf.mxu1  ;;  %vm5164_vm9 = vcmp.ge.f32.partialorder %v5116_v15, 0.0  ;;  %v5212_v1 = vmul.f32 0.2, %v5116_v15 }
 0xa49   : > { %15224 = vst [vmem:[#allocation99_spill] sm:$0xff] %v12612_v62 }
 0xa4a   : > { %v12615_v53 = vpop.f32.mrf.mxu2  ;;  %v12617_v8 = vsel %vm5164_vm9, %v5116_v15, %v5212_v1  ;;  %v4518_v1 = vadd.f32 %v4454_v46, %v4147_v58 }
 0xa4b   : > { %15225 = vst [vmem:[#allocation119_spill] sm:$0xff] %v12615_v53  ;;  %v4999_v17 = vpop.f32.mrf.mxu3  ;;  %8371 = vmatmul.msk.f32.gmra.mxu1 %vm5277_vm10, %v12617_v8  ;;  %v12625_v42 = vsel %vm5277_vm10, %v12617_v8, 0.0  ;;  %v6574_v53 = vld [vmem:[#allocation11 + $0x228] sm:$0xff] }
 0xa4c   : > { %15226 = vst [vmem:[#allocation197_spill] sm:$0xff] %v12617_v8  ;;  %v5065_v21 = vadd.f32 %v4999_v17, %v4743_v23  ;;  %v5917_v12 = vrot.slane %v12625_v42, 1  ;;  %v7276_v8 = vld [vmem:[#allocation11 + $0x378] sm:$0xff]  ;;  %6595 = vmatpush.msrb.mxu1 %v6574_v53  ;;  %v4744_v23 = vadd.f32 %v11754_v27, %v4518_v1  ;;  %v7274_v1 = vld [vmem:[#allocation11 + $0x368] sm:$0xff] }
 0xa4d   : > { %15227 = vst [vmem:[#allocation199_spill] sm:$0xff] %v12625_v42  ;;  %7277 = vmatpush.msra.mxu2 %v7276_v8 }
 0xa4e   : > { %v5117_v15 = vadd.f32 %v12426_v25, %v5065_v21  ;;  %v12633_v40 = vsel %vm1196_vm2, %v5916_v52, %v5917_v12  ;;  %v15234_v52 = vld [vmem:[#allocation166_spill] sm:$0xff] }
 0xa4f   : > { %15230 = vst [vmem:[#allocation103_spill] sm:$0xff] %v12633_v40  ;;  %6125 = vmatmul.f32.gmra.mxu2 %v12633_v40  ;;  %v15235_v21 = vld [vmem:[#allocation174_spill] sm:$0xff] }
 0xa50   : > { %v12636_v43 = vpop.f32.mrf.mxu1  ;;  %vm5165_vm11 = vcmp.ge.f32.partialorder %v5117_v15, 0.0  ;;  %v5213_v62 = vmul.f32 0.2, %v5117_v15  ;;  %v4148_v26 = vadd.f32 %v15235_v21, %v15234_v52  ;;  %7278 = vmatpush.msra.mxu2 %v7275_v45  ;;  %v5525_v52 = vld [vmem:[#allocation11 + $0x20] sm:$0xff] }
 0xa51   : > { %15231 = vst [vmem:[#allocation42_spill] sm:$0xff] %v12636_v43  ;;  %5726 = vmatpush.msra.mxu0 %v5525_v52  ;;  %v7273_v45 = vld [vmem:[#allocation11 + $0x360] sm:$0xff] }
 0xa52   : > { %v12639_v17 = vpop.f32.mrf.mxu2  ;;  %v12641_v30 = vsel %vm5165_vm11, %v5117_v15, %v5213_v62  ;;  %v14292_v62 = vrot.slane %v12625_v42, 7  ;;  %v4519_v21 = vadd.f32 %v4457_v56, %v4148_v26  ;;  %7279 = vmatpush.msra.mxu2 %v7274_v1  ;;  %v7271_v56 = vld [vmem:[#allocation11 + $0x350] sm:$0xff]  ;;  %v15242_v1 = vld [vmem:[#allocation168_spill] sm:$0xff] }
 0xa53   : > { %15232 = vst [vmem:[#allocation158_spill] sm:$0xff] %v12639_v17  ;;  %v5002_v40 = vpop.f32.mrf.mxu3  ;;  %8372 = vmatmul.msk.f32.gmra.mxu1 %vm5272_vm7, %v12641_v30  ;;  %v12651_v46 = vsel %vm5272_vm7, %v12641_v30, 0.0  ;;  %v5523_v17 = vld [vmem:[#allocation11 + $0x10] sm:$0xff] }
 0xa54   : > { %15233 = vst [vmem:[#allocation175_spill] sm:$0xff] %v12641_v30  ;;  %v5066_v27 = vadd.f32 %v5002_v40, %v4744_v23  ;;  %v5918_v53 = vrot.slane %v12651_v46, 1  ;;  %v14291_v8 = vrot.slane %v12651_v46, 7  ;;  %v4460_v23 = vpop.f32.mrf.mxu0  ;;  %v7272_v30 = vld [vmem:[#allocation11 + $0x358] sm:$0xff]  ;;  %7280 = vmatpush.msra.mxu2 %v7273_v45 }
 0xa55   : > { %15236 = vst [vmem:[#allocation149_spill] sm:$0xff] %v12651_v46  ;;  %v4745_v46 = vadd.f32 %v11778_v24, %v4519_v21 }
 0xa56   : > { %v5118_v58 = vadd.f32 %v12426_v25, %v5066_v27  ;;  %v12659_v15 = vsel %vm1196_vm2, %v5917_v12, %v5918_v53  ;;  %v12667_v40 = vsel %vm1000_vm3, %v14292_v62, %v14291_v8  ;;  %v5524_v12 = vld [vmem:[#allocation11 + $0x18] sm:$0xff]  ;;  %v6573_v62 = vld [vmem:[#allocation11 + $0x220] sm:$0xff]  ;;  %7281 = vmatpush.msra.mxu2 %v7272_v30 }
 0xa57   : > { %15237 = vst [vmem:[#allocation190_spill] sm:$0xff] %v12659_v15  ;;  %6128 = vmatmul.f32.gmra.mxu2 %v12659_v15  ;;  %5727 = vmatpush.msra.mxu0 %v5524_v12  ;;  %v15243_v15 = vld [vmem:[#allocation73_spill] sm:$0xff] }
 0xa58   : > { %15238 = vst [vmem:[#allocation153_spill] sm:$0xff] %v12667_v40  ;;  %v5214_v27 = vmul.f32 0.2, %v5118_v58  ;;  %v12670_v43 = vpop.f32.mrf.mxu1  ;;  %vm5166_vm12 = vcmp.ge.f32.partialorder %v5118_v58, 0.0  ;;  %6596 = vmatpush.msrb.mxu1 %v6573_v62  ;;  %7282 = vmatpush.msra.mxu2 %v7271_v56  ;;  %v5522_v62 = vld [vmem:[#allocation11 + $0x8] sm:$0xff]  ;;  %v7269_v56 = vld [vmem:[#allocation11 + $0x340] sm:$0xff] }
 0xa59   : > { %15239 = vst [vmem:[#allocation180_spill] sm:$0xff] %v12670_v43  ;;  %5728 = vmatpush.msra.mxu0 %v5523_v17  ;;  %v4149_v43 = vadd.f32 %v15243_v15, %v15242_v1 }
 0xa5a   : > { %v12673_v42 = vpop.f32.mrf.mxu2  ;;  %v12675_v8 = vsel %vm5166_vm12, %v5118_v58, %v5214_v27 }
 0xa5b   : > { %15240 = vst [vmem:[#allocation82_spill] sm:$0xff] %v12673_v42  ;;  %v5005_v52 = vpop.f32.mrf.mxu3  ;;  %5699 = vmatmul.f32.gmra.mxu1 %v12675_v8  ;;  %v5919_v26 = vrot.slane %v12675_v8, 1  ;;  %v4520_v45 = vadd.f32 %v4460_v23, %v4149_v43  ;;  %v15246_v42 = vld [vmem:[#allocation92_spill] sm:$0xff]  ;;  %5729 = vmatpush.msra.mxu0 %v5522_v62 }
 0xa5c   : > { %15241 = vst [vmem:[#allocation159_spill] sm:$0xff] %v12675_v8  ;;  %v5067_v12 = vadd.f32 %v5005_v52, %v4745_v46  ;;  %v4463_v27 = vpop.f32.mrf.mxu0  ;;  %v7270_v52 = vld [vmem:[#allocation11 + $0x348] sm:$0xff]  ;;  %v5521_v23 = vld [vmem:[#allocation11] sm:$0xff]  ;;  %v7268_v8 = vld [vmem:[#allocation11 + $0x338] sm:$0xff] }
 0xa5d   : > { %v12683_v24 = vsel %vm1196_vm2, %v5918_v53, %v5919_v26  ;;  %v4746_v15 = vadd.f32 %v15246_v42, %v4520_v45  ;;  %v6572_v53 = vld [vmem:[#allocation11 + $0x218] sm:$0xff]  ;;  %v6571_v42 = vld [vmem:[#allocation11 + $0x210] sm:$0xff]  ;;  %7283 = vmatpush.msra.mxu2 %v7270_v52  ;;  %5730 = vmatpush.msra.mxu0 %v5521_v23 }
 0xa5e   : > { %15244 = vst [vmem:[#allocation44_spill] sm:$0xff] %v12683_v24  ;;  %v5119_v58 = vadd.f32 %v12426_v25, %v5067_v12  ;;  %v15249_v12 = vld [vmem:[#allocation170_spill] sm:$0xff]  ;;  %6597 = vmatpush.msrb.mxu1 %v6572_v53 }
 0xa5f   : > { %6131 = vmatmul.f32.gmra.mxu2 %v12683_v24 }
 0xa60   : > { %v12687_v21 = vpop.f32.mrf.mxu1  ;;  %vm5167_vm13 = vcmp.ge.f32.partialorder %v5119_v58, 0.0  ;;  %v5215_v17 = vmul.f32 0.2, %v5119_v58  ;;  %6598 = vmatpush.msrb.mxu1 %v6571_v42  ;;  %7284 = vmatpush.msra.mxu2 %v7269_v56  ;;  %v15256_v56 = vld [vmem:[#allocation173_spill] sm:$0xff] }
 0xa61   : > { %15245 = vst [vmem:[#allocation43_spill] sm:$0xff] %v12687_v21  ;;  %v6347_v21 = vld [vmem:[#allocation11 + $0x1a0] sm:$0xff] }
 0xa62   : > { %v12690_v46 = vpop.f32.mrf.mxu2  ;;  %v12692_v30 = vsel %vm5167_vm13, %v5119_v58, %v5215_v17  ;;  %v15250_v58 = vld [vmem:[#allocation88_spill] sm:$0xff]  ;;  %6370 = vmatpush.msrb.mxu3 %v6347_v21  ;;  %7285 = vmatpush.msra.mxu2 %v7268_v8  ;;  %v15253_v21 = vld [vmem:[#allocation185_spill] sm:$0xff] }
 0xa63   : > { %15247 = vst [vmem:[#allocation161_spill] sm:$0xff] %v12690_v46  ;;  %v5008_v1 = vpop.f32.mrf.mxu3  ;;  %8373 = vmatmul.msk.f32.gmra.mxu1 %vm5277_vm10, %v12692_v30  ;;  %v12700_v43 = vsel %vm5277_vm10, %v12692_v30, 0.0  ;;  %v4150_v45 = vadd.f32 %v15250_v58, %v15249_v12  ;;  %v6570_v46 = vld [vmem:[#allocation11 + $0x208] sm:$0xff] }
 0xa64   : > { %15248 = vst [vmem:[#allocation184_spill] sm:$0xff] %v12692_v30  ;;  %v5068_v17 = vadd.f32 %v5008_v1, %v4746_v15  ;;  %v5920_v24 = vrot.slane %v12700_v43, 1  ;;  %v6569_v15 = vld [vmem:[#allocation11 + $0x200] sm:$0xff]  ;;  %v7267_v1 = vld [vmem:[#allocation11 + $0x330] sm:$0xff]  ;;  %6599 = vmatpush.msrb.mxu1 %v6570_v46  ;;  %v4466_v42 = vpop.f32.mrf.mxu0 }
 0xa65   : > { %v4521_v12 = vadd.f32 %v4463_v27, %v4150_v45  ;;  %7286 = vmatpush.msra.mxu2 %v7267_v1  ;;  %v7265_v46 = vld [vmem:[#allocation11 + $0x320] sm:$0xff] }
 0xa66   : > { %v5120_v30 = vadd.f32 %v12426_v25, %v5068_v17  ;;  %v12708_v62 = vsel %vm1196_vm2, %v5919_v26, %v5920_v24  ;;  %6600 = vmatpush.msrb.mxu1 %v6569_v15  ;;  %v7266_v26 = vld [vmem:[#allocation11 + $0x328] sm:$0xff]  ;;  %v14305_v15 = vrot.slane %v12700_v43, 7 }
 0xa67   : > { %15251 = vst [vmem:[#allocation164_spill] sm:$0xff] %v12708_v62  ;;  %6134 = vmatmul.f32.gmra.mxu2 %v12708_v62  ;;  %v4747_v23 = vadd.f32 %v15253_v21, %v4521_v12  ;;  %v15257_v62 = vld [vmem:[#allocation55_spill] sm:$0xff] }
 0xa68   : > { %v12711_v53 = vpop.f32.mrf.mxu1  ;;  %vm5168_vm14 = vcmp.ge.f32.partialorder %v5120_v30, 0.0  ;;  %v5216_v52 = vmul.f32 0.2, %v5120_v30  ;;  %v4151_v40 = vadd.f32 %v15257_v62, %v15256_v56  ;;  %7287 = vmatpush.msra.mxu2 %v7266_v26  ;;  %v7264_v62 = vld [vmem:[#allocation11 + $0x318] sm:$0xff] }
 0xa69   : > { %15252 = vst [vmem:[#allocation94_spill] sm:$0xff] %v12711_v53 }
 0xa6a   : > { %v12714_v58 = vpop.f32.mrf.mxu2  ;;  %v12716_v17 = vsel %vm5168_vm14, %v5120_v30, %v5216_v52  ;;  %7288 = vmatpush.msra.mxu2 %v7265_v46  ;;  %v4522_v26 = vadd.f32 %v4466_v42, %v4151_v40  ;;  %v6346_v40 = vld [vmem:[#allocation11 + $0x198] sm:$0xff]  ;;  %v15263_v42 = vld [vmem:[#allocation178_spill] sm:$0xff] }
 0xa6b   : > { %15254 = vst [vmem:[#allocation166_spill] sm:$0xff] %v12714_v58  ;;  %v5011_v27 = vpop.f32.mrf.mxu3  ;;  %8374 = vmatmul.msk.f32.gmra.mxu1 %vm5272_vm7, %v12716_v17  ;;  %v12726_v8 = vsel %vm5272_vm7, %v12716_v17, 0.0  ;;  %v15264_v58 = vld [vmem:[#allocation66_spill] sm:$0xff]  ;;  %6371 = vmatpush.msrb.mxu3 %v6346_v40 }
 0xa6c   : > { %15255 = vst [vmem:[#allocation174_spill] sm:$0xff] %v12716_v17  ;;  %v5069_v30 = vadd.f32 %v5011_v27, %v4747_v23  ;;  %v5921_v45 = vrot.slane %v12726_v8, 1  ;;  %v14304_v1 = vrot.slane %v12726_v8, 7  ;;  %v7263_v23 = vld [vmem:[#allocation11 + $0x310] sm:$0xff]  ;;  %7289 = vmatpush.msra.mxu2 %v7264_v62  ;;  %v4469_v62 = vpop.f32.mrf.mxu0 }
 0xa6d   : > { %15258 = vst [vmem:[#allocation168_spill] sm:$0xff] %v12726_v8 }
 0xa6e   : > { %v5121_v12 = vadd.f32 %v12426_v25, %v5069_v30  ;;  %v12734_v52 = vsel %vm1196_vm2, %v5920_v24, %v5921_v45  ;;  %v12742_v21 = vsel %vm1000_vm3, %v14305_v15, %v14304_v1  ;;  %v4748_v24 = vadd.f32 %v11878_v13, %v4522_v26  ;;  %7290 = vmatpush.msra.mxu2 %v7263_v23  ;;  %v7262_v15 = vld [vmem:[#allocation11 + $0x308] sm:$0xff]  ;;  %v6345_v13 = vld [vmem:[#allocation11 + $0x190] sm:$0xff] }
 0xa6f   : > { %15259 = vst [vmem:[#allocation73_spill] sm:$0xff] %v12734_v52  ;;  %6137 = vmatmul.f32.gmra.mxu2 %v12734_v52  ;;  %v7261_v52 = vld [vmem:[#allocation11 + $0x300] sm:$0xff]  ;;  %v6344_v23 = vld [vmem:[#allocation11 + $0x188] sm:$0xff]  ;;  %6372 = vmatpush.msrb.mxu3 %v6345_v13 }
 0xa70   : > { %v5217_v56 = vmul.f32 0.2, %v5121_v12  ;;  %v12745_v27 = vpop.f32.mrf.mxu1  ;;  %vm5169_vm15 = vcmp.ge.f32.partialorder %v5121_v12, 0.0  ;;  %7291 = vmatpush.msra.mxu2 %v7262_v15 }
 0xa71   : > { %15260 = vst [vmem:[#allocation92_spill] sm:$0xff] %v12745_v27  ;;  %v4152_v27 = vadd.f32 %v15264_v58, %v15263_v42  ;;  %6373 = vmatpush.msrb.mxu3 %v6344_v23  ;;  %v15267_v58 = vld [vmem:[#allocation37_spill] sm:$0xff] }
 0xa72   : > { %v12748_v46 = vpop.f32.mrf.mxu2  ;;  %v12750_v30 = vsel %vm5169_vm15, %v5121_v12, %v5217_v56  ;;  %7292 = vmatpush.msra.mxu2 %v7261_v52  ;;  %v6343_v56 = vld [vmem:[#allocation11 + $0x180] sm:$0xff] }
 0xa73   : > { %15261 = vst [vmem:[#allocation170_spill] sm:$0xff] %v12748_v46  ;;  %v5014_v53 = vpop.f32.mrf.mxu3  ;;  %5708 = vmatmul.f32.gmra.mxu1 %v12750_v30  ;;  %v5922_v1 = vrot.slane %v12750_v30, 1  ;;  %v4523_v46 = vadd.f32 %v4469_v62, %v4152_v27  ;;  %6374 = vmatpush.msrb.mxu3 %v6343_v56  ;;  %v15272_v62 = vld [vmem:[#allocation155_spill] sm:$0xff] }
 0xa74   : > { %15262 = vst [vmem:[#allocation88_spill] sm:$0xff] %v12750_v30  ;;  %v5070_v17 = vadd.f32 %v5014_v53, %v4748_v24  ;;  %v12777_v13 = vpop.f32.mrf.mxu0 }
 0xa75   : > { %v12758_v12 = vsel %vm1196_vm2, %v5921_v45, %v5922_v1  ;;  %v4749_v15 = vadd.f32 %v15267_v58, %v4523_v46  ;;  %15271 = vst [vmem:[#allocation37_spill] sm:$0xff] %v12777_v13 }
 0xa76   : > { %15265 = vst [vmem:[#allocation185_spill] sm:$0xff] %v12758_v12  ;;  %v5122_v26 = vadd.f32 %v12426_v25, %v5070_v17 }
 0xa77   : > { %6140 = vmatmul.f32.gmra.mxu2 %v12758_v12 }
 0xa78   : > { %v12762_v8 = vpop.f32.mrf.mxu1  ;;  %vm5170_vm0 = vcmp.ge.f32.partialorder %v5122_v26, 0.0  ;;  %v5218_v53 = vmul.f32 0.2, %v5122_v26 }
 0xa79   : > { %15266 = vst [vmem:[#allocation173_spill] sm:$0xff] %v12762_v8 }
 0xa7a   : > { %v12765_v24 = vpop.f32.mrf.mxu2  ;;  %v12767_v45 = vsel %vm5170_vm0, %v5122_v26, %v5218_v53 }
 0xa7b   : > { %15268 = vst [vmem:[#allocation55_spill] sm:$0xff] %v12765_v24  ;;  %v5017_v40 = vpop.f32.mrf.mxu3  ;;  %v5325_v17 = vsel %vm5277_vm10, %v12767_v45, 0.0  ;;  %8375 = vmatmul.msk.f32.gmra.mxu1 %vm5277_vm10, %v12767_v45 }
 0xa7c   : > { %15269 = vst [vmem:[#allocation178_spill] sm:$0xff] %v12767_v45  ;;  %v5071_v52 = vadd.f32 %v5017_v40, %v4749_v15  ;;  %v12775_v27 = vrot.slane %v5325_v17, 7  ;;  %v5923_v42 = vrot.slane %v5325_v17, 1  ;;  %v15278_v17 = vld [vmem:[#allocation182_spill] sm:$0xff] }
 0xa7e   : > { %15270 = vst [vmem:[#allocation66_spill] sm:$0xff] %v12775_v27  ;;  %v5123_v46 = vadd.f32 %v12426_v25, %v5071_v52  ;;  %v5520_v23 = vsel %vm1000_vm3, %v12775_v27, %v15272_v62  ;;  %v12786_v26 = vsel %vm1196_vm2, %v5922_v1, %v5923_v42  ;;  %v15280_v52 = vld [vmem:[#allocation187_spill] sm:$0xff]  ;;  %v15281_v62 = vld [vmem:[#allocation81_spill] sm:$0xff] }
 0xa7f   : > { %15273 = vst [vmem:[#allocation155_spill] sm:$0xff] %v12786_v26  ;;  %5731 = vmatmul.f32.vlgmr.msra.gmra.mxu0 %v5520_v23  ;;  %6143 = vmatmul.f32.gmra.mxu2 %v12786_v26  ;;  %v4154_v23 = vadd.f32 %v15281_v62, %v15280_v52 }
 0xa80   : > { %vm5171_vm1 = vcmp.ge.f32.partialorder %v5123_v46, 0.0  ;;  %v5219_v56 = vmul.f32 0.2, %v5123_v46  ;;  %v12789_v53 = vpop.f32.mrf.mxu1 }
 0xa81   : > { %15274 = vst [vmem:[#allocation200_spill] sm:$0xff] %v12789_v53  ;;  %v15284_v53 = vld [vmem:[#allocation160_spill] sm:$0xff] }
 0xa82   : > { %v12791_v58 = vsel %vm5171_vm1, %v5123_v46, %v5219_v56  ;;  %v12793_v15 = vpop.f32.mrf.mxu2  ;;  %v15282_v46 = vld [vmem:[#allocation38_spill] sm:$0xff] }
 0xa83   : > { %15275 = vst [vmem:[#allocation201_spill] sm:$0xff] %v12791_v58  ;;  %v12795_v40 = vpop.f32.mrf.mxu3  ;;  %8376 = vmatmul.msk.f32.vlgmr.msrb.gmra.mxu1 %vm5272_vm7, %v15278_v17  ;;  %v12803_v1 = vsel %vm5272_vm7, %v12791_v58, 0.0  ;;  %v5971_v56 = vsel %vm1196_vm2, %v5923_v42, %v15282_v46  ;;  %v4475_v17 = vpop.f32.mrf.mxu0  ;;  %v15287_v58 = vld [vmem:[#allocation186_spill] sm:$0xff] }
 0xa84   : > { %15276 = vst [vmem:[#allocation202_spill] sm:$0xff] %v12793_v15  ;;  %v14321_v26 = vrot.slane %v12803_v1, 1  ;;  %v4525_v8 = vadd.f32 %v4475_v17, %v4154_v23  ;;  %v15294_v17 = vld [vmem:[#allocation93_spill] sm:$0xff] }
 0xa85   : > { %15277 = vst [vmem:[#allocation203_spill] sm:$0xff] %v12795_v40  ;;  %v15370_v40 = vld [vmem:[#allocation104_spill] sm:$0xff] }
 0xa86   : > { %15279 = vst [vmem:[#allocation182_spill] sm:$0xff] %v12803_v1  ;;  %v12815_v12 = vsel %vm1196_vm2, %v5923_v42, %v14321_v26  ;;  %v4751_v52 = vadd.f32 %v11960_v39, %v4525_v8  ;;  %v15288_v1 = vld [vmem:[#allocation91_spill] sm:$0xff]  ;;  %v15289_v42 = vld [vmem:[#allocation172_spill] sm:$0xff] }
 0xa87   : > { %15283 = vst [vmem:[#allocation187_spill] sm:$0xff] %v12815_v12  ;;  %5734 = vmatmul.f32.gmra.mxu0 %v15284_v53  ;;  %6146 = vmatmul.f32.gmra.mxu2 %v5971_v56  ;;  %v7259_v26 = vsel %vm1000_vm3, %v15289_v42, %v15288_v1  ;;  %v15290_v53 = vld [vmem:[#allocation163_spill] sm:$0xff] }
 0xa88   : > { %v12818_v15 = vpop.f32.mrf.mxu1 }
 0xa89   : > { %15285 = vst [vmem:[#allocation81_spill] sm:$0xff] %v12818_v15 }
 0xa8a   : > { %v12821_v62 = vpop.f32.mrf.mxu2 }
 0xa8b   : > { %15286 = vst [vmem:[#allocation38_spill] sm:$0xff] %v12821_v62  ;;  %v5023_v24 = vpop.f32.mrf.mxu3  ;;  %6604 = vmatmul.f32.gmra.mxu1 %v15287_v58 }
 0xa8c   : > { %v5073_v46 = vadd.f32 %v5023_v24, %v4751_v52  ;;  %v5428_v24 = vrot.slane %v15294_v17, 7  ;;  %v15296_v52 = vld [vmem:[#allocation194_spill] sm:$0xff] }
 0xa8e   : > { %v5125_v45 = vadd.f32 %v12426_v25, %v5073_v46 }
 0xa8f   : > { %5737 = vmatmul.f32.gmra.mxu0 %v15290_v53  ;;  %7293 = vmatmul.f32.vlgmr.msra.gmra.mxu2 %v7259_v26  ;;  %v15297_v26 = vld [vmem:[#allocation176_spill] sm:$0xff] }
 0xa90   : > { %vm5173_vm4 = vcmp.ge.f32.partialorder %v5125_v45, 0.0  ;;  %v5221_v23 = vmul.f32 0.2, %v5125_v45  ;;  %v12830_v56 = vpop.f32.mrf.mxu1  ;;  %v5432_v46 = vrot.slane %v15297_v26, 7 }
 0xa91   : > { %15291 = vst [vmem:[#allocation160_spill] sm:$0xff] %v12830_v56  ;;  %v15302_v56 = vld [vmem:[#allocation83_spill] sm:$0xff] }
 0xa92   : > { %v12832_v39 = vsel %vm5173_vm4, %v5125_v45, %v5221_v23  ;;  %v12834_v8 = vpop.f32.mrf.mxu2  ;;  %v15299_v45 = vld [vmem:[#allocation162_spill] sm:$0xff]  ;;  %v5513_v17 = vsel %vm1000_vm3, %v15288_v1, %v5432_v46 }
 0xa93   : > { %15292 = vst [vmem:[#allocation186_spill] sm:$0xff] %v12832_v39  ;;  %v12840_v25 = vsel %vm5277_vm10, %v12832_v39, 0.0  ;;  %8377 = vmatmul.msk.f32.gmra.mxu1 %vm5277_vm10, %v15296_v52  ;;  %v5517_v53 = vsel %vm1000_vm3, %v15299_v45, %v5428_v24  ;;  %v15369_v39 = vld [vmem:[#allocation123_spill] sm:$0xff] }
 0xa94   : > { %15293 = vst [vmem:[#allocation91_spill] sm:$0xff] %v12834_v8  ;;  %v12847_v42 = vrot.slane %v12840_v25, 7 }
 0xa95   : > { %15295 = vst [vmem:[#allocation172_spill] sm:$0xff] %v12840_v25  ;;  %v5429_v25 = vrot.slane %v15287_v58, 7  ;;  %v15307_v58 = vld [vmem:[#allocation189_spill] sm:$0xff] }
 0xa96   : > { %15298 = vst [vmem:[#allocation163_spill] sm:$0xff] %v12847_v42  ;;  %v6341_v23 = vsel %vm1000_vm3, %v12847_v42, %v5428_v24  ;;  %v15308_v15 = vrot.slane %v15307_v58, 7  ;;  %v15315_v58 = vld [vmem:[#allocation58_spill] sm:$0xff] }
 0xa97   : > { %5740 = vmatmul.f32.gmra.mxu0 %v5517_v53  ;;  %6375 = vmatmul.f32.vlgmr.msrb.gmra.mxu3 %v6341_v23  ;;  %v5516_v45 = vsel %vm1000_vm3, %v5428_v24, %v5429_v25  ;;  %v15303_v53 = vld [vmem:[#allocation60_spill] sm:$0xff]  ;;  %v15309_v24 = vld [vmem:[#allocation95_spill] sm:$0xff] }
 0xa98   : > { %7296 = vmatmul.f32.gmra.mxu2 %v5513_v17  ;;  %v12858_v52 = vpop.f32.mrf.mxu1  ;;  %v15304_v23 = vrot.slane %v15303_v53, 7  ;;  %v5515_v8 = vsel %vm1000_vm3, %v5429_v25, %v15308_v15  ;;  %v15316_v15 = vrot.slane %v15315_v58, 7 }
 0xa99   : > { %15300 = vst [vmem:[#allocation93_spill] sm:$0xff] %v12858_v52 }
 0xa9a   : > { %v12860_v12 = vpop.f32.mrf.mxu2  ;;  %v5512_v1 = vsel %vm1000_vm3, %v5432_v46, %v15304_v23  ;;  %v15312_v46 = vld [vmem:[#allocation177_spill] sm:$0xff] }
 0xa9b   : > { %15301 = vst [vmem:[#allocation194_spill] sm:$0xff] %v12860_v12  ;;  %8378 = vmatmul.msk.f32.gmra.mxu1 %vm5272_vm7, %v15302_v56  ;;  %v15313_v23 = vld [vmem:[#allocation181_spill] sm:$0xff]  ;;  %v15366_v56 = vld [vmem:[#allocation23_spill] sm:$0xff] }
 0xa9f   : > { %5743 = vmatmul.f32.gmra.mxu0 %v5516_v45  ;;  %6378 = vmatmul.f32.gmra.mxu3 %v5516_v45 }
 0xaa0   : > { %7299 = vmatmul.f32.gmra.mxu2 %v5512_v1  ;;  %v12872_v52 = vpop.f32.mrf.mxu1 }
 0xaa1   : > { %15305 = vst [vmem:[#allocation162_spill] sm:$0xff] %v12872_v52  ;;  %v5435_v52 = vrot.slane %v15313_v23, 7 }
 0xaa2   : > { %v12874_v12 = vpop.f32.mrf.mxu2 }
 0xaa3   : > { %15306 = vst [vmem:[#allocation60_spill] sm:$0xff] %v12874_v12  ;;  %6613 = vmatmul.f32.gmra.mxu1 %v15297_v26  ;;  %v15314_v12 = vld [vmem:[#allocation25_spill] sm:$0xff] }
 0xaa7   : > { %5746 = vmatmul.f32.gmra.mxu0 %v5515_v8  ;;  %6381 = vmatmul.f32.gmra.mxu3 %v5515_v8  ;;  %v5510_v8 = vsel %vm1000_vm3, %v15316_v15, %v5435_v52 }
 0xaa8   : > { %7302 = vmatmul.f32.gmra.mxu2 %v15309_v24  ;;  %v12882_v45 = vpop.f32.mrf.mxu1 }
 0xaa9   : > { %15310 = vst [vmem:[#allocation189_spill] sm:$0xff] %v12882_v45 }
 0xaaa   : > { %v12884_v53 = vpop.f32.mrf.mxu2 }
 0xaab   : > { %15311 = vst [vmem:[#allocation95_spill] sm:$0xff] %v12884_v53  ;;  %8379 = vmatmul.msk.f32.gmra.mxu1 %vm5277_vm10, %v15312_v46  ;;  %v15319_v53 = vld [vmem:[#allocation179_spill] sm:$0xff]  ;;  %v15320_v46 = vld [vmem:[#allocation78_spill] sm:$0xff] }
 0xaac   : > { %v15321_v26 = vrot.slane %v15320_v46, 7  ;;  %v15329_v46 = vld [vmem:[#allocation188_spill] sm:$0xff] }
 0xaaf   : > { %5749 = vmatmul.f32.gmra.mxu0 %v15314_v12  ;;  %6384 = vmatmul.f32.gmra.mxu3 %v15314_v12  ;;  %v5509_v12 = vsel %vm1000_vm3, %v5435_v52, %v15321_v26  ;;  %v15328_v26 = vld [vmem:[#allocation57_spill] sm:$0xff] }
 0xab0   : > { %7305 = vmatmul.f32.gmra.mxu2 %v5510_v8  ;;  %v12896_v25 = vpop.f32.mrf.mxu1  ;;  %v5438_v52 = vrot.slane %v15328_v26, 7 }
 0xab1   : > { %15317 = vst [vmem:[#allocation25_spill] sm:$0xff] %v12896_v25  ;;  %v15324_v25 = vld [vmem:[#allocation59_spill] sm:$0xff] }
 0xab2   : > { %v12898_v45 = vpop.f32.mrf.mxu2 }
 0xab3   : > { %15318 = vst [vmem:[#allocation58_spill] sm:$0xff] %v12898_v45  ;;  %8380 = vmatmul.msk.f32.gmra.mxu1 %vm5272_vm7, %v15319_v53 }
 0xab7   : > { %5752 = vmatmul.f32.gmra.mxu0 %v5513_v17  ;;  %6387 = vmatmul.f32.gmra.mxu3 %v5513_v17  ;;  %v15327_v17 = vld [vmem:[#allocation52_spill] sm:$0xff] }
 0xab8   : > { %7308 = vmatmul.f32.gmra.mxu2 %v5509_v12  ;;  %v12907_v58 = vpop.f32.mrf.mxu1 }
 0xab9   : > { %15322 = vst [vmem:[#allocation78_spill] sm:$0xff] %v12907_v58  ;;  %v15330_v58 = vrot.slane %v15329_v46, 7 }
 0xaba   : > { %v12909_v15 = vpop.f32.mrf.mxu2 }
 0xabb   : > { %15323 = vst [vmem:[#allocation204_spill] sm:$0xff] %v12909_v15  ;;  %6622 = vmatmul.f32.gmra.mxu1 %v15313_v23  ;;  %v15365_v23 = vld [vmem:[#allocation71_spill] sm:$0xff] }
 0xabf   : > { %5755 = vmatmul.f32.gmra.mxu0 %v5512_v1  ;;  %6390 = vmatmul.f32.gmra.mxu3 %v5512_v1  ;;  %v5507_v1 = vsel %vm1000_vm3, %v15330_v58, %v5438_v52 }
 0xac0   : > { %7311 = vmatmul.f32.gmra.mxu2 %v15324_v25  ;;  %v12913_v45 = vpop.f32.mrf.mxu1 }
 0xac1   : > { %15325 = vst [vmem:[#allocation59_spill] sm:$0xff] %v12913_v45 }
 0xac2   : > { %v12915_v53 = vpop.f32.mrf.mxu2 }
 0xac3   : > { %15326 = vst [vmem:[#allocation205_spill] sm:$0xff] %v12915_v53  ;;  %8381 = vmatmul.msk.f32.gmra.mxu1 %vm5277_vm10, %v15327_v17  ;;  %v15333_v53 = vld [vmem:[#allocation195_spill] sm:$0xff]  ;;  %v15334_v17 = vrot.slane %v11905_v35, 7 }
 0xac4   : > { %v15338_v35 = vld [vmem:[#allocation51_spill] sm:$0xff] }
 0xac7   : > { %5758 = vmatmul.f32.gmra.mxu0 %v15309_v24  ;;  %6393 = vmatmul.f32.gmra.mxu3 %v15309_v24  ;;  %v5506_v24 = vsel %vm1000_vm3, %v5438_v52, %v15334_v17  ;;  %v15339_v17 = vld [vmem:[#allocation64_spill] sm:$0xff] }
 0xac8   : > { %7314 = vmatmul.f32.gmra.mxu2 %v5507_v1  ;;  %v12927_v15 = vpop.f32.mrf.mxu1  ;;  %v5441_v52 = vrot.slane %v15339_v17, 7 }
 0xac9   : > { %15331 = vst [vmem:[#allocation188_spill] sm:$0xff] %v12927_v15 }
 0xaca   : > { %v12929_v45 = vpop.f32.mrf.mxu2 }
 0xacb   : > { %15332 = vst [vmem:[#allocation206_spill] sm:$0xff] %v12929_v45  ;;  %8382 = vmatmul.msk.f32.gmra.mxu1 %vm5272_vm7, %v15333_v53  ;;  %v7502_v45 = vld [vmem:[#allocation11 + $0x3f8] sm:$0xff]  ;;  %v7822_v53 = vld [vmem:[#allocation11 + $0x468] sm:$0xff] }
 0xacc   : > { %7503 = vmatpush.msra.mxu3 %v7502_v45 }
 0xacf   : > { %5761 = vmatmul.f32.gmra.mxu0 %v5510_v8  ;;  %6396 = vmatmul.f32.gmra.mxu3 %v5510_v8  ;;  %v6906_v8 = vld [vmem:[#allocation11 + $0x2f8] sm:$0xff] }
 0xad0   : > { %7317 = vmatmul.f32.gmra.mxu2 %v5506_v24  ;;  %v12938_v46 = vpop.f32.mrf.mxu1  ;;  %6907 = vmatpush.msrb.mxu0 %v6906_v8 }
 0xad1   : > { %15335 = vst [vmem:[#allocation207_spill] sm:$0xff] %v12938_v46 }
 0xad2   : > { %v12940_v58 = vpop.f32.mrf.mxu2 }
 0xad3   : > { %15336 = vst [vmem:[#allocation208_spill] sm:$0xff] %v12940_v58  ;;  %6631 = vmatmul.f32.gmra.mxu1 %v15328_v26  ;;  %v7824_v26 = vld [vmem:[#allocation11 + $0x478] sm:$0xff] }
 0xad4   : > { %7825 = vmatpush.msra.mxu1 %v7824_v26 }
 0xad7   : > { %5764 = vmatmul.f32.gmra.mxu0 %v5509_v12  ;;  %6399 = vmatmul.f32.gmra.mxu3 %v5509_v12  ;;  %v15341_v12 = vld [vmem:[#allocation96_spill] sm:$0xff] }
 0xad8   : > { %7320 = vmatmul.f32.gmra.mxu2 %v11945_v3  ;;  %v12944_v15 = vpop.f32.mrf.mxu1  ;;  %v15342_v58 = vrot.slane %v15341_v12, 7 }
 0xad9   : > { %15337 = vst [vmem:[#allocation209_spill] sm:$0xff] %v12944_v15 }
 0xada   : > { %v12950_v46 = vpop.f32.mrf.mxu2  ;;  %v5504_v15 = vsel %vm1000_vm3, %v15342_v58, %v5441_v52 }
 0xadb   : > { %8383 = vmatmul.msk.f32.gmra.mxu1 %vm5277_vm10, %v15338_v35  ;;  %15340 = vst [vmem:[#allocation210_spill] sm:$0xff] %v12950_v46  ;;  %v15344_v35 = vld [vmem:[#allocation27_spill] sm:$0xff] }
 0xadf   : > { %5767 = vmatmul.f32.gmra.mxu0 %v15324_v25  ;;  %6402 = vmatmul.f32.gmra.mxu3 %v15324_v25  ;;  %v15346_v25 = vrot.slane %v11973_v29, 7  ;;  %v15350_v29 = vld [vmem:[#allocation97_spill] sm:$0xff] }
 0xae0   : > { %7323 = vmatmul.f32.gmra.mxu2 %v5504_v15  ;;  %v12958_v45 = vpop.f32.mrf.mxu1 }
 0xae1   : > { %15343 = vst [vmem:[#allocation96_spill] sm:$0xff] %v12958_v45  ;;  %v5503_v12 = vsel %vm1000_vm3, %v5441_v52, %v15346_v25  ;;  %v15351_v52 = vld [vmem:[#allocation70_spill] sm:$0xff] }
 0xae2   : > { %v12963_v8 = vpop.f32.mrf.mxu2  ;;  %v5444_v25 = vrot.slane %v15351_v52, 7 }
 0xae3   : > { %8384 = vmatmul.msk.f32.gmra.mxu1 %vm5272_vm7, %v15344_v35  ;;  %15345 = vst [vmem:[#allocation211_spill] sm:$0xff] %v12963_v8  ;;  %v7501_v8 = vld [vmem:[#allocation11 + $0x3f0] sm:$0xff] }
 0xae4   : > { %7504 = vmatpush.msra.mxu3 %v7501_v8  ;;  %v7823_v8 = vld [vmem:[#allocation11 + $0x470] sm:$0xff] }
 0xae5   : > { %7826 = vmatpush.msra.mxu1 %v7823_v8 }
 0xae7   : > { %5770 = vmatmul.f32.gmra.mxu0 %v5507_v1  ;;  %6405 = vmatmul.f32.gmra.mxu3 %v5507_v1  ;;  %v6905_v1 = vld [vmem:[#allocation11 + $0x2f0] sm:$0xff] }
 0xae8   : > { %7326 = vmatmul.f32.gmra.mxu2 %v5503_v12  ;;  %v12969_v58 = vpop.f32.mrf.mxu1  ;;  %6908 = vmatpush.msrb.mxu0 %v6905_v1 }
 0xae9   : > { %15347 = vst [vmem:[#allocation212_spill] sm:$0xff] %v12969_v58  ;;  %7827 = vmatpush.msra.mxu1 %v7822_v53 }
 0xaea   : > { %v12972_v26 = vpop.f32.mrf.mxu2 }
 0xaeb   : > { %6640 = vmatmul.f32.gmra.mxu1 %v15339_v17  ;;  %15348 = vst [vmem:[#allocation213_spill] sm:$0xff] %v12972_v26  ;;  %v15356_v17 = vld [vmem:[#allocation101_spill] sm:$0xff] }
 0xaef   : > { %5773 = vmatmul.f32.gmra.mxu0 %v5506_v24  ;;  %6408 = vmatmul.f32.gmra.mxu3 %v5506_v24  ;;  %v15352_v24 = vld [vmem:[#allocation75_spill] sm:$0xff] }
 0xaf0   : > { %7329 = vmatmul.f32.gmra.mxu2 %v12013_v49  ;;  %v12975_v45 = vpop.f32.mrf.mxu1  ;;  %v15353_v58 = vrot.slane %v15352_v24, 7 }
 0xaf1   : > { %15349 = vst [vmem:[#allocation214_spill] sm:$0xff] %v12975_v45 }
 0xaf2   : > { %v5501_v26 = vsel %vm1000_vm3, %v15353_v58, %v5444_v25  ;;  %v12989_v1 = vpop.f32.mrf.mxu2 }
 0xaf3   : > { %8385 = vmatmul.msk.f32.gmra.mxu1 %vm5277_vm10, %v15350_v29  ;;  %15355 = vst [vmem:[#allocation215_spill] sm:$0xff] %v12989_v1 }
 0xaf7   : > { %5776 = vmatmul.f32.gmra.mxu0 %v11945_v3  ;;  %6411 = vmatmul.f32.gmra.mxu3 %v11945_v3  ;;  %v15357_v3 = vrot.slane %v12045_v18, 7  ;;  %v15360_v18 = vld [vmem:[#allocation131_spill] sm:$0xff] }
 0xaf8   : > { %7332 = vmatmul.f32.gmra.mxu2 %v5501_v26  ;;  %v12987_v45 = vpop.f32.mrf.mxu1 }
 0xaf9   : > { %15354 = vst [vmem:[#allocation75_spill] sm:$0xff] %v12987_v45  ;;  %v5500_v24 = vsel %vm1000_vm3, %v5444_v25, %v15357_v3  ;;  %v5447_v25 = vrot.slane %v15360_v18, 7  ;;  %v6904_v3 = vld [vmem:[#allocation11 + $0x2e8] sm:$0xff] }
 0xafa   : > { %v12999_v45 = vpop.f32.mrf.mxu2  ;;  %6909 = vmatpush.msrb.mxu0 %v6904_v3 }
 0xafb   : > { %8386 = vmatmul.msk.f32.gmra.mxu1 %vm5272_vm7, %v15356_v17  ;;  %15358 = vst [vmem:[#allocation216_spill] sm:$0xff] %v12999_v45  ;;  %v7500_v17 = vld [vmem:[#allocation11 + $0x3e8] sm:$0xff] }
 0xafc   : > { %v5732_v29 = vpop.f32.mrf.mxu0  ;;  %7505 = vmatpush.msra.mxu3 %v7500_v17 }
 0xaff   : > { %5779 = vmatmul.f32.gmra.mxu0 %v5504_v15  ;;  %6414 = vmatmul.f32.gmra.mxu3 %v5504_v15  ;;  %v15359_v15 = vld [vmem:[#allocation120_spill] sm:$0xff] }
 0xb00   : > { %7335 = vmatmul.f32.gmra.mxu2 %v5500_v24  ;;  %v6602_v58 = vpop.f32.mrf.mxu1 }
 0xb03   : > { %6649 = vmatmul.f32.gmra.mxu1 %v15351_v52  ;;  %v13006_v52 = vpop.f32.mrf.mxu2 }
 0xb04   : > { %v5735_v8 = vpop.f32.mrf.mxu0  ;;  %15361 = vst [vmem:[#allocation217_spill] sm:$0xff] %v13006_v52  ;;  %v5733_v52 = vadd.f32 %v5732_v29, %v15365_v23 }
 0xb05   : > { %v5736_v23 = vadd.f32 %v5735_v8, %v15370_v40  ;;  %v15376_v40 = vld [vmem:[#allocation150_spill] sm:$0xff] }
 0xb06   : > { %v6150_v53 = vadd.f32 %v15369_v39, %v5733_v52  ;;  %v15375_v52 = vld [vmem:[#allocation126_spill] sm:$0xff] }
 0xb07   : > { %5782 = vmatmul.f32.gmra.mxu0 %v5503_v12  ;;  %6417 = vmatmul.f32.gmra.mxu3 %v5503_v12  ;;  %v15362_v12 = vld [vmem:[#allocation56_spill] sm:$0xff] }
 0xb08   : > { %7338 = vmatmul.f32.gmra.mxu2 %v12085_v50  ;;  %v6605_v1 = vpop.f32.mrf.mxu1  ;;  %v15363_v45 = vrot.slane %v15362_v12, 7 }
 0xb0a   : > { %v5498_v17 = vsel %vm1000_vm3, %v15363_v45, %v5447_v25 }
 0xb0b   : > { %8387 = vmatmul.msk.f32.gmra.mxu1 %vm5277_vm10, %v15359_v15  ;;  %v15364_v15 = vld [vmem:[#allocation113_spill] sm:$0xff]  ;;  %v13022_v62 = vpop.f32.mrf.mxu2 }
 0xb0c   : > { %v5738_v46 = vpop.f32.mrf.mxu0  ;;  %15368 = vst [vmem:[#allocation56_spill] sm:$0xff] %v13022_v62 }
 0xb0f   : > { %5785 = vmatmul.f32.gmra.mxu0 %v12013_v49  ;;  %6420 = vmatmul.f32.gmra.mxu3 %v12013_v49  ;;  %v15367_v49 = vrot.slane %v15366_v56, 7  ;;  %v15372_v56 = vld [vmem:[#allocation147_spill] sm:$0xff] }
 0xb10   : > { %7341 = vmatmul.f32.gmra.mxu2 %v5498_v17  ;;  %v6608_v35 = vpop.f32.mrf.mxu1 }
 0xb11   : > { %v5497_v12 = vsel %vm1000_vm3, %v5447_v25, %v15367_v49  ;;  %v7499_v25 = vld [vmem:[#allocation11 + $0x3e0] sm:$0xff]  ;;  %v15373_v49 = vld [vmem:[#allocation105_spill] sm:$0xff] }
 0xb12   : > { %v6151_v62 = vadd.f32 %v15373_v49, %v5736_v23  ;;  %7506 = vmatpush.msra.mxu3 %v7499_v25  ;;  %v15379_v23 = vld [vmem:[#allocation130_spill] sm:$0xff] }
 0xb13   : > { %8388 = vmatmul.msk.f32.gmra.mxu1 %vm5272_vm7, %v15364_v15  ;;  %v13031_v13 = vpop.f32.mrf.mxu2  ;;  %v15380_v25 = vrot.slane %v15379_v23, 7 }
 0xb14   : > { %v5741_v3 = vpop.f32.mrf.mxu0  ;;  %15374 = vst [vmem:[#allocation23_spill] sm:$0xff] %v13031_v13 }
 0xb17   : > { %5788 = vmatmul.f32.gmra.mxu0 %v5501_v26  ;;  %6423 = vmatmul.f32.gmra.mxu3 %v5501_v26 }
 0xb18   : > { %7344 = vmatmul.f32.gmra.mxu2 %v5497_v12  ;;  %v6611_v45 = vpop.f32.mrf.mxu1 }
 0xb1a   : > { %v6376_v42 = vpop.f32.mrf.mxu3 }
 0xb1b   : > { %v6520_v27 = vadd.f32 %v6376_v42, %v6150_v53  ;;  %6658 = vmatmul.f32.gmra.mxu1 %v15360_v18 }
 0xb1c   : > { %v5744_v15 = vpop.f32.mrf.mxu0 }
 0xb1d   : > { %v13027_v29 = vadd.f32 %v6602_v58, %v6520_v27  ;;  %v5450_v27 = vrot.slane %v15376_v40, 7  ;;  %v6903_v58 = vld [vmem:[#allocation11 + $0x2e0] sm:$0xff] }
 0xb1e   : > { %6910 = vmatpush.msrb.mxu0 %v6903_v58 }
 0xb1f   : > { %15371 = vst [vmem:[#allocation71_spill] sm:$0xff] %v13027_v29  ;;  %5791 = vmatmul.f32.gmra.mxu0 %v5500_v24  ;;  %6426 = vmatmul.f32.gmra.mxu3 %v5500_v24  ;;  %v15377_v24 = vld [vmem:[#allocation108_spill] sm:$0xff] }
 0xb20   : > { %7347 = vmatmul.f32.gmra.mxu2 %v15372_v56  ;;  %v6614_v26 = vpop.f32.mrf.mxu1  ;;  %v5739_v53 = vadd.f32 %v5738_v46, %v15377_v24  ;;  %v15382_v46 = vld [vmem:[#allocation143_spill] sm:$0xff] }
 0xb22   : > { %v6379_v39 = vpop.f32.mrf.mxu3 }
 0xb23   : > { %v6521_v42 = vadd.f32 %v6379_v39, %v6151_v62  ;;  %8389 = vmatmul.msk.f32.gmra.mxu1 %vm5277_vm10, %v15375_v52  ;;  %v5495_v62 = vsel %vm1000_vm3, %v15380_v25, %v5450_v27  ;;  %v7821_v39 = vld [vmem:[#allocation11 + $0x460] sm:$0xff]  ;;  %v15381_v52 = vld [vmem:[#allocation87_spill] sm:$0xff]  ;;  %v15385_v25 = vrot.slane %v12195_v4, 7 }
 0xb24   : > { %v5747_v8 = vpop.f32.mrf.mxu0  ;;  %v6152_v13 = vadd.f32 %v15381_v52, %v5739_v53  ;;  %7828 = vmatpush.msra.mxu1 %v7821_v39  ;;  %v15386_v53 = vld [vmem:[#allocation124_spill] sm:$0xff] }
 0xb25   : > { %v13038_v18 = vadd.f32 %v6605_v1, %v6521_v42  ;;  %v13050_v1 = vpop.f32.mrf.mxu2  ;;  %v15384_v42 = vld [vmem:[#allocation127_spill] sm:$0xff]  ;;  %v5494_v52 = vsel %vm1000_vm3, %v5450_v27, %v15385_v25  ;;  %v15388_v27 = vld [vmem:[#allocation50_spill] sm:$0xff] }
 0xb26   : > { %15383 = vst [vmem:[#allocation104_spill] sm:$0xff] %v13050_v1  ;;  %v5742_v24 = vadd.f32 %v5741_v3, %v15384_v42 }
 0xb27   : > { %15378 = vst [vmem:[#allocation123_spill] sm:$0xff] %v13038_v18  ;;  %5794 = vmatmul.f32.gmra.mxu0 %v12085_v50  ;;  %6429 = vmatmul.f32.gmra.mxu3 %v12085_v50  ;;  %v15387_v18 = vld [vmem:[#allocation109_spill] sm:$0xff] }
 0xb28   : > { %7350 = vmatmul.f32.gmra.mxu2 %v5495_v62  ;;  %v6617_v49 = vpop.f32.mrf.mxu1  ;;  %v6153_v39 = vadd.f32 %v15386_v53, %v5742_v24  ;;  %v5745_v3 = vadd.f32 %v5744_v15, %v15387_v18  ;;  %v15389_v53 = vld [vmem:[#allocation47_spill] sm:$0xff]  ;;  %v5453_v15 = vrot.slane %v12251_v60, 7 }
 0xb29   : > { %v6902_v18 = vld [vmem:[#allocation11 + $0x2d8] sm:$0xff] }
 0xb2a   : > { %v6382_v58 = vpop.f32.mrf.mxu3  ;;  %v6154_v42 = vadd.f32 %v15388_v27, %v5745_v3  ;;  %6911 = vmatpush.msrb.mxu0 %v6902_v18 }
 0xb2b   : > { %v6522_v29 = vadd.f32 %v6382_v58, %v6152_v13  ;;  %8390 = vmatmul.msk.f32.gmra.mxu1 %vm5272_vm7, %v15382_v46 }
 0xb2c   : > { %v5750_v50 = vpop.f32.mrf.mxu0 }
 0xb2d   : > { %v13053_v23 = vadd.f32 %v6608_v35, %v6522_v29  ;;  %v13064_v29 = vpop.f32.mrf.mxu2 }
 0xb2f   : > { %5797 = vmatmul.f32.gmra.mxu0 %v5498_v17  ;;  %6432 = vmatmul.f32.gmra.mxu3 %v5498_v17  ;;  %v7498_v17 = vld [vmem:[#allocation11 + $0x3d8] sm:$0xff] }
 0xb30   : > { %7353 = vmatmul.f32.gmra.mxu2 %v5494_v52  ;;  %v6620_v13 = vpop.f32.mrf.mxu1  ;;  %7507 = vmatpush.msra.mxu3 %v7498_v17 }
 0xb32   : > { %v6385_v58 = vpop.f32.mrf.mxu3 }
 0xb33   : > { %v6523_v46 = vadd.f32 %v6385_v58, %v6153_v39  ;;  %6667 = vmatmul.f32.gmra.mxu1 %v15376_v40  ;;  %v15392_v58 = vld [vmem:[#allocation28_spill] sm:$0xff] }
 0xb34   : > { %v5753_v1 = vpop.f32.mrf.mxu0  ;;  %v15393_v3 = vrot.slane %v15392_v58, 7 }
 0xb35   : > { %v13062_v35 = vadd.f32 %v6611_v45, %v6523_v46  ;;  %v15390_v46 = vld [vmem:[#allocation84_spill] sm:$0xff]  ;;  %v13081_v27 = vpop.f32.mrf.mxu2 }
 0xb36   : > { %v5492_v17 = vsel %vm1000_vm3, %v15393_v3, %v5453_v15  ;;  %15394 = vst [vmem:[#allocation105_spill] sm:$0xff] %v13081_v27  ;;  %v15398_v3 = vrot.slane %v12280_v37, 7 }
 0xb37   : > { %5800 = vmatmul.f32.gmra.mxu0 %v5497_v12  ;;  %6435 = vmatmul.f32.gmra.mxu3 %v5497_v12  ;;  %v5748_v12 = vadd.f32 %v5747_v8, %v15390_v46  ;;  %v15397_v46 = vld [vmem:[#allocation118_spill] sm:$0xff] }
 0xb38   : > { %7356 = vmatmul.f32.gmra.mxu2 %v12239_v54  ;;  %v6623_v4 = vpop.f32.mrf.mxu1  ;;  %v5751_v58 = vadd.f32 %v5750_v50, %v15397_v46  ;;  %v5491_v27 = vsel %vm1000_vm3, %v5453_v15, %v15398_v3  ;;  %v15401_v15 = vld [vmem:[#allocation111_spill] sm:$0xff] }
 0xb3a   : > { %v6388_v24 = vpop.f32.mrf.mxu3 }
 0xb3b   : > { %v6524_v25 = vadd.f32 %v6388_v24, %v6154_v42  ;;  %8391 = vmatmul.msk.f32.gmra.mxu1 %vm5277_vm10, %v15389_v53  ;;  %v7820_v24 = vld [vmem:[#allocation11 + $0x458] sm:$0xff] }
 0xb3c   : > { %v5756_v45 = vpop.f32.mrf.mxu0  ;;  %v15395_v53 = vld [vmem:[#allocation135_spill] sm:$0xff]  ;;  %7829 = vmatpush.msra.mxu1 %v7820_v24 }
 0xb3d   : > { %v13073_v39 = vadd.f32 %v6614_v26, %v6524_v25  ;;  %v6155_v18 = vadd.f32 %v15395_v53, %v5748_v12  ;;  %v15396_v25 = vld [vmem:[#allocation39_spill] sm:$0xff]  ;;  %v15399_v12 = vld [vmem:[#allocation198_spill] sm:$0xff] }
 0xb3e   : > { %v6156_v24 = vadd.f32 %v15399_v12, %v5751_v58 }
 0xb3f   : > { %15391 = vst [vmem:[#allocation147_spill] sm:$0xff] %v13073_v39  ;;  %5803 = vmatmul.f32.gmra.mxu0 %v15372_v56  ;;  %6438 = vmatmul.f32.gmra.mxu3 %v15372_v56 }
 0xb40   : > { %7359 = vmatmul.f32.gmra.mxu2 %v5492_v17  ;;  %v6626_v42 = vpop.f32.mrf.mxu1 }
 0xb42   : > { %v6391_v8 = vpop.f32.mrf.mxu3 }
 0xb43   : > { %v6525_v26 = vadd.f32 %v6391_v8, %v6155_v18  ;;  %8392 = vmatmul.msk.f32.gmra.mxu1 %vm5272_vm7, %v15396_v25  ;;  %v13095_v18 = vpop.f32.mrf.mxu2 }
 0xb44   : > { %v5759_v56 = vpop.f32.mrf.mxu0 }
 0xb45   : > { %v13088_v39 = vadd.f32 %v6617_v49, %v6525_v26  ;;  %v15400_v49 = vld [vmem:[#allocation67_spill] sm:$0xff] }
 0xb46   : > { %v5754_v26 = vadd.f32 %v5753_v1, %v15400_v49  ;;  %v6901_v1 = vld [vmem:[#allocation11 + $0x2d0] sm:$0xff] }
 0xb47   : > { %5806 = vmatmul.f32.gmra.mxu0 %v5495_v62  ;;  %6441 = vmatmul.f32.gmra.mxu3 %v5495_v62  ;;  %v7497_v62 = vld [vmem:[#allocation11 + $0x3d0] sm:$0xff] }
 0xb48   : > { %7362 = vmatmul.f32.gmra.mxu2 %v5491_v27  ;;  %v6629_v53 = vpop.f32.mrf.mxu1  ;;  %v6157_v3 = vadd.f32 %v15401_v15, %v5754_v26  ;;  %7508 = vmatpush.msra.mxu3 %v7497_v62  ;;  %v15403_v26 = vrot.slane %v12316_v19, 7 }
 0xb49   : > { %6912 = vmatpush.msrb.mxu0 %v6901_v1 }
 0xb4a   : > { %v6394_v8 = vpop.f32.mrf.mxu3 }
 0xb4b   : > { %v6526_v25 = vadd.f32 %v6394_v8, %v6156_v24  ;;  %6676 = vmatmul.f32.gmra.mxu1 %v12251_v60  ;;  %v5456_v24 = vrot.slane %v12348_v2, 7 }
 0xb4c   : > { %v5762_v50 = vpop.f32.mrf.mxu0 }
 0xb4d   : > { %v13099_v46 = vadd.f32 %v6620_v13, %v6526_v25  ;;  %v13107_v13 = vpop.f32.mrf.mxu2  ;;  %v5489_v62 = vsel %vm1000_vm3, %v15403_v26, %v5456_v24  ;;  %v15407_v26 = vld [vmem:[#allocation21_spill] sm:$0xff] }
 0xb4f   : > { %5809 = vmatmul.f32.gmra.mxu0 %v5494_v52  ;;  %6444 = vmatmul.f32.gmra.mxu3 %v5494_v52  ;;  %v15402_v52 = vld [vmem:[#allocation132_spill] sm:$0xff] }
 0xb50   : > { %7365 = vmatmul.f32.gmra.mxu2 %v12333_v47  ;;  %v6632_v37 = vpop.f32.mrf.mxu1  ;;  %v5757_v8 = vadd.f32 %v5756_v45, %v15402_v52  ;;  %v15405_v45 = vld [vmem:[#allocation137_spill] sm:$0xff]  ;;  %v15406_v52 = vrot.slane %v12385_v6, 7 }
 0xb52   : > { %v6397_v58 = vpop.f32.mrf.mxu3 }
 0xb53   : > { %v6527_v12 = vadd.f32 %v6397_v58, %v6157_v3  ;;  %8393 = vmatmul.msk.f32.gmra.mxu1 %vm5277_vm10, %v12272_v7  ;;  %v7819_v3 = vld [vmem:[#allocation11 + $0x450] sm:$0xff]  ;;  %v15404_v58 = vld [vmem:[#allocation165_spill] sm:$0xff] }
 0xb54   : > { %v5765_v25 = vpop.f32.mrf.mxu0  ;;  %v6158_v7 = vadd.f32 %v15404_v58, %v5757_v8  ;;  %7830 = vmatpush.msra.mxu1 %v7819_v3  ;;  %v5488_v8 = vsel %vm1000_vm3, %v5456_v24, %v15406_v52  ;;  %v7496_v24 = vld [vmem:[#allocation11 + $0x3c8] sm:$0xff] }
 0xb55   : > { %v13110_v49 = vadd.f32 %v6623_v4, %v6527_v12  ;;  %v13125_v19 = vpop.f32.mrf.mxu2  ;;  %v15409_v52 = vld [vmem:[#allocation33_spill] sm:$0xff]  ;;  %7509 = vmatpush.msra.mxu3 %v7496_v24 }
 0xb56   : > { %v7818_v24 = vld [vmem:[#allocation11 + $0x448] sm:$0xff] }
 0xb57   : > { %5812 = vmatmul.f32.gmra.mxu0 %v12239_v54  ;;  %6447 = vmatmul.f32.gmra.mxu3 %v12239_v54  ;;  %v5760_v54 = vadd.f32 %v5759_v56, %v15405_v45 }
 0xb58   : > { %7368 = vmatmul.f32.gmra.mxu2 %v5489_v62  ;;  %v6635_v15 = vpop.f32.mrf.mxu1  ;;  %7831 = vmatpush.msra.mxu1 %v7818_v24 }
 0xb59   : > { %v6159_v3 = vadd.f32 %v15407_v26, %v5760_v54 }
 0xb5a   : > { %v6400_v1 = vpop.f32.mrf.mxu3 }
 0xb5b   : > { %v6528_v60 = vadd.f32 %v6400_v1, %v6158_v7  ;;  %8394 = vmatmul.msk.f32.gmra.mxu1 %vm5272_vm7, %v12304_v55 }
 0xb5c   : > { %v5768_v4 = vpop.f32.mrf.mxu0 }
 0xb5d   : > { %v13123_v12 = vadd.f32 %v6626_v42, %v6528_v60  ;;  %v15408_v60 = vld [vmem:[#allocation154_spill] sm:$0xff] }
 0xb5e   : > { %v5763_v42 = vadd.f32 %v5762_v50, %v15408_v60  ;;  %v6900_v50 = vld [vmem:[#allocation11 + $0x2c8] sm:$0xff]  ;;  %v15411_v60 = vrot.slane %v12418_v59, 7 }
 0xb5f   : > { %5815 = vmatmul.f32.gmra.mxu0 %v5492_v17  ;;  %6450 = vmatmul.f32.gmra.mxu3 %v5492_v17  ;;  %v13136_v17 = vpop.f32.mrf.mxu2 }
 0xb60   : > { %7371 = vmatmul.f32.gmra.mxu2 %v5488_v8  ;;  %v6638_v7 = vpop.f32.mrf.mxu1  ;;  %v6160_v55 = vadd.f32 %v15409_v52, %v5763_v42  ;;  %6913 = vmatpush.msrb.mxu0 %v6900_v50 }
 0xb62   : > { %v6403_v58 = vpop.f32.mrf.mxu3 }
 0xb63   : > { %v6529_v1 = vadd.f32 %v6403_v58, %v6159_v3  ;;  %6685 = vmatmul.f32.gmra.mxu1 %v12348_v2 }
 0xb64   : > { %v5771_v56 = vpop.f32.mrf.mxu0 }
 0xb65   : > { %v13134_v45 = vadd.f32 %v6629_v53, %v6529_v1  ;;  %v5459_v53 = vrot.slane %v12448_v10, 7 }
 0xb67   : > { %5818 = vmatmul.f32.gmra.mxu0 %v5491_v27  ;;  %6453 = vmatmul.f32.gmra.mxu3 %v5491_v27  ;;  %v15410_v27 = vld [vmem:[#allocation20_spill] sm:$0xff] }
 0xb68   : > { %7374 = vmatmul.f32.gmra.mxu2 %v12439_v0  ;;  %v6641_v6 = vpop.f32.mrf.mxu1  ;;  %v5766_v58 = vadd.f32 %v5765_v25, %v15410_v27  ;;  %v15413_v27 = vrot.slane %v12474_v48, 7 }
 0xb6a   : > { %v6406_v54 = vpop.f32.mrf.mxu3  ;;  %v6161_v52 = vadd.f32 %v12270_v61, %v5766_v58  ;;  %v5485_v61 = vsel %vm1000_vm3, %v5459_v53, %v15413_v27 }
 0xb6b   : > { %v6530_v26 = vadd.f32 %v6406_v54, %v6160_v55  ;;  %8395 = vmatmul.msk.f32.gmra.mxu1 %vm5277_vm10, %v12377_v20  ;;  %v5486_v55 = vsel %vm1000_vm3, %v15411_v60, %v5459_v53  ;;  %v13154_v54 = vpop.f32.mrf.mxu2 }
 0xb6c   : > { %v5774_v3 = vpop.f32.mrf.mxu0 }
 0xb6d   : > { %v13145_v1 = vadd.f32 %v6632_v37, %v6530_v26  ;;  %v15412_v26 = vld [vmem:[#allocation45_spill] sm:$0xff] }
 0xb6e   : > { %v5769_v59 = vadd.f32 %v5768_v4, %v15412_v26 }
 0xb6f   : > { %5821 = vmatmul.f32.gmra.mxu0 %v12333_v47  ;;  %6456 = vmatmul.f32.gmra.mxu3 %v12333_v47 }
 0xb70   : > { %7377 = vmatmul.f32.gmra.mxu2 %v5486_v55  ;;  %v6644_v42 = vpop.f32.mrf.mxu1  ;;  %v6162_v60 = vadd.f32 %v12302_v9, %v5769_v59  ;;  %v5462_v59 = vrot.slane %v12525_v32, 7 }
 0xb72   : > { %v6409_v25 = vpop.f32.mrf.mxu3 }
 0xb73   : > { %v6531_v37 = vadd.f32 %v6409_v25, %v6161_v52  ;;  %8396 = vmatmul.msk.f32.gmra.mxu1 %vm5272_vm7, %v12408_v14  ;;  %v13168_v25 = vpop.f32.mrf.mxu2 }
 0xb74   : > { %v5777_v47 = vpop.f32.mrf.mxu0 }
 0xb75   : > { %v13160_v50 = vadd.f32 %v6635_v15, %v6531_v37  ;;  %v5772_v15 = vadd.f32 %v5771_v56, %v12265_v44  ;;  %v6899_v44 = vld [vmem:[#allocation11 + $0x2c0] sm:$0xff] }
 0xb76   : > { %6914 = vmatpush.msrb.mxu0 %v6899_v44 }
 0xb77   : > { %5824 = vmatmul.f32.gmra.mxu0 %v5489_v62  ;;  %6459 = vmatmul.f32.gmra.mxu3 %v5489_v62  ;;  %v7495_v62 = vld [vmem:[#allocation11 + $0x3c0] sm:$0xff]  ;;  %v6163_v53 = vadd.f32 %v12346_v38, %v5772_v15  ;;  %v15414_v38 = vrot.slane %v12501_v36, 7  ;;  %v15415_v36 = vrot.slane %v12550_v22, 7 }
 0xb78   : > { %7380 = vmatmul.f32.gmra.mxu2 %v5485_v61  ;;  %v6647_v58 = vpop.f32.mrf.mxu1  ;;  %7510 = vmatpush.msra.mxu3 %v7495_v62 }
 0xb7a   : > { %v6412_v24 = vpop.f32.mrf.mxu3 }
 0xb7b   : > { %v6532_v52 = vadd.f32 %v6412_v24, %v6162_v60  ;;  %6694 = vmatmul.f32.gmra.mxu1 %v12448_v10  ;;  %v13182_v27 = vpop.f32.mrf.mxu2  ;;  %v5483_v60 = vsel %vm1000_vm3, %v15414_v38, %v5462_v59 }
 0xb7c   : > { %v5780_v4 = vpop.f32.mrf.mxu0 }
 0xb7d   : > { %v13171_v37 = vadd.f32 %v6638_v7, %v6532_v52  ;;  %v7817_v52 = vld [vmem:[#allocation11 + $0x440] sm:$0xff] }
 0xb7e   : > { %7832 = vmatpush.msra.mxu1 %v7817_v52 }
 0xb7f   : > { %5827 = vmatmul.f32.gmra.mxu0 %v5488_v8  ;;  %6462 = vmatmul.f32.gmra.mxu3 %v5488_v8  ;;  %v5775_v8 = vadd.f32 %v5774_v3, %v12299_v16 }
 0xb80   : > { %7383 = vmatmul.f32.gmra.mxu2 %v12517_v57  ;;  %v6650_v48 = vpop.f32.mrf.mxu1 }
 0xb81   : > { %v6164_v15 = vadd.f32 %v12375_v11, %v5775_v8 }
 0xb82   : > { %v6415_v9 = vpop.f32.mrf.mxu3 }
 0xb83   : > { %v6533_v26 = vadd.f32 %v6415_v9, %v6163_v53  ;;  %8397 = vmatmul.msk.f32.gmra.mxu1 %vm5277_vm10, %v12466_v41  ;;  %v5482_v53 = vsel %vm1000_vm3, %v5462_v59, %v15415_v36  ;;  %v13201_v11 = vpop.f32.mrf.mxu2  ;;  %v15417_v59 = vld [vmem:[#allocation63_spill] sm:$0xff] }
 0xb84   : > { %v5783_v7 = vpop.f32.mrf.mxu0 }
 0xb85   : > { %v13180_v56 = vadd.f32 %v6641_v6, %v6533_v26 }
 0xb87   : > { %5830 = vmatmul.f32.gmra.mxu0 %v12439_v0  ;;  %6465 = vmatmul.f32.gmra.mxu3 %v12439_v0  ;;  %v5778_v0 = vadd.f32 %v5777_v47, %v12343_v31 }
 0xb88   : > { %7386 = vmatmul.f32.gmra.mxu2 %v5483_v60  ;;  %v6653_v24 = vpop.f32.mrf.mxu1 }
 0xb89   : > { %v6165_v26 = vadd.f32 %v12406_v63, %v5778_v0 }
 0xb8a   : > { %v6418_v16 = vpop.f32.mrf.mxu3 }
 0xb8b   : > { %v6534_v6 = vadd.f32 %v6418_v16, %v6164_v15  ;;  %8398 = vmatmul.msk.f32.gmra.mxu1 %vm5272_vm7, %v12491_v28  ;;  %v13210_v52 = vpop.f32.mrf.mxu2  ;;  %v15418_v16 = vld [vmem:[#allocation117_spill] sm:$0xff] }
 0xb8c   : > { %v5786_v3 = vpop.f32.mrf.mxu0 }
 0xb8d   : > { %v13195_v62 = vadd.f32 %v6644_v42, %v6534_v6  ;;  %v5781_v42 = vadd.f32 %v5780_v4, %v12372_v33  ;;  %v15419_v33 = vld [vmem:[#allocation152_spill] sm:$0xff]  ;;  %v6898_v4 = vld [vmem:[#allocation11 + $0x2b8] sm:$0xff] }
 0xb8e   : > { %6915 = vmatpush.msrb.mxu0 %v6898_v4 }
 0xb8f   : > { %5833 = vmatmul.f32.gmra.mxu0 %v5486_v55  ;;  %6468 = vmatmul.f32.gmra.mxu3 %v5486_v55  ;;  %v7494_v55 = vld [vmem:[#allocation11 + $0x3b8] sm:$0xff]  ;;  %v6166_v38 = vadd.f32 %v15417_v59, %v5781_v42  ;;  %v15424_v59 = vld [vmem:[#allocation54_spill] sm:$0xff] }
 0xb90   : > { %7389 = vmatmul.f32.gmra.mxu2 %v5482_v53  ;;  %v6656_v9 = vpop.f32.mrf.mxu1  ;;  %7511 = vmatpush.msra.mxu3 %v7494_v55  ;;  %v7816_v55 = vld [vmem:[#allocation11 + $0x438] sm:$0xff] }
 0xb91   : > { %7833 = vmatpush.msra.mxu1 %v7816_v55 }
 0xb92   : > { %v6421_v44 = vpop.f32.mrf.mxu3 }
 0xb93   : > { %v6535_v8 = vadd.f32 %v6421_v44, %v6165_v26  ;;  %6703 = vmatmul.f32.gmra.mxu1 %v12525_v32  ;;  %v15422_v26 = vld [vmem:[#allocation136_spill] sm:$0xff]  ;;  %v15431_v32 = vld [vmem:[#allocation142_spill] sm:$0xff] }
 0xb94   : > { %v5789_v31 = vpop.f32.mrf.mxu0  ;;  %v15423_v44 = vrot.slane %v15422_v26, 7 }
 0xb95   : > { %v13206_v47 = vadd.f32 %v6647_v58, %v6535_v8  ;;  %v5465_v58 = vrot.slane %v15419_v33, 7 }
 0xb97   : > { %15416 = vst [vmem:[#allocation150_spill] sm:$0xff] %v13206_v47  ;;  %5836 = vmatmul.f32.gmra.mxu0 %v5485_v61  ;;  %6471 = vmatmul.f32.gmra.mxu3 %v5485_v61  ;;  %v15420_v61 = vld [vmem:[#allocation76_spill] sm:$0xff]  ;;  %v5480_v8 = vsel %vm1000_vm3, %v15423_v44, %v5465_v58  ;;  %v15428_v44 = vld [vmem:[#allocation199_spill] sm:$0xff] }
 0xb98   : > { %7392 = vmatmul.f32.gmra.mxu2 %v12592_v34  ;;  %v6659_v22 = vpop.f32.mrf.mxu1  ;;  %v5784_v0 = vadd.f32 %v5783_v7, %v15420_v61  ;;  %v15425_v7 = vld [vmem:[#allocation133_spill] sm:$0xff] }
 0xb9a   : > { %v6424_v63 = vpop.f32.mrf.mxu3 }
 0xb9b   : > { %v6536_v15 = vadd.f32 %v6424_v63, %v6166_v38  ;;  %8399 = vmatmul.msk.f32.gmra.mxu1 %vm5277_vm10, %v15418_v16  ;;  %v6167_v38 = vadd.f32 %v15424_v59, %v5784_v0  ;;  %v15429_v16 = vrot.slane %v15428_v44, 7  ;;  %v15430_v59 = vld [vmem:[#allocation138_spill] sm:$0xff] }
 0xb9c   : > { %v5792_v6 = vpop.f32.mrf.mxu0 }
 0xb9d   : > { %v13217_v36 = vadd.f32 %v6650_v48, %v6536_v15  ;;  %v13229_v48 = vpop.f32.mrf.mxu2  ;;  %v15426_v15 = vld [vmem:[#allocation68_spill] sm:$0xff]  ;;  %v5479_v0 = vsel %vm1000_vm3, %v5465_v58, %v15429_v16  ;;  %v7493_v58 = vld [vmem:[#allocation11 + $0x3b0] sm:$0xff] }
 0xb9e   : > { %v5787_v61 = vadd.f32 %v5786_v3, %v15426_v15  ;;  %v5790_v3 = vadd.f32 %v5789_v31, %v15431_v32  ;;  %v15434_v15 = vld [vmem:[#allocation106_spill] sm:$0xff]  ;;  %7512 = vmatpush.msra.mxu3 %v7493_v58  ;;  %v15436_v32 = vld [vmem:[#allocation159_spill] sm:$0xff] }
 0xb9f   : > { %15421 = vst [vmem:[#allocation108_spill] sm:$0xff] %v13217_v36  ;;  %5839 = vmatmul.f32.gmra.mxu0 %v12517_v57  ;;  %6474 = vmatmul.f32.gmra.mxu3 %v12517_v57  ;;  %v6897_v31 = vld [vmem:[#allocation11 + $0x2b0] sm:$0xff] }
 0xba0   : > { %7395 = vmatmul.f32.gmra.mxu2 %v5480_v8  ;;  %v6662_v42 = vpop.f32.mrf.mxu1  ;;  %v6169_v44 = vadd.f32 %v15434_v15, %v5790_v3  ;;  %6916 = vmatpush.msrb.mxu0 %v6897_v31  ;;  %v15439_v3 = vld [vmem:[#allocation149_spill] sm:$0xff]  ;;  %v7815_v31 = vld [vmem:[#allocation11 + $0x430] sm:$0xff] }
 0xba1   : > { %v15440_v58 = vrot.slane %v15439_v3, 7  ;;  %7834 = vmatpush.msra.mxu1 %v7815_v31  ;;  %v15444_v3 = vld [vmem:[#allocation141_spill] sm:$0xff] }
 0xba2   : > { %v6427_v63 = vpop.f32.mrf.mxu3 }
 0xba3   : > { %v6537_v4 = vadd.f32 %v6427_v63, %v6167_v38  ;;  %8400 = vmatmul.msk.f32.gmra.mxu1 %vm5272_vm7, %v15425_v7  ;;  %v6168_v38 = vadd.f32 %v15430_v59, %v5787_v61 }
 0xba4   : > { %v5795_v57 = vpop.f32.mrf.mxu0 }
 0xba5   : > { %v13232_v26 = vadd.f32 %v6653_v24, %v6537_v4  ;;  %v13243_v4 = vpop.f32.mrf.mxu2 }
 0xba7   : > { %15427 = vst [vmem:[#allocation130_spill] sm:$0xff] %v13232_v26  ;;  %5842 = vmatmul.f32.gmra.mxu0 %v5483_v60  ;;  %6477 = vmatmul.f32.gmra.mxu3 %v5483_v60  ;;  %v15433_v60 = vld [vmem:[#allocation153_spill] sm:$0xff] }
 0xba8   : > { %7398 = vmatmul.f32.gmra.mxu2 %v5479_v0  ;;  %v6665_v55 = vpop.f32.mrf.mxu1 }
 0xbaa   : > { %v6430_v63 = vpop.f32.mrf.mxu3 }
 0xbab   : > { %v6538_v7 = vadd.f32 %v6430_v63, %v6168_v38  ;;  %6712 = vmatmul.f32.gmra.mxu1 %v15419_v33  ;;  %v15435_v38 = vld [vmem:[#allocation197_spill] sm:$0xff]  ;;  %v15437_v63 = vld [vmem:[#allocation98_spill] sm:$0xff] }
 0xbac   : > { %v5798_v36 = vpop.f32.mrf.mxu0 }
 0xbad   : > { %v13241_v24 = vadd.f32 %v6656_v9, %v6538_v7  ;;  %v5468_v9 = vrot.slane %v15436_v32, 7 }
 0xbaf   : > { %15432 = vst [vmem:[#allocation87_spill] sm:$0xff] %v13241_v24  ;;  %5845 = vmatmul.f32.gmra.mxu0 %v5482_v53  ;;  %6480 = vmatmul.f32.gmra.mxu3 %v5482_v53  ;;  %v5793_v53 = vadd.f32 %v5792_v6, %v15437_v63  ;;  %v13260_v15 = vsel %vm1000_vm3, %v15440_v58, %v5468_v9  ;;  %v15443_v63 = vld [vmem:[#allocation175_spill] sm:$0xff]  ;;  %v15446_v24 = vrot.slane %v12700_v43, 7 }
 0xbb0   : > { %7401 = vmatmul.f32.gmra.mxu2 %v15433_v60  ;;  %v6668_v16 = vpop.f32.mrf.mxu1 }
 0xbb1   : > { %v13276_v26 = vsel %vm1000_vm3, %v5468_v9, %v15446_v24  ;;  %v7492_v9 = vld [vmem:[#allocation11 + $0x3a8] sm:$0xff] }
 0xbb2   : > { %v6433_v61 = vpop.f32.mrf.mxu3  ;;  %7513 = vmatpush.msra.mxu3 %v7492_v9 }
 0xbb3   : > { %v6539_v59 = vadd.f32 %v6433_v61, %v6169_v44  ;;  %8401 = vmatmul.msk.f32.gmra.mxu1 %vm5277_vm10, %v15435_v38  ;;  %v13262_v44 = vpop.f32.mrf.mxu2  ;;  %v15442_v38 = vld [vmem:[#allocation114_spill] sm:$0xff] }
 0xbb4   : > { %v5801_v7 = vpop.f32.mrf.mxu0  ;;  %15441 = vst [vmem:[#allocation124_spill] sm:$0xff] %v13262_v44  ;;  %v6170_v6 = vadd.f32 %v15442_v38, %v5793_v53  ;;  %v15447_v53 = vld [vmem:[#allocation129_spill] sm:$0xff] }
 0xbb5   : > { %v13252_v33 = vadd.f32 %v6659_v22, %v6539_v59 }
 0xbb7   : > { %15438 = vst [vmem:[#allocation127_spill] sm:$0xff] %v13252_v33  ;;  %5848 = vmatmul.f32.gmra.mxu0 %v12592_v34  ;;  %6483 = vmatmul.f32.gmra.mxu3 %v12592_v34  ;;  %v5796_v33 = vadd.f32 %v5795_v57, %v15444_v3  ;;  %v15451_v3 = vld [vmem:[#allocation148_spill] sm:$0xff] }
 0xbb8   : > { %7404 = vmatmul.f32.gmra.mxu2 %v13260_v15  ;;  %v6671_v61 = vpop.f32.mrf.mxu1 }
 0xbb9   : > { %v6171_v31 = vadd.f32 %v15447_v53, %v5796_v33 }
 0xbba   : > { %v6436_v22 = vpop.f32.mrf.mxu3 }
 0xbbb   : > { %v6540_v59 = vadd.f32 %v6436_v22, %v6170_v6  ;;  %8402 = vmatmul.msk.f32.gmra.mxu1 %vm5272_vm7, %v15443_v63  ;;  %v13282_v6 = vpop.f32.mrf.mxu2 }
 0xbbc   : > { %v5804_v34 = vpop.f32.mrf.mxu0  ;;  %15448 = vst [vmem:[#allocation50_spill] sm:$0xff] %v13282_v6  ;;  %v6895_v6 = vld [vmem:[#allocation11 + $0x2a0] sm:$0xff] }
 0xbbd   : > { %v13270_v58 = vadd.f32 %v6662_v42, %v6540_v59 }
 0xbbf   : > { %15445 = vst [vmem:[#allocation109_spill] sm:$0xff] %v13270_v58  ;;  %5851 = vmatmul.f32.gmra.mxu0 %v5480_v8  ;;  %6486 = vmatmul.f32.gmra.mxu3 %v5480_v8  ;;  %v15449_v8 = vld [vmem:[#allocation156_spill] sm:$0xff]  ;;  %v15463_v58 = vld [vmem:[#allocation174_spill] sm:$0xff] }
 0xbc0   : > { %7407 = vmatmul.f32.gmra.mxu2 %v13276_v26  ;;  %v13279_v38 = vpop.f32.mrf.mxu1  ;;  %v5799_v59 = vadd.f32 %v5798_v36, %v15449_v8  ;;  %v5471_v36 = vrot.slane %v12750_v30, 7 }
 0xbc2   : > { %v6439_v22 = vpop.f32.mrf.mxu3  ;;  %v6172_v33 = vadd.f32 %v15451_v3, %v5799_v59  ;;  %v15458_v3 = vld [vmem:[#allocation168_spill] sm:$0xff] }
 0xbc3   : > { %v6541_v57 = vadd.f32 %v6439_v22, %v6171_v31  ;;  %6721 = vmatmul.f32.gmra.mxu1 %v15436_v32  ;;  %v15452_v31 = vld [vmem:[#allocation184_spill] sm:$0xff]  ;;  %v15453_v22 = vld [vmem:[#allocation34_spill] sm:$0xff]  ;;  %v13298_v8 = vpop.f32.mrf.mxu2 }
 0xbc4   : > { %v5807_v42 = vpop.f32.mrf.mxu0  ;;  %15455 = vst [vmem:[#allocation28_spill] sm:$0xff] %v13298_v8 }
 0xbc5   : > { %v13286_v43 = vadd.f32 %v6665_v55, %v6541_v57  ;;  %v6896_v55 = vld [vmem:[#allocation11 + $0x2a8] sm:$0xff]  ;;  %v15454_v57 = vld [vmem:[#allocation191_spill] sm:$0xff] }
 0xbc6   : > { %6917 = vmatpush.msrb.mxu0 %v6896_v55  ;;  %v7814_v55 = vld [vmem:[#allocation11 + $0x428] sm:$0xff] }
 0xbc7   : > { %15450 = vst [vmem:[#allocation84_spill] sm:$0xff] %v13286_v43  ;;  %5854 = vmatmul.f32.gmra.mxu0 %v5479_v0  ;;  %6489 = vmatmul.f32.gmra.mxu3 %v5479_v0  ;;  %v4153_v0 = vadd.f32 %v15454_v57, %v15453_v22  ;;  %v15456_v43 = vld [vmem:[#allocation125_spill] sm:$0xff] }
 0xbc8   : > { %7410 = vmatmul.f32.gmra.mxu2 %v12742_v21  ;;  %v13289_v24 = vpop.f32.mrf.mxu1  ;;  %v5802_v59 = vadd.f32 %v5801_v7, %v15456_v43  ;;  %v15460_v22 = vld [vmem:[#allocation37_spill] sm:$0xff]  ;;  %v15461_v7 = vld [vmem:[#allocation119_spill] sm:$0xff]  ;;  %7835 = vmatpush.msra.mxu1 %v7814_v55 }
 0xbc9   : > { %v4524_v57 = vadd.f32 %v15460_v22, %v4153_v0  ;;  %v15465_v0 = vld [vmem:[#allocation144_spill] sm:$0xff]  ;;  %6918 = vmatpush.msrb.mxu0 %v6895_v6  ;;  %v6894_v55 = vld [vmem:[#allocation11 + $0x298] sm:$0xff]  ;;  %v15468_v6 = vld [vmem:[#allocation158_spill] sm:$0xff] }
 0xbca   : > { %v6442_v53 = vpop.f32.mrf.mxu3  ;;  %v5805_v22 = vadd.f32 %v5804_v34, %v15465_v0 }
 0xbcb   : > { %v6542_v63 = vadd.f32 %v6442_v53, %v6172_v33  ;;  %8403 = vmatmul.msk.f32.gmra.mxu1 %vm5277_vm10, %v15452_v31  ;;  %v15459_v33 = vrot.slane %v15458_v3, 7  ;;  %v15464_v3 = vld [vmem:[#allocation203_spill] sm:$0xff]  ;;  %v13328_v47 = vpop.f32.mrf.mxu2  ;;  %6919 = vmatpush.msrb.mxu0 %v6894_v55 }
 0xbcc   : > { %v13300_v32 = vpop.f32.mrf.mxu0 }
 0xbcd   : > { %v13303_v9 = vadd.f32 %v6668_v16, %v6542_v63  ;;  %v13311_v53 = vsel %vm1000_vm3, %v15459_v33, %v5471_v36  ;;  %v6173_v16 = vadd.f32 %v15461_v7, %v5802_v59  ;;  %v15462_v63 = vld [vmem:[#allocation77_spill] sm:$0xff]  ;;  %v15467_v59 = vld [vmem:[#allocation66_spill] sm:$0xff]  ;;  %v6174_v7 = vadd.f32 %v15468_v6, %v5805_v22  ;;  %v6891_v22 = vld [vmem:[#allocation11 + $0x280] sm:$0xff] }
 0xbce   : > { %v4750_v43 = vadd.f32 %v15462_v63, %v4524_v57  ;;  %v8663_v57 = vld [vmem:[%s13932_s6] ss:$0 sm:$0xff] }
 0xbcf   : > { %15457 = vst [vmem:[#allocation135_spill] sm:$0xff] %v13303_v9  ;;  %5857 = vmatmul.f32.gmra.mxu0 %v15433_v60  ;;  %6492 = vmatmul.f32.gmra.mxu3 %v15433_v60  ;;  %v15469_v63 = vld [vmem:[#allocation182_spill] sm:$0xff] }
 0xbd0   : > { %7413 = vmatmul.f32.gmra.mxu2 %v13311_v53  ;;  %v13315_v31 = vpop.f32.mrf.mxu1  ;;  %v5072_v33 = vadd.f32 %v15464_v3, %v4750_v43  ;;  %v6893_v43 = vld [vmem:[#allocation11 + $0x290] sm:$0xff] }
 0xbd1   : > { %6920 = vmatpush.msrb.mxu0 %v6893_v43  ;;  %v7811_v6 = vld [vmem:[#allocation11 + $0x410] sm:$0xff]  ;;  %v7810_v43 = vld [vmem:[#allocation11 + $0x408] sm:$0xff] }
 0xbd2   : > { %v6445_v9 = vpop.f32.mrf.mxu3  ;;  %v5124_v34 = vadd.f32 %v8663_v57, %v5072_v33  ;;  %v15470_v33 = vld [vmem:[#allocation99_spill] sm:$0xff] }
 0xbd3   : > { %v6543_v60 = vadd.f32 %v6445_v9, %v6173_v16  ;;  %8404 = vmatmul.msk.f32.gmra.mxu1 %vm5272_vm7, %v15463_v58  ;;  %v13335_v9 = vsel %vm1000_vm3, %v5471_v36, %v15467_v59  ;;  %v6291_v36 = vrot.slane %v15469_v63, 7  ;;  %v5808_v57 = vadd.f32 %v5807_v42, %v15470_v33  ;;  %v6892_v58 = vld [vmem:[#allocation11 + $0x288] sm:$0xff]  ;;  %v13361_v42 = vpop.f32.mrf.mxu2  ;;  %v15474_v33 = vld [vmem:[#allocation178_spill] sm:$0xff]  ;;  %v15495_v63 = vld [vmem:[#allocation92_spill] sm:$0xff] }
 0xbd4   : > { %v13323_v8 = vpop.f32.mrf.mxu0  ;;  %v5220_v3 = vmul.f32 0.2, %v5124_v34  ;;  %vm5172_vm5 = vcmp.ge.f32.partialorder %v5124_v34, 0.0  ;;  %6921 = vmatpush.msrb.mxu0 %v6892_v58  ;;  %v7491_v58 = vld [vmem:[#allocation11 + $0x3a0] sm:$0xff] }
 0xbd5   : > { %v13326_v44 = vadd.f32 %v6671_v61, %v6543_v60  ;;  %v7813_v60 = vld [vmem:[#allocation11 + $0x420] sm:$0xff]  ;;  %7514 = vmatpush.msra.mxu3 %v7491_v58  ;;  %v15477_v58 = vld [vmem:[#allocation161_spill] sm:$0xff] }
 0xbd6   : > { %7836 = vmatpush.msra.mxu1 %v7813_v60  ;;  %6922 = vmatpush.msrb.mxu0 %v6891_v22 }
 0xbd7   : > { %15466 = vst [vmem:[#allocation118_spill] sm:$0xff] %v13326_v44  ;;  %5860 = vmatmul.f32.gmra.mxu0 %v13260_v15  ;;  %6495 = vmatmul.f32.gmra.mxu3 %v13260_v15  ;;  %v7812_v44 = vld [vmem:[#allocation11 + $0x418] sm:$0xff] }
 0xbd8   : > { %7416 = vmatmul.f32.gmra.mxu2 %v13335_v9  ;;  %v13341_v61 = vpop.f32.mrf.mxu1  ;;  %7837 = vmatpush.msra.mxu1 %v7812_v44  ;;  %v15473_v44 = vld [vmem:[#allocation82_spill] sm:$0xff] }
 0xbda   : > { %v6448_v16 = vpop.f32.mrf.mxu3  ;;  %7838 = vmatpush.msra.mxu1 %v7811_v6 }
 0xbdb   : > { %v6544_v15 = vadd.f32 %v6448_v16, %v6174_v7  ;;  %6730 = vmatmul.f32.gmra.mxu1 %v12750_v30  ;;  %v13357_v7 = vsel %vm1000_vm3, %v15467_v59, %v6291_v36  ;;  %v13359_v16 = vsel %vm5172_vm5, %v5124_v34, %v5220_v3  ;;  %v7809_v34 = vld [vmem:[#allocation11 + $0x400] sm:$0xff]  ;;  %v15475_v30 = vld [vmem:[#allocation42_spill] sm:$0xff] }
 0xbdc   : > { %v13346_v0 = vpop.f32.mrf.mxu0  ;;  %15472 = vst [vmem:[#allocation67_spill] sm:$0xff] %v13359_v16  ;;  %v6292_v59 = vrot.slane %v13359_v16, 7  ;;  %7839 = vmatpush.msra.mxu1 %v7810_v43  ;;  %v5811_v22 = vadd.f32 %v13300_v32, %v15475_v30  ;;  %v15478_v30 = vld [vmem:[#allocation201_spill] sm:$0xff] }
 0xbdd   : > { %v13350_v55 = vadd.f32 %v13279_v38, %v6544_v15  ;;  %v6175_v15 = vadd.f32 %v15473_v44, %v5808_v57 }
 0xbde   : > { %7840 = vmatpush.msra.mxu1 %v7809_v34  ;;  %v6295_v57 = vsel %vm1000_vm3, %v6291_v36, %v6292_v59  ;;  %v6176_v44 = vadd.f32 %v15477_v58, %v5811_v22  ;;  %v15481_v36 = vld [vmem:[#allocation163_spill] sm:$0xff] }
 0xbdf   : > { %15471 = vst [vmem:[#allocation198_spill] sm:$0xff] %v13350_v55  ;;  %5863 = vmatmul.f32.gmra.mxu0 %v13276_v26  ;;  %6498 = vmatmul.f32.gmra.mxu3 %v13276_v26  ;;  %v6294_v34 = vsel %vm1000_vm3, %v6292_v59, %v15481_v36  ;;  %v7490_v58 = vld [vmem:[#allocation11 + $0x398] sm:$0xff]  ;;  %v7487_v59 = vld [vmem:[#allocation11 + $0x380] sm:$0xff] }
 0xbe0   : > { %7419 = vmatmul.f32.gmra.mxu2 %v13357_v7  ;;  %v6686_v38 = vpop.f32.mrf.mxu1  ;;  %7515 = vmatpush.msra.mxu3 %v7490_v58 }
 0xbe2   : > { %v6451_v26 = vpop.f32.mrf.mxu3 }
 0xbe3   : > { %v6545_v60 = vadd.f32 %v6451_v26, %v6175_v15  ;;  %8405 = vmatmul.msk.f32.gmra.mxu1 %vm5277_vm10, %v15474_v33  ;;  %v13379_v15 = vpop.f32.mrf.mxu2 }
 0xbe4   : > { %v5819_v3 = vpop.f32.mrf.mxu0 }
 0xbe5   : > { %v13372_v55 = vadd.f32 %v13289_v24, %v6545_v60  ;;  %v15479_v24 = vld [vmem:[#allocation180_spill] sm:$0xff] }
 0xbe6   : > { %v5814_v60 = vadd.f32 %v13323_v8, %v15479_v24 }
 0xbe7   : > { %15476 = vst [vmem:[#allocation111_spill] sm:$0xff] %v13372_v55  ;;  %5866 = vmatmul.f32.gmra.mxu0 %v12742_v21  ;;  %6501 = vmatmul.f32.gmra.mxu3 %v12742_v21 }
 0xbe8   : > { %7422 = vmatmul.f32.gmra.mxu2 %v6295_v57  ;;  %v6689_v6 = vpop.f32.mrf.mxu1 }
 0xbea   : > { %v6454_v43 = vpop.f32.mrf.mxu3 }
 0xbeb   : > { %v6546_v26 = vadd.f32 %v6454_v43, %v6176_v44  ;;  %8406 = vmatmul.msk.f32.gmra.mxu1 %vm5272_vm7, %v15478_v30  ;;  %v15482_v44 = vld [vmem:[#allocation166_spill] sm:$0xff]  ;;  %v13396_v8 = vpop.f32.mrf.mxu2 }
 0xbec   : > { %v5822_v32 = vpop.f32.mrf.mxu0  ;;  %v6177_v43 = vadd.f32 %v15482_v44, %v5814_v60  ;;  %v15486_v44 = vld [vmem:[#allocation170_spill] sm:$0xff] }
 0xbed   : > { %v13387_v21 = vadd.f32 %v13315_v31, %v6546_v26  ;;  %v7489_v31 = vld [vmem:[#allocation11 + $0x390] sm:$0xff] }
 0xbee   : > { %7516 = vmatpush.msra.mxu3 %v7489_v31 }
 0xbef   : > { %15480 = vst [vmem:[#allocation132_spill] sm:$0xff] %v13387_v21  ;;  %5869 = vmatmul.f32.gmra.mxu0 %v13311_v53  ;;  %6504 = vmatmul.f32.gmra.mxu3 %v13311_v53  ;;  %v15483_v53 = vld [vmem:[#allocation43_spill] sm:$0xff]  ;;  %v7488_v21 = vld [vmem:[#allocation11 + $0x388] sm:$0xff] }
 0xbf0   : > { %7425 = vmatmul.f32.gmra.mxu2 %v6294_v34  ;;  %v6692_v22 = vpop.f32.mrf.mxu1  ;;  %v5817_v24 = vadd.f32 %v13346_v0, %v15483_v53  ;;  %7517 = vmatpush.msra.mxu3 %v7488_v21  ;;  %v15487_v53 = vld [vmem:[#allocation186_spill] sm:$0xff] }
 0xbf2   : > { %v6457_v30 = vpop.f32.mrf.mxu3  ;;  %7518 = vmatpush.msra.mxu3 %v7487_v59  ;;  %v6178_v0 = vadd.f32 %v15486_v44, %v5817_v24  ;;  %v15492_v59 = vld [vmem:[#allocation146_spill] sm:$0xff] }
 0xbf3   : > { %v6547_v33 = vadd.f32 %v6457_v30, %v6177_v43  ;;  %6739 = vmatmul.f32.gmra.mxu1 %v13359_v16  ;;  %v15485_v30 = vld [vmem:[#allocation134_spill] sm:$0xff]  ;;  %v15501_v16 = vld [vmem:[#allocation173_spill] sm:$0xff] }
 0xbf4   : > { %v5825_v26 = vpop.f32.mrf.mxu0  ;;  %v7214_v60 = vsel %vm1000_vm3, %v15481_v36, %v15485_v30  ;;  %v15491_v36 = vld [vmem:[#allocation32_spill] sm:$0xff]  ;;  %v15493_v30 = vld [vmem:[#allocation55_spill] sm:$0xff] }
 0xbf5   : > { %v13401_v55 = vadd.f32 %v13341_v61, %v6547_v33  ;;  %v15488_v33 = vld [vmem:[#allocation94_spill] sm:$0xff] }
 0xbf6   : > { %v5820_v21 = vadd.f32 %v5819_v3, %v15488_v33  ;;  %v5823_v3 = vadd.f32 %v5822_v32, %v15495_v63  ;;  %v15498_v33 = vld [vmem:[#allocation151_spill] sm:$0xff]  ;;  %v15504_v32 = vld [vmem:[#allocation38_spill] sm:$0xff] }
 0xbf7   : > { %15484 = vst [vmem:[#allocation165_spill] sm:$0xff] %v13401_v55  ;;  %5872 = vmatmul.f32.gmra.mxu0 %v13335_v9  ;;  %6507 = vmatmul.f32.gmra.mxu3 %v13335_v9  ;;  %v13416_v55 = vpop.f32.mrf.mxu2 }
 0xbf8   : > { %7428 = vmatmul.f32.gmra.mxu2 %v7214_v60  ;;  %v6695_v58 = vpop.f32.mrf.mxu1  ;;  %15490 = vst [vmem:[#allocation21_spill] sm:$0xff] %v13416_v55  ;;  %v6179_v60 = vadd.f32 %v15493_v30, %v5820_v21  ;;  %v5826_v55 = vadd.f32 %v5825_v26, %v15501_v16  ;;  %v15508_v16 = vld [vmem:[#allocation83_spill] sm:$0xff] }
 0xbfa   : > { %v6460_v43 = vpop.f32.mrf.mxu3 }
 0xbfb   : > { %v6548_v31 = vadd.f32 %v6460_v43, %v6178_v0  ;;  %8407 = vmatmul.msk.f32.gmra.mxu1 %vm5277_vm10, %v15487_v53  ;;  %v15494_v43 = vld [vmem:[#allocation65_spill] sm:$0xff] }
 0xbfc   : > { %v5828_v61 = vpop.f32.mrf.mxu0 }
 0xbfd   : > { %v13414_v9 = vadd.f32 %v6686_v38, %v6548_v31  ;;  %v15497_v31 = vld [vmem:[#allocation192_spill] sm:$0xff] }
 0xbff   : > { %15489 = vst [vmem:[#allocation137_spill] sm:$0xff] %v13414_v9  ;;  %6510 = vmatmul.f32.gmra.mxu3 %v13357_v7  ;;  %6923 = vmatmul.f32.vlgmr.msrb.gmra.mxu0 %v15491_v36  ;;  %v13427_v7 = vpop.f32.mrf.mxu2 }
 0xc00   : > { %7431 = vmatmul.f32.gmra.mxu2 %v15492_v59  ;;  %v6698_v24 = vpop.f32.mrf.mxu1  ;;  %v15499_v59 = vld [vmem:[#allocation202_spill] sm:$0xff] }
 0xc01   : > { %v6180_v9 = vadd.f32 %v15499_v59, %v5823_v3  ;;  %v15506_v59 = vld [vmem:[#allocation200_spill] sm:$0xff] }
 0xc02   : > { %v6463_v44 = vpop.f32.mrf.mxu3 }
 0xc03   : > { %v6549_v0 = vadd.f32 %v6463_v44, %v6179_v60  ;;  %7841 = vmatmul.f32.vlgmr.msra.gmra.mxu1 %v15494_v43  ;;  %v15500_v60 = vld [vmem:[#allocation89_spill] sm:$0xff] }
 0xc04   : > { %v5831_v53 = vpop.f32.mrf.mxu0 }
 0xc05   : > { %v13424_v38 = vadd.f32 %v6689_v6, %v6549_v0  ;;  %v6181_v0 = vadd.f32 %v15504_v32, %v5826_v55 }
 0xc07   : > { %15496 = vst [vmem:[#allocation154_spill] sm:$0xff] %v13424_v38  ;;  %6513 = vmatmul.f32.gmra.mxu3 %v6295_v57  ;;  %6926 = vmatmul.f32.gmra.mxu0 %v15497_v31  ;;  %v15503_v57 = vld [vmem:[#allocation79_spill] sm:$0xff]  ;;  %v15505_v38 = vld [vmem:[#allocation62_spill] sm:$0xff] }
 0xc08   : > { %7434 = vmatmul.f32.gmra.mxu2 %v15498_v33  ;;  %v6701_v36 = vpop.f32.mrf.mxu1 }
 0xc0a   : > { %v6466_v21 = vpop.f32.mrf.mxu3 }
 0xc0b   : > { %v6550_v30 = vadd.f32 %v6466_v21, %v6180_v9  ;;  %7844 = vmatmul.f32.gmra.mxu1 %v15500_v60  ;;  %v5829_v9 = vadd.f32 %v5828_v61, %v15506_v59 }
 0xc0c   : > { %v5834_v44 = vpop.f32.mrf.mxu0 }
 0xc0d   : > { %v13433_v63 = vadd.f32 %v6692_v22, %v6550_v30  ;;  %v15509_v22 = vld [vmem:[#allocation91_spill] sm:$0xff] }
 0xc0e   : > { %v6182_v26 = vadd.f32 %v15509_v22, %v5829_v9  ;;  %v15516_v22 = vld [vmem:[#allocation160_spill] sm:$0xff] }
 0xc0f   : > { %15502 = vst [vmem:[#allocation33_spill] sm:$0xff] %v13433_v63  ;;  %6516 = vmatmul.f32.gmra.mxu3 %v6294_v34  ;;  %6929 = vmatmul.f32.gmra.mxu0 %v15503_v57  ;;  %v15510_v57 = vld [vmem:[#allocation183_spill] sm:$0xff] }
 0xc10   : > { %v6704_v6 = vpop.f32.mrf.mxu1 }
 0xc12   : > { %v6469_v31 = vpop.f32.mrf.mxu3 }
 0xc13   : > { %v6551_v33 = vadd.f32 %v6469_v31, %v6181_v0  ;;  %7847 = vmatmul.f32.gmra.mxu1 %v15505_v38  ;;  %v15511_v0 = vld [vmem:[#allocation81_spill] sm:$0xff] }
 0xc14   : > { %v5837_v3 = vpop.f32.mrf.mxu0  ;;  %v5832_v31 = vadd.f32 %v5831_v53, %v15511_v0  ;;  %v15518_v53 = vld [vmem:[#allocation177_spill] sm:$0xff] }
 0xc15   : > { %v13439_v21 = vadd.f32 %v6695_v58, %v6551_v33  ;;  %v15513_v58 = vld [vmem:[#allocation176_spill] sm:$0xff] }
 0xc17   : > { %15507 = vst [vmem:[#allocation20_spill] sm:$0xff] %v13439_v21  ;;  %6932 = vmatmul.f32.gmra.mxu0 %v15494_v43  ;;  %8408 = vmatmul.msk.f32.vlgmr.msra.gmra.mxu3 %vm5272_vm7, %v15508_v16  ;;  %v15514_v43 = vld [vmem:[#allocation194_spill] sm:$0xff]  ;;  %v15515_v21 = vld [vmem:[#allocation48_spill] sm:$0xff] }
 0xc18   : > { %v6707_v34 = vpop.f32.mrf.mxu1  ;;  %v6183_v33 = vadd.f32 %v15514_v43, %v5832_v31 }
 0xc1a   : > { %v6472_v30 = vpop.f32.mrf.mxu3 }
 0xc1b   : > { %v6552_v55 = vadd.f32 %v6472_v30, %v6182_v26  ;;  %7850 = vmatmul.f32.gmra.mxu1 %v15510_v57  ;;  %v5835_v26 = vadd.f32 %v5834_v44, %v15516_v22  ;;  %v15524_v44 = vld [vmem:[#allocation95_spill] sm:$0xff] }
 0xc1c   : > { %v5840_v32 = vpop.f32.mrf.mxu0 }
 0xc1d   : > { %v13448_v63 = vadd.f32 %v6698_v24, %v6552_v55 }
 0xc1f   : > { %15512 = vst [vmem:[#allocation45_spill] sm:$0xff] %v13448_v63  ;;  %6935 = vmatmul.f32.gmra.mxu0 %v15500_v60  ;;  %7522 = vmatmul.f32.gmra.mxu3 %v15513_v58  ;;  %v15519_v60 = vld [vmem:[#allocation60_spill] sm:$0xff]  ;;  %v15520_v58 = vld [vmem:[#allocation53_spill] sm:$0xff] }
 0xc20   : > { %v6710_v61 = vpop.f32.mrf.mxu1  ;;  %v6184_v55 = vadd.f32 %v15519_v60, %v5835_v26 }
 0xc22   : > { %v6475_v59 = vpop.f32.mrf.mxu3 }
 0xc23   : > { %v6553_v16 = vadd.f32 %v6475_v59, %v6183_v33  ;;  %7853 = vmatmul.f32.gmra.mxu1 %v15515_v21  ;;  %v15521_v33 = vld [vmem:[#allocation93_spill] sm:$0xff] }
 0xc24   : > { %v5843_v9 = vpop.f32.mrf.mxu0  ;;  %v5838_v59 = vadd.f32 %v5837_v3, %v15521_v33 }
 0xc25   : > { %v13455_v30 = vadd.f32 %v6701_v36, %v6553_v16  ;;  %v15523_v36 = vld [vmem:[#allocation179_spill] sm:$0xff] }
 0xc26   : > { %v6185_v16 = vadd.f32 %v15524_v44, %v5838_v59  ;;  %v15531_v44 = vld [vmem:[#allocation189_spill] sm:$0xff] }
 0xc27   : > { %15517 = vst [vmem:[#allocation63_spill] sm:$0xff] %v13455_v30  ;;  %6938 = vmatmul.f32.gmra.mxu0 %v15505_v38  ;;  %8409 = vmatmul.msk.f32.gmra.mxu3 %vm5277_vm10, %v15518_v53  ;;  %v15525_v53 = vld [vmem:[#allocation196_spill] sm:$0xff] }
 0xc28   : > { %v6713_v24 = vpop.f32.mrf.mxu1 }
 0xc2a   : > { %v6478_v0 = vpop.f32.mrf.mxu3 }
 0xc2b   : > { %v6554_v31 = vadd.f32 %v6478_v0, %v6184_v55  ;;  %7856 = vmatmul.f32.gmra.mxu1 %v15520_v58  ;;  %v15526_v55 = vld [vmem:[#allocation162_spill] sm:$0xff] }
 0xc2c   : > { %v5846_v43 = vpop.f32.mrf.mxu0  ;;  %v5841_v0 = vadd.f32 %v5840_v32, %v15526_v55  ;;  %v15534_v32 = vld [vmem:[#allocation204_spill] sm:$0xff] }
 0xc2d   : > { %v13464_v63 = vadd.f32 %v6704_v6, %v6554_v31  ;;  %v15528_v6 = vld [vmem:[#allocation181_spill] sm:$0xff] }
 0xc2f   : > { %15522 = vst [vmem:[#allocation76_spill] sm:$0xff] %v13464_v63  ;;  %6941 = vmatmul.f32.gmra.mxu0 %v15510_v57  ;;  %8410 = vmatmul.msk.f32.gmra.mxu3 %vm5272_vm7, %v15523_v36  ;;  %v15529_v57 = vld [vmem:[#allocation58_spill] sm:$0xff]  ;;  %v15530_v63 = vld [vmem:[#allocation24_spill] sm:$0xff] }
 0xc30   : > { %v6716_v38 = vpop.f32.mrf.mxu1  ;;  %v6186_v31 = vadd.f32 %v15529_v57, %v5841_v0 }
 0xc32   : > { %v6481_v22 = vpop.f32.mrf.mxu3 }
 0xc33   : > { %v6555_v26 = vadd.f32 %v6481_v22, %v6185_v16  ;;  %7859 = vmatmul.f32.gmra.mxu1 %v15525_v53  ;;  %v5844_v16 = vadd.f32 %v5843_v9, %v15531_v44 }
 0xc34   : > { %v5849_v60 = vpop.f32.mrf.mxu0 }
 0xc35   : > { %v13473_v30 = vadd.f32 %v6707_v34, %v6555_v26  ;;  %v15533_v34 = vld [vmem:[#allocation52_spill] sm:$0xff]  ;;  %v6187_v26 = vadd.f32 %v15534_v32, %v5844_v16 }
 0xc37   : > { %15527 = vst [vmem:[#allocation136_spill] sm:$0xff] %v13473_v30  ;;  %6944 = vmatmul.f32.gmra.mxu0 %v15515_v21  ;;  %7531 = vmatmul.f32.gmra.mxu3 %v15528_v6  ;;  %v15535_v6 = vld [vmem:[#allocation100_spill] sm:$0xff] }
 0xc38   : > { %v6719_v3 = vpop.f32.mrf.mxu1 }
 0xc3a   : > { %v6484_v33 = vpop.f32.mrf.mxu3 }
 0xc3b   : > { %v6556_v36 = vadd.f32 %v6484_v33, %v6186_v31  ;;  %7862 = vmatmul.f32.gmra.mxu1 %v15530_v63  ;;  %v15536_v31 = vld [vmem:[#allocation25_spill] sm:$0xff] }
 0xc3c   : > { %v5852_v59 = vpop.f32.mrf.mxu0  ;;  %v5847_v33 = vadd.f32 %v5846_v43, %v15536_v31 }
 0xc3d   : > { %v13480_v22 = vadd.f32 %v6710_v61, %v6556_v36  ;;  %v15538_v61 = vld [vmem:[#allocation195_spill] sm:$0xff] }
 0xc3f   : > { %15532 = vst [vmem:[#allocation54_spill] sm:$0xff] %v13480_v22  ;;  %6947 = vmatmul.f32.gmra.mxu0 %v15520_v58  ;;  %8411 = vmatmul.msk.f32.gmra.mxu3 %vm5277_vm10, %v15533_v34  ;;  %v15539_v58 = vld [vmem:[#allocation205_spill] sm:$0xff] }
 0xc40   : > { %v6722_v21 = vpop.f32.mrf.mxu1  ;;  %v6188_v36 = vadd.f32 %v15539_v58, %v5847_v33  ;;  %v15540_v34 = vld [vmem:[#allocation41_spill] sm:$0xff]  ;;  %v15546_v58 = vld [vmem:[#allocation59_spill] sm:$0xff] }
 0xc42   : > { %v6487_v55 = vpop.f32.mrf.mxu3 }
 0xc43   : > { %v6557_v0 = vadd.f32 %v6487_v55, %v6187_v26  ;;  %7865 = vmatmul.f32.gmra.mxu1 %v15535_v6  ;;  %v15541_v26 = vld [vmem:[#allocation78_spill] sm:$0xff] }
 0xc44   : > { %v5855_v57 = vpop.f32.mrf.mxu0  ;;  %v5850_v55 = vadd.f32 %v5849_v60, %v15541_v26  ;;  %v15549_v60 = vld [vmem:[#allocation208_spill] sm:$0xff] }
 0xc45   : > { %v13489_v30 = vadd.f32 %v6713_v24, %v6557_v0  ;;  %v15543_v24 = vld [vmem:[#allocation57_spill] sm:$0xff] }
 0xc47   : > { %15537 = vst [vmem:[#allocation68_spill] sm:$0xff] %v13489_v30  ;;  %6950 = vmatmul.f32.gmra.mxu0 %v15525_v53  ;;  %8412 = vmatmul.msk.f32.gmra.mxu3 %vm5272_vm7, %v15538_v61  ;;  %v15544_v53 = vld [vmem:[#allocation206_spill] sm:$0xff]  ;;  %v15545_v30 = vld [vmem:[#allocation69_spill] sm:$0xff] }
 0xc48   : > { %v6725_v9 = vpop.f32.mrf.mxu1  ;;  %v6189_v0 = vadd.f32 %v15544_v53, %v5850_v55 }
 0xc4a   : > { %v6490_v44 = vpop.f32.mrf.mxu3 }
 0xc4b   : > { %v6558_v16 = vadd.f32 %v6490_v44, %v6188_v36  ;;  %7868 = vmatmul.f32.gmra.mxu1 %v15540_v34  ;;  %v5853_v36 = vadd.f32 %v5852_v59, %v15546_v58 }
 0xc4c   : > { %v5858_v32 = vpop.f32.mrf.mxu0 }
 0xc4d   : > { %v13498_v22 = vadd.f32 %v6716_v38, %v6558_v16  ;;  %v15548_v38 = vld [vmem:[#allocation51_spill] sm:$0xff]  ;;  %v6190_v16 = vadd.f32 %v15549_v60, %v5853_v36 }
 0xc4f   : > { %15542 = vst [vmem:[#allocation199_spill] sm:$0xff] %v13498_v22  ;;  %6953 = vmatmul.f32.gmra.mxu0 %v15530_v63  ;;  %7540 = vmatmul.f32.gmra.mxu3 %v15543_v24  ;;  %v15550_v24 = vld [vmem:[#allocation112_spill] sm:$0xff] }
 0xc50   : > { %v6728_v43 = vpop.f32.mrf.mxu1 }
 0xc52   : > { %v6493_v31 = vpop.f32.mrf.mxu3 }
 0xc53   : > { %v6559_v61 = vadd.f32 %v6493_v31, %v6189_v0  ;;  %7871 = vmatmul.f32.gmra.mxu1 %v15545_v30  ;;  %v15551_v0 = vld [vmem:[#allocation188_spill] sm:$0xff] }
 0xc54   : > { %v5861_v33 = vpop.f32.mrf.mxu0  ;;  %v5856_v31 = vadd.f32 %v5855_v57, %v15551_v0 }
 0xc55   : > { %v13505_v44 = vadd.f32 %v6719_v3, %v6559_v61  ;;  %v15553_v3 = vld [vmem:[#allocation27_spill] sm:$0xff] }
 0xc57   : > { %15547 = vst [vmem:[#allocation138_spill] sm:$0xff] %v13505_v44  ;;  %6956 = vmatmul.f32.gmra.mxu0 %v15535_v6  ;;  %8413 = vmatmul.msk.f32.gmra.mxu3 %vm5277_vm10, %v15548_v38  ;;  %v15554_v6 = vld [vmem:[#allocation210_spill] sm:$0xff]  ;;  %v15555_v38 = vld [vmem:[#allocation116_spill] sm:$0xff] }
 0xc58   : > { %v6731_v63 = vpop.f32.mrf.mxu1  ;;  %v6191_v61 = vadd.f32 %v15554_v6, %v5856_v31  ;;  %v15561_v6 = vld [vmem:[#allocation209_spill] sm:$0xff] }
 0xc5a   : > { %v6496_v26 = vpop.f32.mrf.mxu3 }
 0xc5b   : > { %v6560_v55 = vadd.f32 %v6496_v26, %v6190_v16  ;;  %7874 = vmatmul.f32.gmra.mxu1 %v15550_v24  ;;  %v15556_v16 = vld [vmem:[#allocation207_spill] sm:$0xff] }
 0xc5c   : > { %v5864_v53 = vpop.f32.mrf.mxu0  ;;  %v5859_v26 = vadd.f32 %v5858_v32, %v15556_v16  ;;  %v15564_v32 = vld [vmem:[#allocation213_spill] sm:$0xff] }
 0xc5d   : > { %v13514_v22 = vadd.f32 %v6722_v21, %v6560_v55  ;;  %v15558_v21 = vld [vmem:[#allocation64_spill] sm:$0xff] }
 0xc5f   : > { %15552 = vst [vmem:[#allocation142_spill] sm:$0xff] %v13514_v22  ;;  %6959 = vmatmul.f32.gmra.mxu0 %v15540_v34  ;;  %8414 = vmatmul.msk.f32.gmra.mxu3 %vm5272_vm7, %v15553_v3  ;;  %v15559_v34 = vld [vmem:[#allocation211_spill] sm:$0xff]  ;;  %v15560_v22 = vld [vmem:[#allocation18_spill] sm:$0xff] }
 0xc60   : > { %v6734_v59 = vpop.f32.mrf.mxu1  ;;  %v6192_v55 = vadd.f32 %v15559_v34, %v5859_v26 }
 0xc62   : > { %v6499_v58 = vpop.f32.mrf.mxu3 }
 0xc63   : > { %v6561_v36 = vadd.f32 %v6499_v58, %v6191_v61  ;;  %7877 = vmatmul.f32.gmra.mxu1 %v15555_v38  ;;  %v5862_v61 = vadd.f32 %v5861_v33, %v15561_v6 }
 0xc64   : > { %v5867_v60 = vpop.f32.mrf.mxu0 }
 0xc65   : > { %v13523_v44 = vadd.f32 %v6725_v9, %v6561_v36  ;;  %v15563_v9 = vld [vmem:[#allocation97_spill] sm:$0xff]  ;;  %v6193_v36 = vadd.f32 %v15564_v32, %v5862_v61 }
 0xc67   : > { %15557 = vst [vmem:[#allocation153_spill] sm:$0xff] %v13523_v44  ;;  %6962 = vmatmul.f32.gmra.mxu0 %v15545_v30  ;;  %7549 = vmatmul.f32.gmra.mxu3 %v15558_v21  ;;  %v15565_v21 = vld [vmem:[#allocation128_spill] sm:$0xff] }
 0xc68   : > { %v6737_v57 = vpop.f32.mrf.mxu1 }
 0xc6a   : > { %v6502_v0 = vpop.f32.mrf.mxu3 }
 0xc6b   : > { %v6562_v3 = vadd.f32 %v6502_v0, %v6192_v55  ;;  %7880 = vmatmul.f32.gmra.mxu1 %v15560_v22  ;;  %v15566_v55 = vld [vmem:[#allocation96_spill] sm:$0xff] }
 0xc6c   : > { %v5870_v31 = vpop.f32.mrf.mxu0  ;;  %v5865_v0 = vadd.f32 %v5864_v53, %v15566_v55 }
 0xc6d   : > { %v13530_v58 = vadd.f32 %v6728_v43, %v6562_v3  ;;  %v15568_v43 = vld [vmem:[#allocation101_spill] sm:$0xff] }
 0xc6f   : > { %15562 = vst [vmem:[#allocation106_spill] sm:$0xff] %v13530_v58  ;;  %6965 = vmatmul.f32.gmra.mxu0 %v15550_v24  ;;  %8415 = vmatmul.msk.f32.gmra.mxu3 %vm5277_vm10, %v15563_v9  ;;  %v15569_v24 = vld [vmem:[#allocation215_spill] sm:$0xff]  ;;  %v15570_v9 = vld [vmem:[#allocation122_spill] sm:$0xff] }
 0xc70   : > { %v6740_v30 = vpop.f32.mrf.mxu1  ;;  %v6194_v3 = vadd.f32 %v15569_v24, %v5865_v0  ;;  %v15576_v24 = vld [vmem:[#allocation214_spill] sm:$0xff] }
 0xc72   : > { %v6505_v16 = vpop.f32.mrf.mxu3 }
 0xc73   : > { %v6563_v26 = vadd.f32 %v6505_v16, %v6193_v36  ;;  %7883 = vmatmul.f32.gmra.mxu1 %v15565_v21  ;;  %v15571_v36 = vld [vmem:[#allocation212_spill] sm:$0xff] }
 0xc74   : > { %v5873_v34 = vpop.f32.mrf.mxu0  ;;  %v5868_v16 = vadd.f32 %v5867_v60, %v15571_v36  ;;  %v15579_v60 = vld [vmem:[#allocation217_spill] sm:$0xff] }
 0xc75   : > { %v13539_v44 = vadd.f32 %v6731_v63, %v6563_v26  ;;  %v15573_v63 = vld [vmem:[#allocation70_spill] sm:$0xff] }
 0xc77   : > { %15567 = vst [vmem:[#allocation98_spill] sm:$0xff] %v13539_v44  ;;  %6968 = vmatmul.f32.gmra.mxu0 %v15555_v38  ;;  %8416 = vmatmul.msk.f32.gmra.mxu3 %vm5272_vm7, %v15568_v43  ;;  %v15574_v38 = vld [vmem:[#allocation216_spill] sm:$0xff]  ;;  %v15575_v44 = vld [vmem:[#allocation139_spill] sm:$0xff] }
 0xc78   : > { %v6743_v33 = vpop.f32.mrf.mxu1  ;;  %v6195_v26 = vadd.f32 %v15574_v38, %v5868_v16 }
 0xc7a   : > { %v6508_v6 = vpop.f32.mrf.mxu3 }
 0xc7b   : > { %v6564_v61 = vadd.f32 %v6508_v6, %v6194_v3  ;;  %7886 = vmatmul.f32.gmra.mxu1 %v15570_v9  ;;  %v5871_v3 = vadd.f32 %v5870_v31, %v15576_v24 }
 0xc7c   : > { %v6924_v32 = vpop.f32.mrf.mxu0 }
 0xc7d   : > { %v13548_v58 = vadd.f32 %v6734_v59, %v6564_v61  ;;  %v15578_v59 = vld [vmem:[#allocation120_spill] sm:$0xff]  ;;  %v6196_v61 = vadd.f32 %v15579_v60, %v5871_v3 }
 0xc7f   : > { %15572 = vst [vmem:[#allocation149_spill] sm:$0xff] %v13548_v58  ;;  %6971 = vmatmul.f32.gmra.mxu0 %v15560_v22  ;;  %7558 = vmatmul.f32.gmra.mxu3 %v15573_v63  ;;  %v15580_v63 = vld [vmem:[#allocation107_spill] sm:$0xff] }
 0xc80   : > { %v7842_v53 = vpop.f32.mrf.mxu1 }
 0xc82   : > { %v6511_v55 = vpop.f32.mrf.mxu3 }
 0xc83   : > { %v6565_v43 = vadd.f32 %v6511_v55, %v6195_v26  ;;  %7889 = vmatmul.f32.gmra.mxu1 %v15575_v44  ;;  %v15581_v26 = vld [vmem:[#allocation75_spill] sm:$0xff] }
 0xc84   : > { %v6927_v0 = vpop.f32.mrf.mxu0  ;;  %v5874_v55 = vadd.f32 %v5873_v34, %v15581_v26 }
 0xc85   : > { %v13555_v6 = vadd.f32 %v6737_v57, %v6565_v43  ;;  %v15582_v57 = vld [vmem:[#allocation113_spill] sm:$0xff] }
 0xc87   : > { %15577 = vst [vmem:[#allocation114_spill] sm:$0xff] %v13555_v6  ;;  %6974 = vmatmul.f32.gmra.mxu0 %v15565_v21  ;;  %8417 = vmatmul.msk.f32.gmra.mxu3 %vm5277_vm10, %v15578_v59  ;;  %v15583_v21 = vld [vmem:[#allocation56_spill] sm:$0xff]  ;;  %v15584_v59 = vld [vmem:[#allocation115_spill] sm:$0xff] }
 0xc88   : > { %v7845_v22 = vpop.f32.mrf.mxu1  ;;  %v6197_v43 = vadd.f32 %v15583_v21, %v5874_v55  ;;  %v13581_v55 = vld [vmem:[%s13934_s8] ss:$0 sm:$0xff]  ;;  %v15589_v21 = vld [vmem:[#allocation19_spill] sm:$0xff] }
 0xc8a   : > { %v6514_v36 = vpop.f32.mrf.mxu3 }
 0xc8b   : > { %v6566_v16 = vadd.f32 %v6514_v36, %v6196_v61  ;;  %7892 = vmatmul.f32.gmra.mxu1 %v15580_v63  ;;  %v15585_v61 = vld [vmem:[#allocation71_spill] sm:$0xff] }
 0xc8c   : > { %v6930_v38 = vpop.f32.mrf.mxu0  ;;  %v7068_v36 = vadd.f32 %v6924_v32, %v15585_v61 }
 0xc8d   : > { %v13564_v58 = vadd.f32 %v6740_v30, %v6566_v16  ;;  %v15587_v30 = vld [vmem:[#allocation131_spill] sm:$0xff] }
 0xc8f   : > { %6977 = vmatmul.f32.gmra.mxu0 %v15570_v9  ;;  %8418 = vmatmul.msk.f32.gmra.mxu3 %vm5272_vm7, %v15582_v57  ;;  %v15588_v9 = vld [vmem:[#allocation23_spill] sm:$0xff] }
 0xc90   : > { %v7848_v31 = vpop.f32.mrf.mxu1  ;;  %v7438_v16 = vadd.f32 %v15588_v9, %v7068_v36  ;;  %v15592_v36 = vld [vmem:[#allocation104_spill] sm:$0xff] }
 0xc92   : > { %v6517_v24 = vpop.f32.mrf.mxu3 }
 0xc93   : > { %v6567_v3 = vadd.f32 %v6517_v24, %v6197_v43  ;;  %7895 = vmatmul.f32.gmra.mxu1 %v15584_v59 }
 0xc94   : > { %v6933_v60 = vpop.f32.mrf.mxu0 }
 0xc95   : > { %v13573_v6 = vadd.f32 %v6743_v33, %v6567_v3  ;;  %v15590_v33 = vld [vmem:[#allocation123_spill] sm:$0xff]  ;;  %v15591_v3 = vld [vmem:[#allocation126_spill] sm:$0xff] }
 0xc96   : > { %v7069_v43 = vadd.f32 %v6927_v0, %v15590_v33  ;;  %v15594_v33 = vld [vmem:[#allocation143_spill] sm:$0xff] }
 0xc97   : > { %15586 = vst [vmem:[#allocation141_spill] sm:$0xff] %v13573_v6  ;;  %6980 = vmatmul.f32.gmra.mxu0 %v15575_v44  ;;  %7567 = vmatmul.f32.gmra.mxu3 %v15587_v30 }
 0xc98   : > { %v7851_v34 = vpop.f32.mrf.mxu1  ;;  %v7439_v30 = vadd.f32 %v15592_v36, %v7069_v43 }
 0xc9a   : > { %v7520_v26 = vpop.f32.mrf.mxu3 }
 0xc9b   : > { %v7664_v57 = vadd.f32 %v7520_v26, %v7438_v16  ;;  %7898 = vmatmul.f32.gmra.mxu1 %v15589_v21  ;;  %v15593_v26 = vld [vmem:[#allocation46_spill] sm:$0xff] }
 0xc9c   : > { %v6936_v32 = vpop.f32.mrf.mxu0 }
 0xc9d   : > { %v7986_v24 = vadd.f32 %v7842_v53, %v7664_v57  ;;  %v7070_v53 = vadd.f32 %v6930_v38, %v13053_v23 }
 0xc9f   : > { %v8038_v44 = vadd.f32 %v13581_v55, %v7986_v24  ;;  %6983 = vmatmul.f32.gmra.mxu0 %v15580_v63  ;;  %8419 = vmatmul.msk.f32.gmra.mxu3 %vm5277_vm10, %v15591_v3  ;;  %v7440_v23 = vadd.f32 %v13064_v29, %v7070_v53  ;;  %v7071_v3 = vadd.f32 %v6933_v60, %v13062_v35  ;;  %v15596_v29 = vld [vmem:[#allocation105_spill] sm:$0xff]  ;;  %v15598_v35 = vld [vmem:[#allocation147_spill] sm:$0xff] }
 0xca0   : > { %v7854_v61 = vpop.f32.mrf.mxu1 }
 0xca1   : > { %8563 = vtanh.f32 %v8038_v44  ;;  %v15595_v44 = vld [vmem:[#allocation35_spill] sm:$0xff] }
 0xca2   : > { %v7523_v9 = vpop.f32.mrf.mxu3 }
 0xca3   : > { %v7665_v16 = vadd.f32 %v7523_v9, %v7439_v30  ;;  %7901 = vmatmul.f32.gmra.mxu1 %v15593_v26 }
 0xca4   : > { %v6939_v6 = vpop.f32.mrf.mxu0 }
 0xca5   : > { %v7987_v0 = vadd.f32 %v7845_v22, %v7665_v16  ;;  %v7441_v16 = vadd.f32 %v15596_v29, %v7071_v3  ;;  %v15601_v29 = vld [vmem:[#allocation39_spill] sm:$0xff] }
 0xca7   : > { %v8564_v63 = vpop.eup %8563  ;;  %v8039_v57 = vadd.f32 %v13581_v55, %v7987_v0  ;;  %6986 = vmatmul.f32.gmra.mxu0 %v15584_v59  ;;  %8420 = vmatmul.msk.f32.gmra.mxu3 %vm5272_vm7, %v15594_v33 }
 0xca8   : > { %8134 = vst [vmem:[%s13597_s29] sm:$0xff] %v8564_v63  ;;  %v7857_v43 = vpop.f32.mrf.mxu1  ;;  %v15597_v63 = vld [vmem:[#allocation90_spill] sm:$0xff] }
 0xca9   : > { %8565 = vtanh.f32 %v8039_v57 }
 0xcaa   : > { %v7526_v38 = vpop.f32.mrf.mxu3 }
 0xcab   : > { %v7666_v24 = vadd.f32 %v7526_v38, %v7440_v23  ;;  %7904 = vmatmul.f32.gmra.mxu1 %v15595_v44 }
 0xcac   : > { %v6942_v22 = vpop.f32.mrf.mxu0 }
 0xcad   : > { %v7988_v36 = vadd.f32 %v7848_v31, %v7666_v24  ;;  %v7072_v31 = vadd.f32 %v6936_v32, %v15598_v35  ;;  %v7073_v32 = vadd.f32 %v6939_v6, %v13088_v39  ;;  %v15602_v35 = vld [vmem:[#allocation29_spill] sm:$0xff]  ;;  %v7074_v6 = vadd.f32 %v6942_v22, %v13099_v46 }
 0xcaf   : > { %v8566_v30 = vpop.eup %8565  ;;  %v8040_v59 = vadd.f32 %v13581_v55, %v7988_v36  ;;  %6989 = vmatmul.f32.gmra.mxu0 %v15589_v21  ;;  %7576 = vmatmul.f32.gmra.mxu3 %v15376_v40  ;;  %v15599_v21 = vld [vmem:[#allocation47_spill] sm:$0xff]  ;;  %v7442_v38 = vadd.f32 %v13095_v18, %v7072_v31 }
 0xcb0   : > { %8135 = vst [vmem:[%s13597_s29 + $0x8] sm:$0xff] %v8566_v30  ;;  %v7860_v9 = vpop.f32.mrf.mxu1  ;;  %v15600_v36 = vld [vmem:[#allocation31_spill] sm:$0xff] }
 0xcb1   : > { %8567 = vtanh.f32 %v8040_v59 }
 0xcb2   : > { %v7529_v53 = vpop.f32.mrf.mxu3 }
 0xcb3   : > { %v7667_v0 = vadd.f32 %v7529_v53, %v7441_v16  ;;  %7907 = vmatmul.f32.gmra.mxu1 %v15597_v63  ;;  %v7443_v16 = vadd.f32 %v13107_v13, %v7073_v32  ;;  %v7444_v13 = vadd.f32 %v13125_v19, %v7074_v6 }
 0xcb4   : > { %v6945_v57 = vpop.f32.mrf.mxu0 }
 0xcb5   : > { %v7989_v60 = vadd.f32 %v7851_v34, %v7667_v0  ;;  %v7075_v46 = vadd.f32 %v6945_v57, %v13110_v49 }
 0xcb7   : > { %v8568_v33 = vpop.eup %8567  ;;  %v8041_v23 = vadd.f32 %v13581_v55, %v7989_v60  ;;  %6992 = vmatmul.f32.gmra.mxu0 %v15593_v26  ;;  %8421 = vmatmul.msk.f32.gmra.mxu3 %vm5277_vm10, %v15599_v21  ;;  %v15603_v60 = vld [vmem:[#allocation22_spill] sm:$0xff]  ;;  %v7445_v32 = vadd.f32 %v13136_v17, %v7075_v46 }
 0xcb8   : > { %8136 = vst [vmem:[%s13597_s29 + $0x10] sm:$0xff] %v8568_v33  ;;  %v7863_v40 = vpop.f32.mrf.mxu1 }
 0xcb9   : > { %8569 = vtanh.f32 %v8041_v23 }
 0xcba   : > { %v7532_v24 = vpop.f32.mrf.mxu3 }
 0xcbb   : > { %v7668_v3 = vadd.f32 %v7532_v24, %v7442_v38  ;;  %7910 = vmatmul.f32.gmra.mxu1 %v15600_v36  ;;  %v15604_v38 = vld [vmem:[#allocation49_spill] sm:$0xff] }
 0xcbc   : > { %v6948_v34 = vpop.f32.mrf.mxu0 }
 0xcbd   : > { %v7990_v30 = vadd.f32 %v7854_v61, %v7668_v3 }
 0xcbf   : > { %v8570_v59 = vpop.eup %8569  ;;  %v8042_v26 = vadd.f32 %v13581_v55, %v7990_v30  ;;  %6995 = vmatmul.f32.gmra.mxu0 %v15595_v44  ;;  %8422 = vmatmul.msk.f32.gmra.mxu3 %vm5272_vm7, %v15601_v29 }
 0xcc0   : > { %8137 = vst [vmem:[%s13597_s29 + $0x18] sm:$0xff] %v8570_v59  ;;  %v7866_v18 = vpop.f32.mrf.mxu1 }
 0xcc1   : > { %8571 = vtanh.f32 %v8042_v26  ;;  %v15606_v26 = vld [vmem:[#allocation72_spill] sm:$0xff] }
 0xcc2   : > { %v7535_v53 = vpop.f32.mrf.mxu3 }
 0xcc3   : > { %v7669_v0 = vadd.f32 %v7535_v53, %v7443_v16  ;;  %7913 = vmatmul.f32.gmra.mxu1 %v15602_v35  ;;  %v15607_v16 = vld [vmem:[#allocation86_spill] sm:$0xff] }
 0xcc4   : > { %v6951_v39 = vpop.f32.mrf.mxu0 }
 0xcc5   : > { %v7991_v61 = vadd.f32 %v7857_v43, %v7669_v0 }
 0xcc7   : > { %v8572_v31 = vpop.eup %8571  ;;  %v8043_v44 = vadd.f32 %v13581_v55, %v7991_v61  ;;  %6998 = vmatmul.f32.gmra.mxu0 %v15597_v63  ;;  %7585 = vmatmul.f32.gmra.mxu3 %v15603_v60  ;;  %v15605_v63 = vld [vmem:[#allocation36_spill] sm:$0xff]  ;;  %v15608_v61 = vld [vmem:[#allocation74_spill] sm:$0xff] }
 0xcc8   : > { %8138 = vst [vmem:[%s13597_s29 + $0x20] sm:$0xff] %v8572_v31  ;;  %v7869_v33 = vpop.f32.mrf.mxu1 }
 0xcc9   : > { %8573 = vtanh.f32 %v8043_v44 }
 0xcca   : > { %v7538_v23 = vpop.f32.mrf.mxu3 }
 0xccb   : > { %v7670_v21 = vadd.f32 %v7538_v23, %v7444_v13  ;;  %7916 = vmatmul.f32.gmra.mxu1 %v15604_v38  ;;  %v15609_v23 = vld [vmem:[#allocation61_spill] sm:$0xff] }
 0xccc   : > { %v6954_v24 = vpop.f32.mrf.mxu0 }
 0xccd   : > { %v7992_v43 = vadd.f32 %v7860_v9, %v7670_v21  ;;  %v7076_v9 = vadd.f32 %v6948_v34, %v13123_v12 }
 0xccf   : > { %v8574_v22 = vpop.eup %8573  ;;  %v8044_v3 = vadd.f32 %v13581_v55, %v7992_v43  ;;  %7001 = vmatmul.f32.gmra.mxu0 %v15600_v36  ;;  %8423 = vmatmul.msk.f32.gmra.mxu3 %vm5277_vm10, %v15605_v63  ;;  %v7446_v53 = vadd.f32 %v13154_v54, %v7076_v9 }
 0xcd0   : > { %8139 = vst [vmem:[%s13597_s29 + $0x28] sm:$0xff] %v8574_v22  ;;  %v7872_v19 = vpop.f32.mrf.mxu1  ;;  %v15610_v22 = vld [vmem:[#allocation102_spill] sm:$0xff] }
 0xcd1   : > { %8575 = vtanh.f32 %v8044_v3 }
 0xcd2   : > { %v7541_v30 = vpop.f32.mrf.mxu3 }
 0xcd3   : > { %v7671_v59 = vadd.f32 %v7541_v30, %v7445_v32  ;;  %7919 = vmatmul.f32.gmra.mxu1 %v15606_v26 }
 0xcd4   : > { %v6957_v49 = vpop.f32.mrf.mxu0 }
 0xcd5   : > { %v7993_v57 = vadd.f32 %v7863_v40, %v7671_v59  ;;  %v7077_v40 = vadd.f32 %v6951_v39, %v13134_v45  ;;  %v7078_v45 = vadd.f32 %v6954_v24, %v13145_v1  ;;  %v15611_v59 = vld [vmem:[#allocation110_spill] sm:$0xff] }
 0xcd7   : > { %v8576_v29 = vpop.eup %8575  ;;  %v8045_v36 = vadd.f32 %v13581_v55, %v7993_v57  ;;  %7004 = vmatmul.f32.gmra.mxu0 %v15602_v35  ;;  %8424 = vmatmul.msk.f32.gmra.mxu3 %vm5272_vm7, %v15607_v16  ;;  %v7447_v54 = vadd.f32 %v13168_v25, %v7077_v40  ;;  %v7448_v25 = vadd.f32 %v13182_v27, %v7078_v45 }
 0xcd8   : > { %8140 = vst [vmem:[%s13597_s29 + $0x30] sm:$0xff] %v8576_v29  ;;  %v7875_v17 = vpop.f32.mrf.mxu1 }
 0xcd9   : > { %8577 = vtanh.f32 %v8045_v36  ;;  %v15612_v36 = vld [vmem:[#allocation121_spill] sm:$0xff] }
 0xcda   : > { %v7544_v0 = vpop.f32.mrf.mxu3 }
 0xcdb   : > { %v7672_v6 = vadd.f32 %v7544_v0, %v7446_v53  ;;  %7922 = vmatmul.f32.gmra.mxu1 %v15608_v61 }
 0xcdc   : > { %v6960_v12 = vpop.f32.mrf.mxu0 }
 0xcdd   : > { %v7994_v34 = vadd.f32 %v7866_v18, %v7672_v6 }
 0xcdf   : > { %v8578_v31 = vpop.eup %8577  ;;  %v8046_v35 = vadd.f32 %v13581_v55, %v7994_v34  ;;  %7007 = vmatmul.f32.gmra.mxu0 %v15604_v38  ;;  %7594 = vmatmul.f32.gmra.mxu3 %v12348_v2 }
 0xce0   : > { %8141 = vst [vmem:[%s13597_s29 + $0x38] sm:$0xff] %v8578_v31  ;;  %v7878_v44 = vpop.f32.mrf.mxu1 }
 0xce1   : > { %8579 = vtanh.f32 %v8046_v35 }
 0xce2   : > { %v7547_v60 = vpop.f32.mrf.mxu3 }
 0xce3   : > { %v7673_v13 = vadd.f32 %v7547_v60, %v7447_v54  ;;  %7925 = vmatmul.f32.gmra.mxu1 %v15609_v23  ;;  %v15614_v60 = vld [vmem:[#allocation157_spill] sm:$0xff] }
 0xce4   : > { %v6963_v21 = vpop.f32.mrf.mxu0 }
 0xce5   : > { %v7995_v18 = vadd.f32 %v7869_v33, %v7673_v13  ;;  %v7079_v33 = vadd.f32 %v6957_v49, %v13160_v50  ;;  %v15615_v13 = vld [vmem:[#allocation150_spill] sm:$0xff] }
 0xce7   : > { %v8580_v39 = vpop.eup %8579  ;;  %v8047_v46 = vadd.f32 %v13581_v55, %v7995_v18  ;;  %7010 = vmatmul.f32.gmra.mxu0 %v15606_v26  ;;  %8425 = vmatmul.msk.f32.gmra.mxu3 %vm5277_vm10, %v12377_v20  ;;  %v7449_v27 = vadd.f32 %v13201_v11, %v7079_v33 }
 0xce8   : > { %8142 = vst [vmem:[%s13597_s29 + $0x40] sm:$0xff] %v8580_v39  ;;  %v7881_v2 = vpop.f32.mrf.mxu1  ;;  %v15616_v39 = vld [vmem:[#allocation145_spill] sm:$0xff] }
 0xce9   : > { %8581 = vtanh.f32 %v8047_v46 }
 0xcea   : > { %v7550_v38 = vpop.f32.mrf.mxu3 }
 0xceb   : > { %v7674_v43 = vadd.f32 %v7550_v38, %v7448_v25  ;;  %7928 = vmatmul.f32.gmra.mxu1 %v15610_v22  ;;  %v15618_v38 = vld [vmem:[#allocation103_spill] sm:$0xff] }
 0xcec   : > { %v6966_v1 = vpop.f32.mrf.mxu0 }
 0xced   : > { %v7996_v24 = vadd.f32 %v7872_v19, %v7674_v43  ;;  %v7080_v19 = vadd.f32 %v6960_v12, %v13171_v37  ;;  %v7081_v37 = vadd.f32 %v6963_v21, %v13180_v56  ;;  %v15613_v12 = vld [vmem:[#allocation140_spill] sm:$0xff]  ;;  %v7082_v40 = vadd.f32 %v6966_v1, %v13195_v62 }
 0xcef   : > { %v8582_v3 = vpop.eup %8581  ;;  %v8048_v63 = vadd.f32 %v13581_v55, %v7996_v24  ;;  %7013 = vmatmul.f32.gmra.mxu0 %v15608_v61  ;;  %8426 = vmatmul.msk.f32.gmra.mxu3 %vm5272_vm7, %v12408_v14  ;;  %v7450_v11 = vadd.f32 %v13210_v52, %v7080_v19  ;;  %v7451_v52 = vadd.f32 %v13229_v48, %v7081_v37 }
 0xcf0   : > { %8143 = vst [vmem:[%s13597_s29 + $0x48] sm:$0xff] %v8582_v3  ;;  %v7884_v20 = vpop.f32.mrf.mxu1  ;;  %v7452_v48 = vadd.f32 %v13243_v4, %v7082_v40  ;;  %v15617_v4 = vld [vmem:[#allocation124_spill] sm:$0xff] }
 0xcf1   : > { %8583 = vtanh.f32 %v8048_v63  ;;  %v15620_v63 = vld [vmem:[#allocation117_spill] sm:$0xff] }
 0xcf2   : > { %v7553_v32 = vpop.f32.mrf.mxu3 }
 0xcf3   : > { %v7675_v30 = vadd.f32 %v7553_v32, %v7449_v27  ;;  %7931 = vmatmul.f32.gmra.mxu1 %v15611_v59  ;;  %v15621_v27 = vld [vmem:[#allocation50_spill] sm:$0xff] }
 0xcf4   : > { %v6969_v50 = vpop.f32.mrf.mxu0 }
 0xcf5   : > { %v7997_v26 = vadd.f32 %v7875_v17, %v7675_v30 }
 0xcf7   : > { %v8584_v49 = vpop.eup %8583  ;;  %v8049_v9 = vadd.f32 %v13581_v55, %v7997_v26  ;;  %7016 = vmatmul.f32.gmra.mxu0 %v15609_v23  ;;  %7603 = vmatmul.f32.gmra.mxu3 %v12448_v10  ;;  %v7083_v23 = vadd.f32 %v6969_v50, %v15615_v13  ;;  %v15622_v50 = vld [vmem:[#allocation190_spill] sm:$0xff] }
 0xcf8   : > { %8144 = vst [vmem:[%s13597_s29 + $0x50] sm:$0xff] %v8584_v49  ;;  %v7887_v14 = vpop.f32.mrf.mxu1  ;;  %v15623_v26 = vld [vmem:[#allocation130_spill] sm:$0xff] }
 0xcf9   : > { %8585 = vtanh.f32 %v8049_v9  ;;  %v7453_v46 = vadd.f32 %v15617_v4, %v7083_v23  ;;  %v15632_v4 = vld [vmem:[#allocation73_spill] sm:$0xff] }
 0xcfa   : > { %v7556_v57 = vpop.f32.mrf.mxu3 }
 0xcfb   : > { %v7676_v29 = vadd.f32 %v7556_v57, %v7450_v11  ;;  %7934 = vmatmul.f32.gmra.mxu1 %v15612_v36  ;;  %v15624_v57 = vld [vmem:[#allocation133_spill] sm:$0xff] }
 0xcfc   : > { %v6972_v16 = vpop.f32.mrf.mxu0 }
 0xcfd   : > { %v7998_v17 = vadd.f32 %v7878_v44, %v7676_v29 }
 0xcff   : > { %v8586_v53 = vpop.eup %8585  ;;  %v8050_v0 = vadd.f32 %v13581_v55, %v7998_v17  ;;  %7019 = vmatmul.f32.gmra.mxu0 %v15610_v22  ;;  %8427 = vmatmul.msk.f32.gmra.mxu3 %vm5277_vm10, %v12466_v41  ;;  %v15619_v22 = vld [vmem:[#allocation108_spill] sm:$0xff] }
 0xd00   : > { %8145 = vst [vmem:[%s13597_s29 + $0x58] sm:$0xff] %v8586_v53  ;;  %v7890_v10 = vpop.f32.mrf.mxu1  ;;  %v7084_v1 = vadd.f32 %v6972_v16, %v15619_v22  ;;  %v15626_v53 = vld [vmem:[#allocation44_spill] sm:$0xff] }
 0xd01   : > { %8587 = vtanh.f32 %v8050_v0 }
 0xd02   : > { %v7559_v6 = vpop.f32.mrf.mxu3  ;;  %v7454_v32 = vadd.f32 %v15621_v27, %v7084_v1  ;;  %v15634_v1 = vld [vmem:[#allocation175_spill] sm:$0xff]  ;;  %v15636_v27 = vld [vmem:[#allocation84_spill] sm:$0xff] }
 0xd03   : > { %v7677_v61 = vadd.f32 %v7559_v6, %v7451_v52  ;;  %7937 = vmatmul.f32.gmra.mxu1 %v15613_v12 }
 0xd04   : > { %v6975_v56 = vpop.f32.mrf.mxu0 }
 0xd05   : > { %v7999_v34 = vadd.f32 %v7881_v2, %v7677_v61  ;;  %v7085_v49 = vadd.f32 %v6975_v56, %v15623_v26  ;;  %v15628_v56 = vld [vmem:[#allocation152_spill] sm:$0xff]  ;;  %v15637_v26 = vld [vmem:[#allocation159_spill] sm:$0xff] }
 0xd07   : > { %v8588_v31 = vpop.eup %8587  ;;  %v8051_v35 = vadd.f32 %v13581_v55, %v7999_v34  ;;  %7022 = vmatmul.f32.gmra.mxu0 %v15611_v59  ;;  %8428 = vmatmul.msk.f32.gmra.mxu3 %vm5272_vm7, %v12491_v28 }
 0xd08   : > { %8146 = vst [vmem:[%s13597_s29 + $0x60] sm:$0xff] %v8588_v31  ;;  %v7893_v41 = vpop.f32.mrf.mxu1  ;;  %v13738_v31 = vpop.f32.mrf.mxu2 }
 0xd09   : > { %8589 = vtanh.f32 %v8051_v35 }
 0xd0a   : > { %v7562_v44 = vpop.f32.mrf.mxu3 }
 0xd0b   : > { %v7678_v54 = vadd.f32 %v7562_v44, %v7452_v48  ;;  %7940 = vmatmul.f32.gmra.mxu1 %v15614_v60  ;;  %v15629_v44 = vld [vmem:[#allocation164_spill] sm:$0xff] }
 0xd0c   : > { %v6978_v62 = vpop.f32.mrf.mxu0 }
 0xd0d   : > { %v8000_v21 = vadd.f32 %v7884_v20, %v7678_v54  ;;  %v15630_v54 = vld [vmem:[#allocation127_spill] sm:$0xff] }
 0xd0f   : > { %v8590_v45 = vpop.eup %8589  ;;  %v8052_v18 = vadd.f32 %v13581_v55, %v8000_v21  ;;  %7025 = vmatmul.f32.gmra.mxu0 %v15612_v36  ;;  %7612 = vmatmul.f32.gmra.mxu3 %v15616_v39  ;;  %v15625_v36 = vld [vmem:[#allocation28_spill] sm:$0xff]  ;;  %v15631_v21 = vld [vmem:[#allocation197_spill] sm:$0xff] }
 0xd10   : > { %8147 = vst [vmem:[%s13597_s29 + $0x68] sm:$0xff] %v8590_v45  ;;  %v7896_v28 = vpop.f32.mrf.mxu1  ;;  %v7455_v16 = vadd.f32 %v15625_v36, %v7085_v49 }
 0xd11   : > { %8591 = vtanh.f32 %v8052_v18 }
 0xd12   : > { %v7565_v2 = vpop.f32.mrf.mxu3 }
 0xd13   : > { %v7679_v25 = vadd.f32 %v7565_v2, %v7453_v46  ;;  %7943 = vmatmul.f32.gmra.mxu1 %v15618_v38  ;;  %v15633_v2 = vld [vmem:[#allocation109_spill] sm:$0xff] }
 0xd14   : > { %v6981_v43 = vpop.f32.mrf.mxu0 }
 0xd15   : > { %v8001_v33 = vadd.f32 %v7887_v14, %v7679_v25 }
 0xd17   : > { %v8592_v24 = vpop.eup %8591  ;;  %v8053_v3 = vadd.f32 %v13581_v55, %v8001_v33  ;;  %7028 = vmatmul.f32.gmra.mxu0 %v15613_v12  ;;  %8429 = vmatmul.msk.f32.gmra.mxu3 %vm5277_vm10, %v15620_v63  ;;  %v15635_v63 = vld [vmem:[#allocation185_spill] sm:$0xff] }
 0xd18   : > { %8148 = vst [vmem:[%s13597_s29 + $0x70] sm:$0xff] %v8592_v24  ;;  %v7899_v20 = vpop.f32.mrf.mxu1 }
 0xd19   : > { %8593 = vtanh.f32 %v8053_v3 }
 0xd1a   : > { %v7568_v30 = vpop.f32.mrf.mxu3 }
 0xd1b   : > { %v7680_v59 = vadd.f32 %v7568_v30, %v7454_v32  ;;  %7946 = vmatmul.f32.gmra.mxu1 %v15622_v50 }
 0xd1c   : > { %v6984_v19 = vpop.f32.mrf.mxu0 }
 0xd1d   : > { %v8002_v9 = vadd.f32 %v7890_v10, %v7680_v59  ;;  %v15627_v10 = vld [vmem:[#allocation87_spill] sm:$0xff]  ;;  %v7088_v25 = vadd.f32 %v6984_v19, %v15633_v2 }
 0xd1e   : > { %v7086_v52 = vadd.f32 %v6978_v62, %v15627_v10  ;;  %v15641_v10 = vld [vmem:[#allocation21_spill] sm:$0xff] }
 0xd1f   : > { %v8594_v14 = vpop.eup %8593  ;;  %v8054_v11 = vadd.f32 %v13581_v55, %v8002_v9  ;;  %7031 = vmatmul.f32.gmra.mxu0 %v15614_v60  ;;  %8430 = vmatmul.msk.f32.gmra.mxu3 %vm5272_vm7, %v15624_v57  ;;  %v7087_v60 = vadd.f32 %v6981_v43, %v15630_v54  ;;  %v7458_v33 = vadd.f32 %v13379_v15, %v7088_v25 }
 0xd20   : > { %8149 = vst [vmem:[%s13597_s29 + $0x78] sm:$0xff] %v8594_v14  ;;  %v7902_v29 = vpop.f32.mrf.mxu1  ;;  %v7456_v34 = vadd.f32 %v13328_v47, %v7086_v52 }
 0xd21   : > { %8595 = vtanh.f32 %v8054_v11  ;;  %v7457_v45 = vadd.f32 %v13361_v42, %v7087_v60  ;;  %v15638_v11 = vld [vmem:[#allocation155_spill] sm:$0xff]  ;;  %v15645_v60 = vld [vmem:[#allocation174_spill] sm:$0xff] }
 0xd22   : > { %v7571_v37 = vpop.f32.mrf.mxu3 }
 0xd23   : > { %v7681_v17 = vadd.f32 %v7571_v37, %v7455_v16  ;;  %7949 = vmatmul.f32.gmra.mxu1 %v15626_v53 }
 0xd24   : > { %v6987_v0 = vpop.f32.mrf.mxu0 }
 0xd25   : > { %v8003_v6 = vadd.f32 %v7893_v41, %v7681_v17  ;;  %v7089_v32 = vadd.f32 %v6987_v0, %v15636_v27 }
 0xd27   : > { %v8596_v61 = vpop.eup %8595  ;;  %v8055_v12 = vadd.f32 %v13581_v55, %v8003_v6  ;;  %7034 = vmatmul.f32.gmra.mxu0 %v15618_v38  ;;  %7621 = vmatmul.f32.gmra.mxu3 %v15628_v56  ;;  %v7459_v49 = vadd.f32 %v13396_v8, %v7089_v32  ;;  %v15651_v32 = vld [vmem:[#allocation111_spill] sm:$0xff] }
 0xd28   : > { %8150 = vst [vmem:[%s13597_s29 + $0x80] sm:$0xff] %v8596_v61  ;;  %v7905_v40 = vpop.f32.mrf.mxu1 }
 0xd29   : > { %8597 = vtanh.f32 %v8055_v12  ;;  %v15642_v12 = vld [vmem:[#allocation187_spill] sm:$0xff] }
 0xd2a   : > { %v7574_v35 = vpop.f32.mrf.mxu3 }
 0xd2b   : > { %v7682_v48 = vadd.f32 %v7574_v35, %v7456_v34  ;;  %7952 = vmatmul.f32.gmra.mxu1 %v15629_v44 }
 0xd2c   : > { %v6990_v41 = vpop.f32.mrf.mxu0 }
 0xd2d   : > { %v8004_v62 = vadd.f32 %v7896_v28, %v7682_v48  ;;  %v13750_v28 = vpop.f32.mrf.mxu2  ;;  %v15644_v48 = vld [vmem:[#allocation67_spill] sm:$0xff] }
 0xd2f   : > { %v8598_v13 = vpop.eup %8597  ;;  %v8056_v23 = vadd.f32 %v13581_v55, %v8004_v62  ;;  %7037 = vmatmul.f32.gmra.mxu0 %v15622_v50  ;;  %8431 = vmatmul.msk.f32.gmra.mxu3 %vm5277_vm10, %v15631_v21 }
 0xd30   : > { %8151 = vst [vmem:[%s13597_s29 + $0x88] sm:$0xff] %v8598_v13  ;;  %v7908_v47 = vpop.f32.mrf.mxu1 }
 0xd31   : > { %8599 = vtanh.f32 %v8056_v23 }
 0xd32   : > { %v7577_v18 = vpop.f32.mrf.mxu3 }
 0xd33   : > { %v7683_v39 = vadd.f32 %v7577_v18, %v7457_v45  ;;  %7955 = vmatmul.f32.gmra.mxu1 %v15632_v4 }
 0xd34   : > { %v6993_v46 = vpop.f32.mrf.mxu0 }
 0xd35   : > { %v8005_v38 = vadd.f32 %v7899_v20, %v7683_v39  ;;  %v13762_v59 = vpop.f32.mrf.mxu2 }
 0xd37   : > { %v8600_v43 = vpop.eup %8599  ;;  %v8057_v22 = vadd.f32 %v13581_v55, %v8005_v38  ;;  %7040 = vmatmul.f32.gmra.mxu0 %v15626_v53  ;;  %8432 = vmatmul.msk.f32.gmra.mxu3 %vm5272_vm7, %v15634_v1  ;;  %v15640_v53 = vld [vmem:[#allocation184_spill] sm:$0xff] }
 0xd38   : > { %8152 = vst [vmem:[%s13597_s29 + $0x90] sm:$0xff] %v8600_v43  ;;  %v7911_v42 = vpop.f32.mrf.mxu1  ;;  %v15649_v38 = vld [vmem:[#allocation172_spill] sm:$0xff] }
 0xd39   : > { %8601 = vtanh.f32 %v8057_v22  ;;  %v13798_v43 = vrot.slane %v15649_v38, 1  ;;  %v15650_v1 = vld [vmem:[#allocation88_spill] sm:$0xff] }
 0xd3a   : > { %v7580_v24 = vpop.f32.mrf.mxu3 }
 0xd3b   : > { %v7684_v3 = vadd.f32 %v7580_v24, %v7458_v33  ;;  %7958 = vmatmul.f32.gmra.mxu1 %v15635_v63 }
 0xd3c   : > { %v6996_v20 = vpop.f32.mrf.mxu0 }
 0xd3d   : > { %v8006_v30 = vadd.f32 %v7902_v29, %v7684_v3  ;;  %v15639_v29 = vld [vmem:[#allocation135_spill] sm:$0xff]  ;;  %v13776_v0 = vpop.f32.mrf.mxu2 }
 0xd3e   : > { %v7090_v36 = vadd.f32 %v6990_v41, %v15639_v29 }
 0xd3f   : > { %v8602_v50 = vpop.eup %8601  ;;  %v8058_v19 = vadd.f32 %v13581_v55, %v8006_v30  ;;  %7043 = vmatmul.f32.gmra.mxu0 %v15629_v44  ;;  %7630 = vmatmul.f32.gmra.mxu3 %v15637_v26  ;;  %v6840_v44 = vrot.slane %v15644_v48, 1 }
 0xd40   : > { %8153 = vst [vmem:[%s13597_s29 + $0x98] sm:$0xff] %v8602_v50  ;;  %v7914_v15 = vpop.f32.mrf.mxu1  ;;  %v7460_v52 = vadd.f32 %v15641_v10, %v7090_v36  ;;  %v15654_v36 = vld [vmem:[#allocation132_spill] sm:$0xff] }
 0xd41   : > { %8603 = vtanh.f32 %v8058_v19 }
 0xd42   : > { %v7583_v9 = vpop.f32.mrf.mxu3 }
 0xd43   : > { %v7685_v14 = vadd.f32 %v7583_v9, %v7459_v49  ;;  %7961 = vmatmul.f32.gmra.mxu1 %v15638_v11  ;;  %v15652_v49 = vld [vmem:[#allocation178_spill] sm:$0xff] }
 0xd44   : > { %v6999_v57 = vpop.f32.mrf.mxu0 }
 0xd45   : > { %v8007_v16 = vadd.f32 %v7905_v40, %v7685_v14  ;;  %v15643_v40 = vld [vmem:[#allocation118_spill] sm:$0xff]  ;;  %v13790_v23 = vpop.f32.mrf.mxu2  ;;  %v7093_v30 = vadd.f32 %v6999_v57, %v15651_v32 }
 0xd46   : > { %v7091_v34 = vadd.f32 %v6993_v46, %v15643_v40  ;;  %v15648_v46 = vld [vmem:[#allocation198_spill] sm:$0xff]  ;;  %v15657_v40 = vld [vmem:[#allocation165_spill] sm:$0xff] }
 0xd47   : > { %v8604_v37 = vpop.eup %8603  ;;  %v8059_v17 = vadd.f32 %v13581_v55, %v8007_v16  ;;  %7046 = vmatmul.f32.gmra.mxu0 %v15632_v4  ;;  %8433 = vmatmul.msk.f32.gmra.mxu3 %vm5277_vm10, %v15640_v53  ;;  %v7092_v2 = vadd.f32 %v6996_v20, %v15648_v46  ;;  %v7463_v9 = vadd.f32 %v13750_v28, %v7093_v30  ;;  %v15665_v30 = vld [vmem:[#allocation167_spill] sm:$0xff] }
 0xd48   : > { %8154 = vst [vmem:[%s13597_s29 + $0xa0] sm:$0xff] %v8604_v37  ;;  %v7917_v8 = vpop.f32.mrf.mxu1  ;;  %v7461_v13 = vadd.f32 %v13427_v7, %v7091_v34 }
 0xd49   : > { %8605 = vtanh.f32 %v8059_v17  ;;  %v7462_v24 = vadd.f32 %v13738_v31, %v7092_v2 }
 0xd4a   : > { %v7586_v6 = vpop.f32.mrf.mxu3 }
 0xd4b   : > { %v7686_v61 = vadd.f32 %v7586_v6, %v7460_v52  ;;  %7964 = vmatmul.f32.gmra.mxu1 %v15642_v12  ;;  %v15655_v52 = vld [vmem:[#allocation201_spill] sm:$0xff] }
 0xd4c   : > { %v7002_v56 = vpop.f32.mrf.mxu0 }
 0xd4d   : > { %v8008_v35 = vadd.f32 %v7908_v47, %v7686_v61  ;;  %v15646_v47 = vld [vmem:[#allocation182_spill] sm:$0xff]  ;;  %v13808_v20 = vpop.f32.mrf.mxu2  ;;  %v7094_v16 = vadd.f32 %v7002_v56, %v15654_v36 }
 0xd4e   : > { %v15647_v45 = vrot.slane %v15646_v47, 1  ;;  %v15656_v56 = vld [vmem:[#allocation30_spill] sm:$0xff]  ;;  %v15658_v47 = vld [vmem:[#allocation80_spill] sm:$0xff] }
 0xd4f   : > { %v8606_v41 = vpop.eup %8605  ;;  %v8060_v54 = vadd.f32 %v13581_v55, %v8008_v35  ;;  %7049 = vmatmul.f32.gmra.mxu0 %v15635_v63  ;;  %8434 = vmatmul.msk.f32.gmra.mxu3 %vm5272_vm7, %v15645_v60  ;;  %v7464_v6 = vadd.f32 %v13762_v59, %v7094_v16 }
 0xd50   : > { %8155 = vst [vmem:[%s13597_s29 + $0xa8] sm:$0xff] %v8606_v41  ;;  %v7920_v62 = vpop.f32.mrf.mxu1  ;;  %v6843_v18 = vsel %vm1196_vm2, %v15647_v45, %v6840_v44 }
 0xd51   : > { %8607 = vtanh.f32 %v8060_v54 }
 0xd52   : > { %v7589_v21 = vpop.f32.mrf.mxu3 }
 0xd53   : > { %v7687_v39 = vadd.f32 %v7589_v21, %v7461_v13  ;;  %7967 = vmatmul.f32.gmra.mxu1 %v6843_v18 }
 0xd54   : > { %v7005_v4 = vpop.f32.mrf.mxu0 }
 0xd55   : > { %v8009_v25 = vadd.f32 %v7911_v42, %v7687_v39  ;;  %v6842_v42 = vsel %vm1196_vm2, %v6840_v44, %v13798_v43  ;;  %v13823_v17 = vpop.f32.mrf.mxu2  ;;  %v7095_v34 = vadd.f32 %v7005_v4, %v15657_v40  ;;  %v15660_v4 = vld [vmem:[#allocation193_spill] sm:$0xff] }
 0xd57   : > { %v8608_v22 = vpop.eup %8607  ;;  %v8061_v7 = vadd.f32 %v13581_v55, %v8009_v25  ;;  %7052 = vmatmul.f32.gmra.mxu0 %v15638_v11  ;;  %7639 = vmatmul.f32.gmra.mxu3 %v15650_v1  ;;  %v15653_v11 = vld [vmem:[#allocation26_spill] sm:$0xff]  ;;  %v7465_v59 = vadd.f32 %v13776_v0, %v7095_v34  ;;  %v15662_v1 = vld [vmem:[#allocation40_spill] sm:$0xff] }
 0xd58   : > { %8156 = vst [vmem:[%s13597_s29 + $0xb0] sm:$0xff] %v8608_v22  ;;  %v7923_v33 = vpop.f32.mrf.mxu1  ;;  %v15661_v25 = vld [vmem:[#allocation186_spill] sm:$0xff] }
 0xd59   : > { %8609 = vtanh.f32 %v8061_v7 }
 0xd5a   : > { %v7592_v3 = vpop.f32.mrf.mxu3 }
 0xd5b   : > { %v7688_v63 = vadd.f32 %v7592_v3, %v7462_v24  ;;  %7970 = vmatmul.f32.gmra.mxu1 %v6842_v42 }
 0xd5c   : > { %v7008_v27 = vpop.f32.mrf.mxu0 }
 0xd5d   : > { %v8010_v50 = vadd.f32 %v7914_v15, %v7688_v63  ;;  %v7762_v15 = vsel %vm1196_vm2, %v13798_v43, %v15653_v11  ;;  %v7387_v54 = vpop.f32.mrf.mxu2 }
 0xd5f   : > { %v8610_v19 = vpop.eup %8609  ;;  %v8062_v26 = vadd.f32 %v13581_v55, %v8010_v50  ;;  %7055 = vmatmul.f32.gmra.mxu0 %v15642_v12  ;;  %8435 = vmatmul.msk.f32.gmra.mxu3 %vm5277_vm10, %v15652_v49 }
 0xd60   : > { %8157 = vst [vmem:[%s13597_s29 + $0xb8] sm:$0xff] %v8610_v19  ;;  %v7926_v31 = vpop.f32.mrf.mxu1 }
 0xd61   : > { %8611 = vtanh.f32 %v8062_v26 }
 0xd62   : > { %v7595_v14 = vpop.f32.mrf.mxu3 }
 0xd63   : > { %v7689_v57 = vadd.f32 %v7595_v14, %v7463_v9  ;;  %7973 = vmatmul.f32.gmra.mxu1 %v7762_v15  ;;  %v15666_v9 = vld [vmem:[#allocation33_spill] sm:$0xff] }
 0xd64   : > { %v7011_v29 = vpop.f32.mrf.mxu0 }
 0xd65   : > { %v8011_v37 = vadd.f32 %v7917_v8, %v7689_v57  ;;  %v7390_v22 = vpop.f32.mrf.mxu2  ;;  %v15667_v57 = vld [vmem:[#allocation169_spill] sm:$0xff] }
 0xd67   : > { %v8612_v53 = vpop.eup %8611  ;;  %v8063_v10 = vadd.f32 %v13581_v55, %v8011_v37  ;;  %7058 = vmatmul.f32.gmra.mxu0 %v6843_v18  ;;  %8436 = vmatmul.msk.f32.gmra.mxu3 %vm5272_vm7, %v15655_v52  ;;  %v15659_v18 = vld [vmem:[#allocation137_spill] sm:$0xff] }
 0xd68   : > { %8158 = vst [vmem:[%s13597_s29 + $0xc0] sm:$0xff] %v8612_v53  ;;  %v7929_v28 = vpop.f32.mrf.mxu1  ;;  %v15668_v53 = vld [vmem:[#allocation20_spill] sm:$0xff] }
 0xd69   : > { %8613 = vtanh.f32 %v8063_v10 }
 0xd6a   : > { %v7598_v61 = vpop.f32.mrf.mxu3 }
 0xd6b   : > { %v7690_v12 = vadd.f32 %v7598_v61, %v7464_v6  ;;  %7976 = vmatmul.f32.gmra.mxu1 %v15656_v56 }
 0xd6c   : > { %v7014_v8 = vpop.f32.mrf.mxu0 }
 0xd6d   : > { %v8012_v35 = vadd.f32 %v7920_v62, %v7690_v12  ;;  %v7096_v62 = vadd.f32 %v7008_v27, %v15659_v18  ;;  %v7393_v26 = vpop.f32.mrf.mxu2  ;;  %v7098_v14 = vadd.f32 %v7014_v8, %v15666_v9  ;;  %v15669_v12 = vld [vmem:[#allocation171_spill] sm:$0xff] }
 0xd6f   : > { %v8614_v44 = vpop.eup %8613  ;;  %v8064_v41 = vadd.f32 %v13581_v55, %v8012_v35  ;;  %7061 = vmatmul.f32.gmra.mxu0 %v6842_v42  ;;  %7648 = vmatmul.f32.gmra.mxu3 %v15644_v48  ;;  %v6889_v48 = vsel %vm1196_vm2, %v13798_v43, %v15660_v4  ;;  %v7466_v38 = vadd.f32 %v13790_v23, %v7096_v62  ;;  %v15664_v42 = vld [vmem:[#allocation154_spill] sm:$0xff]  ;;  %v15670_v35 = vld [vmem:[#allocation45_spill] sm:$0xff] }
 0xd70   : > { %8159 = vst [vmem:[%s13597_s29 + $0xc8] sm:$0xff] %v8614_v44  ;;  %v7932_v60 = vpop.f32.mrf.mxu1  ;;  %v7097_v63 = vadd.f32 %v7011_v29, %v15664_v42  ;;  %v7468_v36 = vadd.f32 %v13823_v17, %v7098_v14 }
 0xd71   : > { %8615 = vtanh.f32 %v8064_v41 }
 0xd72   : > { %v7601_v13 = vpop.f32.mrf.mxu3  ;;  %v7467_v50 = vadd.f32 %v13808_v20, %v7097_v63 }
 0xd73   : > { %v7691_v21 = vadd.f32 %v7601_v13, %v7465_v59  ;;  %7979 = vmatmul.f32.gmra.mxu1 %v15658_v47 }
 0xd74   : > { %v7017_v45 = vpop.f32.mrf.mxu0 }
 0xd75   : > { %v8013_v39 = vadd.f32 %v7923_v33, %v7691_v21  ;;  %v15663_v33 = vld [vmem:[#allocation85_spill] sm:$0xff]  ;;  %v7099_v10 = vadd.f32 %v7017_v45, %v15668_v53  ;;  %v7396_v6 = vpop.f32.mrf.mxu2 }
 0xd76   : > { %v7807_v43 = vsel %vm1196_vm2, %v15663_v33, %v15662_v1 }
 0xd77   : > { %v8616_v46 = vpop.eup %8615  ;;  %v8065_v2 = vadd.f32 %v13581_v55, %v8013_v39  ;;  %7064 = vmatmul.f32.gmra.mxu0 %v6889_v48  ;;  %8437 = vmatmul.msk.f32.gmra.mxu3 %vm5277_vm10, %v15661_v25  ;;  %v7469_v8 = vadd.f32 %v7387_v54, %v7099_v10  ;;  %v15671_v39 = vld [vmem:[#allocation63_spill] sm:$0xff] }
 0xd78   : > { %8160 = vst [vmem:[%s13597_s29 + $0xd0] sm:$0xff] %v8616_v46  ;;  %v7935_v0 = vpop.f32.mrf.mxu1 }
 0xd79   : > { %8617 = vtanh.f32 %v8065_v2 }
 0xd7a   : > { %v7604_v7 = vpop.f32.mrf.mxu3 }
 0xd7b   : > { %v7692_v24 = vadd.f32 %v7604_v7, %v7466_v38  ;;  %7982 = vmatmul.f32.gmra.mxu1 %v7807_v43  ;;  %v15672_v7 = vld [vmem:[#allocation76_spill] sm:$0xff] }
 0xd7c   : > { %v7020_v3 = vpop.f32.mrf.mxu0 }
 0xd7d   : > { %v8014_v5 = vadd.f32 %v7926_v31, %v7692_v24  ;;  %v7100_v44 = vadd.f32 %v7020_v3, %v15670_v35  ;;  %v7399_v13 = vpop.f32.mrf.mxu2 }
 0xd7f   : > { %v8618_v27 = vpop.eup %8617  ;;  %v8066_v32 = vadd.f32 %v13581_v55, %v8014_v5  ;;  %7654 = vmatmul.f32.gmra.mxu3 %v15665_v30  ;;  %v7470_v21 = vadd.f32 %v7390_v22, %v7100_v44  ;;  %v15676_v44 = vld [vmem:[#allocation199_spill] sm:$0xff] }
 0xd80   : > { %8161 = vst [vmem:[%s13597_s29 + $0xd8] sm:$0xff] %v8618_v27  ;;  %v7938_v23 = vpop.f32.mrf.mxu1 }
 0xd81   : > { %8619 = vtanh.f32 %v8066_v32  ;;  %v15673_v32 = vld [vmem:[#allocation136_spill] sm:$0xff] }
 0xd82   : > { %v7607_v19 = vpop.f32.mrf.mxu3 }
 0xd83   : > { %v7693_v51 = vadd.f32 %v7607_v19, %v7467_v50 }
 0xd84   : > { %v7023_v49 = vpop.f32.mrf.mxu0 }
 0xd85   : > { %v8015_v11 = vadd.f32 %v7929_v28, %v7693_v51  ;;  %v7101_v54 = vadd.f32 %v7023_v49, %v15671_v39  ;;  %v7402_v25 = vpop.f32.mrf.mxu2 }
 0xd87   : > { %v8620_v15 = vpop.eup %8619  ;;  %v8067_v31 = vadd.f32 %v13581_v55, %v8015_v11  ;;  %7657 = vmatmul.f32.gmra.mxu3 %v15667_v57  ;;  %v7471_v2 = vadd.f32 %v7393_v26, %v7101_v54  ;;  %v15674_v11 = vld [vmem:[#allocation54_spill] sm:$0xff] }
 0xd88   : > { %8162 = vst [vmem:[%s13597_s29 + $0xe0] sm:$0xff] %v8620_v15  ;;  %v7941_v29 = vpop.f32.mrf.mxu1 }
 0xd89   : > { %8621 = vtanh.f32 %v8067_v31 }
 0xd8a   : > { %v7610_v16 = vpop.f32.mrf.mxu3 }
 0xd8b   : > { %v7694_v20 = vadd.f32 %v7610_v16, %v7468_v36 }
 0xd8c   : > { %v7026_v37 = vpop.f32.mrf.mxu0 }
 0xd8d   : > { %v8016_v52 = vadd.f32 %v7932_v60, %v7694_v20  ;;  %v7102_v1 = vadd.f32 %v7026_v37, %v15672_v7  ;;  %v7405_v27 = vpop.f32.mrf.mxu2 }
 0xd8f   : > { %v8622_v28 = vpop.eup %8621  ;;  %v8068_v61 = vadd.f32 %v13581_v55, %v8016_v52  ;;  %7660 = vmatmul.f32.gmra.mxu3 %v15669_v12  ;;  %v7472_v42 = vadd.f32 %v7396_v6, %v7102_v1  ;;  %v15675_v52 = vld [vmem:[#allocation68_spill] sm:$0xff]  ;;  %v15678_v1 = vld [vmem:[#allocation142_spill] sm:$0xff] }
 0xd90   : > { %8163 = vst [vmem:[%s13597_s29 + $0xe8] sm:$0xff] %v8622_v28  ;;  %v7944_v56 = vpop.f32.mrf.mxu1 }
 0xd91   : > { %8623 = vtanh.f32 %v8068_v61 }
 0xd92   : > { %v7613_v40 = vpop.f32.mrf.mxu3 }
 0xd93   : > { %v7695_v34 = vadd.f32 %v7613_v40, %v7469_v8 }
 0xd94   : > { %v7029_v17 = vpop.f32.mrf.mxu0 }
 0xd95   : > { %v8017_v41 = vadd.f32 %v7935_v0, %v7695_v34  ;;  %v7103_v30 = vadd.f32 %v7029_v17, %v15673_v32  ;;  %v7408_v57 = vpop.f32.mrf.mxu2  ;;  %v15679_v32 = vld [vmem:[#allocation153_spill] sm:$0xff] }
 0xd97   : > { %v8624_v59 = vpop.eup %8623  ;;  %v8069_v60 = vadd.f32 %v13581_v55, %v8017_v41  ;;  %v7473_v49 = vadd.f32 %v7399_v13, %v7103_v30  ;;  %v13889_v13 = vld [vmem:[%s13934_s8] ss:$0 sm:$0xff] }
 0xd98   : > { %8164 = vst [vmem:[%s13597_s29 + $0xf0] sm:$0xff] %v8624_v59  ;;  %v7947_v45 = vpop.f32.mrf.mxu1 }
 0xd99   : > { %8625 = vtanh.f32 %v8069_v60 }
 0xd9a   : > { %v7616_v47 = vpop.f32.mrf.mxu3 }
 0xd9b   : > { %v7696_v18 = vadd.f32 %v7616_v47, %v7470_v21 }
 0xd9c   : > { %v7032_v62 = vpop.f32.mrf.mxu0 }
 0xd9d   : > { %v8018_v4 = vadd.f32 %v7938_v23, %v7696_v18  ;;  %v7104_v15 = vadd.f32 %v7032_v62, %v15674_v11  ;;  %v15677_v62 = vld [vmem:[#allocation138_spill] sm:$0xff] }
 0xd9f   : > { %v8626_v48 = vpop.eup %8625  ;;  %v8070_v46 = vadd.f32 %v13581_v55, %v8018_v4  ;;  %v7474_v20 = vadd.f32 %v7402_v25, %v7104_v15  ;;  %v15680_v15 = vld [vmem:[#allocation106_spill] sm:$0xff] }
 0xda0   : > { %8165 = vst [vmem:[%s13597_s29 + $0xf8] sm:$0xff] %v8626_v48  ;;  %v7950_v22 = vpop.f32.mrf.mxu1 }
 0xda1   : > { %8627 = vtanh.f32 %v8070_v46 }
 0xda2   : > { %v7619_v0 = vpop.f32.mrf.mxu3 }
 0xda3   : > { %v7697_v38 = vadd.f32 %v7619_v0, %v7471_v2 }
 0xda4   : > { %v7035_v43 = vpop.f32.mrf.mxu0 }
 0xda5   : > { %v8019_v33 = vadd.f32 %v7941_v29, %v7697_v38  ;;  %v7105_v6 = vadd.f32 %v7035_v43, %v15675_v52 }
 0xda7   : > { %v8628_v24 = vpop.eup %8627  ;;  %v8071_v3 = vadd.f32 %v13581_v55, %v8019_v33  ;;  %v7475_v8 = vadd.f32 %v7405_v27, %v7105_v6  ;;  %v15681_v6 = vld [vmem:[#allocation98_spill] sm:$0xff] }
 0xda8   : > { %8166 = vst [vmem:[%s13597_s29 + $0x100] sm:$0xff] %v8628_v24  ;;  %v7953_v19 = vpop.f32.mrf.mxu1 }
 0xda9   : > { %8629 = vtanh.f32 %v8071_v3 }
 0xdaa   : > { %v7622_v63 = vpop.f32.mrf.mxu3 }
 0xdab   : > { %v7698_v5 = vadd.f32 %v7622_v63, %v7472_v42 }
 0xdac   : > { %v7038_v26 = vpop.f32.mrf.mxu0 }
 0xdad   : > { %v8020_v23 = vadd.f32 %v7944_v56, %v7698_v5  ;;  %v7411_v56 = vpop.f32.mrf.mxu2  ;;  %v7106_v41 = vadd.f32 %v7038_v26, %v15676_v44 }
 0xdaf   : > { %v8630_v50 = vpop.eup %8629  ;;  %v8072_v51 = vadd.f32 %v13581_v55, %v8020_v23  ;;  %v7476_v21 = vadd.f32 %v7408_v57, %v7106_v41 }
 0xdb0   : > { %8167 = vst [vmem:[%s13597_s29 + $0x108] sm:$0xff] %v8630_v50  ;;  %v7956_v16 = vpop.f32.mrf.mxu1 }
 0xdb1   : > { %8631 = vtanh.f32 %v8072_v51 }
 0xdb2   : > { %v7625_v9 = vpop.f32.mrf.mxu3 }
 0xdb3   : > { %v7699_v14 = vadd.f32 %v7625_v9, %v7473_v49 }
 0xdb4   : > { %v7041_v37 = vpop.f32.mrf.mxu0 }
 0xdb5   : > { %v8021_v31 = vadd.f32 %v7947_v45, %v7699_v14  ;;  %v7414_v47 = vpop.f32.mrf.mxu2  ;;  %v7107_v39 = vadd.f32 %v7041_v37, %v15677_v62 }
 0xdb7   : > { %v8632_v29 = vpop.eup %8631  ;;  %v8073_v36 = vadd.f32 %v13581_v55, %v8021_v31  ;;  %v7477_v25 = vadd.f32 %v7411_v56, %v7107_v39  ;;  %v15683_v39 = vld [vmem:[#allocation114_spill] sm:$0xff] }
 0xdb8   : > { %8168 = vst [vmem:[%s13597_s29 + $0x110] sm:$0xff] %v8632_v29  ;;  %v7959_v34 = vpop.f32.mrf.mxu1 }
 0xdb9   : > { %8633 = vtanh.f32 %v8073_v36 }
 0xdba   : > { %v7628_v53 = vpop.f32.mrf.mxu3 }
 0xdbb   : > { %v7700_v10 = vadd.f32 %v7628_v53, %v7474_v20 }
 0xdbc   : > { %v7044_v35 = vpop.f32.mrf.mxu0 }
 0xdbd   : > { %v8022_v28 = vadd.f32 %v7950_v22, %v7700_v10  ;;  %v7417_v7 = vpop.f32.mrf.mxu2  ;;  %v7108_v22 = vadd.f32 %v7044_v35, %v15678_v1  ;;  %v15682_v35 = vld [vmem:[#allocation149_spill] sm:$0xff] }
 0xdbf   : > { %v8634_v61 = vpop.eup %8633  ;;  %v8074_v12 = vadd.f32 %v13581_v55, %v8022_v28  ;;  %v7478_v63 = vadd.f32 %v7414_v47, %v7108_v22 }
 0xdc0   : > { %8169 = vst [vmem:[%s13597_s29 + $0x118] sm:$0xff] %v8634_v61  ;;  %v7962_v54 = vpop.f32.mrf.mxu1 }
 0xdc1   : > { %8635 = vtanh.f32 %v8074_v12 }
 0xdc2   : > { %v7631_v40 = vpop.f32.mrf.mxu3 }
 0xdc3   : > { %v7701_v17 = vadd.f32 %v7631_v40, %v7475_v8 }
 0xdc4   : > { %v7047_v48 = vpop.f32.mrf.mxu0 }
 0xdc5   : > { %v8023_v59 = vadd.f32 %v7953_v19, %v7701_v17  ;;  %v7109_v30 = vadd.f32 %v7047_v48, %v15679_v32  ;;  %v7420_v50 = vpop.f32.mrf.mxu2  ;;  %v15684_v32 = vld [vmem:[#allocation141_spill] sm:$0xff] }
 0xdc7   : > { %v8636_v60 = vpop.eup %8635  ;;  %v8075_v55 = vadd.f32 %v13889_v13, %v8023_v59  ;;  %v7479_v49 = vadd.f32 %v7417_v7, %v7109_v30 }
 0xdc8   : > { %8170 = vst [vmem:[%s13597_s29 + $0x120] sm:$0xff] %v8636_v60  ;;  %v7965_v24 = vpop.f32.mrf.mxu1 }
 0xdc9   : > { %8637 = vtanh.f32 %v8075_v55 }
 0xdca   : > { %v7634_v45 = vpop.f32.mrf.mxu3 }
 0xdcb   : > { %v7702_v18 = vadd.f32 %v7634_v45, %v7476_v21 }
 0xdcc   : > { %v7050_v42 = vpop.f32.mrf.mxu0 }
 0xdcd   : > { %v8024_v4 = vadd.f32 %v7956_v16, %v7702_v18  ;;  %v7110_v31 = vadd.f32 %v7050_v42, %v15680_v15  ;;  %v7423_v16 = vpop.f32.mrf.mxu2 }
 0xdcf   : > { %v8638_v46 = vpop.eup %8637  ;;  %v8076_v2 = vadd.f32 %v13889_v13, %v8024_v4  ;;  %v7480_v20 = vadd.f32 %v7420_v50, %v7110_v31 }
 0xdd0   : > { %8171 = vst [vmem:[%s13597_s29 + $0x128] sm:$0xff] %v8638_v46  ;;  %v7968_v26 = vpop.f32.mrf.mxu1 }
 0xdd1   : > { %8639 = vtanh.f32 %v8076_v2 }
 0xdd2   : > { %v7637_v0 = vpop.f32.mrf.mxu3 }
 0xdd3   : > { %v7703_v38 = vadd.f32 %v7637_v0, %v7477_v25 }
 0xdd4   : > { %v7053_v9 = vpop.f32.mrf.mxu0 }
 0xdd5   : > { %v8025_v33 = vadd.f32 %v7959_v34, %v7703_v38  ;;  %v7111_v28 = vadd.f32 %v7053_v9, %v15681_v6  ;;  %v7426_v40 = vpop.f32.mrf.mxu2 }
 0xdd7   : > { %v8640_v43 = vpop.eup %8639  ;;  %v8077_v3 = vadd.f32 %v13889_v13, %v8025_v33  ;;  %v7481_v8 = vadd.f32 %v7423_v16, %v7111_v28 }
 0xdd8   : > { %8172 = vst [vmem:[%s13597_s29 + $0x130] sm:$0xff] %v8640_v43  ;;  %v7971_v53 = vpop.f32.mrf.mxu1 }
 0xdd9   : > { %8641 = vtanh.f32 %v8077_v3 }
 0xdda   : > { %v7640_v5 = vpop.f32.mrf.mxu3 }
 0xddb   : > { %v7704_v27 = vadd.f32 %v7640_v5, %v7478_v63 }
 0xddc   : > { %v7056_v52 = vpop.f32.mrf.mxu0 }
 0xddd   : > { %v8026_v23 = vadd.f32 %v7962_v54, %v7704_v27  ;;  %v7112_v44 = vadd.f32 %v7056_v52, %v15682_v35  ;;  %v7429_v62 = vpop.f32.mrf.mxu2 }
 0xddf   : > { %v8642_v19 = vpop.eup %8641  ;;  %v8078_v51 = vadd.f32 %v13889_v13, %v8026_v23  ;;  %v7482_v47 = vadd.f32 %v7426_v40, %v7112_v44 }
 0xde0   : > { %8173 = vst [vmem:[%s13597_s29 + $0x138] sm:$0xff] %v8642_v19  ;;  %v7974_v41 = vpop.f32.mrf.mxu1 }
 0xde1   : > { %8643 = vtanh.f32 %v8078_v51 }
 0xde2   : > { %v7643_v14 = vpop.f32.mrf.mxu3 }
 0xde3   : > { %v7705_v11 = vadd.f32 %v7643_v14, %v7479_v49 }
 0xde4   : > { %v7059_v60 = vpop.f32.mrf.mxu0 }
 0xde5   : > { %v8027_v57 = vadd.f32 %v7965_v24, %v7705_v11  ;;  %v7113_v54 = vadd.f32 %v7059_v60, %v15683_v39  ;;  %v7432_v33 = vpop.f32.mrf.mxu2 }
 0xde7   : > { %v8644_v29 = vpop.eup %8643  ;;  %v8079_v36 = vadd.f32 %v13889_v13, %v8027_v57  ;;  %v7483_v0 = vadd.f32 %v7429_v62, %v7113_v54 }
 0xde8   : > { %8174 = vst [vmem:[%s13597_s29 + $0x140] sm:$0xff] %v8644_v29  ;;  %v7977_v46 = vpop.f32.mrf.mxu1 }
 0xde9   : > { %8645 = vtanh.f32 %v8079_v36 }
 0xdea   : > { %v7646_v37 = vpop.f32.mrf.mxu3 }
 0xdeb   : > { %v7706_v10 = vadd.f32 %v7646_v37, %v7480_v20 }
 0xdec   : > { %v7062_v25 = vpop.f32.mrf.mxu0 }
 0xded   : > { %v8028_v61 = vadd.f32 %v7968_v26, %v7706_v10  ;;  %v7114_v1 = vadd.f32 %v7062_v25, %v13564_v58  ;;  %v7435_v19 = vpop.f32.mrf.mxu2 }
 0xdef   : > { %v8646_v12 = vpop.eup %8645  ;;  %v8080_v56 = vadd.f32 %v13889_v13, %v8028_v61  ;;  %v7484_v42 = vadd.f32 %v7432_v33, %v7114_v1 }
 0xdf0   : > { %8175 = vst [vmem:[%s13597_s29 + $0x148] sm:$0xff] %v8646_v12  ;;  %v7980_v3 = vpop.f32.mrf.mxu1 }
 0xdf1   : > { %8647 = vtanh.f32 %v8080_v56 }
 0xdf2   : > { %v7649_v34 = vpop.f32.mrf.mxu3 }
 0xdf3   : > { %v7707_v17 = vadd.f32 %v7649_v34, %v7481_v8 }
 0xdf4   : > { %v7065_v63 = vpop.f32.mrf.mxu0 }
 0xdf5   : > { %v8029_v59 = vadd.f32 %v7971_v53, %v7707_v17  ;;  %v7115_v30 = vadd.f32 %v7065_v63, %v15684_v32 }
 0xdf7   : > { %v8648_v55 = vpop.eup %8647  ;;  %v8081_v21 = vadd.f32 %v13889_v13, %v8029_v59  ;;  %v7485_v51 = vadd.f32 %v7435_v19, %v7115_v30 }
 0xdf8   : > { %8176 = vst [vmem:[%s13597_s29 + $0x150] sm:$0xff] %v8648_v55  ;;  %v7983_v9 = vpop.f32.mrf.mxu1 }
 0xdf9   : > { %8649 = vtanh.f32 %v8081_v21 }
 0xdfa   : > { %v7652_v45 = vpop.f32.mrf.mxu3 }
 0xdfb   : > { %v7708_v18 = vadd.f32 %v7652_v45, %v7482_v47 }
 0xdfd   : > { %v8030_v4 = vadd.f32 %v7974_v41, %v7708_v18 }
 0xdff   : > { %v8650_v48 = vpop.eup %8649  ;;  %v8082_v2 = vadd.f32 %v13889_v13, %v8030_v4 }
 0xe00   : > { %8177 = vst [vmem:[%s13597_s29 + $0x158] sm:$0xff] %v8650_v48 }
 0xe01   : > { %8651 = vtanh.f32 %v8082_v2 }
 0xe02   : > { %v7655_v38 = vpop.f32.mrf.mxu3 }
 0xe03   : > { %v7709_v7 = vadd.f32 %v7655_v38, %v7483_v0 }
 0xe05   : > { %v8031_v22 = vadd.f32 %v7977_v46, %v7709_v7 }
 0xe07   : > { %v8652_v43 = vpop.eup %8651  ;;  %v8083_v24 = vadd.f32 %v13889_v13, %v8031_v22 }
 0xe08   : > { %8178 = vst [vmem:[%s13597_s29 + $0x160] sm:$0xff] %v8652_v43 }
 0xe09   : > { %8653 = vtanh.f32 %v8083_v24 }
 0xe0a   : > { %v7658_v5 = vpop.f32.mrf.mxu3 }
 0xe0b   : > { %v7710_v27 = vadd.f32 %v7658_v5, %v7484_v42 }
 0xe0d   : > { %v8032_v23 = vadd.f32 %v7980_v3, %v7710_v27 }
 0xe0f   : > { %v8654_v50 = vpop.eup %8653  ;;  %v8084_v58 = vadd.f32 %v13889_v13, %v8032_v23 }
 0xe10   : > { %8179 = vst [vmem:[%s13597_s29 + $0x168] sm:$0xff] %v8654_v50 }
 0xe11   : > { %8655 = vtanh.f32 %v8084_v58 }
 0xe12   : > { %v7661_v26 = vpop.f32.mrf.mxu3 }
 0xe13   : > { %v7711_v49 = vadd.f32 %v7661_v26, %v7485_v51 }
 0xe15   : > { %v8033_v14 = vadd.f32 %v7983_v9, %v7711_v49 }
 0xe17   : > { %v8656_v11 = vpop.eup %8655  ;;  %v8085_v15 = vadd.f32 %v13889_v13, %v8033_v14 }
 0xe18   : > { %8180 = vst [vmem:[%s13597_s29 + $0x170] sm:$0xff] %v8656_v11 }
 0xe19   : > { %8657 = vtanh.f32 %v8085_v15 }
 0xe1f   : > { %v8658_v31 = vpop.eup %8657 }
 0xe20   : > { %8181 = vst [vmem:[%s13597_s29 + $0x178] sm:$0xff] %v8658_v31 }
 0xe21 PF: > { %s24_s13 = sadd.s32 1, %s8867_s13  }
 0xe22   : > { %p21_p7 = scmp.ge.s32.totalorder %s24_s13, 4  }
 0xe24   :  { %23 = sbr.rel (!%p21_p7) target bundleno = 4 (0x4), region = 146 }
 0xe29   :  { %8203 = vsyncpa [#allocation5], 1 }
 0xe2a   :  { %8205 = vsyncpa [#allocation5 + $0x1], 1 }
 0xe2b   :  { %8206 = vsyncpa [#allocation7], 1 }
 0xe2c   :  { %8207 = vsyncpa [#allocation10], 1 }
 0xe2d   :  { %8208 = vsyncpa [#allocation13], 1 }

</bundles_post_ra>
